<compile_context>
chip_gen: v6e
topology: v6e:2x2x1
jax: 0.10.0
libtpu: 0.0.40
codegen_flags: <defaults>
</compile_context>

<pallas_src>
import numpy as np
import jax
import jax.numpy as jnp
from jax import lax
from jax.experimental import pallas as pl
from jax.experimental.pallas import tpu as pltpu


IN_CHANNELS = 4
LAYER_CHANNELS = (8, 16)   # layer_channels=8, num_layers=2 -> [8, 16]
_LRELU_SLOPE = 0.01
_IN_EPS = 1e-5


# ----------------------------------------------------------------------------- #
# Host-side constant: space-to-depth (k=2, s=2) gather expressed as a 0/1 matmul
# ----------------------------------------------------------------------------- #
def _downsample_perm(D, H, W):
    """P (S_in, 8*S_out): column t*S_out + q' selects the fine-grid voxel feeding
    tap t = (dz, dy, dx) of coarse voxel q' for a kernel=2, stride=2 conv."""
    Dh, Hh, Wh = D // 2, H // 2, W // 2
    S_in, S_out = D * H * W, Dh * Hh * Wh
    P = np.zeros((S_in, 8 * S_out), np.float32)
    for t in range(8):
        dz, dy, dx = (t >> 2) & 1, (t >> 1) & 1, t & 1
        for d in range(Dh):
            for h in range(Hh):
                for w in range(Wh):
                    qo = (d * Hh + h) * Wh + w
                    pin = ((2 * d + dz) * H + (2 * h + dy)) * W + (2 * w + dx)
                    P[pin, t * S_out + qo] = 1.0
    return P


# ----------------------------------------------------------------------------- #
# Fused whole-network kernel (built per static shape)
# ----------------------------------------------------------------------------- #
def _make_fused_kernel(Cin, C0, C1, D, H, W):
    S0 = D * H * W
    Dh, Hh, Wh = D // 2, H // 2, W // 2
    S1 = Dh * Hh * Wh

    def conv3_in_lrelu(x, w_ref, b_ref, g_ref, be_ref, ext_ref, pat_ref, dims):
        """Conv3d(k=3, s=1, pad=1) + InstanceNorm3d + LeakyReLU on a resident sample.

        x: (cin, S) value, channel-major flat-spatial (S = d*h*w on lanes).
        Returns (cout, S) f32.
        """
        d_, h_, w_ = dims
        S = d_ * h_ * w_
        cin = x.shape[0]
        padf = h_ * w_ + w_ + 1              # max |flat offset| of a 3x3x3 tap
        width = S + 2 * padf

        # Zero halo + drop the sample into the interior of the extension scratch.
        ext_ref[0:cin, 0:width] = jnp.zeros((cin, width), jnp.float32)
        ext_ref[0:cin, padf:padf + S] = x

        # Per-voxel (d, h, w) coordinates of the flat index (dims are powers of two).
        wbits = w_.bit_length() - 1
        hbits = h_.bit_length() - 1
        q = lax.broadcasted_iota(jnp.int32, (1, S), 1)
        wq = q & (w_ - 1)
        hq = (q >> wbits) & (h_ - 1)
        dq = q >> (wbits + hbits)

        def ax_mask(c, n):
            return {o: (c + o >= 0) & (c + o <= n - 1) for o in (-1, 0, 1)}

        mz, my, mx = ax_mask(dq, d_), ax_mask(hq, h_), ax_mask(wq, w_)

        # In-VMEM im2col: 27 shifted + boundary-masked copies of x.
        # flat(d+dz, h+dy, w+dx) = flat(d,h,w) + ofs when all three are in range;
        # the mask kills every out-of-range contribution (== zero padding).
        t = 0
        for dz in (-1, 0, 1):
            for dy in (-1, 0, 1):
                for dx in (-1, 0, 1):
                    ofs = (dz * h_ + dy) * w_ + dx
                    m = (mz[dz] & my[dy] & mx[dx]).astype(jnp.float32)     # (1, S)
                    tap = ext_ref[0:cin, padf + ofs:padf + ofs + S]        # (cin, S)
                    pat_ref[t * cin:(t + 1) * cin, 0:S] = tap * m
                    t += 1

        K = 27 * cin
        y = jnp.dot(w_ref[...], pat_ref[0:K, 0:S],
                    preferred_element_type=jnp.float32)                     # (cout, S)
        y = y + b_ref[...]                                                  # bias (cout, 1)

        # InstanceNorm3d: biased variance over spatial, eps=1e-5, affine (PyTorch-style).
        mean = jnp.mean(y, axis=1, keepdims=True)
        var = jnp.mean(jnp.square(y - mean), axis=1, keepdims=True)
        y = (y - mean) * lax.rsqrt(var + _IN_EPS)
        y = y * g_ref[...] + be_ref[...]
        return jnp.where(y >= 0.0, y, _LRELU_SLOPE * y)                     # LeakyReLU

    def kernel(x_ref,
               sw, sb, sg, sbe,
               l0w, l0b, l0g, l0be,
               pd, d0w, d0b,
               l1w, l1b, l1g, l1be,
               f0_ref, f1_ref, cls_ref,
               ext_ref, pat_ref):
        x = x_ref[0]                                                        # (Cin, S0)

        # stem: Conv3d(k3, s1, p1) + IN + LeakyReLU
        h = conv3_in_lrelu(x, sw, sb, sg, sbe, ext_ref, pat_ref, (D, H, W))

        # layer 0 (BasicConvLayer depth=1) + Identity norm -> feature_maps[0]
        f0 = conv3_in_lrelu(h, l0w, l0b, l0g, l0be, ext_ref, pat_ref, (D, H, W))
        f0_ref[0] = f0.astype(f0_ref.dtype)

        # downsampling 0: Conv3d(k=2, s=2). Gather the 8 strided taps via a 0/1
        # permutation matmul (space-to-depth on the MXU), then one matmul.
        z = jnp.dot(f0, pd[...], preferred_element_type=jnp.float32)        # (C0, 8*S1)
        for t in range(8):
            pat_ref[t * C0:(t + 1) * C0, 0:S1] = z[:, t * S1:(t + 1) * S1]
        xd = jnp.dot(d0w[...], pat_ref[0:8 * C0, 0:S1],
                     preferred_element_type=jnp.float32) + d0b[...]         # (C1, S1)

        # layer 1 (BasicConvLayer depth=1) + Identity norm -> feature_maps[1]
        f1 = conv3_in_lrelu(xd, l1w, l1b, l1g, l1be, ext_ref, pat_ref, (Dh, Hh, Wh))
        f1_ref[0] = f1.astype(f1_ref.dtype)

        # cls_feature = AdaptiveAvgPool3d(1)(feature_maps[-1])  (fused, lane reduce)
        cls_ref[0] = jnp.mean(f1, axis=1, keepdims=True).astype(cls_ref.dtype)

    return kernel


# ----------------------------------------------------------------------------- #
# Forward pass wrapper (mirrors SwinBackbone.forward for the conv-only config)
# ----------------------------------------------------------------------------- #
@jax.jit
def swin_backbone_forward(x_ncdhw, params):
    N, Cin, D, H, W = x_ncdhw.shape
    C0, C1 = LAYER_CHANNELS
    assert Cin == IN_CHANNELS
    for dim in (D, H, W):
        assert dim >= 2 and (dim & (dim - 1)) == 0, "spatial dims must be powers of two"

    S0 = D * H * W
    Dh, Hh, Wh = D // 2, H // 2, W // 2
    S1 = Dh * Hh * Wh

    # (C, D*H*W) channel-major flat layout IS flattened NCDHW -> free reshape only.
    x_flat = x_ncdhw.reshape(N, Cin, S0).astype(jnp.float32)
    pd = _downsample_perm(D, H, W)                      # trace-time numpy constant

    kernel = _make_fused_kernel(Cin, C0, C1, D, H, W)

    def full(shape):
        return pl.BlockSpec(shape, lambda i: (0,) * len(shape))

    in_specs = [
        pl.BlockSpec((1, Cin, S0), lambda i: (i, 0, 0)),          # x (per-batch block)
        full((C0, 27 * Cin)), full((C0, 1)), full((C0, 1)), full((C0, 1)),   # stem
        full((C0, 27 * C0)), full((C0, 1)), full((C0, 1)), full((C0, 1)),    # layer0
        full((S0, 8 * S1)),                                                  # perm matrix
        full((C1, 8 * C0)), full((C1, 1)),                                   # down0
        full((C1, 27 * C1)), full((C1, 1)), full((C1, 1)), full((C1, 1)),    # layer1
    ]
    out_specs = [
        pl.BlockSpec((1, C0, S0), lambda i: (i, 0, 0)),           # feature_maps[0]
        pl.BlockSpec((1, C1, S1), lambda i: (i, 0, 0)),           # feature_maps[1]
        pl.BlockSpec((1, C1, 1), lambda i: (i, 0, 0)),            # cls_feature
    ]
    out_shape = [
        jax.ShapeDtypeStruct((N, C0, S0), jnp.float32),
        jax.ShapeDtypeStruct((N, C1, S1), jnp.float32),
        jax.ShapeDtypeStruct((N, C1, 1), jnp.float32),
    ]

    maxc = max(Cin, C0, C1)
    halo = H * W + W + 1                                # largest 3x3x3 flat offset
    scratch_shapes = [
        pltpu.VMEM((maxc, S0 + 2 * halo), jnp.float32),  # halo-extended activation
        pltpu.VMEM((27 * maxc, S0), jnp.float32),        # in-VMEM im2col patches
    ]

    f0, f1, cls = pl.pallas_call(
        kernel,
        out_shape=out_shape,
        grid=(N,),
        in_specs=in_specs,
        out_specs=out_specs,
        scratch_shapes=scratch_shapes,
        compiler_params=pltpu.CompilerParams(dimension_semantics=("parallel",)),
    )(x_flat,
      params["stem_w"], params["stem_b"], params["stem_g"], params["stem_be"],
      params["l0_w"], params["l0_b"], params["l0_g"], params["l0_be"],
      pd,
      params["d0_w"], params["d0_b"],
      params["l1_w"], params["l1_b"], params["l1_g"], params["l1_be"])

    feature_maps = [f0.reshape(N, C0, D, H, W), f1.reshape(N, C1, Dh, Hh, Wh)]
    cls_feature = cls.reshape(N, C1, 1, 1, 1)
    return {"cls_feature": cls_feature, "feature_maps": feature_maps}


# ----------------------------------------------------------------------------- #
# Parameters (deterministic init). Conv weights are stored pre-flattened as
# (Cout, kd*kh*kw*Cin), tap-major in (kd, kh, kw) ascending then Cin — matching the
# in-kernel im2col order. Bias / gamma / beta are (C, 1) for lane-broadcast.
# ----------------------------------------------------------------------------- #
def init_params(key):
    c0, c1 = LAYER_CHANNELS

    def conv_w(k, cout, cin, ksz):
        fan_in = (ksz ** 3) * cin
        return (jax.random.normal(k, (cout, (ksz ** 3) * cin), jnp.float32)
                * (2.0 / fan_in) ** 0.5)

    ks = jax.random.split(key, 4)
    p = {}
    # stem: Conv3d(4 -> 8, k3) + IN + LeakyReLU
    p["stem_w"] = conv_w(ks[0], c0, IN_CHANNELS, 3)
    p["stem_b"] = jnp.zeros((c0, 1), jnp.float32)
    p["stem_g"] = jnp.ones((c0, 1), jnp.float32)
    p["stem_be"] = jnp.zeros((c0, 1), jnp.float32)
    # layer 0: BasicConvLayer depth 1 (8 -> 8, k3)
    p["l0_w"] = conv_w(ks[1], c0, c0, 3)
    p["l0_b"] = jnp.zeros((c0, 1), jnp.float32)
    p["l0_g"] = jnp.ones((c0, 1), jnp.float32)
    p["l0_be"] = jnp.zeros((c0, 1), jnp.float32)
    # downsampling 0: AdaptiveDownsampling (8 -> 16, k2 s2)
    p["d0_w"] = conv_w(ks[2], c1, c0, 2)
    p["d0_b"] = jnp.zeros((c1, 1), jnp.float32)
    # layer 1: BasicConvLayer depth 1 (16 -> 16, k3)
    p["l1_w"] = conv_w(ks[3], c1, c1, 3)
    p["l1_b"] = jnp.zeros((c1, 1), jnp.float32)
    p["l1_g"] = jnp.ones((c1, 1), jnp.float32)
    p["l1_be"] = jnp.zeros((c1, 1), jnp.float32)
    return p


# ----------------------------------------------------------------------------- #
if __name__ == "__main__":
    key = jax.random.PRNGKey(0)
    kx, kp = jax.random.split(key)
    # NCDHW input: batch=2, channels=4, spatial=8^3
    x = jax.random.normal(kx, (2, IN_CHANNELS, 8, 8, 8), jnp.float32)
    params = init_params(kp)

    out = swin_backbone_forward(x, params)
    jax.block_until_ready(out)

    assert out["cls_feature"].shape == (2, 16, 1, 1, 1)
    assert out["feature_maps"][0].shape == (2, 8, 8, 8, 8)
    assert out["feature_maps"][1].shape == (2, 16, 4, 4, 4)
    assert bool(jnp.all(jnp.isfinite(out["cls_feature"])))
    print("KERNEL_OK")
</pallas_src>

<mosaic_0001>
module attributes {stable_mosaic.version = 11 : i64} {
  func.func @kernel(%arg0: i32, %arg1: memref<1x4x512xf32, #tpu.memory_space<vmem>>, %arg2: memref<8x108xf32, #tpu.memory_space<vmem>>, %arg3: memref<8x1xf32, #tpu.memory_space<vmem>>, %arg4: memref<8x1xf32, #tpu.memory_space<vmem>>, %arg5: memref<8x1xf32, #tpu.memory_space<vmem>>, %arg6: memref<8x216xf32, #tpu.memory_space<vmem>>, %arg7: memref<8x1xf32, #tpu.memory_space<vmem>>, %arg8: memref<8x1xf32, #tpu.memory_space<vmem>>, %arg9: memref<8x1xf32, #tpu.memory_space<vmem>>, %arg10: memref<512x512xf32, #tpu.memory_space<vmem>>, %arg11: memref<16x64xf32, #tpu.memory_space<vmem>>, %arg12: memref<16x1xf32, #tpu.memory_space<vmem>>, %arg13: memref<16x432xf32, #tpu.memory_space<vmem>>, %arg14: memref<16x1xf32, #tpu.memory_space<vmem>>, %arg15: memref<16x1xf32, #tpu.memory_space<vmem>>, %arg16: memref<16x1xf32, #tpu.memory_space<vmem>>, %arg17: memref<1x8x512xf32, #tpu.memory_space<vmem>>, %arg18: memref<1x16x64xf32, #tpu.memory_space<vmem>>, %arg19: memref<1x16x1xf32, #tpu.memory_space<vmem>>, %arg20: memref<16x658xf32, #tpu.memory_space<vmem>>, %arg21: memref<432x512xf32, #tpu.memory_space<vmem>>) attributes {dimension_semantics = [#tpu.dimension_semantics<parallel>], iteration_bounds = array<i64: 2>, scalar_prefetch = 0 : i64, scratch_operands = 2 : i64, tpu.core_type = #tpu.core_type<tc>, window_params = [{transform_indices = @transform_0, window_bounds = array<i64: 1, 4, 512>}, {pipeline_mode = #tpu.pipeline_mode<synchronous>, transform_indices = @transform_1, window_bounds = array<i64: 8, 108>}, {pipeline_mode = #tpu.pipeline_mode<synchronous>, transform_indices = @transform_2, window_bounds = array<i64: 8, 1>}, {pipeline_mode = #tpu.pipeline_mode<synchronous>, transform_indices = @transform_3, window_bounds = array<i64: 8, 1>}, {pipeline_mode = #tpu.pipeline_mode<synchronous>, transform_indices = @transform_4, window_bounds = array<i64: 8, 1>}, {pipeline_mode = #tpu.pipeline_mode<synchronous>, transform_indices = @transform_5, window_bounds = array<i64: 8, 216>}, {pipeline_mode = #tpu.pipeline_mode<synchronous>, transform_indices = @transform_6, window_bounds = array<i64: 8, 1>}, {pipeline_mode = #tpu.pipeline_mode<synchronous>, transform_indices = @transform_7, window_bounds = array<i64: 8, 1>}, {pipeline_mode = #tpu.pipeline_mode<synchronous>, transform_indices = @transform_8, window_bounds = array<i64: 8, 1>}, {pipeline_mode = #tpu.pipeline_mode<synchronous>, transform_indices = @transform_9, window_bounds = array<i64: 512, 512>}, {pipeline_mode = #tpu.pipeline_mode<synchronous>, transform_indices = @transform_10, window_bounds = array<i64: 16, 64>}, {pipeline_mode = #tpu.pipeline_mode<synchronous>, transform_indices = @transform_11, window_bounds = array<i64: 16, 1>}, {pipeline_mode = #tpu.pipeline_mode<synchronous>, transform_indices = @transform_12, window_bounds = array<i64: 16, 432>}, {pipeline_mode = #tpu.pipeline_mode<synchronous>, transform_indices = @transform_13, window_bounds = array<i64: 16, 1>}, {pipeline_mode = #tpu.pipeline_mode<synchronous>, transform_indices = @transform_14, window_bounds = array<i64: 16, 1>}, {pipeline_mode = #tpu.pipeline_mode<synchronous>, transform_indices = @transform_15, window_bounds = array<i64: 16, 1>}, {transform_indices = @transform_16, window_bounds = array<i64: 1, 8, 512>}, {transform_indices = @transform_17, window_bounds = array<i64: 1, 16, 64>}, {transform_indices = @transform_18, window_bounds = array<i64: 1, 16, 1>}]} {
    %c0 = arith.constant 0 : index
    %c0_0 = arith.constant 0 : index
    %c0_1 = arith.constant 0 : index
    %0 = vector.load %arg1[%c0, %c0_0, %c0_1] : memref<1x4x512xf32, #tpu.memory_space<vmem>>, vector<1x4x512xf32>
    %1 = vector.shape_cast %0 : vector<1x4x512xf32> to vector<4x512xf32>
    %cst = arith.constant 0.000000e+00 : f32
    %2 = vector.broadcast %cst : f32 to vector<4x658xf32>
    %c0_2 = arith.constant 0 : index
    %c0_3 = arith.constant 0 : index
    %3 = vector.load %arg20[%c0_2, %c0_3] : memref<16x658xf32, #tpu.memory_space<vmem>>, vector<4x658xf32>
    tpu.vector_store %arg20[%c0_2, %c0_3], %2 {strides = array<i32>} : memref<16x658xf32, #tpu.memory_space<vmem>>, vector<4x658xf32>,
    %c0_4 = arith.constant 0 : index
    %c73 = arith.constant 73 : index
    %4 = vector.load %arg20[%c0_4, %c73] : memref<16x658xf32, #tpu.memory_space<vmem>>, vector<4x512xf32>
    tpu.vector_store %arg20[%c0_4, %c73], %1 {strides = array<i32>} : memref<16x658xf32, #tpu.memory_space<vmem>>, vector<4x512xf32>,
    %5 = tpu.iota {dimensions = array<i32: 1>} : vector<1x512xi32>
    %c7_i32 = arith.constant 7 : i32
    %6 = vector.broadcast %c7_i32 : i32 to vector<1x512xi32>
    %7 = arith.andi %5, %6 : vector<1x512xi32>
    %c3_i32 = arith.constant 3 : i32
    %8 = vector.broadcast %c3_i32 : i32 to vector<1x512xi32>
    %9 = arith.shrsi %5, %8 : vector<1x512xi32>
    %c7_i32_5 = arith.constant 7 : i32
    %10 = vector.broadcast %c7_i32_5 : i32 to vector<1x512xi32>
    %11 = arith.andi %9, %10 : vector<1x512xi32>
    %c6_i32 = arith.constant 6 : i32
    %12 = vector.broadcast %c6_i32 : i32 to vector<1x512xi32>
    %13 = arith.shrsi %5, %12 : vector<1x512xi32>
    %c-1_i32 = arith.constant -1 : i32
    %14 = vector.broadcast %c-1_i32 : i32 to vector<1x512xi32>
    %15 = arith.addi %13, %14 : vector<1x512xi32>
    %c0_i32 = arith.constant 0 : i32
    %16 = vector.broadcast %c0_i32 : i32 to vector<1x512xi32>
    %17 = arith.cmpi sge, %15, %16 : vector<1x512xi32>
    %c-1_i32_6 = arith.constant -1 : i32
    %18 = vector.broadcast %c-1_i32_6 : i32 to vector<1x512xi32>
    %19 = arith.addi %13, %18 : vector<1x512xi32>
    %c7_i32_7 = arith.constant 7 : i32
    %20 = vector.broadcast %c7_i32_7 : i32 to vector<1x512xi32>
    %21 = arith.cmpi sle, %19, %20 : vector<1x512xi32>
    %22 = arith.andi %17, %21 : vector<1x512xi1>
    %c0_i32_8 = arith.constant 0 : i32
    %23 = vector.broadcast %c0_i32_8 : i32 to vector<1x512xi32>
    %24 = arith.addi %13, %23 : vector<1x512xi32>
    %c0_i32_9 = arith.constant 0 : i32
    %25 = vector.broadcast %c0_i32_9 : i32 to vector<1x512xi32>
    %26 = arith.cmpi sge, %24, %25 : vector<1x512xi32>
    %c0_i32_10 = arith.constant 0 : i32
    %27 = vector.broadcast %c0_i32_10 : i32 to vector<1x512xi32>
    %28 = arith.addi %13, %27 : vector<1x512xi32>
    %c7_i32_11 = arith.constant 7 : i32
    %29 = vector.broadcast %c7_i32_11 : i32 to vector<1x512xi32>
    %30 = arith.cmpi sle, %28, %29 : vector<1x512xi32>
    %31 = arith.andi %26, %30 : vector<1x512xi1>
    %c1_i32 = arith.constant 1 : i32
    %32 = vector.broadcast %c1_i32 : i32 to vector<1x512xi32>
    %33 = arith.addi %13, %32 : vector<1x512xi32>
    %c0_i32_12 = arith.constant 0 : i32
    %34 = vector.broadcast %c0_i32_12 : i32 to vector<1x512xi32>
    %35 = arith.cmpi sge, %33, %34 : vector<1x512xi32>
    %c1_i32_13 = arith.constant 1 : i32
    %36 = vector.broadcast %c1_i32_13 : i32 to vector<1x512xi32>
    %37 = arith.addi %13, %36 : vector<1x512xi32>
    %c7_i32_14 = arith.constant 7 : i32
    %38 = vector.broadcast %c7_i32_14 : i32 to vector<1x512xi32>
    %39 = arith.cmpi sle, %37, %38 : vector<1x512xi32>
    %40 = arith.andi %35, %39 : vector<1x512xi1>
    %c-1_i32_15 = arith.constant -1 : i32
    %41 = vector.broadcast %c-1_i32_15 : i32 to vector<1x512xi32>
    %42 = arith.addi %11, %41 : vector<1x512xi32>
    %c0_i32_16 = arith.constant 0 : i32
    %43 = vector.broadcast %c0_i32_16 : i32 to vector<1x512xi32>
    %44 = arith.cmpi sge, %42, %43 : vector<1x512xi32>
    %c-1_i32_17 = arith.constant -1 : i32
    %45 = vector.broadcast %c-1_i32_17 : i32 to vector<1x512xi32>
    %46 = arith.addi %11, %45 : vector<1x512xi32>
    %c7_i32_18 = arith.constant 7 : i32
    %47 = vector.broadcast %c7_i32_18 : i32 to vector<1x512xi32>
    %48 = arith.cmpi sle, %46, %47 : vector<1x512xi32>
    %49 = arith.andi %44, %48 : vector<1x512xi1>
    %c0_i32_19 = arith.constant 0 : i32
    %50 = vector.broadcast %c0_i32_19 : i32 to vector<1x512xi32>
    %51 = arith.addi %11, %50 : vector<1x512xi32>
    %c0_i32_20 = arith.constant 0 : i32
    %52 = vector.broadcast %c0_i32_20 : i32 to vector<1x512xi32>
    %53 = arith.cmpi sge, %51, %52 : vector<1x512xi32>
    %c0_i32_21 = arith.constant 0 : i32
    %54 = vector.broadcast %c0_i32_21 : i32 to vector<1x512xi32>
    %55 = arith.addi %11, %54 : vector<1x512xi32>
    %c7_i32_22 = arith.constant 7 : i32
    %56 = vector.broadcast %c7_i32_22 : i32 to vector<1x512xi32>
    %57 = arith.cmpi sle, %55, %56 : vector<1x512xi32>
    %58 = arith.andi %53, %57 : vector<1x512xi1>
    %c1_i32_23 = arith.constant 1 : i32
    %59 = vector.broadcast %c1_i32_23 : i32 to vector<1x512xi32>
    %60 = arith.addi %11, %59 : vector<1x512xi32>
    %c0_i32_24 = arith.constant 0 : i32
    %61 = vector.broadcast %c0_i32_24 : i32 to vector<1x512xi32>
    %62 = arith.cmpi sge, %60, %61 : vector<1x512xi32>
    %c1_i32_25 = arith.constant 1 : i32
    %63 = vector.broadcast %c1_i32_25 : i32 to vector<1x512xi32>
    %64 = arith.addi %11, %63 : vector<1x512xi32>
    %c7_i32_26 = arith.constant 7 : i32
    %65 = vector.broadcast %c7_i32_26 : i32 to vector<1x512xi32>
    %66 = arith.cmpi sle, %64, %65 : vector<1x512xi32>
    %67 = arith.andi %62, %66 : vector<1x512xi1>
    %c-1_i32_27 = arith.constant -1 : i32
    %68 = vector.broadcast %c-1_i32_27 : i32 to vector<1x512xi32>
    %69 = arith.addi %7, %68 : vector<1x512xi32>
    %c0_i32_28 = arith.constant 0 : i32
    %70 = vector.broadcast %c0_i32_28 : i32 to vector<1x512xi32>
    %71 = arith.cmpi sge, %69, %70 : vector<1x512xi32>
    %c-1_i32_29 = arith.constant -1 : i32
    %72 = vector.broadcast %c-1_i32_29 : i32 to vector<1x512xi32>
    %73 = arith.addi %7, %72 : vector<1x512xi32>
    %c7_i32_30 = arith.constant 7 : i32
    %74 = vector.broadcast %c7_i32_30 : i32 to vector<1x512xi32>
    %75 = arith.cmpi sle, %73, %74 : vector<1x512xi32>
    %76 = arith.andi %71, %75 : vector<1x512xi1>
    %c0_i32_31 = arith.constant 0 : i32
    %77 = vector.broadcast %c0_i32_31 : i32 to vector<1x512xi32>
    %78 = arith.addi %7, %77 : vector<1x512xi32>
    %c0_i32_32 = arith.constant 0 : i32
    %79 = vector.broadcast %c0_i32_32 : i32 to vector<1x512xi32>
    %80 = arith.cmpi sge, %78, %79 : vector<1x512xi32>
    %c0_i32_33 = arith.constant 0 : i32
    %81 = vector.broadcast %c0_i32_33 : i32 to vector<1x512xi32>
    %82 = arith.addi %7, %81 : vector<1x512xi32>
    %c7_i32_34 = arith.constant 7 : i32
    %83 = vector.broadcast %c7_i32_34 : i32 to vector<1x512xi32>
    %84 = arith.cmpi sle, %82, %83 : vector<1x512xi32>
    %85 = arith.andi %80, %84 : vector<1x512xi1>
    %c1_i32_35 = arith.constant 1 : i32
    %86 = vector.broadcast %c1_i32_35 : i32 to vector<1x512xi32>
    %87 = arith.addi %7, %86 : vector<1x512xi32>
    %c0_i32_36 = arith.constant 0 : i32
    %88 = vector.broadcast %c0_i32_36 : i32 to vector<1x512xi32>
    %89 = arith.cmpi sge, %87, %88 : vector<1x512xi32>
    %c1_i32_37 = arith.constant 1 : i32
    %90 = vector.broadcast %c1_i32_37 : i32 to vector<1x512xi32>
    %91 = arith.addi %7, %90 : vector<1x512xi32>
    %c7_i32_38 = arith.constant 7 : i32
    %92 = vector.broadcast %c7_i32_38 : i32 to vector<1x512xi32>
    %93 = arith.cmpi sle, %91, %92 : vector<1x512xi32>
    %94 = arith.andi %89, %93 : vector<1x512xi1>
    %95 = arith.andi %22, %49 : vector<1x512xi1>
    %96 = arith.andi %95, %76 : vector<1x512xi1>
    %97 = arith.extui %96 : vector<1x512xi1> to vector<1x512xi32>
    %98 = arith.sitofp %97 : vector<1x512xi32> to vector<1x512xf32>
    %c0_39 = arith.constant 0 : index
    %c0_40 = arith.constant 0 : index
    %99 = vector.load %arg20[%c0_39, %c0_40] : memref<16x658xf32, #tpu.memory_space<vmem>>, vector<4x512xf32>
    %100 = vector.broadcast %98 : vector<1x512xf32> to vector<4x512xf32>
    %101 = arith.mulf %99, %100 : vector<4x512xf32>
    %c0_41 = arith.constant 0 : index
    %c0_42 = arith.constant 0 : index
    %102 = vector.load %arg21[%c0_41, %c0_42] : memref<432x512xf32, #tpu.memory_space<vmem>>, vector<4x512xf32>
    tpu.vector_store %arg21[%c0_41, %c0_42], %101 {strides = array<i32>} : memref<432x512xf32, #tpu.memory_space<vmem>>, vector<4x512xf32>,
    %103 = arith.andi %22, %49 : vector<1x512xi1>
    %104 = arith.andi %103, %85 : vector<1x512xi1>
    %105 = arith.extui %104 : vector<1x512xi1> to vector<1x512xi32>
    %106 = arith.sitofp %105 : vector<1x512xi32> to vector<1x512xf32>
    %c0_43 = arith.constant 0 : index
    %c1 = arith.constant 1 : index
    %107 = vector.load %arg20[%c0_43, %c1] : memref<16x658xf32, #tpu.memory_space<vmem>>, vector<4x512xf32>
    %108 = vector.broadcast %106 : vector<1x512xf32> to vector<4x512xf32>
    %109 = arith.mulf %107, %108 : vector<4x512xf32>
    %c4 = arith.constant 4 : index
    %c0_44 = arith.constant 0 : index
    %110 = vector.load %arg21[%c4, %c0_44] : memref<432x512xf32, #tpu.memory_space<vmem>>, vector<4x512xf32>
    tpu.vector_store %arg21[%c4, %c0_44], %109 {strides = array<i32>} : memref<432x512xf32, #tpu.memory_space<vmem>>, vector<4x512xf32>,
    %111 = arith.andi %22, %49 : vector<1x512xi1>
    %112 = arith.andi %111, %94 : vector<1x512xi1>
    %113 = arith.extui %112 : vector<1x512xi1> to vector<1x512xi32>
    %114 = arith.sitofp %113 : vector<1x512xi32> to vector<1x512xf32>
    %c0_45 = arith.constant 0 : index
    %c2 = arith.constant 2 : index
    %115 = vector.load %arg20[%c0_45, %c2] : memref<16x658xf32, #tpu.memory_space<vmem>>, vector<4x512xf32>
    %116 = vector.broadcast %114 : vector<1x512xf32> to vector<4x512xf32>
    %117 = arith.mulf %115, %116 : vector<4x512xf32>
    %c8 = arith.constant 8 : index
    %c0_46 = arith.constant 0 : index
    %118 = vector.load %arg21[%c8, %c0_46] : memref<432x512xf32, #tpu.memory_space<vmem>>, vector<4x512xf32>
    tpu.vector_store %arg21[%c8, %c0_46], %117 {strides = array<i32>} : memref<432x512xf32, #tpu.memory_space<vmem>>, vector<4x512xf32>,
    %119 = arith.andi %22, %58 : vector<1x512xi1>
    %120 = arith.andi %119, %76 : vector<1x512xi1>
    %121 = arith.extui %120 : vector<1x512xi1> to vector<1x512xi32>
    %122 = arith.sitofp %121 : vector<1x512xi32> to vector<1x512xf32>
    %c0_47 = arith.constant 0 : index
    %c8_48 = arith.constant 8 : index
    %123 = vector.load %arg20[%c0_47, %c8_48] : memref<16x658xf32, #tpu.memory_space<vmem>>, vector<4x512xf32>
    %124 = vector.broadcast %122 : vector<1x512xf32> to vector<4x512xf32>
    %125 = arith.mulf %123, %124 : vector<4x512xf32>
    %c12 = arith.constant 12 : index
    %c0_49 = arith.constant 0 : index
    %126 = vector.load %arg21[%c12, %c0_49] : memref<432x512xf32, #tpu.memory_space<vmem>>, vector<4x512xf32>
    tpu.vector_store %arg21[%c12, %c0_49], %125 {strides = array<i32>} : memref<432x512xf32, #tpu.memory_space<vmem>>, vector<4x512xf32>,
    %127 = arith.andi %22, %58 : vector<1x512xi1>
    %128 = arith.andi %127, %85 : vector<1x512xi1>
    %129 = arith.extui %128 : vector<1x512xi1> to vector<1x512xi32>
    %130 = arith.sitofp %129 : vector<1x512xi32> to vector<1x512xf32>
    %c0_50 = arith.constant 0 : index
    %c9 = arith.constant 9 : index
    %131 = vector.load %arg20[%c0_50, %c9] : memref<16x658xf32, #tpu.memory_space<vmem>>, vector<4x512xf32>
    %132 = vector.broadcast %130 : vector<1x512xf32> to vector<4x512xf32>
    %133 = arith.mulf %131, %132 : vector<4x512xf32>
    %c16 = arith.constant 16 : index
    %c0_51 = arith.constant 0 : index
    %134 = vector.load %arg21[%c16, %c0_51] : memref<432x512xf32, #tpu.memory_space<vmem>>, vector<4x512xf32>
    tpu.vector_store %arg21[%c16, %c0_51], %133 {strides = array<i32>} : memref<432x512xf32, #tpu.memory_space<vmem>>, vector<4x512xf32>,
    %135 = arith.andi %22, %58 : vector<1x512xi1>
    %136 = arith.andi %135, %94 : vector<1x512xi1>
    %137 = arith.extui %136 : vector<1x512xi1> to vector<1x512xi32>
    %138 = arith.sitofp %137 : vector<1x512xi32> to vector<1x512xf32>
    %c0_52 = arith.constant 0 : index
    %c10 = arith.constant 10 : index
    %139 = vector.load %arg20[%c0_52, %c10] : memref<16x658xf32, #tpu.memory_space<vmem>>, vector<4x512xf32>
    %140 = vector.broadcast %138 : vector<1x512xf32> to vector<4x512xf32>
    %141 = arith.mulf %139, %140 : vector<4x512xf32>
    %c20 = arith.constant 20 : index
    %c0_53 = arith.constant 0 : index
    %142 = vector.load %arg21[%c20, %c0_53] : memref<432x512xf32, #tpu.memory_space<vmem>>, vector<4x512xf32>
    tpu.vector_store %arg21[%c20, %c0_53], %141 {strides = array<i32>} : memref<432x512xf32, #tpu.memory_space<vmem>>, vector<4x512xf32>,
    %143 = arith.andi %22, %67 : vector<1x512xi1>
    %144 = arith.andi %143, %76 : vector<1x512xi1>
    %145 = arith.extui %144 : vector<1x512xi1> to vector<1x512xi32>
    %146 = arith.sitofp %145 : vector<1x512xi32> to vector<1x512xf32>
    %c0_54 = arith.constant 0 : index
    %c16_55 = arith.constant 16 : index
    %147 = vector.load %arg20[%c0_54, %c16_55] : memref<16x658xf32, #tpu.memory_space<vmem>>, vector<4x512xf32>
    %148 = vector.broadcast %146 : vector<1x512xf32> to vector<4x512xf32>
    %149 = arith.mulf %147, %148 : vector<4x512xf32>
    %c24 = arith.constant 24 : index
    %c0_56 = arith.constant 0 : index
    %150 = vector.load %arg21[%c24, %c0_56] : memref<432x512xf32, #tpu.memory_space<vmem>>, vector<4x512xf32>
    tpu.vector_store %arg21[%c24, %c0_56], %149 {strides = array<i32>} : memref<432x512xf32, #tpu.memory_space<vmem>>, vector<4x512xf32>,
    %151 = arith.andi %22, %67 : vector<1x512xi1>
    %152 = arith.andi %151, %85 : vector<1x512xi1>
    %153 = arith.extui %152 : vector<1x512xi1> to vector<1x512xi32>
    %154 = arith.sitofp %153 : vector<1x512xi32> to vector<1x512xf32>
    %c0_57 = arith.constant 0 : index
    %c17 = arith.constant 17 : index
    %155 = vector.load %arg20[%c0_57, %c17] : memref<16x658xf32, #tpu.memory_space<vmem>>, vector<4x512xf32>
    %156 = vector.broadcast %154 : vector<1x512xf32> to vector<4x512xf32>
    %157 = arith.mulf %155, %156 : vector<4x512xf32>
    %c28 = arith.constant 28 : index
    %c0_58 = arith.constant 0 : index
    %158 = vector.load %arg21[%c28, %c0_58] : memref<432x512xf32, #tpu.memory_space<vmem>>, vector<4x512xf32>
    tpu.vector_store %arg21[%c28, %c0_58], %157 {strides = array<i32>} : memref<432x512xf32, #tpu.memory_space<vmem>>, vector<4x512xf32>,
    %159 = arith.andi %22, %67 : vector<1x512xi1>
    %160 = arith.andi %159, %94 : vector<1x512xi1>
    %161 = arith.extui %160 : vector<1x512xi1> to vector<1x512xi32>
    %162 = arith.sitofp %161 : vector<1x512xi32> to vector<1x512xf32>
    %c0_59 = arith.constant 0 : index
    %c18 = arith.constant 18 : index
    %163 = vector.load %arg20[%c0_59, %c18] : memref<16x658xf32, #tpu.memory_space<vmem>>, vector<4x512xf32>
    %164 = vector.broadcast %162 : vector<1x512xf32> to vector<4x512xf32>
    %165 = arith.mulf %163, %164 : vector<4x512xf32>
    %c32 = arith.constant 32 : index
    %c0_60 = arith.constant 0 : index
    %166 = vector.load %arg21[%c32, %c0_60] : memref<432x512xf32, #tpu.memory_space<vmem>>, vector<4x512xf32>
    tpu.vector_store %arg21[%c32, %c0_60], %165 {strides = array<i32>} : memref<432x512xf32, #tpu.memory_space<vmem>>, vector<4x512xf32>,
    %167 = arith.andi %31, %49 : vector<1x512xi1>
    %168 = arith.andi %167, %76 : vector<1x512xi1>
    %169 = arith.extui %168 : vector<1x512xi1> to vector<1x512xi32>
    %170 = arith.sitofp %169 : vector<1x512xi32> to vector<1x512xf32>
    %c0_61 = arith.constant 0 : index
    %c64 = arith.constant 64 : index
    %171 = vector.load %arg20[%c0_61, %c64] : memref<16x658xf32, #tpu.memory_space<vmem>>, vector<4x512xf32>
    %172 = vector.broadcast %170 : vector<1x512xf32> to vector<4x512xf32>
    %173 = arith.mulf %171, %172 : vector<4x512xf32>
    %c36 = arith.constant 36 : index
    %c0_62 = arith.constant 0 : index
    %174 = vector.load %arg21[%c36, %c0_62] : memref<432x512xf32, #tpu.memory_space<vmem>>, vector<4x512xf32>
    tpu.vector_store %arg21[%c36, %c0_62], %173 {strides = array<i32>} : memref<432x512xf32, #tpu.memory_space<vmem>>, vector<4x512xf32>,
    %175 = arith.andi %31, %49 : vector<1x512xi1>
    %176 = arith.andi %175, %85 : vector<1x512xi1>
    %177 = arith.extui %176 : vector<1x512xi1> to vector<1x512xi32>
    %178 = arith.sitofp %177 : vector<1x512xi32> to vector<1x512xf32>
    %c0_63 = arith.constant 0 : index
    %c65 = arith.constant 65 : index
    %179 = vector.load %arg20[%c0_63, %c65] : memref<16x658xf32, #tpu.memory_space<vmem>>, vector<4x512xf32>
    %180 = vector.broadcast %178 : vector<1x512xf32> to vector<4x512xf32>
    %181 = arith.mulf %179, %180 : vector<4x512xf32>
    %c40 = arith.constant 40 : index
    %c0_64 = arith.constant 0 : index
    %182 = vector.load %arg21[%c40, %c0_64] : memref<432x512xf32, #tpu.memory_space<vmem>>, vector<4x512xf32>
    tpu.vector_store %arg21[%c40, %c0_64], %181 {strides = array<i32>} : memref<432x512xf32, #tpu.memory_space<vmem>>, vector<4x512xf32>,
    %183 = arith.andi %31, %49 : vector<1x512xi1>
    %184 = arith.andi %183, %94 : vector<1x512xi1>
    %185 = arith.extui %184 : vector<1x512xi1> to vector<1x512xi32>
    %186 = arith.sitofp %185 : vector<1x512xi32> to vector<1x512xf32>
    %c0_65 = arith.constant 0 : index
    %c66 = arith.constant 66 : index
    %187 = vector.load %arg20[%c0_65, %c66] : memref<16x658xf32, #tpu.memory_space<vmem>>, vector<4x512xf32>
    %188 = vector.broadcast %186 : vector<1x512xf32> to vector<4x512xf32>
    %189 = arith.mulf %187, %188 : vector<4x512xf32>
    %c44 = arith.constant 44 : index
    %c0_66 = arith.constant 0 : index
    %190 = vector.load %arg21[%c44, %c0_66] : memref<432x512xf32, #tpu.memory_space<vmem>>, vector<4x512xf32>
    tpu.vector_store %arg21[%c44, %c0_66], %189 {strides = array<i32>} : memref<432x512xf32, #tpu.memory_space<vmem>>, vector<4x512xf32>,
    %191 = arith.andi %31, %58 : vector<1x512xi1>
    %192 = arith.andi %191, %76 : vector<1x512xi1>
    %193 = arith.extui %192 : vector<1x512xi1> to vector<1x512xi32>
    %194 = arith.sitofp %193 : vector<1x512xi32> to vector<1x512xf32>
    %c0_67 = arith.constant 0 : index
    %c72 = arith.constant 72 : index
    %195 = vector.load %arg20[%c0_67, %c72] : memref<16x658xf32, #tpu.memory_space<vmem>>, vector<4x512xf32>
    %196 = vector.broadcast %194 : vector<1x512xf32> to vector<4x512xf32>
    %197 = arith.mulf %195, %196 : vector<4x512xf32>
    %c48 = arith.constant 48 : index
    %c0_68 = arith.constant 0 : index
    %198 = vector.load %arg21[%c48, %c0_68] : memref<432x512xf32, #tpu.memory_space<vmem>>, vector<4x512xf32>
    tpu.vector_store %arg21[%c48, %c0_68], %197 {strides = array<i32>} : memref<432x512xf32, #tpu.memory_space<vmem>>, vector<4x512xf32>,
    %199 = arith.andi %31, %58 : vector<1x512xi1>
    %200 = arith.andi %199, %85 : vector<1x512xi1>
    %201 = arith.extui %200 : vector<1x512xi1> to vector<1x512xi32>
    %202 = arith.sitofp %201 : vector<1x512xi32> to vector<1x512xf32>
    %c0_69 = arith.constant 0 : index
    %c73_70 = arith.constant 73 : index
    %203 = vector.load %arg20[%c0_69, %c73_70] : memref<16x658xf32, #tpu.memory_space<vmem>>, vector<4x512xf32>
    %204 = vector.broadcast %202 : vector<1x512xf32> to vector<4x512xf32>
    %205 = arith.mulf %203, %204 : vector<4x512xf32>
    %c52 = arith.constant 52 : index
    %c0_71 = arith.constant 0 : index
    %206 = vector.load %arg21[%c52, %c0_71] : memref<432x512xf32, #tpu.memory_space<vmem>>, vector<4x512xf32>
    tpu.vector_store %arg21[%c52, %c0_71], %205 {strides = array<i32>} : memref<432x512xf32, #tpu.memory_space<vmem>>, vector<4x512xf32>,
    %207 = arith.andi %31, %58 : vector<1x512xi1>
    %208 = arith.andi %207, %94 : vector<1x512xi1>
    %209 = arith.extui %208 : vector<1x512xi1> to vector<1x512xi32>
    %210 = arith.sitofp %209 : vector<1x512xi32> to vector<1x512xf32>
    %c0_72 = arith.constant 0 : index
    %c74 = arith.constant 74 : index
    %211 = vector.load %arg20[%c0_72, %c74] : memref<16x658xf32, #tpu.memory_space<vmem>>, vector<4x512xf32>
    %212 = vector.broadcast %210 : vector<1x512xf32> to vector<4x512xf32>
    %213 = arith.mulf %211, %212 : vector<4x512xf32>
    %c56 = arith.constant 56 : index
    %c0_73 = arith.constant 0 : index
    %214 = vector.load %arg21[%c56, %c0_73] : memref<432x512xf32, #tpu.memory_space<vmem>>, vector<4x512xf32>
    tpu.vector_store %arg21[%c56, %c0_73], %213 {strides = array<i32>} : memref<432x512xf32, #tpu.memory_space<vmem>>, vector<4x512xf32>,
    %215 = arith.andi %31, %67 : vector<1x512xi1>
    %216 = arith.andi %215, %76 : vector<1x512xi1>
    %217 = arith.extui %216 : vector<1x512xi1> to vector<1x512xi32>
    %218 = arith.sitofp %217 : vector<1x512xi32> to vector<1x512xf32>
    %c0_74 = arith.constant 0 : index
    %c80 = arith.constant 80 : index
    %219 = vector.load %arg20[%c0_74, %c80] : memref<16x658xf32, #tpu.memory_space<vmem>>, vector<4x512xf32>
    %220 = vector.broadcast %218 : vector<1x512xf32> to vector<4x512xf32>
    %221 = arith.mulf %219, %220 : vector<4x512xf32>
    %c60 = arith.constant 60 : index
    %c0_75 = arith.constant 0 : index
    %222 = vector.load %arg21[%c60, %c0_75] : memref<432x512xf32, #tpu.memory_space<vmem>>, vector<4x512xf32>
    tpu.vector_store %arg21[%c60, %c0_75], %221 {strides = array<i32>} : memref<432x512xf32, #tpu.memory_space<vmem>>, vector<4x512xf32>,
    %223 = arith.andi %31, %67 : vector<1x512xi1>
    %224 = arith.andi %223, %85 : vector<1x512xi1>
    %225 = arith.extui %224 : vector<1x512xi1> to vector<1x512xi32>
    %226 = arith.sitofp %225 : vector<1x512xi32> to vector<1x512xf32>
    %c0_76 = arith.constant 0 : index
    %c81 = arith.constant 81 : index
    %227 = vector.load %arg20[%c0_76, %c81] : memref<16x658xf32, #tpu.memory_space<vmem>>, vector<4x512xf32>
    %228 = vector.broadcast %226 : vector<1x512xf32> to vector<4x512xf32>
    %229 = arith.mulf %227, %228 : vector<4x512xf32>
    %c64_77 = arith.constant 64 : index
    %c0_78 = arith.constant 0 : index
    %230 = vector.load %arg21[%c64_77, %c0_78] : memref<432x512xf32, #tpu.memory_space<vmem>>, vector<4x512xf32>
    tpu.vector_store %arg21[%c64_77, %c0_78], %229 {strides = array<i32>} : memref<432x512xf32, #tpu.memory_space<vmem>>, vector<4x512xf32>,
    %231 = arith.andi %31, %67 : vector<1x512xi1>
    %232 = arith.andi %231, %94 : vector<1x512xi1>
    %233 = arith.extui %232 : vector<1x512xi1> to vector<1x512xi32>
    %234 = arith.sitofp %233 : vector<1x512xi32> to vector<1x512xf32>
    %c0_79 = arith.constant 0 : index
    %c82 = arith.constant 82 : index
    %235 = vector.load %arg20[%c0_79, %c82] : memref<16x658xf32, #tpu.memory_space<vmem>>, vector<4x512xf32>
    %236 = vector.broadcast %234 : vector<1x512xf32> to vector<4x512xf32>
    %237 = arith.mulf %235, %236 : vector<4x512xf32>
    %c68 = arith.constant 68 : index
    %c0_80 = arith.constant 0 : index
    %238 = vector.load %arg21[%c68, %c0_80] : memref<432x512xf32, #tpu.memory_space<vmem>>, vector<4x512xf32>
    tpu.vector_store %arg21[%c68, %c0_80], %237 {strides = array<i32>} : memref<432x512xf32, #tpu.memory_space<vmem>>, vector<4x512xf32>,
    %239 = arith.andi %40, %49 : vector<1x512xi1>
    %240 = arith.andi %239, %76 : vector<1x512xi1>
    %241 = arith.extui %240 : vector<1x512xi1> to vector<1x512xi32>
    %242 = arith.sitofp %241 : vector<1x512xi32> to vector<1x512xf32>
    %c0_81 = arith.constant 0 : index
    %c128 = arith.constant 128 : index
    %243 = vector.load %arg20[%c0_81, %c128] : memref<16x658xf32, #tpu.memory_space<vmem>>, vector<4x512xf32>
    %244 = vector.broadcast %242 : vector<1x512xf32> to vector<4x512xf32>
    %245 = arith.mulf %243, %244 : vector<4x512xf32>
    %c72_82 = arith.constant 72 : index
    %c0_83 = arith.constant 0 : index
    %246 = vector.load %arg21[%c72_82, %c0_83] : memref<432x512xf32, #tpu.memory_space<vmem>>, vector<4x512xf32>
    tpu.vector_store %arg21[%c72_82, %c0_83], %245 {strides = array<i32>} : memref<432x512xf32, #tpu.memory_space<vmem>>, vector<4x512xf32>,
    %247 = arith.andi %40, %49 : vector<1x512xi1>
    %248 = arith.andi %247, %85 : vector<1x512xi1>
    %249 = arith.extui %248 : vector<1x512xi1> to vector<1x512xi32>
    %250 = arith.sitofp %249 : vector<1x512xi32> to vector<1x512xf32>
    %c0_84 = arith.constant 0 : index
    %c129 = arith.constant 129 : index
    %251 = vector.load %arg20[%c0_84, %c129] : memref<16x658xf32, #tpu.memory_space<vmem>>, vector<4x512xf32>
    %252 = vector.broadcast %250 : vector<1x512xf32> to vector<4x512xf32>
    %253 = arith.mulf %251, %252 : vector<4x512xf32>
    %c76 = arith.constant 76 : index
    %c0_85 = arith.constant 0 : index
    %254 = vector.load %arg21[%c76, %c0_85] : memref<432x512xf32, #tpu.memory_space<vmem>>, vector<4x512xf32>
    tpu.vector_store %arg21[%c76, %c0_85], %253 {strides = array<i32>} : memref<432x512xf32, #tpu.memory_space<vmem>>, vector<4x512xf32>,
    %255 = arith.andi %40, %49 : vector<1x512xi1>
    %256 = arith.andi %255, %94 : vector<1x512xi1>
    %257 = arith.extui %256 : vector<1x512xi1> to vector<1x512xi32>
    %258 = arith.sitofp %257 : vector<1x512xi32> to vector<1x512xf32>
    %c0_86 = arith.constant 0 : index
    %c130 = arith.constant 130 : index
    %259 = vector.load %arg20[%c0_86, %c130] : memref<16x658xf32, #tpu.memory_space<vmem>>, vector<4x512xf32>
    %260 = vector.broadcast %258 : vector<1x512xf32> to vector<4x512xf32>
    %261 = arith.mulf %259, %260 : vector<4x512xf32>
    %c80_87 = arith.constant 80 : index
    %c0_88 = arith.constant 0 : index
    %262 = vector.load %arg21[%c80_87, %c0_88] : memref<432x512xf32, #tpu.memory_space<vmem>>, vector<4x512xf32>
    tpu.vector_store %arg21[%c80_87, %c0_88], %261 {strides = array<i32>} : memref<432x512xf32, #tpu.memory_space<vmem>>, vector<4x512xf32>,
    %263 = arith.andi %40, %58 : vector<1x512xi1>
    %264 = arith.andi %263, %76 : vector<1x512xi1>
    %265 = arith.extui %264 : vector<1x512xi1> to vector<1x512xi32>
    %266 = arith.sitofp %265 : vector<1x512xi32> to vector<1x512xf32>
    %c0_89 = arith.constant 0 : index
    %c136 = arith.constant 136 : index
    %267 = vector.load %arg20[%c0_89, %c136] : memref<16x658xf32, #tpu.memory_space<vmem>>, vector<4x512xf32>
    %268 = vector.broadcast %266 : vector<1x512xf32> to vector<4x512xf32>
    %269 = arith.mulf %267, %268 : vector<4x512xf32>
    %c84 = arith.constant 84 : index
    %c0_90 = arith.constant 0 : index
    %270 = vector.load %arg21[%c84, %c0_90] : memref<432x512xf32, #tpu.memory_space<vmem>>, vector<4x512xf32>
    tpu.vector_store %arg21[%c84, %c0_90], %269 {strides = array<i32>} : memref<432x512xf32, #tpu.memory_space<vmem>>, vector<4x512xf32>,
    %271 = arith.andi %40, %58 : vector<1x512xi1>
    %272 = arith.andi %271, %85 : vector<1x512xi1>
    %273 = arith.extui %272 : vector<1x512xi1> to vector<1x512xi32>
    %274 = arith.sitofp %273 : vector<1x512xi32> to vector<1x512xf32>
    %c0_91 = arith.constant 0 : index
    %c137 = arith.constant 137 : index
    %275 = vector.load %arg20[%c0_91, %c137] : memref<16x658xf32, #tpu.memory_space<vmem>>, vector<4x512xf32>
    %276 = vector.broadcast %274 : vector<1x512xf32> to vector<4x512xf32>
    %277 = arith.mulf %275, %276 : vector<4x512xf32>
    %c88 = arith.constant 88 : index
    %c0_92 = arith.constant 0 : index
    %278 = vector.load %arg21[%c88, %c0_92] : memref<432x512xf32, #tpu.memory_space<vmem>>, vector<4x512xf32>
    tpu.vector_store %arg21[%c88, %c0_92], %277 {strides = array<i32>} : memref<432x512xf32, #tpu.memory_space<vmem>>, vector<4x512xf32>,
    %279 = arith.andi %40, %58 : vector<1x512xi1>
    %280 = arith.andi %279, %94 : vector<1x512xi1>
    %281 = arith.extui %280 : vector<1x512xi1> to vector<1x512xi32>
    %282 = arith.sitofp %281 : vector<1x512xi32> to vector<1x512xf32>
    %c0_93 = arith.constant 0 : index
    %c138 = arith.constant 138 : index
    %283 = vector.load %arg20[%c0_93, %c138] : memref<16x658xf32, #tpu.memory_space<vmem>>, vector<4x512xf32>
    %284 = vector.broadcast %282 : vector<1x512xf32> to vector<4x512xf32>
    %285 = arith.mulf %283, %284 : vector<4x512xf32>
    %c92 = arith.constant 92 : index
    %c0_94 = arith.constant 0 : index
    %286 = vector.load %arg21[%c92, %c0_94] : memref<432x512xf32, #tpu.memory_space<vmem>>, vector<4x512xf32>
    tpu.vector_store %arg21[%c92, %c0_94], %285 {strides = array<i32>} : memref<432x512xf32, #tpu.memory_space<vmem>>, vector<4x512xf32>,
    %287 = arith.andi %40, %67 : vector<1x512xi1>
    %288 = arith.andi %287, %76 : vector<1x512xi1>
    %289 = arith.extui %288 : vector<1x512xi1> to vector<1x512xi32>
    %290 = arith.sitofp %289 : vector<1x512xi32> to vector<1x512xf32>
    %c0_95 = arith.constant 0 : index
    %c144 = arith.constant 144 : index
    %291 = vector.load %arg20[%c0_95, %c144] : memref<16x658xf32, #tpu.memory_space<vmem>>, vector<4x512xf32>
    %292 = vector.broadcast %290 : vector<1x512xf32> to vector<4x512xf32>
    %293 = arith.mulf %291, %292 : vector<4x512xf32>
    %c96 = arith.constant 96 : index
    %c0_96 = arith.constant 0 : index
    %294 = vector.load %arg21[%c96, %c0_96] : memref<432x512xf32, #tpu.memory_space<vmem>>, vector<4x512xf32>
    tpu.vector_store %arg21[%c96, %c0_96], %293 {strides = array<i32>} : memref<432x512xf32, #tpu.memory_space<vmem>>, vector<4x512xf32>,
    %295 = arith.andi %40, %67 : vector<1x512xi1>
    %296 = arith.andi %295, %85 : vector<1x512xi1>
    %297 = arith.extui %296 : vector<1x512xi1> to vector<1x512xi32>
    %298 = arith.sitofp %297 : vector<1x512xi32> to vector<1x512xf32>
    %c0_97 = arith.constant 0 : index
    %c145 = arith.constant 145 : index
    %299 = vector.load %arg20[%c0_97, %c145] : memref<16x658xf32, #tpu.memory_space<vmem>>, vector<4x512xf32>
    %300 = vector.broadcast %298 : vector<1x512xf32> to vector<4x512xf32>
    %301 = arith.mulf %299, %300 : vector<4x512xf32>
    %c100 = arith.constant 100 : index
    %c0_98 = arith.constant 0 : index
    %302 = vector.load %arg21[%c100, %c0_98] : memref<432x512xf32, #tpu.memory_space<vmem>>, vector<4x512xf32>
    tpu.vector_store %arg21[%c100, %c0_98], %301 {strides = array<i32>} : memref<432x512xf32, #tpu.memory_space<vmem>>, vector<4x512xf32>,
    %303 = arith.andi %40, %67 : vector<1x512xi1>
    %304 = arith.andi %303, %94 : vector<1x512xi1>
    %305 = arith.extui %304 : vector<1x512xi1> to vector<1x512xi32>
    %306 = arith.sitofp %305 : vector<1x512xi32> to vector<1x512xf32>
    %c0_99 = arith.constant 0 : index
    %c146 = arith.constant 146 : index
    %307 = vector.load %arg20[%c0_99, %c146] : memref<16x658xf32, #tpu.memory_space<vmem>>, vector<4x512xf32>
    %308 = vector.broadcast %306 : vector<1x512xf32> to vector<4x512xf32>
    %309 = arith.mulf %307, %308 : vector<4x512xf32>
    %c104 = arith.constant 104 : index
    %c0_100 = arith.constant 0 : index
    %310 = vector.load %arg21[%c104, %c0_100] : memref<432x512xf32, #tpu.memory_space<vmem>>, vector<4x512xf32>
    tpu.vector_store %arg21[%c104, %c0_100], %309 {strides = array<i32>} : memref<432x512xf32, #tpu.memory_space<vmem>>, vector<4x512xf32>,
    %c0_101 = arith.constant 0 : index
    %c0_102 = arith.constant 0 : index
    %311 = vector.load %arg2[%c0_101, %c0_102] : memref<8x108xf32, #tpu.memory_space<vmem>>, vector<8x108xf32>
    %c0_103 = arith.constant 0 : index
    %c0_104 = arith.constant 0 : index
    %312 = vector.load %arg21[%c0_103, %c0_104] : memref<432x512xf32, #tpu.memory_space<vmem>>, vector<108x512xf32>
    %cst_105 = arith.constant dense<0.000000e+00> : vector<8x512xf32>
    %313 = tpu.matmul %311, %312, %cst_105 {dimension_numbers = #tpu.dot_dimension_numbers<[1], [0], [0], [1], [0, 0, 1, 1], [], []>} : vector<8x108xf32>, vector<108x512xf32>, vector<8x512xf32> -> vector<8x512xf32>
    %c0_106 = arith.constant 0 : index
    %c0_107 = arith.constant 0 : index
    %314 = vector.load %arg3[%c0_106, %c0_107] : memref<8x1xf32, #tpu.memory_space<vmem>>, vector<8x1xf32>
    %315 = vector.broadcast %314 : vector<8x1xf32> to vector<8x512xf32>
    %316 = arith.addf %313, %315 : vector<8x512xf32>
    %cst_108 = arith.constant dense<0.000000e+00> : vector<8xf32>
    %317 = vector.multi_reduction <add>, %316, %cst_108 [1] : vector<8x512xf32> to vector<8xf32>
    %318 = vector.shape_cast %317 : vector<8xf32> to vector<8x1xf32>
    %cst_109 = arith.constant 5.120000e+02 : f32
    %319 = vector.broadcast %cst_109 : f32 to vector<8x1xf32>
    %320 = arith.divf %318, %319 : vector<8x1xf32>
    %321 = vector.broadcast %320 : vector<8x1xf32> to vector<8x512xf32>
    %322 = arith.subf %316, %321 : vector<8x512xf32>
    %323 = arith.mulf %322, %322 : vector<8x512xf32>
    %cst_110 = arith.constant dense<0.000000e+00> : vector<8xf32>
    %324 = vector.multi_reduction <add>, %323, %cst_110 [1] : vector<8x512xf32> to vector<8xf32>
    %325 = vector.shape_cast %324 : vector<8xf32> to vector<8x1xf32>
    %cst_111 = arith.constant 5.120000e+02 : f32
    %326 = vector.broadcast %cst_111 : f32 to vector<8x1xf32>
    %327 = arith.divf %325, %326 : vector<8x1xf32>
    %328 = vector.broadcast %320 : vector<8x1xf32> to vector<8x512xf32>
    %329 = arith.subf %316, %328 : vector<8x512xf32>
    %cst_112 = arith.constant 9.99999974E-6 : f32
    %330 = vector.broadcast %cst_112 : f32 to vector<8x1xf32>
    %331 = arith.addf %327, %330 : vector<8x1xf32>
    %332 = math.rsqrt %331 : vector<8x1xf32>
    %333 = vector.broadcast %332 : vector<8x1xf32> to vector<8x512xf32>
    %334 = arith.mulf %329, %333 : vector<8x512xf32>
    %c0_113 = arith.constant 0 : index
    %c0_114 = arith.constant 0 : index
    %335 = vector.load %arg4[%c0_113, %c0_114] : memref<8x1xf32, #tpu.memory_space<vmem>>, vector<8x1xf32>
    %336 = vector.broadcast %335 : vector<8x1xf32> to vector<8x512xf32>
    %337 = arith.mulf %334, %336 : vector<8x512xf32>
    %c0_115 = arith.constant 0 : index
    %c0_116 = arith.constant 0 : index
    %338 = vector.load %arg5[%c0_115, %c0_116] : memref<8x1xf32, #tpu.memory_space<vmem>>, vector<8x1xf32>
    %339 = vector.broadcast %338 : vector<8x1xf32> to vector<8x512xf32>
    %340 = arith.addf %337, %339 : vector<8x512xf32>
    %cst_117 = arith.constant 0.000000e+00 : f32
    %341 = vector.broadcast %cst_117 : f32 to vector<8x512xf32>
    %342 = arith.cmpf oge, %340, %341 : vector<8x512xf32>
    %cst_118 = arith.constant 0.00999999977 : f32
    %343 = vector.broadcast %cst_118 : f32 to vector<8x512xf32>
    %344 = arith.mulf %343, %340 : vector<8x512xf32>
    %345 = arith.select %342, %340, %344 : vector<8x512xi1>, vector<8x512xf32>
    %cst_119 = arith.constant 0.000000e+00 : f32
    %346 = vector.broadcast %cst_119 : f32 to vector<8x658xf32>
    %c0_120 = arith.constant 0 : index
    %c0_121 = arith.constant 0 : index
    %347 = vector.load %arg20[%c0_120, %c0_121] : memref<16x658xf32, #tpu.memory_space<vmem>>, vector<8x658xf32>
    tpu.vector_store %arg20[%c0_120, %c0_121], %346 {strides = array<i32>} : memref<16x658xf32, #tpu.memory_space<vmem>>, vector<8x658xf32>,
    %c0_122 = arith.constant 0 : index
    %c73_123 = arith.constant 73 : index
    %348 = vector.load %arg20[%c0_122, %c73_123] : memref<16x658xf32, #tpu.memory_space<vmem>>, vector<8x512xf32>
    tpu.vector_store %arg20[%c0_122, %c73_123], %345 {strides = array<i32>} : memref<16x658xf32, #tpu.memory_space<vmem>>, vector<8x512xf32>,
    %349 = tpu.iota {dimensions = array<i32: 1>} : vector<1x512xi32>
    %c7_i32_124 = arith.constant 7 : i32
    %350 = vector.broadcast %c7_i32_124 : i32 to vector<1x512xi32>
    %351 = arith.andi %349, %350 : vector<1x512xi32>
    %c3_i32_125 = arith.constant 3 : i32
    %352 = vector.broadcast %c3_i32_125 : i32 to vector<1x512xi32>
    %353 = arith.shrsi %349, %352 : vector<1x512xi32>
    %c7_i32_126 = arith.constant 7 : i32
    %354 = vector.broadcast %c7_i32_126 : i32 to vector<1x512xi32>
    %355 = arith.andi %353, %354 : vector<1x512xi32>
    %c6_i32_127 = arith.constant 6 : i32
    %356 = vector.broadcast %c6_i32_127 : i32 to vector<1x512xi32>
    %357 = arith.shrsi %349, %356 : vector<1x512xi32>
    %c-1_i32_128 = arith.constant -1 : i32
    %358 = vector.broadcast %c-1_i32_128 : i32 to vector<1x512xi32>
    %359 = arith.addi %357, %358 : vector<1x512xi32>
    %c0_i32_129 = arith.constant 0 : i32
    %360 = vector.broadcast %c0_i32_129 : i32 to vector<1x512xi32>
    %361 = arith.cmpi sge, %359, %360 : vector<1x512xi32>
    %c-1_i32_130 = arith.constant -1 : i32
    %362 = vector.broadcast %c-1_i32_130 : i32 to vector<1x512xi32>
    %363 = arith.addi %357, %362 : vector<1x512xi32>
    %c7_i32_131 = arith.constant 7 : i32
    %364 = vector.broadcast %c7_i32_131 : i32 to vector<1x512xi32>
    %365 = arith.cmpi sle, %363, %364 : vector<1x512xi32>
    %366 = arith.andi %361, %365 : vector<1x512xi1>
    %c0_i32_132 = arith.constant 0 : i32
    %367 = vector.broadcast %c0_i32_132 : i32 to vector<1x512xi32>
    %368 = arith.addi %357, %367 : vector<1x512xi32>
    %c0_i32_133 = arith.constant 0 : i32
    %369 = vector.broadcast %c0_i32_133 : i32 to vector<1x512xi32>
    %370 = arith.cmpi sge, %368, %369 : vector<1x512xi32>
    %c0_i32_134 = arith.constant 0 : i32
    %371 = vector.broadcast %c0_i32_134 : i32 to vector<1x512xi32>
    %372 = arith.addi %357, %371 : vector<1x512xi32>
    %c7_i32_135 = arith.constant 7 : i32
    %373 = vector.broadcast %c7_i32_135 : i32 to vector<1x512xi32>
    %374 = arith.cmpi sle, %372, %373 : vector<1x512xi32>
    %375 = arith.andi %370, %374 : vector<1x512xi1>
    %c1_i32_136 = arith.constant 1 : i32
    %376 = vector.broadcast %c1_i32_136 : i32 to vector<1x512xi32>
    %377 = arith.addi %357, %376 : vector<1x512xi32>
    %c0_i32_137 = arith.constant 0 : i32
    %378 = vector.broadcast %c0_i32_137 : i32 to vector<1x512xi32>
    %379 = arith.cmpi sge, %377, %378 : vector<1x512xi32>
    %c1_i32_138 = arith.constant 1 : i32
    %380 = vector.broadcast %c1_i32_138 : i32 to vector<1x512xi32>
    %381 = arith.addi %357, %380 : vector<1x512xi32>
    %c7_i32_139 = arith.constant 7 : i32
    %382 = vector.broadcast %c7_i32_139 : i32 to vector<1x512xi32>
    %383 = arith.cmpi sle, %381, %382 : vector<1x512xi32>
    %384 = arith.andi %379, %383 : vector<1x512xi1>
    %c-1_i32_140 = arith.constant -1 : i32
    %385 = vector.broadcast %c-1_i32_140 : i32 to vector<1x512xi32>
    %386 = arith.addi %355, %385 : vector<1x512xi32>
    %c0_i32_141 = arith.constant 0 : i32
    %387 = vector.broadcast %c0_i32_141 : i32 to vector<1x512xi32>
    %388 = arith.cmpi sge, %386, %387 : vector<1x512xi32>
    %c-1_i32_142 = arith.constant -1 : i32
    %389 = vector.broadcast %c-1_i32_142 : i32 to vector<1x512xi32>
    %390 = arith.addi %355, %389 : vector<1x512xi32>
    %c7_i32_143 = arith.constant 7 : i32
    %391 = vector.broadcast %c7_i32_143 : i32 to vector<1x512xi32>
    %392 = arith.cmpi sle, %390, %391 : vector<1x512xi32>
    %393 = arith.andi %388, %392 : vector<1x512xi1>
    %c0_i32_144 = arith.constant 0 : i32
    %394 = vector.broadcast %c0_i32_144 : i32 to vector<1x512xi32>
    %395 = arith.addi %355, %394 : vector<1x512xi32>
    %c0_i32_145 = arith.constant 0 : i32
    %396 = vector.broadcast %c0_i32_145 : i32 to vector<1x512xi32>
    %397 = arith.cmpi sge, %395, %396 : vector<1x512xi32>
    %c0_i32_146 = arith.constant 0 : i32
    %398 = vector.broadcast %c0_i32_146 : i32 to vector<1x512xi32>
    %399 = arith.addi %355, %398 : vector<1x512xi32>
    %c7_i32_147 = arith.constant 7 : i32
    %400 = vector.broadcast %c7_i32_147 : i32 to vector<1x512xi32>
    %401 = arith.cmpi sle, %399, %400 : vector<1x512xi32>
    %402 = arith.andi %397, %401 : vector<1x512xi1>
    %c1_i32_148 = arith.constant 1 : i32
    %403 = vector.broadcast %c1_i32_148 : i32 to vector<1x512xi32>
    %404 = arith.addi %355, %403 : vector<1x512xi32>
    %c0_i32_149 = arith.constant 0 : i32
    %405 = vector.broadcast %c0_i32_149 : i32 to vector<1x512xi32>
    %406 = arith.cmpi sge, %404, %405 : vector<1x512xi32>
    %c1_i32_150 = arith.constant 1 : i32
    %407 = vector.broadcast %c1_i32_150 : i32 to vector<1x512xi32>
    %408 = arith.addi %355, %407 : vector<1x512xi32>
    %c7_i32_151 = arith.constant 7 : i32
    %409 = vector.broadcast %c7_i32_151 : i32 to vector<1x512xi32>
    %410 = arith.cmpi sle, %408, %409 : vector<1x512xi32>
    %411 = arith.andi %406, %410 : vector<1x512xi1>
    %c-1_i32_152 = arith.constant -1 : i32
    %412 = vector.broadcast %c-1_i32_152 : i32 to vector<1x512xi32>
    %413 = arith.addi %351, %412 : vector<1x512xi32>
    %c0_i32_153 = arith.constant 0 : i32
    %414 = vector.broadcast %c0_i32_153 : i32 to vector<1x512xi32>
    %415 = arith.cmpi sge, %413, %414 : vector<1x512xi32>
    %c-1_i32_154 = arith.constant -1 : i32
    %416 = vector.broadcast %c-1_i32_154 : i32 to vector<1x512xi32>
    %417 = arith.addi %351, %416 : vector<1x512xi32>
    %c7_i32_155 = arith.constant 7 : i32
    %418 = vector.broadcast %c7_i32_155 : i32 to vector<1x512xi32>
    %419 = arith.cmpi sle, %417, %418 : vector<1x512xi32>
    %420 = arith.andi %415, %419 : vector<1x512xi1>
    %c0_i32_156 = arith.constant 0 : i32
    %421 = vector.broadcast %c0_i32_156 : i32 to vector<1x512xi32>
    %422 = arith.addi %351, %421 : vector<1x512xi32>
    %c0_i32_157 = arith.constant 0 : i32
    %423 = vector.broadcast %c0_i32_157 : i32 to vector<1x512xi32>
    %424 = arith.cmpi sge, %422, %423 : vector<1x512xi32>
    %c0_i32_158 = arith.constant 0 : i32
    %425 = vector.broadcast %c0_i32_158 : i32 to vector<1x512xi32>
    %426 = arith.addi %351, %425 : vector<1x512xi32>
    %c7_i32_159 = arith.constant 7 : i32
    %427 = vector.broadcast %c7_i32_159 : i32 to vector<1x512xi32>
    %428 = arith.cmpi sle, %426, %427 : vector<1x512xi32>
    %429 = arith.andi %424, %428 : vector<1x512xi1>
    %c1_i32_160 = arith.constant 1 : i32
    %430 = vector.broadcast %c1_i32_160 : i32 to vector<1x512xi32>
    %431 = arith.addi %351, %430 : vector<1x512xi32>
    %c0_i32_161 = arith.constant 0 : i32
    %432 = vector.broadcast %c0_i32_161 : i32 to vector<1x512xi32>
    %433 = arith.cmpi sge, %431, %432 : vector<1x512xi32>
    %c1_i32_162 = arith.constant 1 : i32
    %434 = vector.broadcast %c1_i32_162 : i32 to vector<1x512xi32>
    %435 = arith.addi %351, %434 : vector<1x512xi32>
    %c7_i32_163 = arith.constant 7 : i32
    %436 = vector.broadcast %c7_i32_163 : i32 to vector<1x512xi32>
    %437 = arith.cmpi sle, %435, %436 : vector<1x512xi32>
    %438 = arith.andi %433, %437 : vector<1x512xi1>
    %439 = arith.andi %366, %393 : vector<1x512xi1>
    %440 = arith.andi %439, %420 : vector<1x512xi1>
    %441 = arith.extui %440 : vector<1x512xi1> to vector<1x512xi32>
    %442 = arith.sitofp %441 : vector<1x512xi32> to vector<1x512xf32>
    %c0_164 = arith.constant 0 : index
    %c0_165 = arith.constant 0 : index
    %443 = vector.load %arg20[%c0_164, %c0_165] : memref<16x658xf32, #tpu.memory_space<vmem>>, vector<8x512xf32>
    %444 = vector.broadcast %442 : vector<1x512xf32> to vector<8x512xf32>
    %445 = arith.mulf %443, %444 : vector<8x512xf32>
    %c0_166 = arith.constant 0 : index
    %c0_167 = arith.constant 0 : index
    %446 = vector.load %arg21[%c0_166, %c0_167] : memref<432x512xf32, #tpu.memory_space<vmem>>, vector<8x512xf32>
    tpu.vector_store %arg21[%c0_166, %c0_167], %445 {strides = array<i32>} : memref<432x512xf32, #tpu.memory_space<vmem>>, vector<8x512xf32>,
    %447 = arith.andi %366, %393 : vector<1x512xi1>
    %448 = arith.andi %447, %429 : vector<1x512xi1>
    %449 = arith.extui %448 : vector<1x512xi1> to vector<1x512xi32>
    %450 = arith.sitofp %449 : vector<1x512xi32> to vector<1x512xf32>
    %c0_168 = arith.constant 0 : index
    %c1_169 = arith.constant 1 : index
    %451 = vector.load %arg20[%c0_168, %c1_169] : memref<16x658xf32, #tpu.memory_space<vmem>>, vector<8x512xf32>
    %452 = vector.broadcast %450 : vector<1x512xf32> to vector<8x512xf32>
    %453 = arith.mulf %451, %452 : vector<8x512xf32>
    %c8_170 = arith.constant 8 : index
    %c0_171 = arith.constant 0 : index
    %454 = vector.load %arg21[%c8_170, %c0_171] : memref<432x512xf32, #tpu.memory_space<vmem>>, vector<8x512xf32>
    tpu.vector_store %arg21[%c8_170, %c0_171], %453 {strides = array<i32>} : memref<432x512xf32, #tpu.memory_space<vmem>>, vector<8x512xf32>,
    %455 = arith.andi %366, %393 : vector<1x512xi1>
    %456 = arith.andi %455, %438 : vector<1x512xi1>
    %457 = arith.extui %456 : vector<1x512xi1> to vector<1x512xi32>
    %458 = arith.sitofp %457 : vector<1x512xi32> to vector<1x512xf32>
    %c0_172 = arith.constant 0 : index
    %c2_173 = arith.constant 2 : index
    %459 = vector.load %arg20[%c0_172, %c2_173] : memref<16x658xf32, #tpu.memory_space<vmem>>, vector<8x512xf32>
    %460 = vector.broadcast %458 : vector<1x512xf32> to vector<8x512xf32>
    %461 = arith.mulf %459, %460 : vector<8x512xf32>
    %c16_174 = arith.constant 16 : index
    %c0_175 = arith.constant 0 : index
    %462 = vector.load %arg21[%c16_174, %c0_175] : memref<432x512xf32, #tpu.memory_space<vmem>>, vector<8x512xf32>
    tpu.vector_store %arg21[%c16_174, %c0_175], %461 {strides = array<i32>} : memref<432x512xf32, #tpu.memory_space<vmem>>, vector<8x512xf32>,
    %463 = arith.andi %366, %402 : vector<1x512xi1>
    %464 = arith.andi %463, %420 : vector<1x512xi1>
    %465 = arith.extui %464 : vector<1x512xi1> to vector<1x512xi32>
    %466 = arith.sitofp %465 : vector<1x512xi32> to vector<1x512xf32>
    %c0_176 = arith.constant 0 : index
    %c8_177 = arith.constant 8 : index
    %467 = vector.load %arg20[%c0_176, %c8_177] : memref<16x658xf32, #tpu.memory_space<vmem>>, vector<8x512xf32>
    %468 = vector.broadcast %466 : vector<1x512xf32> to vector<8x512xf32>
    %469 = arith.mulf %467, %468 : vector<8x512xf32>
    %c24_178 = arith.constant 24 : index
    %c0_179 = arith.constant 0 : index
    %470 = vector.load %arg21[%c24_178, %c0_179] : memref<432x512xf32, #tpu.memory_space<vmem>>, vector<8x512xf32>
    tpu.vector_store %arg21[%c24_178, %c0_179], %469 {strides = array<i32>} : memref<432x512xf32, #tpu.memory_space<vmem>>, vector<8x512xf32>,
    %471 = arith.andi %366, %402 : vector<1x512xi1>
    %472 = arith.andi %471, %429 : vector<1x512xi1>
    %473 = arith.extui %472 : vector<1x512xi1> to vector<1x512xi32>
    %474 = arith.sitofp %473 : vector<1x512xi32> to vector<1x512xf32>
    %c0_180 = arith.constant 0 : index
    %c9_181 = arith.constant 9 : index
    %475 = vector.load %arg20[%c0_180, %c9_181] : memref<16x658xf32, #tpu.memory_space<vmem>>, vector<8x512xf32>
    %476 = vector.broadcast %474 : vector<1x512xf32> to vector<8x512xf32>
    %477 = arith.mulf %475, %476 : vector<8x512xf32>
    %c32_182 = arith.constant 32 : index
    %c0_183 = arith.constant 0 : index
    %478 = vector.load %arg21[%c32_182, %c0_183] : memref<432x512xf32, #tpu.memory_space<vmem>>, vector<8x512xf32>
    tpu.vector_store %arg21[%c32_182, %c0_183], %477 {strides = array<i32>} : memref<432x512xf32, #tpu.memory_space<vmem>>, vector<8x512xf32>,
    %479 = arith.andi %366, %402 : vector<1x512xi1>
    %480 = arith.andi %479, %438 : vector<1x512xi1>
    %481 = arith.extui %480 : vector<1x512xi1> to vector<1x512xi32>
    %482 = arith.sitofp %481 : vector<1x512xi32> to vector<1x512xf32>
    %c0_184 = arith.constant 0 : index
    %c10_185 = arith.constant 10 : index
    %483 = vector.load %arg20[%c0_184, %c10_185] : memref<16x658xf32, #tpu.memory_space<vmem>>, vector<8x512xf32>
    %484 = vector.broadcast %482 : vector<1x512xf32> to vector<8x512xf32>
    %485 = arith.mulf %483, %484 : vector<8x512xf32>
    %c40_186 = arith.constant 40 : index
    %c0_187 = arith.constant 0 : index
    %486 = vector.load %arg21[%c40_186, %c0_187] : memref<432x512xf32, #tpu.memory_space<vmem>>, vector<8x512xf32>
    tpu.vector_store %arg21[%c40_186, %c0_187], %485 {strides = array<i32>} : memref<432x512xf32, #tpu.memory_space<vmem>>, vector<8x512xf32>,
    %487 = arith.andi %366, %411 : vector<1x512xi1>
    %488 = arith.andi %487, %420 : vector<1x512xi1>
    %489 = arith.extui %488 : vector<1x512xi1> to vector<1x512xi32>
    %490 = arith.sitofp %489 : vector<1x512xi32> to vector<1x512xf32>
    %c0_188 = arith.constant 0 : index
    %c16_189 = arith.constant 16 : index
    %491 = vector.load %arg20[%c0_188, %c16_189] : memref<16x658xf32, #tpu.memory_space<vmem>>, vector<8x512xf32>
    %492 = vector.broadcast %490 : vector<1x512xf32> to vector<8x512xf32>
    %493 = arith.mulf %491, %492 : vector<8x512xf32>
    %c48_190 = arith.constant 48 : index
    %c0_191 = arith.constant 0 : index
    %494 = vector.load %arg21[%c48_190, %c0_191] : memref<432x512xf32, #tpu.memory_space<vmem>>, vector<8x512xf32>
    tpu.vector_store %arg21[%c48_190, %c0_191], %493 {strides = array<i32>} : memref<432x512xf32, #tpu.memory_space<vmem>>, vector<8x512xf32>,
    %495 = arith.andi %366, %411 : vector<1x512xi1>
    %496 = arith.andi %495, %429 : vector<1x512xi1>
    %497 = arith.extui %496 : vector<1x512xi1> to vector<1x512xi32>
    %498 = arith.sitofp %497 : vector<1x512xi32> to vector<1x512xf32>
    %c0_192 = arith.constant 0 : index
    %c17_193 = arith.constant 17 : index
    %499 = vector.load %arg20[%c0_192, %c17_193] : memref<16x658xf32, #tpu.memory_space<vmem>>, vector<8x512xf32>
    %500 = vector.broadcast %498 : vector<1x512xf32> to vector<8x512xf32>
    %501 = arith.mulf %499, %500 : vector<8x512xf32>
    %c56_194 = arith.constant 56 : index
    %c0_195 = arith.constant 0 : index
    %502 = vector.load %arg21[%c56_194, %c0_195] : memref<432x512xf32, #tpu.memory_space<vmem>>, vector<8x512xf32>
    tpu.vector_store %arg21[%c56_194, %c0_195], %501 {strides = array<i32>} : memref<432x512xf32, #tpu.memory_space<vmem>>, vector<8x512xf32>,
    %503 = arith.andi %366, %411 : vector<1x512xi1>
    %504 = arith.andi %503, %438 : vector<1x512xi1>
    %505 = arith.extui %504 : vector<1x512xi1> to vector<1x512xi32>
    %506 = arith.sitofp %505 : vector<1x512xi32> to vector<1x512xf32>
    %c0_196 = arith.constant 0 : index
    %c18_197 = arith.constant 18 : index
    %507 = vector.load %arg20[%c0_196, %c18_197] : memref<16x658xf32, #tpu.memory_space<vmem>>, vector<8x512xf32>
    %508 = vector.broadcast %506 : vector<1x512xf32> to vector<8x512xf32>
    %509 = arith.mulf %507, %508 : vector<8x512xf32>
    %c64_198 = arith.constant 64 : index
    %c0_199 = arith.constant 0 : index
    %510 = vector.load %arg21[%c64_198, %c0_199] : memref<432x512xf32, #tpu.memory_space<vmem>>, vector<8x512xf32>
    tpu.vector_store %arg21[%c64_198, %c0_199], %509 {strides = array<i32>} : memref<432x512xf32, #tpu.memory_space<vmem>>, vector<8x512xf32>,
    %511 = arith.andi %375, %393 : vector<1x512xi1>
    %512 = arith.andi %511, %420 : vector<1x512xi1>
    %513 = arith.extui %512 : vector<1x512xi1> to vector<1x512xi32>
    %514 = arith.sitofp %513 : vector<1x512xi32> to vector<1x512xf32>
    %c0_200 = arith.constant 0 : index
    %c64_201 = arith.constant 64 : index
    %515 = vector.load %arg20[%c0_200, %c64_201] : memref<16x658xf32, #tpu.memory_space<vmem>>, vector<8x512xf32>
    %516 = vector.broadcast %514 : vector<1x512xf32> to vector<8x512xf32>
    %517 = arith.mulf %515, %516 : vector<8x512xf32>
    %c72_202 = arith.constant 72 : index
    %c0_203 = arith.constant 0 : index
    %518 = vector.load %arg21[%c72_202, %c0_203] : memref<432x512xf32, #tpu.memory_space<vmem>>, vector<8x512xf32>
    tpu.vector_store %arg21[%c72_202, %c0_203], %517 {strides = array<i32>} : memref<432x512xf32, #tpu.memory_space<vmem>>, vector<8x512xf32>,
    %519 = arith.andi %375, %393 : vector<1x512xi1>
    %520 = arith.andi %519, %429 : vector<1x512xi1>
    %521 = arith.extui %520 : vector<1x512xi1> to vector<1x512xi32>
    %522 = arith.sitofp %521 : vector<1x512xi32> to vector<1x512xf32>
    %c0_204 = arith.constant 0 : index
    %c65_205 = arith.constant 65 : index
    %523 = vector.load %arg20[%c0_204, %c65_205] : memref<16x658xf32, #tpu.memory_space<vmem>>, vector<8x512xf32>
    %524 = vector.broadcast %522 : vector<1x512xf32> to vector<8x512xf32>
    %525 = arith.mulf %523, %524 : vector<8x512xf32>
    %c80_206 = arith.constant 80 : index
    %c0_207 = arith.constant 0 : index
    %526 = vector.load %arg21[%c80_206, %c0_207] : memref<432x512xf32, #tpu.memory_space<vmem>>, vector<8x512xf32>
    tpu.vector_store %arg21[%c80_206, %c0_207], %525 {strides = array<i32>} : memref<432x512xf32, #tpu.memory_space<vmem>>, vector<8x512xf32>,
    %527 = arith.andi %375, %393 : vector<1x512xi1>
    %528 = arith.andi %527, %438 : vector<1x512xi1>
    %529 = arith.extui %528 : vector<1x512xi1> to vector<1x512xi32>
    %530 = arith.sitofp %529 : vector<1x512xi32> to vector<1x512xf32>
    %c0_208 = arith.constant 0 : index
    %c66_209 = arith.constant 66 : index
    %531 = vector.load %arg20[%c0_208, %c66_209] : memref<16x658xf32, #tpu.memory_space<vmem>>, vector<8x512xf32>
    %532 = vector.broadcast %530 : vector<1x512xf32> to vector<8x512xf32>
    %533 = arith.mulf %531, %532 : vector<8x512xf32>
    %c88_210 = arith.constant 88 : index
    %c0_211 = arith.constant 0 : index
    %534 = vector.load %arg21[%c88_210, %c0_211] : memref<432x512xf32, #tpu.memory_space<vmem>>, vector<8x512xf32>
    tpu.vector_store %arg21[%c88_210, %c0_211], %533 {strides = array<i32>} : memref<432x512xf32, #tpu.memory_space<vmem>>, vector<8x512xf32>,
    %535 = arith.andi %375, %402 : vector<1x512xi1>
    %536 = arith.andi %535, %420 : vector<1x512xi1>
    %537 = arith.extui %536 : vector<1x512xi1> to vector<1x512xi32>
    %538 = arith.sitofp %537 : vector<1x512xi32> to vector<1x512xf32>
    %c0_212 = arith.constant 0 : index
    %c72_213 = arith.constant 72 : index
    %539 = vector.load %arg20[%c0_212, %c72_213] : memref<16x658xf32, #tpu.memory_space<vmem>>, vector<8x512xf32>
    %540 = vector.broadcast %538 : vector<1x512xf32> to vector<8x512xf32>
    %541 = arith.mulf %539, %540 : vector<8x512xf32>
    %c96_214 = arith.constant 96 : index
    %c0_215 = arith.constant 0 : index
    %542 = vector.load %arg21[%c96_214, %c0_215] : memref<432x512xf32, #tpu.memory_space<vmem>>, vector<8x512xf32>
    tpu.vector_store %arg21[%c96_214, %c0_215], %541 {strides = array<i32>} : memref<432x512xf32, #tpu.memory_space<vmem>>, vector<8x512xf32>,
    %543 = arith.andi %375, %402 : vector<1x512xi1>
    %544 = arith.andi %543, %429 : vector<1x512xi1>
    %545 = arith.extui %544 : vector<1x512xi1> to vector<1x512xi32>
    %546 = arith.sitofp %545 : vector<1x512xi32> to vector<1x512xf32>
    %c0_216 = arith.constant 0 : index
    %c73_217 = arith.constant 73 : index
    %547 = vector.load %arg20[%c0_216, %c73_217] : memref<16x658xf32, #tpu.memory_space<vmem>>, vector<8x512xf32>
    %548 = vector.broadcast %546 : vector<1x512xf32> to vector<8x512xf32>
    %549 = arith.mulf %547, %548 : vector<8x512xf32>
    %c104_218 = arith.constant 104 : index
    %c0_219 = arith.constant 0 : index
    %550 = vector.load %arg21[%c104_218, %c0_219] : memref<432x512xf32, #tpu.memory_space<vmem>>, vector<8x512xf32>
    tpu.vector_store %arg21[%c104_218, %c0_219], %549 {strides = array<i32>} : memref<432x512xf32, #tpu.memory_space<vmem>>, vector<8x512xf32>,
    %551 = arith.andi %375, %402 : vector<1x512xi1>
    %552 = arith.andi %551, %438 : vector<1x512xi1>
    %553 = arith.extui %552 : vector<1x512xi1> to vector<1x512xi32>
    %554 = arith.sitofp %553 : vector<1x512xi32> to vector<1x512xf32>
    %c0_220 = arith.constant 0 : index
    %c74_221 = arith.constant 74 : index
    %555 = vector.load %arg20[%c0_220, %c74_221] : memref<16x658xf32, #tpu.memory_space<vmem>>, vector<8x512xf32>
    %556 = vector.broadcast %554 : vector<1x512xf32> to vector<8x512xf32>
    %557 = arith.mulf %555, %556 : vector<8x512xf32>
    %c112 = arith.constant 112 : index
    %c0_222 = arith.constant 0 : index
    %558 = vector.load %arg21[%c112, %c0_222] : memref<432x512xf32, #tpu.memory_space<vmem>>, vector<8x512xf32>
    tpu.vector_store %arg21[%c112, %c0_222], %557 {strides = array<i32>} : memref<432x512xf32, #tpu.memory_space<vmem>>, vector<8x512xf32>,
    %559 = arith.andi %375, %411 : vector<1x512xi1>
    %560 = arith.andi %559, %420 : vector<1x512xi1>
    %561 = arith.extui %560 : vector<1x512xi1> to vector<1x512xi32>
    %562 = arith.sitofp %561 : vector<1x512xi32> to vector<1x512xf32>
    %c0_223 = arith.constant 0 : index
    %c80_224 = arith.constant 80 : index
    %563 = vector.load %arg20[%c0_223, %c80_224] : memref<16x658xf32, #tpu.memory_space<vmem>>, vector<8x512xf32>
    %564 = vector.broadcast %562 : vector<1x512xf32> to vector<8x512xf32>
    %565 = arith.mulf %563, %564 : vector<8x512xf32>
    %c120 = arith.constant 120 : index
    %c0_225 = arith.constant 0 : index
    %566 = vector.load %arg21[%c120, %c0_225] : memref<432x512xf32, #tpu.memory_space<vmem>>, vector<8x512xf32>
    tpu.vector_store %arg21[%c120, %c0_225], %565 {strides = array<i32>} : memref<432x512xf32, #tpu.memory_space<vmem>>, vector<8x512xf32>,
    %567 = arith.andi %375, %411 : vector<1x512xi1>
    %568 = arith.andi %567, %429 : vector<1x512xi1>
    %569 = arith.extui %568 : vector<1x512xi1> to vector<1x512xi32>
    %570 = arith.sitofp %569 : vector<1x512xi32> to vector<1x512xf32>
    %c0_226 = arith.constant 0 : index
    %c81_227 = arith.constant 81 : index
    %571 = vector.load %arg20[%c0_226, %c81_227] : memref<16x658xf32, #tpu.memory_space<vmem>>, vector<8x512xf32>
    %572 = vector.broadcast %570 : vector<1x512xf32> to vector<8x512xf32>
    %573 = arith.mulf %571, %572 : vector<8x512xf32>
    %c128_228 = arith.constant 128 : index
    %c0_229 = arith.constant 0 : index
    %574 = vector.load %arg21[%c128_228, %c0_229] : memref<432x512xf32, #tpu.memory_space<vmem>>, vector<8x512xf32>
    tpu.vector_store %arg21[%c128_228, %c0_229], %573 {strides = array<i32>} : memref<432x512xf32, #tpu.memory_space<vmem>>, vector<8x512xf32>,
    %575 = arith.andi %375, %411 : vector<1x512xi1>
    %576 = arith.andi %575, %438 : vector<1x512xi1>
    %577 = arith.extui %576 : vector<1x512xi1> to vector<1x512xi32>
    %578 = arith.sitofp %577 : vector<1x512xi32> to vector<1x512xf32>
    %c0_230 = arith.constant 0 : index
    %c82_231 = arith.constant 82 : index
    %579 = vector.load %arg20[%c0_230, %c82_231] : memref<16x658xf32, #tpu.memory_space<vmem>>, vector<8x512xf32>
    %580 = vector.broadcast %578 : vector<1x512xf32> to vector<8x512xf32>
    %581 = arith.mulf %579, %580 : vector<8x512xf32>
    %c136_232 = arith.constant 136 : index
    %c0_233 = arith.constant 0 : index
    %582 = vector.load %arg21[%c136_232, %c0_233] : memref<432x512xf32, #tpu.memory_space<vmem>>, vector<8x512xf32>
    tpu.vector_store %arg21[%c136_232, %c0_233], %581 {strides = array<i32>} : memref<432x512xf32, #tpu.memory_space<vmem>>, vector<8x512xf32>,
    %583 = arith.andi %384, %393 : vector<1x512xi1>
    %584 = arith.andi %583, %420 : vector<1x512xi1>
    %585 = arith.extui %584 : vector<1x512xi1> to vector<1x512xi32>
    %586 = arith.sitofp %585 : vector<1x512xi32> to vector<1x512xf32>
    %c0_234 = arith.constant 0 : index
    %c128_235 = arith.constant 128 : index
    %587 = vector.load %arg20[%c0_234, %c128_235] : memref<16x658xf32, #tpu.memory_space<vmem>>, vector<8x512xf32>
    %588 = vector.broadcast %586 : vector<1x512xf32> to vector<8x512xf32>
    %589 = arith.mulf %587, %588 : vector<8x512xf32>
    %c144_236 = arith.constant 144 : index
    %c0_237 = arith.constant 0 : index
    %590 = vector.load %arg21[%c144_236, %c0_237] : memref<432x512xf32, #tpu.memory_space<vmem>>, vector<8x512xf32>
    tpu.vector_store %arg21[%c144_236, %c0_237], %589 {strides = array<i32>} : memref<432x512xf32, #tpu.memory_space<vmem>>, vector<8x512xf32>,
    %591 = arith.andi %384, %393 : vector<1x512xi1>
    %592 = arith.andi %591, %429 : vector<1x512xi1>
    %593 = arith.extui %592 : vector<1x512xi1> to vector<1x512xi32>
    %594 = arith.sitofp %593 : vector<1x512xi32> to vector<1x512xf32>
    %c0_238 = arith.constant 0 : index
    %c129_239 = arith.constant 129 : index
    %595 = vector.load %arg20[%c0_238, %c129_239] : memref<16x658xf32, #tpu.memory_space<vmem>>, vector<8x512xf32>
    %596 = vector.broadcast %594 : vector<1x512xf32> to vector<8x512xf32>
    %597 = arith.mulf %595, %596 : vector<8x512xf32>
    %c152 = arith.constant 152 : index
    %c0_240 = arith.constant 0 : index
    %598 = vector.load %arg21[%c152, %c0_240] : memref<432x512xf32, #tpu.memory_space<vmem>>, vector<8x512xf32>
    tpu.vector_store %arg21[%c152, %c0_240], %597 {strides = array<i32>} : memref<432x512xf32, #tpu.memory_space<vmem>>, vector<8x512xf32>,
    %599 = arith.andi %384, %393 : vector<1x512xi1>
    %600 = arith.andi %599, %438 : vector<1x512xi1>
    %601 = arith.extui %600 : vector<1x512xi1> to vector<1x512xi32>
    %602 = arith.sitofp %601 : vector<1x512xi32> to vector<1x512xf32>
    %c0_241 = arith.constant 0 : index
    %c130_242 = arith.constant 130 : index
    %603 = vector.load %arg20[%c0_241, %c130_242] : memref<16x658xf32, #tpu.memory_space<vmem>>, vector<8x512xf32>
    %604 = vector.broadcast %602 : vector<1x512xf32> to vector<8x512xf32>
    %605 = arith.mulf %603, %604 : vector<8x512xf32>
    %c160 = arith.constant 160 : index
    %c0_243 = arith.constant 0 : index
    %606 = vector.load %arg21[%c160, %c0_243] : memref<432x512xf32, #tpu.memory_space<vmem>>, vector<8x512xf32>
    tpu.vector_store %arg21[%c160, %c0_243], %605 {strides = array<i32>} : memref<432x512xf32, #tpu.memory_space<vmem>>, vector<8x512xf32>,
    %607 = arith.andi %384, %402 : vector<1x512xi1>
    %608 = arith.andi %607, %420 : vector<1x512xi1>
    %609 = arith.extui %608 : vector<1x512xi1> to vector<1x512xi32>
    %610 = arith.sitofp %609 : vector<1x512xi32> to vector<1x512xf32>
    %c0_244 = arith.constant 0 : index
    %c136_245 = arith.constant 136 : index
    %611 = vector.load %arg20[%c0_244, %c136_245] : memref<16x658xf32, #tpu.memory_space<vmem>>, vector<8x512xf32>
    %612 = vector.broadcast %610 : vector<1x512xf32> to vector<8x512xf32>
    %613 = arith.mulf %611, %612 : vector<8x512xf32>
    %c168 = arith.constant 168 : index
    %c0_246 = arith.constant 0 : index
    %614 = vector.load %arg21[%c168, %c0_246] : memref<432x512xf32, #tpu.memory_space<vmem>>, vector<8x512xf32>
    tpu.vector_store %arg21[%c168, %c0_246], %613 {strides = array<i32>} : memref<432x512xf32, #tpu.memory_space<vmem>>, vector<8x512xf32>,
    %615 = arith.andi %384, %402 : vector<1x512xi1>
    %616 = arith.andi %615, %429 : vector<1x512xi1>
    %617 = arith.extui %616 : vector<1x512xi1> to vector<1x512xi32>
    %618 = arith.sitofp %617 : vector<1x512xi32> to vector<1x512xf32>
    %c0_247 = arith.constant 0 : index
    %c137_248 = arith.constant 137 : index
    %619 = vector.load %arg20[%c0_247, %c137_248] : memref<16x658xf32, #tpu.memory_space<vmem>>, vector<8x512xf32>
    %620 = vector.broadcast %618 : vector<1x512xf32> to vector<8x512xf32>
    %621 = arith.mulf %619, %620 : vector<8x512xf32>
    %c176 = arith.constant 176 : index
    %c0_249 = arith.constant 0 : index
    %622 = vector.load %arg21[%c176, %c0_249] : memref<432x512xf32, #tpu.memory_space<vmem>>, vector<8x512xf32>
    tpu.vector_store %arg21[%c176, %c0_249], %621 {strides = array<i32>} : memref<432x512xf32, #tpu.memory_space<vmem>>, vector<8x512xf32>,
    %623 = arith.andi %384, %402 : vector<1x512xi1>
    %624 = arith.andi %623, %438 : vector<1x512xi1>
    %625 = arith.extui %624 : vector<1x512xi1> to vector<1x512xi32>
    %626 = arith.sitofp %625 : vector<1x512xi32> to vector<1x512xf32>
    %c0_250 = arith.constant 0 : index
    %c138_251 = arith.constant 138 : index
    %627 = vector.load %arg20[%c0_250, %c138_251] : memref<16x658xf32, #tpu.memory_space<vmem>>, vector<8x512xf32>
    %628 = vector.broadcast %626 : vector<1x512xf32> to vector<8x512xf32>
    %629 = arith.mulf %627, %628 : vector<8x512xf32>
    %c184 = arith.constant 184 : index
    %c0_252 = arith.constant 0 : index
    %630 = vector.load %arg21[%c184, %c0_252] : memref<432x512xf32, #tpu.memory_space<vmem>>, vector<8x512xf32>
    tpu.vector_store %arg21[%c184, %c0_252], %629 {strides = array<i32>} : memref<432x512xf32, #tpu.memory_space<vmem>>, vector<8x512xf32>,
    %631 = arith.andi %384, %411 : vector<1x512xi1>
    %632 = arith.andi %631, %420 : vector<1x512xi1>
    %633 = arith.extui %632 : vector<1x512xi1> to vector<1x512xi32>
    %634 = arith.sitofp %633 : vector<1x512xi32> to vector<1x512xf32>
    %c0_253 = arith.constant 0 : index
    %c144_254 = arith.constant 144 : index
    %635 = vector.load %arg20[%c0_253, %c144_254] : memref<16x658xf32, #tpu.memory_space<vmem>>, vector<8x512xf32>
    %636 = vector.broadcast %634 : vector<1x512xf32> to vector<8x512xf32>
    %637 = arith.mulf %635, %636 : vector<8x512xf32>
    %c192 = arith.constant 192 : index
    %c0_255 = arith.constant 0 : index
    %638 = vector.load %arg21[%c192, %c0_255] : memref<432x512xf32, #tpu.memory_space<vmem>>, vector<8x512xf32>
    tpu.vector_store %arg21[%c192, %c0_255], %637 {strides = array<i32>} : memref<432x512xf32, #tpu.memory_space<vmem>>, vector<8x512xf32>,
    %639 = arith.andi %384, %411 : vector<1x512xi1>
    %640 = arith.andi %639, %429 : vector<1x512xi1>
    %641 = arith.extui %640 : vector<1x512xi1> to vector<1x512xi32>
    %642 = arith.sitofp %641 : vector<1x512xi32> to vector<1x512xf32>
    %c0_256 = arith.constant 0 : index
    %c145_257 = arith.constant 145 : index
    %643 = vector.load %arg20[%c0_256, %c145_257] : memref<16x658xf32, #tpu.memory_space<vmem>>, vector<8x512xf32>
    %644 = vector.broadcast %642 : vector<1x512xf32> to vector<8x512xf32>
    %645 = arith.mulf %643, %644 : vector<8x512xf32>
    %c200 = arith.constant 200 : index
    %c0_258 = arith.constant 0 : index
    %646 = vector.load %arg21[%c200, %c0_258] : memref<432x512xf32, #tpu.memory_space<vmem>>, vector<8x512xf32>
    tpu.vector_store %arg21[%c200, %c0_258], %645 {strides = array<i32>} : memref<432x512xf32, #tpu.memory_space<vmem>>, vector<8x512xf32>,
    %647 = arith.andi %384, %411 : vector<1x512xi1>
    %648 = arith.andi %647, %438 : vector<1x512xi1>
    %649 = arith.extui %648 : vector<1x512xi1> to vector<1x512xi32>
    %650 = arith.sitofp %649 : vector<1x512xi32> to vector<1x512xf32>
    %c0_259 = arith.constant 0 : index
    %c146_260 = arith.constant 146 : index
    %651 = vector.load %arg20[%c0_259, %c146_260] : memref<16x658xf32, #tpu.memory_space<vmem>>, vector<8x512xf32>
    %652 = vector.broadcast %650 : vector<1x512xf32> to vector<8x512xf32>
    %653 = arith.mulf %651, %652 : vector<8x512xf32>
    %c208 = arith.constant 208 : index
    %c0_261 = arith.constant 0 : index
    %654 = vector.load %arg21[%c208, %c0_261] : memref<432x512xf32, #tpu.memory_space<vmem>>, vector<8x512xf32>
    tpu.vector_store %arg21[%c208, %c0_261], %653 {strides = array<i32>} : memref<432x512xf32, #tpu.memory_space<vmem>>, vector<8x512xf32>,
    %c0_262 = arith.constant 0 : index
    %c0_263 = arith.constant 0 : index
    %655 = vector.load %arg6[%c0_262, %c0_263] : memref<8x216xf32, #tpu.memory_space<vmem>>, vector<8x216xf32>
    %c0_264 = arith.constant 0 : index
    %c0_265 = arith.constant 0 : index
    %656 = vector.load %arg21[%c0_264, %c0_265] : memref<432x512xf32, #tpu.memory_space<vmem>>, vector<216x512xf32>
    %cst_266 = arith.constant dense<0.000000e+00> : vector<8x512xf32>
    %657 = tpu.matmul %655, %656, %cst_266 {dimension_numbers = #tpu.dot_dimension_numbers<[1], [0], [0], [1], [0, 0, 1, 1], [], []>} : vector<8x216xf32>, vector<216x512xf32>, vector<8x512xf32> -> vector<8x512xf32>
    %c0_267 = arith.constant 0 : index
    %c0_268 = arith.constant 0 : index
    %658 = vector.load %arg7[%c0_267, %c0_268] : memref<8x1xf32, #tpu.memory_space<vmem>>, vector<8x1xf32>
    %659 = vector.broadcast %658 : vector<8x1xf32> to vector<8x512xf32>
    %660 = arith.addf %657, %659 : vector<8x512xf32>
    %cst_269 = arith.constant dense<0.000000e+00> : vector<8xf32>
    %661 = vector.multi_reduction <add>, %660, %cst_269 [1] : vector<8x512xf32> to vector<8xf32>
    %662 = vector.shape_cast %661 : vector<8xf32> to vector<8x1xf32>
    %cst_270 = arith.constant 5.120000e+02 : f32
    %663 = vector.broadcast %cst_270 : f32 to vector<8x1xf32>
    %664 = arith.divf %662, %663 : vector<8x1xf32>
    %665 = vector.broadcast %664 : vector<8x1xf32> to vector<8x512xf32>
    %666 = arith.subf %660, %665 : vector<8x512xf32>
    %667 = arith.mulf %666, %666 : vector<8x512xf32>
    %cst_271 = arith.constant dense<0.000000e+00> : vector<8xf32>
    %668 = vector.multi_reduction <add>, %667, %cst_271 [1] : vector<8x512xf32> to vector<8xf32>
    %669 = vector.shape_cast %668 : vector<8xf32> to vector<8x1xf32>
    %cst_272 = arith.constant 5.120000e+02 : f32
    %670 = vector.broadcast %cst_272 : f32 to vector<8x1xf32>
    %671 = arith.divf %669, %670 : vector<8x1xf32>
    %672 = vector.broadcast %664 : vector<8x1xf32> to vector<8x512xf32>
    %673 = arith.subf %660, %672 : vector<8x512xf32>
    %cst_273 = arith.constant 9.99999974E-6 : f32
    %674 = vector.broadcast %cst_273 : f32 to vector<8x1xf32>
    %675 = arith.addf %671, %674 : vector<8x1xf32>
    %676 = math.rsqrt %675 : vector<8x1xf32>
    %677 = vector.broadcast %676 : vector<8x1xf32> to vector<8x512xf32>
    %678 = arith.mulf %673, %677 : vector<8x512xf32>
    %c0_274 = arith.constant 0 : index
    %c0_275 = arith.constant 0 : index
    %679 = vector.load %arg8[%c0_274, %c0_275] : memref<8x1xf32, #tpu.memory_space<vmem>>, vector<8x1xf32>
    %680 = vector.broadcast %679 : vector<8x1xf32> to vector<8x512xf32>
    %681 = arith.mulf %678, %680 : vector<8x512xf32>
    %c0_276 = arith.constant 0 : index
    %c0_277 = arith.constant 0 : index
    %682 = vector.load %arg9[%c0_276, %c0_277] : memref<8x1xf32, #tpu.memory_space<vmem>>, vector<8x1xf32>
    %683 = vector.broadcast %682 : vector<8x1xf32> to vector<8x512xf32>
    %684 = arith.addf %681, %683 : vector<8x512xf32>
    %cst_278 = arith.constant 0.000000e+00 : f32
    %685 = vector.broadcast %cst_278 : f32 to vector<8x512xf32>
    %686 = arith.cmpf oge, %684, %685 : vector<8x512xf32>
    %cst_279 = arith.constant 0.00999999977 : f32
    %687 = vector.broadcast %cst_279 : f32 to vector<8x512xf32>
    %688 = arith.mulf %687, %684 : vector<8x512xf32>
    %689 = arith.select %686, %684, %688 : vector<8x512xi1>, vector<8x512xf32>
    %c0_280 = arith.constant 0 : index
    %c0_281 = arith.constant 0 : index
    %c0_282 = arith.constant 0 : index
    %690 = vector.load %arg17[%c0_280, %c0_281, %c0_282] : memref<1x8x512xf32, #tpu.memory_space<vmem>>, vector<1x8x512xf32>
    %691 = vector.shape_cast %690 : vector<1x8x512xf32> to vector<8x512xf32>
    %692 = vector.shape_cast %689 : vector<8x512xf32> to vector<1x8x512xf32>
    tpu.vector_store %arg17[%c0_280, %c0_281, %c0_282], %692 {strides = array<i32>} : memref<1x8x512xf32, #tpu.memory_space<vmem>>, vector<1x8x512xf32>,
    %c0_283 = arith.constant 0 : index
    %c0_284 = arith.constant 0 : index
    %693 = vector.load %arg10[%c0_283, %c0_284] : memref<512x512xf32, #tpu.memory_space<vmem>>, vector<512x512xf32>
    %cst_285 = arith.constant dense<0.000000e+00> : vector<8x512xf32>
    %694 = tpu.matmul %689, %693, %cst_285 {dimension_numbers = #tpu.dot_dimension_numbers<[1], [0], [0], [1], [0, 0, 1, 1], [], []>} : vector<8x512xf32>, vector<512x512xf32>, vector<8x512xf32> -> vector<8x512xf32>
    %695 = vector.extract_strided_slice %694 {offsets = [0, 0], sizes = [8, 64], strides = [1, 1]} : vector<8x512xf32> to vector<8x64xf32>
    %c0_286 = arith.constant 0 : index
    %c0_287 = arith.constant 0 : index
    %696 = vector.load %arg21[%c0_286, %c0_287] : memref<432x512xf32, #tpu.memory_space<vmem>>, vector<8x64xf32>
    tpu.vector_store %arg21[%c0_286, %c0_287], %695 {strides = array<i32>} : memref<432x512xf32, #tpu.memory_space<vmem>>, vector<8x64xf32>,
    %697 = vector.extract_strided_slice %694 {offsets = [0, 64], sizes = [8, 64], strides = [1, 1]} : vector<8x512xf32> to vector<8x64xf32>
    %c8_288 = arith.constant 8 : index
    %c0_289 = arith.constant 0 : index
    %698 = vector.load %arg21[%c8_288, %c0_289] : memref<432x512xf32, #tpu.memory_space<vmem>>, vector<8x64xf32>
    tpu.vector_store %arg21[%c8_288, %c0_289], %697 {strides = array<i32>} : memref<432x512xf32, #tpu.memory_space<vmem>>, vector<8x64xf32>,
    %699 = vector.extract_strided_slice %694 {offsets = [0, 128], sizes = [8, 64], strides = [1, 1]} : vector<8x512xf32> to vector<8x64xf32>
    %c16_290 = arith.constant 16 : index
    %c0_291 = arith.constant 0 : index
    %700 = vector.load %arg21[%c16_290, %c0_291] : memref<432x512xf32, #tpu.memory_space<vmem>>, vector<8x64xf32>
    tpu.vector_store %arg21[%c16_290, %c0_291], %699 {strides = array<i32>} : memref<432x512xf32, #tpu.memory_space<vmem>>, vector<8x64xf32>,
    %701 = vector.extract_strided_slice %694 {offsets = [0, 192], sizes = [8, 64], strides = [1, 1]} : vector<8x512xf32> to vector<8x64xf32>
    %c24_292 = arith.constant 24 : index
    %c0_293 = arith.constant 0 : index
    %702 = vector.load %arg21[%c24_292, %c0_293] : memref<432x512xf32, #tpu.memory_space<vmem>>, vector<8x64xf32>
    tpu.vector_store %arg21[%c24_292, %c0_293], %701 {strides = array<i32>} : memref<432x512xf32, #tpu.memory_space<vmem>>, vector<8x64xf32>,
    %703 = vector.extract_strided_slice %694 {offsets = [0, 256], sizes = [8, 64], strides = [1, 1]} : vector<8x512xf32> to vector<8x64xf32>
    %c32_294 = arith.constant 32 : index
    %c0_295 = arith.constant 0 : index
    %704 = vector.load %arg21[%c32_294, %c0_295] : memref<432x512xf32, #tpu.memory_space<vmem>>, vector<8x64xf32>
    tpu.vector_store %arg21[%c32_294, %c0_295], %703 {strides = array<i32>} : memref<432x512xf32, #tpu.memory_space<vmem>>, vector<8x64xf32>,
    %705 = vector.extract_strided_slice %694 {offsets = [0, 320], sizes = [8, 64], strides = [1, 1]} : vector<8x512xf32> to vector<8x64xf32>
    %c40_296 = arith.constant 40 : index
    %c0_297 = arith.constant 0 : index
    %706 = vector.load %arg21[%c40_296, %c0_297] : memref<432x512xf32, #tpu.memory_space<vmem>>, vector<8x64xf32>
    tpu.vector_store %arg21[%c40_296, %c0_297], %705 {strides = array<i32>} : memref<432x512xf32, #tpu.memory_space<vmem>>, vector<8x64xf32>,
    %707 = vector.extract_strided_slice %694 {offsets = [0, 384], sizes = [8, 64], strides = [1, 1]} : vector<8x512xf32> to vector<8x64xf32>
    %c48_298 = arith.constant 48 : index
    %c0_299 = arith.constant 0 : index
    %708 = vector.load %arg21[%c48_298, %c0_299] : memref<432x512xf32, #tpu.memory_space<vmem>>, vector<8x64xf32>
    tpu.vector_store %arg21[%c48_298, %c0_299], %707 {strides = array<i32>} : memref<432x512xf32, #tpu.memory_space<vmem>>, vector<8x64xf32>,
    %709 = vector.extract_strided_slice %694 {offsets = [0, 448], sizes = [8, 64], strides = [1, 1]} : vector<8x512xf32> to vector<8x64xf32>
    %c56_300 = arith.constant 56 : index
    %c0_301 = arith.constant 0 : index
    %710 = vector.load %arg21[%c56_300, %c0_301] : memref<432x512xf32, #tpu.memory_space<vmem>>, vector<8x64xf32>
    tpu.vector_store %arg21[%c56_300, %c0_301], %709 {strides = array<i32>} : memref<432x512xf32, #tpu.memory_space<vmem>>, vector<8x64xf32>,
    %c0_302 = arith.constant 0 : index
    %c0_303 = arith.constant 0 : index
    %711 = vector.load %arg11[%c0_302, %c0_303] : memref<16x64xf32, #tpu.memory_space<vmem>>, vector<16x64xf32>
    %c0_304 = arith.constant 0 : index
    %c0_305 = arith.constant 0 : index
    %712 = vector.load %arg21[%c0_304, %c0_305] : memref<432x512xf32, #tpu.memory_space<vmem>>, vector<64x64xf32>
    %cst_306 = arith.constant dense<0.000000e+00> : vector<16x64xf32>
    %713 = tpu.matmul %711, %712, %cst_306 {dimension_numbers = #tpu.dot_dimension_numbers<[1], [0], [0], [1], [0, 0, 1, 1], [], []>} : vector<16x64xf32>, vector<64x64xf32>, vector<16x64xf32> -> vector<16x64xf32>
    %c0_307 = arith.constant 0 : index
    %c0_308 = arith.constant 0 : index
    %714 = vector.load %arg12[%c0_307, %c0_308] : memref<16x1xf32, #tpu.memory_space<vmem>>, vector<16x1xf32>
    %715 = vector.broadcast %714 : vector<16x1xf32> to vector<16x64xf32>
    %716 = arith.addf %713, %715 : vector<16x64xf32>
    %cst_309 = arith.constant 0.000000e+00 : f32
    %717 = vector.broadcast %cst_309 : f32 to vector<16x106xf32>
    %c0_310 = arith.constant 0 : index
    %c0_311 = arith.constant 0 : index
    %718 = vector.load %arg20[%c0_310, %c0_311] : memref<16x658xf32, #tpu.memory_space<vmem>>, vector<16x106xf32>
    tpu.vector_store %arg20[%c0_310, %c0_311], %717 {strides = array<i32>} : memref<16x658xf32, #tpu.memory_space<vmem>>, vector<16x106xf32>,
    %c0_312 = arith.constant 0 : index
    %c21 = arith.constant 21 : index
    %719 = vector.load %arg20[%c0_312, %c21] : memref<16x658xf32, #tpu.memory_space<vmem>>, vector<16x64xf32>
    tpu.vector_store %arg20[%c0_312, %c21], %716 {strides = array<i32>} : memref<16x658xf32, #tpu.memory_space<vmem>>, vector<16x64xf32>,
    %720 = tpu.iota {dimensions = array<i32: 1>} : vector<1x64xi32>
    %c3_i32_313 = arith.constant 3 : i32
    %721 = vector.broadcast %c3_i32_313 : i32 to vector<1x64xi32>
    %722 = arith.andi %720, %721 : vector<1x64xi32>
    %c2_i32 = arith.constant 2 : i32
    %723 = vector.broadcast %c2_i32 : i32 to vector<1x64xi32>
    %724 = arith.shrsi %720, %723 : vector<1x64xi32>
    %c3_i32_314 = arith.constant 3 : i32
    %725 = vector.broadcast %c3_i32_314 : i32 to vector<1x64xi32>
    %726 = arith.andi %724, %725 : vector<1x64xi32>
    %c4_i32 = arith.constant 4 : i32
    %727 = vector.broadcast %c4_i32 : i32 to vector<1x64xi32>
    %728 = arith.shrsi %720, %727 : vector<1x64xi32>
    %c-1_i32_315 = arith.constant -1 : i32
    %729 = vector.broadcast %c-1_i32_315 : i32 to vector<1x64xi32>
    %730 = arith.addi %728, %729 : vector<1x64xi32>
    %c0_i32_316 = arith.constant 0 : i32
    %731 = vector.broadcast %c0_i32_316 : i32 to vector<1x64xi32>
    %732 = arith.cmpi sge, %730, %731 : vector<1x64xi32>
    %c-1_i32_317 = arith.constant -1 : i32
    %733 = vector.broadcast %c-1_i32_317 : i32 to vector<1x64xi32>
    %734 = arith.addi %728, %733 : vector<1x64xi32>
    %c3_i32_318 = arith.constant 3 : i32
    %735 = vector.broadcast %c3_i32_318 : i32 to vector<1x64xi32>
    %736 = arith.cmpi sle, %734, %735 : vector<1x64xi32>
    %737 = arith.andi %732, %736 : vector<1x64xi1>
    %c0_i32_319 = arith.constant 0 : i32
    %738 = vector.broadcast %c0_i32_319 : i32 to vector<1x64xi32>
    %739 = arith.addi %728, %738 : vector<1x64xi32>
    %c0_i32_320 = arith.constant 0 : i32
    %740 = vector.broadcast %c0_i32_320 : i32 to vector<1x64xi32>
    %741 = arith.cmpi sge, %739, %740 : vector<1x64xi32>
    %c0_i32_321 = arith.constant 0 : i32
    %742 = vector.broadcast %c0_i32_321 : i32 to vector<1x64xi32>
    %743 = arith.addi %728, %742 : vector<1x64xi32>
    %c3_i32_322 = arith.constant 3 : i32
    %744 = vector.broadcast %c3_i32_322 : i32 to vector<1x64xi32>
    %745 = arith.cmpi sle, %743, %744 : vector<1x64xi32>
    %746 = arith.andi %741, %745 : vector<1x64xi1>
    %c1_i32_323 = arith.constant 1 : i32
    %747 = vector.broadcast %c1_i32_323 : i32 to vector<1x64xi32>
    %748 = arith.addi %728, %747 : vector<1x64xi32>
    %c0_i32_324 = arith.constant 0 : i32
    %749 = vector.broadcast %c0_i32_324 : i32 to vector<1x64xi32>
    %750 = arith.cmpi sge, %748, %749 : vector<1x64xi32>
    %c1_i32_325 = arith.constant 1 : i32
    %751 = vector.broadcast %c1_i32_325 : i32 to vector<1x64xi32>
    %752 = arith.addi %728, %751 : vector<1x64xi32>
    %c3_i32_326 = arith.constant 3 : i32
    %753 = vector.broadcast %c3_i32_326 : i32 to vector<1x64xi32>
    %754 = arith.cmpi sle, %752, %753 : vector<1x64xi32>
    %755 = arith.andi %750, %754 : vector<1x64xi1>
    %c-1_i32_327 = arith.constant -1 : i32
    %756 = vector.broadcast %c-1_i32_327 : i32 to vector<1x64xi32>
    %757 = arith.addi %726, %756 : vector<1x64xi32>
    %c0_i32_328 = arith.constant 0 : i32
    %758 = vector.broadcast %c0_i32_328 : i32 to vector<1x64xi32>
    %759 = arith.cmpi sge, %757, %758 : vector<1x64xi32>
    %c-1_i32_329 = arith.constant -1 : i32
    %760 = vector.broadcast %c-1_i32_329 : i32 to vector<1x64xi32>
    %761 = arith.addi %726, %760 : vector<1x64xi32>
    %c3_i32_330 = arith.constant 3 : i32
    %762 = vector.broadcast %c3_i32_330 : i32 to vector<1x64xi32>
    %763 = arith.cmpi sle, %761, %762 : vector<1x64xi32>
    %764 = arith.andi %759, %763 : vector<1x64xi1>
    %c0_i32_331 = arith.constant 0 : i32
    %765 = vector.broadcast %c0_i32_331 : i32 to vector<1x64xi32>
    %766 = arith.addi %726, %765 : vector<1x64xi32>
    %c0_i32_332 = arith.constant 0 : i32
    %767 = vector.broadcast %c0_i32_332 : i32 to vector<1x64xi32>
    %768 = arith.cmpi sge, %766, %767 : vector<1x64xi32>
    %c0_i32_333 = arith.constant 0 : i32
    %769 = vector.broadcast %c0_i32_333 : i32 to vector<1x64xi32>
    %770 = arith.addi %726, %769 : vector<1x64xi32>
    %c3_i32_334 = arith.constant 3 : i32
    %771 = vector.broadcast %c3_i32_334 : i32 to vector<1x64xi32>
    %772 = arith.cmpi sle, %770, %771 : vector<1x64xi32>
    %773 = arith.andi %768, %772 : vector<1x64xi1>
    %c1_i32_335 = arith.constant 1 : i32
    %774 = vector.broadcast %c1_i32_335 : i32 to vector<1x64xi32>
    %775 = arith.addi %726, %774 : vector<1x64xi32>
    %c0_i32_336 = arith.constant 0 : i32
    %776 = vector.broadcast %c0_i32_336 : i32 to vector<1x64xi32>
    %777 = arith.cmpi sge, %775, %776 : vector<1x64xi32>
    %c1_i32_337 = arith.constant 1 : i32
    %778 = vector.broadcast %c1_i32_337 : i32 to vector<1x64xi32>
    %779 = arith.addi %726, %778 : vector<1x64xi32>
    %c3_i32_338 = arith.constant 3 : i32
    %780 = vector.broadcast %c3_i32_338 : i32 to vector<1x64xi32>
    %781 = arith.cmpi sle, %779, %780 : vector<1x64xi32>
    %782 = arith.andi %777, %781 : vector<1x64xi1>
    %c-1_i32_339 = arith.constant -1 : i32
    %783 = vector.broadcast %c-1_i32_339 : i32 to vector<1x64xi32>
    %784 = arith.addi %722, %783 : vector<1x64xi32>
    %c0_i32_340 = arith.constant 0 : i32
    %785 = vector.broadcast %c0_i32_340 : i32 to vector<1x64xi32>
    %786 = arith.cmpi sge, %784, %785 : vector<1x64xi32>
    %c-1_i32_341 = arith.constant -1 : i32
    %787 = vector.broadcast %c-1_i32_341 : i32 to vector<1x64xi32>
    %788 = arith.addi %722, %787 : vector<1x64xi32>
    %c3_i32_342 = arith.constant 3 : i32
    %789 = vector.broadcast %c3_i32_342 : i32 to vector<1x64xi32>
    %790 = arith.cmpi sle, %788, %789 : vector<1x64xi32>
    %791 = arith.andi %786, %790 : vector<1x64xi1>
    %c0_i32_343 = arith.constant 0 : i32
    %792 = vector.broadcast %c0_i32_343 : i32 to vector<1x64xi32>
    %793 = arith.addi %722, %792 : vector<1x64xi32>
    %c0_i32_344 = arith.constant 0 : i32
    %794 = vector.broadcast %c0_i32_344 : i32 to vector<1x64xi32>
    %795 = arith.cmpi sge, %793, %794 : vector<1x64xi32>
    %c0_i32_345 = arith.constant 0 : i32
    %796 = vector.broadcast %c0_i32_345 : i32 to vector<1x64xi32>
    %797 = arith.addi %722, %796 : vector<1x64xi32>
    %c3_i32_346 = arith.constant 3 : i32
    %798 = vector.broadcast %c3_i32_346 : i32 to vector<1x64xi32>
    %799 = arith.cmpi sle, %797, %798 : vector<1x64xi32>
    %800 = arith.andi %795, %799 : vector<1x64xi1>
    %c1_i32_347 = arith.constant 1 : i32
    %801 = vector.broadcast %c1_i32_347 : i32 to vector<1x64xi32>
    %802 = arith.addi %722, %801 : vector<1x64xi32>
    %c0_i32_348 = arith.constant 0 : i32
    %803 = vector.broadcast %c0_i32_348 : i32 to vector<1x64xi32>
    %804 = arith.cmpi sge, %802, %803 : vector<1x64xi32>
    %c1_i32_349 = arith.constant 1 : i32
    %805 = vector.broadcast %c1_i32_349 : i32 to vector<1x64xi32>
    %806 = arith.addi %722, %805 : vector<1x64xi32>
    %c3_i32_350 = arith.constant 3 : i32
    %807 = vector.broadcast %c3_i32_350 : i32 to vector<1x64xi32>
    %808 = arith.cmpi sle, %806, %807 : vector<1x64xi32>
    %809 = arith.andi %804, %808 : vector<1x64xi1>
    %810 = arith.andi %737, %764 : vector<1x64xi1>
    %811 = arith.andi %810, %791 : vector<1x64xi1>
    %812 = arith.extui %811 : vector<1x64xi1> to vector<1x64xi32>
    %813 = arith.sitofp %812 : vector<1x64xi32> to vector<1x64xf32>
    %c0_351 = arith.constant 0 : index
    %c0_352 = arith.constant 0 : index
    %814 = vector.load %arg20[%c0_351, %c0_352] : memref<16x658xf32, #tpu.memory_space<vmem>>, vector<16x64xf32>
    %815 = vector.broadcast %813 : vector<1x64xf32> to vector<16x64xf32>
    %816 = arith.mulf %814, %815 : vector<16x64xf32>
    %c0_353 = arith.constant 0 : index
    %c0_354 = arith.constant 0 : index
    %817 = vector.load %arg21[%c0_353, %c0_354] : memref<432x512xf32, #tpu.memory_space<vmem>>, vector<16x64xf32>
    tpu.vector_store %arg21[%c0_353, %c0_354], %816 {strides = array<i32>} : memref<432x512xf32, #tpu.memory_space<vmem>>, vector<16x64xf32>,
    %818 = arith.andi %737, %764 : vector<1x64xi1>
    %819 = arith.andi %818, %800 : vector<1x64xi1>
    %820 = arith.extui %819 : vector<1x64xi1> to vector<1x64xi32>
    %821 = arith.sitofp %820 : vector<1x64xi32> to vector<1x64xf32>
    %c0_355 = arith.constant 0 : index
    %c1_356 = arith.constant 1 : index
    %822 = vector.load %arg20[%c0_355, %c1_356] : memref<16x658xf32, #tpu.memory_space<vmem>>, vector<16x64xf32>
    %823 = vector.broadcast %821 : vector<1x64xf32> to vector<16x64xf32>
    %824 = arith.mulf %822, %823 : vector<16x64xf32>
    %c16_357 = arith.constant 16 : index
    %c0_358 = arith.constant 0 : index
    %825 = vector.load %arg21[%c16_357, %c0_358] : memref<432x512xf32, #tpu.memory_space<vmem>>, vector<16x64xf32>
    tpu.vector_store %arg21[%c16_357, %c0_358], %824 {strides = array<i32>} : memref<432x512xf32, #tpu.memory_space<vmem>>, vector<16x64xf32>,
    %826 = arith.andi %737, %764 : vector<1x64xi1>
    %827 = arith.andi %826, %809 : vector<1x64xi1>
    %828 = arith.extui %827 : vector<1x64xi1> to vector<1x64xi32>
    %829 = arith.sitofp %828 : vector<1x64xi32> to vector<1x64xf32>
    %c0_359 = arith.constant 0 : index
    %c2_360 = arith.constant 2 : index
    %830 = vector.load %arg20[%c0_359, %c2_360] : memref<16x658xf32, #tpu.memory_space<vmem>>, vector<16x64xf32>
    %831 = vector.broadcast %829 : vector<1x64xf32> to vector<16x64xf32>
    %832 = arith.mulf %830, %831 : vector<16x64xf32>
    %c32_361 = arith.constant 32 : index
    %c0_362 = arith.constant 0 : index
    %833 = vector.load %arg21[%c32_361, %c0_362] : memref<432x512xf32, #tpu.memory_space<vmem>>, vector<16x64xf32>
    tpu.vector_store %arg21[%c32_361, %c0_362], %832 {strides = array<i32>} : memref<432x512xf32, #tpu.memory_space<vmem>>, vector<16x64xf32>,
    %834 = arith.andi %737, %773 : vector<1x64xi1>
    %835 = arith.andi %834, %791 : vector<1x64xi1>
    %836 = arith.extui %835 : vector<1x64xi1> to vector<1x64xi32>
    %837 = arith.sitofp %836 : vector<1x64xi32> to vector<1x64xf32>
    %c0_363 = arith.constant 0 : index
    %c4_364 = arith.constant 4 : index
    %838 = vector.load %arg20[%c0_363, %c4_364] : memref<16x658xf32, #tpu.memory_space<vmem>>, vector<16x64xf32>
    %839 = vector.broadcast %837 : vector<1x64xf32> to vector<16x64xf32>
    %840 = arith.mulf %838, %839 : vector<16x64xf32>
    %c48_365 = arith.constant 48 : index
    %c0_366 = arith.constant 0 : index
    %841 = vector.load %arg21[%c48_365, %c0_366] : memref<432x512xf32, #tpu.memory_space<vmem>>, vector<16x64xf32>
    tpu.vector_store %arg21[%c48_365, %c0_366], %840 {strides = array<i32>} : memref<432x512xf32, #tpu.memory_space<vmem>>, vector<16x64xf32>,
    %842 = arith.andi %737, %773 : vector<1x64xi1>
    %843 = arith.andi %842, %800 : vector<1x64xi1>
    %844 = arith.extui %843 : vector<1x64xi1> to vector<1x64xi32>
    %845 = arith.sitofp %844 : vector<1x64xi32> to vector<1x64xf32>
    %c0_367 = arith.constant 0 : index
    %c5 = arith.constant 5 : index
    %846 = vector.load %arg20[%c0_367, %c5] : memref<16x658xf32, #tpu.memory_space<vmem>>, vector<16x64xf32>
    %847 = vector.broadcast %845 : vector<1x64xf32> to vector<16x64xf32>
    %848 = arith.mulf %846, %847 : vector<16x64xf32>
    %c64_368 = arith.constant 64 : index
    %c0_369 = arith.constant 0 : index
    %849 = vector.load %arg21[%c64_368, %c0_369] : memref<432x512xf32, #tpu.memory_space<vmem>>, vector<16x64xf32>
    tpu.vector_store %arg21[%c64_368, %c0_369], %848 {strides = array<i32>} : memref<432x512xf32, #tpu.memory_space<vmem>>, vector<16x64xf32>,
    %850 = arith.andi %737, %773 : vector<1x64xi1>
    %851 = arith.andi %850, %809 : vector<1x64xi1>
    %852 = arith.extui %851 : vector<1x64xi1> to vector<1x64xi32>
    %853 = arith.sitofp %852 : vector<1x64xi32> to vector<1x64xf32>
    %c0_370 = arith.constant 0 : index
    %c6 = arith.constant 6 : index
    %854 = vector.load %arg20[%c0_370, %c6] : memref<16x658xf32, #tpu.memory_space<vmem>>, vector<16x64xf32>
    %855 = vector.broadcast %853 : vector<1x64xf32> to vector<16x64xf32>
    %856 = arith.mulf %854, %855 : vector<16x64xf32>
    %c80_371 = arith.constant 80 : index
    %c0_372 = arith.constant 0 : index
    %857 = vector.load %arg21[%c80_371, %c0_372] : memref<432x512xf32, #tpu.memory_space<vmem>>, vector<16x64xf32>
    tpu.vector_store %arg21[%c80_371, %c0_372], %856 {strides = array<i32>} : memref<432x512xf32, #tpu.memory_space<vmem>>, vector<16x64xf32>,
    %858 = arith.andi %737, %782 : vector<1x64xi1>
    %859 = arith.andi %858, %791 : vector<1x64xi1>
    %860 = arith.extui %859 : vector<1x64xi1> to vector<1x64xi32>
    %861 = arith.sitofp %860 : vector<1x64xi32> to vector<1x64xf32>
    %c0_373 = arith.constant 0 : index
    %c8_374 = arith.constant 8 : index
    %862 = vector.load %arg20[%c0_373, %c8_374] : memref<16x658xf32, #tpu.memory_space<vmem>>, vector<16x64xf32>
    %863 = vector.broadcast %861 : vector<1x64xf32> to vector<16x64xf32>
    %864 = arith.mulf %862, %863 : vector<16x64xf32>
    %c96_375 = arith.constant 96 : index
    %c0_376 = arith.constant 0 : index
    %865 = vector.load %arg21[%c96_375, %c0_376] : memref<432x512xf32, #tpu.memory_space<vmem>>, vector<16x64xf32>
    tpu.vector_store %arg21[%c96_375, %c0_376], %864 {strides = array<i32>} : memref<432x512xf32, #tpu.memory_space<vmem>>, vector<16x64xf32>,
    %866 = arith.andi %737, %782 : vector<1x64xi1>
    %867 = arith.andi %866, %800 : vector<1x64xi1>
    %868 = arith.extui %867 : vector<1x64xi1> to vector<1x64xi32>
    %869 = arith.sitofp %868 : vector<1x64xi32> to vector<1x64xf32>
    %c0_377 = arith.constant 0 : index
    %c9_378 = arith.constant 9 : index
    %870 = vector.load %arg20[%c0_377, %c9_378] : memref<16x658xf32, #tpu.memory_space<vmem>>, vector<16x64xf32>
    %871 = vector.broadcast %869 : vector<1x64xf32> to vector<16x64xf32>
    %872 = arith.mulf %870, %871 : vector<16x64xf32>
    %c112_379 = arith.constant 112 : index
    %c0_380 = arith.constant 0 : index
    %873 = vector.load %arg21[%c112_379, %c0_380] : memref<432x512xf32, #tpu.memory_space<vmem>>, vector<16x64xf32>
    tpu.vector_store %arg21[%c112_379, %c0_380], %872 {strides = array<i32>} : memref<432x512xf32, #tpu.memory_space<vmem>>, vector<16x64xf32>,
    %874 = arith.andi %737, %782 : vector<1x64xi1>
    %875 = arith.andi %874, %809 : vector<1x64xi1>
    %876 = arith.extui %875 : vector<1x64xi1> to vector<1x64xi32>
    %877 = arith.sitofp %876 : vector<1x64xi32> to vector<1x64xf32>
    %c0_381 = arith.constant 0 : index
    %c10_382 = arith.constant 10 : index
    %878 = vector.load %arg20[%c0_381, %c10_382] : memref<16x658xf32, #tpu.memory_space<vmem>>, vector<16x64xf32>
    %879 = vector.broadcast %877 : vector<1x64xf32> to vector<16x64xf32>
    %880 = arith.mulf %878, %879 : vector<16x64xf32>
    %c128_383 = arith.constant 128 : index
    %c0_384 = arith.constant 0 : index
    %881 = vector.load %arg21[%c128_383, %c0_384] : memref<432x512xf32, #tpu.memory_space<vmem>>, vector<16x64xf32>
    tpu.vector_store %arg21[%c128_383, %c0_384], %880 {strides = array<i32>} : memref<432x512xf32, #tpu.memory_space<vmem>>, vector<16x64xf32>,
    %882 = arith.andi %746, %764 : vector<1x64xi1>
    %883 = arith.andi %882, %791 : vector<1x64xi1>
    %884 = arith.extui %883 : vector<1x64xi1> to vector<1x64xi32>
    %885 = arith.sitofp %884 : vector<1x64xi32> to vector<1x64xf32>
    %c0_385 = arith.constant 0 : index
    %c16_386 = arith.constant 16 : index
    %886 = vector.load %arg20[%c0_385, %c16_386] : memref<16x658xf32, #tpu.memory_space<vmem>>, vector<16x64xf32>
    %887 = vector.broadcast %885 : vector<1x64xf32> to vector<16x64xf32>
    %888 = arith.mulf %886, %887 : vector<16x64xf32>
    %c144_387 = arith.constant 144 : index
    %c0_388 = arith.constant 0 : index
    %889 = vector.load %arg21[%c144_387, %c0_388] : memref<432x512xf32, #tpu.memory_space<vmem>>, vector<16x64xf32>
    tpu.vector_store %arg21[%c144_387, %c0_388], %888 {strides = array<i32>} : memref<432x512xf32, #tpu.memory_space<vmem>>, vector<16x64xf32>,
    %890 = arith.andi %746, %764 : vector<1x64xi1>
    %891 = arith.andi %890, %800 : vector<1x64xi1>
    %892 = arith.extui %891 : vector<1x64xi1> to vector<1x64xi32>
    %893 = arith.sitofp %892 : vector<1x64xi32> to vector<1x64xf32>
    %c0_389 = arith.constant 0 : index
    %c17_390 = arith.constant 17 : index
    %894 = vector.load %arg20[%c0_389, %c17_390] : memref<16x658xf32, #tpu.memory_space<vmem>>, vector<16x64xf32>
    %895 = vector.broadcast %893 : vector<1x64xf32> to vector<16x64xf32>
    %896 = arith.mulf %894, %895 : vector<16x64xf32>
    %c160_391 = arith.constant 160 : index
    %c0_392 = arith.constant 0 : index
    %897 = vector.load %arg21[%c160_391, %c0_392] : memref<432x512xf32, #tpu.memory_space<vmem>>, vector<16x64xf32>
    tpu.vector_store %arg21[%c160_391, %c0_392], %896 {strides = array<i32>} : memref<432x512xf32, #tpu.memory_space<vmem>>, vector<16x64xf32>,
    %898 = arith.andi %746, %764 : vector<1x64xi1>
    %899 = arith.andi %898, %809 : vector<1x64xi1>
    %900 = arith.extui %899 : vector<1x64xi1> to vector<1x64xi32>
    %901 = arith.sitofp %900 : vector<1x64xi32> to vector<1x64xf32>
    %c0_393 = arith.constant 0 : index
    %c18_394 = arith.constant 18 : index
    %902 = vector.load %arg20[%c0_393, %c18_394] : memref<16x658xf32, #tpu.memory_space<vmem>>, vector<16x64xf32>
    %903 = vector.broadcast %901 : vector<1x64xf32> to vector<16x64xf32>
    %904 = arith.mulf %902, %903 : vector<16x64xf32>
    %c176_395 = arith.constant 176 : index
    %c0_396 = arith.constant 0 : index
    %905 = vector.load %arg21[%c176_395, %c0_396] : memref<432x512xf32, #tpu.memory_space<vmem>>, vector<16x64xf32>
    tpu.vector_store %arg21[%c176_395, %c0_396], %904 {strides = array<i32>} : memref<432x512xf32, #tpu.memory_space<vmem>>, vector<16x64xf32>,
    %906 = arith.andi %746, %773 : vector<1x64xi1>
    %907 = arith.andi %906, %791 : vector<1x64xi1>
    %908 = arith.extui %907 : vector<1x64xi1> to vector<1x64xi32>
    %909 = arith.sitofp %908 : vector<1x64xi32> to vector<1x64xf32>
    %c0_397 = arith.constant 0 : index
    %c20_398 = arith.constant 20 : index
    %910 = vector.load %arg20[%c0_397, %c20_398] : memref<16x658xf32, #tpu.memory_space<vmem>>, vector<16x64xf32>
    %911 = vector.broadcast %909 : vector<1x64xf32> to vector<16x64xf32>
    %912 = arith.mulf %910, %911 : vector<16x64xf32>
    %c192_399 = arith.constant 192 : index
    %c0_400 = arith.constant 0 : index
    %913 = vector.load %arg21[%c192_399, %c0_400] : memref<432x512xf32, #tpu.memory_space<vmem>>, vector<16x64xf32>
    tpu.vector_store %arg21[%c192_399, %c0_400], %912 {strides = array<i32>} : memref<432x512xf32, #tpu.memory_space<vmem>>, vector<16x64xf32>,
    %914 = arith.andi %746, %773 : vector<1x64xi1>
    %915 = arith.andi %914, %800 : vector<1x64xi1>
    %916 = arith.extui %915 : vector<1x64xi1> to vector<1x64xi32>
    %917 = arith.sitofp %916 : vector<1x64xi32> to vector<1x64xf32>
    %c0_401 = arith.constant 0 : index
    %c21_402 = arith.constant 21 : index
    %918 = vector.load %arg20[%c0_401, %c21_402] : memref<16x658xf32, #tpu.memory_space<vmem>>, vector<16x64xf32>
    %919 = vector.broadcast %917 : vector<1x64xf32> to vector<16x64xf32>
    %920 = arith.mulf %918, %919 : vector<16x64xf32>
    %c208_403 = arith.constant 208 : index
    %c0_404 = arith.constant 0 : index
    %921 = vector.load %arg21[%c208_403, %c0_404] : memref<432x512xf32, #tpu.memory_space<vmem>>, vector<16x64xf32>
    tpu.vector_store %arg21[%c208_403, %c0_404], %920 {strides = array<i32>} : memref<432x512xf32, #tpu.memory_space<vmem>>, vector<16x64xf32>,
    %922 = arith.andi %746, %773 : vector<1x64xi1>
    %923 = arith.andi %922, %809 : vector<1x64xi1>
    %924 = arith.extui %923 : vector<1x64xi1> to vector<1x64xi32>
    %925 = arith.sitofp %924 : vector<1x64xi32> to vector<1x64xf32>
    %c0_405 = arith.constant 0 : index
    %c22 = arith.constant 22 : index
    %926 = vector.load %arg20[%c0_405, %c22] : memref<16x658xf32, #tpu.memory_space<vmem>>, vector<16x64xf32>
    %927 = vector.broadcast %925 : vector<1x64xf32> to vector<16x64xf32>
    %928 = arith.mulf %926, %927 : vector<16x64xf32>
    %c224 = arith.constant 224 : index
    %c0_406 = arith.constant 0 : index
    %929 = vector.load %arg21[%c224, %c0_406] : memref<432x512xf32, #tpu.memory_space<vmem>>, vector<16x64xf32>
    tpu.vector_store %arg21[%c224, %c0_406], %928 {strides = array<i32>} : memref<432x512xf32, #tpu.memory_space<vmem>>, vector<16x64xf32>,
    %930 = arith.andi %746, %782 : vector<1x64xi1>
    %931 = arith.andi %930, %791 : vector<1x64xi1>
    %932 = arith.extui %931 : vector<1x64xi1> to vector<1x64xi32>
    %933 = arith.sitofp %932 : vector<1x64xi32> to vector<1x64xf32>
    %c0_407 = arith.constant 0 : index
    %c24_408 = arith.constant 24 : index
    %934 = vector.load %arg20[%c0_407, %c24_408] : memref<16x658xf32, #tpu.memory_space<vmem>>, vector<16x64xf32>
    %935 = vector.broadcast %933 : vector<1x64xf32> to vector<16x64xf32>
    %936 = arith.mulf %934, %935 : vector<16x64xf32>
    %c240 = arith.constant 240 : index
    %c0_409 = arith.constant 0 : index
    %937 = vector.load %arg21[%c240, %c0_409] : memref<432x512xf32, #tpu.memory_space<vmem>>, vector<16x64xf32>
    tpu.vector_store %arg21[%c240, %c0_409], %936 {strides = array<i32>} : memref<432x512xf32, #tpu.memory_space<vmem>>, vector<16x64xf32>,
    %938 = arith.andi %746, %782 : vector<1x64xi1>
    %939 = arith.andi %938, %800 : vector<1x64xi1>
    %940 = arith.extui %939 : vector<1x64xi1> to vector<1x64xi32>
    %941 = arith.sitofp %940 : vector<1x64xi32> to vector<1x64xf32>
    %c0_410 = arith.constant 0 : index
    %c25 = arith.constant 25 : index
    %942 = vector.load %arg20[%c0_410, %c25] : memref<16x658xf32, #tpu.memory_space<vmem>>, vector<16x64xf32>
    %943 = vector.broadcast %941 : vector<1x64xf32> to vector<16x64xf32>
    %944 = arith.mulf %942, %943 : vector<16x64xf32>
    %c256 = arith.constant 256 : index
    %c0_411 = arith.constant 0 : index
    %945 = vector.load %arg21[%c256, %c0_411] : memref<432x512xf32, #tpu.memory_space<vmem>>, vector<16x64xf32>
    tpu.vector_store %arg21[%c256, %c0_411], %944 {strides = array<i32>} : memref<432x512xf32, #tpu.memory_space<vmem>>, vector<16x64xf32>,
    %946 = arith.andi %746, %782 : vector<1x64xi1>
    %947 = arith.andi %946, %809 : vector<1x64xi1>
    %948 = arith.extui %947 : vector<1x64xi1> to vector<1x64xi32>
    %949 = arith.sitofp %948 : vector<1x64xi32> to vector<1x64xf32>
    %c0_412 = arith.constant 0 : index
    %c26 = arith.constant 26 : index
    %950 = vector.load %arg20[%c0_412, %c26] : memref<16x658xf32, #tpu.memory_space<vmem>>, vector<16x64xf32>
    %951 = vector.broadcast %949 : vector<1x64xf32> to vector<16x64xf32>
    %952 = arith.mulf %950, %951 : vector<16x64xf32>
    %c272 = arith.constant 272 : index
    %c0_413 = arith.constant 0 : index
    %953 = vector.load %arg21[%c272, %c0_413] : memref<432x512xf32, #tpu.memory_space<vmem>>, vector<16x64xf32>
    tpu.vector_store %arg21[%c272, %c0_413], %952 {strides = array<i32>} : memref<432x512xf32, #tpu.memory_space<vmem>>, vector<16x64xf32>,
    %954 = arith.andi %755, %764 : vector<1x64xi1>
    %955 = arith.andi %954, %791 : vector<1x64xi1>
    %956 = arith.extui %955 : vector<1x64xi1> to vector<1x64xi32>
    %957 = arith.sitofp %956 : vector<1x64xi32> to vector<1x64xf32>
    %c0_414 = arith.constant 0 : index
    %c32_415 = arith.constant 32 : index
    %958 = vector.load %arg20[%c0_414, %c32_415] : memref<16x658xf32, #tpu.memory_space<vmem>>, vector<16x64xf32>
    %959 = vector.broadcast %957 : vector<1x64xf32> to vector<16x64xf32>
    %960 = arith.mulf %958, %959 : vector<16x64xf32>
    %c288 = arith.constant 288 : index
    %c0_416 = arith.constant 0 : index
    %961 = vector.load %arg21[%c288, %c0_416] : memref<432x512xf32, #tpu.memory_space<vmem>>, vector<16x64xf32>
    tpu.vector_store %arg21[%c288, %c0_416], %960 {strides = array<i32>} : memref<432x512xf32, #tpu.memory_space<vmem>>, vector<16x64xf32>,
    %962 = arith.andi %755, %764 : vector<1x64xi1>
    %963 = arith.andi %962, %800 : vector<1x64xi1>
    %964 = arith.extui %963 : vector<1x64xi1> to vector<1x64xi32>
    %965 = arith.sitofp %964 : vector<1x64xi32> to vector<1x64xf32>
    %c0_417 = arith.constant 0 : index
    %c33 = arith.constant 33 : index
    %966 = vector.load %arg20[%c0_417, %c33] : memref<16x658xf32, #tpu.memory_space<vmem>>, vector<16x64xf32>
    %967 = vector.broadcast %965 : vector<1x64xf32> to vector<16x64xf32>
    %968 = arith.mulf %966, %967 : vector<16x64xf32>
    %c304 = arith.constant 304 : index
    %c0_418 = arith.constant 0 : index
    %969 = vector.load %arg21[%c304, %c0_418] : memref<432x512xf32, #tpu.memory_space<vmem>>, vector<16x64xf32>
    tpu.vector_store %arg21[%c304, %c0_418], %968 {strides = array<i32>} : memref<432x512xf32, #tpu.memory_space<vmem>>, vector<16x64xf32>,
    %970 = arith.andi %755, %764 : vector<1x64xi1>
    %971 = arith.andi %970, %809 : vector<1x64xi1>
    %972 = arith.extui %971 : vector<1x64xi1> to vector<1x64xi32>
    %973 = arith.sitofp %972 : vector<1x64xi32> to vector<1x64xf32>
    %c0_419 = arith.constant 0 : index
    %c34 = arith.constant 34 : index
    %974 = vector.load %arg20[%c0_419, %c34] : memref<16x658xf32, #tpu.memory_space<vmem>>, vector<16x64xf32>
    %975 = vector.broadcast %973 : vector<1x64xf32> to vector<16x64xf32>
    %976 = arith.mulf %974, %975 : vector<16x64xf32>
    %c320 = arith.constant 320 : index
    %c0_420 = arith.constant 0 : index
    %977 = vector.load %arg21[%c320, %c0_420] : memref<432x512xf32, #tpu.memory_space<vmem>>, vector<16x64xf32>
    tpu.vector_store %arg21[%c320, %c0_420], %976 {strides = array<i32>} : memref<432x512xf32, #tpu.memory_space<vmem>>, vector<16x64xf32>,
    %978 = arith.andi %755, %773 : vector<1x64xi1>
    %979 = arith.andi %978, %791 : vector<1x64xi1>
    %980 = arith.extui %979 : vector<1x64xi1> to vector<1x64xi32>
    %981 = arith.sitofp %980 : vector<1x64xi32> to vector<1x64xf32>
    %c0_421 = arith.constant 0 : index
    %c36_422 = arith.constant 36 : index
    %982 = vector.load %arg20[%c0_421, %c36_422] : memref<16x658xf32, #tpu.memory_space<vmem>>, vector<16x64xf32>
    %983 = vector.broadcast %981 : vector<1x64xf32> to vector<16x64xf32>
    %984 = arith.mulf %982, %983 : vector<16x64xf32>
    %c336 = arith.constant 336 : index
    %c0_423 = arith.constant 0 : index
    %985 = vector.load %arg21[%c336, %c0_423] : memref<432x512xf32, #tpu.memory_space<vmem>>, vector<16x64xf32>
    tpu.vector_store %arg21[%c336, %c0_423], %984 {strides = array<i32>} : memref<432x512xf32, #tpu.memory_space<vmem>>, vector<16x64xf32>,
    %986 = arith.andi %755, %773 : vector<1x64xi1>
    %987 = arith.andi %986, %800 : vector<1x64xi1>
    %988 = arith.extui %987 : vector<1x64xi1> to vector<1x64xi32>
    %989 = arith.sitofp %988 : vector<1x64xi32> to vector<1x64xf32>
    %c0_424 = arith.constant 0 : index
    %c37 = arith.constant 37 : index
    %990 = vector.load %arg20[%c0_424, %c37] : memref<16x658xf32, #tpu.memory_space<vmem>>, vector<16x64xf32>
    %991 = vector.broadcast %989 : vector<1x64xf32> to vector<16x64xf32>
    %992 = arith.mulf %990, %991 : vector<16x64xf32>
    %c352 = arith.constant 352 : index
    %c0_425 = arith.constant 0 : index
    %993 = vector.load %arg21[%c352, %c0_425] : memref<432x512xf32, #tpu.memory_space<vmem>>, vector<16x64xf32>
    tpu.vector_store %arg21[%c352, %c0_425], %992 {strides = array<i32>} : memref<432x512xf32, #tpu.memory_space<vmem>>, vector<16x64xf32>,
    %994 = arith.andi %755, %773 : vector<1x64xi1>
    %995 = arith.andi %994, %809 : vector<1x64xi1>
    %996 = arith.extui %995 : vector<1x64xi1> to vector<1x64xi32>
    %997 = arith.sitofp %996 : vector<1x64xi32> to vector<1x64xf32>
    %c0_426 = arith.constant 0 : index
    %c38 = arith.constant 38 : index
    %998 = vector.load %arg20[%c0_426, %c38] : memref<16x658xf32, #tpu.memory_space<vmem>>, vector<16x64xf32>
    %999 = vector.broadcast %997 : vector<1x64xf32> to vector<16x64xf32>
    %1000 = arith.mulf %998, %999 : vector<16x64xf32>
    %c368 = arith.constant 368 : index
    %c0_427 = arith.constant 0 : index
    %1001 = vector.load %arg21[%c368, %c0_427] : memref<432x512xf32, #tpu.memory_space<vmem>>, vector<16x64xf32>
    tpu.vector_store %arg21[%c368, %c0_427], %1000 {strides = array<i32>} : memref<432x512xf32, #tpu.memory_space<vmem>>, vector<16x64xf32>,
    %1002 = arith.andi %755, %782 : vector<1x64xi1>
    %1003 = arith.andi %1002, %791 : vector<1x64xi1>
    %1004 = arith.extui %1003 : vector<1x64xi1> to vector<1x64xi32>
    %1005 = arith.sitofp %1004 : vector<1x64xi32> to vector<1x64xf32>
    %c0_428 = arith.constant 0 : index
    %c40_429 = arith.constant 40 : index
    %1006 = vector.load %arg20[%c0_428, %c40_429] : memref<16x658xf32, #tpu.memory_space<vmem>>, vector<16x64xf32>
    %1007 = vector.broadcast %1005 : vector<1x64xf32> to vector<16x64xf32>
    %1008 = arith.mulf %1006, %1007 : vector<16x64xf32>
    %c384 = arith.constant 384 : index
    %c0_430 = arith.constant 0 : index
    %1009 = vector.load %arg21[%c384, %c0_430] : memref<432x512xf32, #tpu.memory_space<vmem>>, vector<16x64xf32>
    tpu.vector_store %arg21[%c384, %c0_430], %1008 {strides = array<i32>} : memref<432x512xf32, #tpu.memory_space<vmem>>, vector<16x64xf32>,
    %1010 = arith.andi %755, %782 : vector<1x64xi1>
    %1011 = arith.andi %1010, %800 : vector<1x64xi1>
    %1012 = arith.extui %1011 : vector<1x64xi1> to vector<1x64xi32>
    %1013 = arith.sitofp %1012 : vector<1x64xi32> to vector<1x64xf32>
    %c0_431 = arith.constant 0 : index
    %c41 = arith.constant 41 : index
    %1014 = vector.load %arg20[%c0_431, %c41] : memref<16x658xf32, #tpu.memory_space<vmem>>, vector<16x64xf32>
    %1015 = vector.broadcast %1013 : vector<1x64xf32> to vector<16x64xf32>
    %1016 = arith.mulf %1014, %1015 : vector<16x64xf32>
    %c400 = arith.constant 400 : index
    %c0_432 = arith.constant 0 : index
    %1017 = vector.load %arg21[%c400, %c0_432] : memref<432x512xf32, #tpu.memory_space<vmem>>, vector<16x64xf32>
    tpu.vector_store %arg21[%c400, %c0_432], %1016 {strides = array<i32>} : memref<432x512xf32, #tpu.memory_space<vmem>>, vector<16x64xf32>,
    %1018 = arith.andi %755, %782 : vector<1x64xi1>
    %1019 = arith.andi %1018, %809 : vector<1x64xi1>
    %1020 = arith.extui %1019 : vector<1x64xi1> to vector<1x64xi32>
    %1021 = arith.sitofp %1020 : vector<1x64xi32> to vector<1x64xf32>
    %c0_433 = arith.constant 0 : index
    %c42 = arith.constant 42 : index
    %1022 = vector.load %arg20[%c0_433, %c42] : memref<16x658xf32, #tpu.memory_space<vmem>>, vector<16x64xf32>
    %1023 = vector.broadcast %1021 : vector<1x64xf32> to vector<16x64xf32>
    %1024 = arith.mulf %1022, %1023 : vector<16x64xf32>
    %c416 = arith.constant 416 : index
    %c0_434 = arith.constant 0 : index
    %1025 = vector.load %arg21[%c416, %c0_434] : memref<432x512xf32, #tpu.memory_space<vmem>>, vector<16x64xf32>
    tpu.vector_store %arg21[%c416, %c0_434], %1024 {strides = array<i32>} : memref<432x512xf32, #tpu.memory_space<vmem>>, vector<16x64xf32>,
    %c0_435 = arith.constant 0 : index
    %c0_436 = arith.constant 0 : index
    %1026 = vector.load %arg13[%c0_435, %c0_436] : memref<16x432xf32, #tpu.memory_space<vmem>>, vector<16x432xf32>
    %c0_437 = arith.constant 0 : index
    %c0_438 = arith.constant 0 : index
    %1027 = vector.load %arg21[%c0_437, %c0_438] : memref<432x512xf32, #tpu.memory_space<vmem>>, vector<432x64xf32>
    %cst_439 = arith.constant dense<0.000000e+00> : vector<16x64xf32>
    %1028 = tpu.matmul %1026, %1027, %cst_439 {dimension_numbers = #tpu.dot_dimension_numbers<[1], [0], [0], [1], [0, 0, 1, 1], [], []>} : vector<16x432xf32>, vector<432x64xf32>, vector<16x64xf32> -> vector<16x64xf32>
    %c0_440 = arith.constant 0 : index
    %c0_441 = arith.constant 0 : index
    %1029 = vector.load %arg14[%c0_440, %c0_441] : memref<16x1xf32, #tpu.memory_space<vmem>>, vector<16x1xf32>
    %1030 = vector.broadcast %1029 : vector<16x1xf32> to vector<16x64xf32>
    %1031 = arith.addf %1028, %1030 : vector<16x64xf32>
    %cst_442 = arith.constant dense<0.000000e+00> : vector<16xf32>
    %1032 = vector.multi_reduction <add>, %1031, %cst_442 [1] : vector<16x64xf32> to vector<16xf32>
    %1033 = vector.shape_cast %1032 : vector<16xf32> to vector<16x1xf32>
    %cst_443 = arith.constant 6.400000e+01 : f32
    %1034 = vector.broadcast %cst_443 : f32 to vector<16x1xf32>
    %1035 = arith.divf %1033, %1034 : vector<16x1xf32>
    %1036 = vector.broadcast %1035 : vector<16x1xf32> to vector<16x64xf32>
    %1037 = arith.subf %1031, %1036 : vector<16x64xf32>
    %1038 = arith.mulf %1037, %1037 : vector<16x64xf32>
    %cst_444 = arith.constant dense<0.000000e+00> : vector<16xf32>
    %1039 = vector.multi_reduction <add>, %1038, %cst_444 [1] : vector<16x64xf32> to vector<16xf32>
    %1040 = vector.shape_cast %1039 : vector<16xf32> to vector<16x1xf32>
    %cst_445 = arith.constant 6.400000e+01 : f32
    %1041 = vector.broadcast %cst_445 : f32 to vector<16x1xf32>
    %1042 = arith.divf %1040, %1041 : vector<16x1xf32>
    %1043 = vector.broadcast %1035 : vector<16x1xf32> to vector<16x64xf32>
    %1044 = arith.subf %1031, %1043 : vector<16x64xf32>
    %cst_446 = arith.constant 9.99999974E-6 : f32
    %1045 = vector.broadcast %cst_446 : f32 to vector<16x1xf32>
    %1046 = arith.addf %1042, %1045 : vector<16x1xf32>
    %1047 = math.rsqrt %1046 : vector<16x1xf32>
    %1048 = vector.broadcast %1047 : vector<16x1xf32> to vector<16x64xf32>
    %1049 = arith.mulf %1044, %1048 : vector<16x64xf32>
    %c0_447 = arith.constant 0 : index
    %c0_448 = arith.constant 0 : index
    %1050 = vector.load %arg15[%c0_447, %c0_448] : memref<16x1xf32, #tpu.memory_space<vmem>>, vector<16x1xf32>
    %1051 = vector.broadcast %1050 : vector<16x1xf32> to vector<16x64xf32>
    %1052 = arith.mulf %1049, %1051 : vector<16x64xf32>
    %c0_449 = arith.constant 0 : index
    %c0_450 = arith.constant 0 : index
    %1053 = vector.load %arg16[%c0_449, %c0_450] : memref<16x1xf32, #tpu.memory_space<vmem>>, vector<16x1xf32>
    %1054 = vector.broadcast %1053 : vector<16x1xf32> to vector<16x64xf32>
    %1055 = arith.addf %1052, %1054 : vector<16x64xf32>
    %cst_451 = arith.constant 0.000000e+00 : f32
    %1056 = vector.broadcast %cst_451 : f32 to vector<16x64xf32>
    %1057 = arith.cmpf oge, %1055, %1056 : vector<16x64xf32>
    %cst_452 = arith.constant 0.00999999977 : f32
    %1058 = vector.broadcast %cst_452 : f32 to vector<16x64xf32>
    %1059 = arith.mulf %1058, %1055 : vector<16x64xf32>
    %1060 = arith.select %1057, %1055, %1059 : vector<16x64xi1>, vector<16x64xf32>
    %c0_453 = arith.constant 0 : index
    %c0_454 = arith.constant 0 : index
    %c0_455 = arith.constant 0 : index
    %1061 = vector.load %arg18[%c0_453, %c0_454, %c0_455] : memref<1x16x64xf32, #tpu.memory_space<vmem>>, vector<1x16x64xf32>
    %1062 = vector.shape_cast %1061 : vector<1x16x64xf32> to vector<16x64xf32>
    %1063 = vector.shape_cast %1060 : vector<16x64xf32> to vector<1x16x64xf32>
    tpu.vector_store %arg18[%c0_453, %c0_454, %c0_455], %1063 {strides = array<i32>} : memref<1x16x64xf32, #tpu.memory_space<vmem>>, vector<1x16x64xf32>,
    %cst_456 = arith.constant dense<0.000000e+00> : vector<16xf32>
    %1064 = vector.multi_reduction <add>, %1060, %cst_456 [1] : vector<16x64xf32> to vector<16xf32>
    %1065 = vector.shape_cast %1064 : vector<16xf32> to vector<16x1xf32>
    %cst_457 = arith.constant 6.400000e+01 : f32
    %1066 = vector.broadcast %cst_457 : f32 to vector<16x1xf32>
    %1067 = arith.divf %1065, %1066 : vector<16x1xf32>
    %c0_458 = arith.constant 0 : index
    %c0_459 = arith.constant 0 : index
    %c0_460 = arith.constant 0 : index
    %1068 = vector.load %arg19[%c0_458, %c0_459, %c0_460] : memref<1x16x1xf32, #tpu.memory_space<vmem>>, vector<1x16x1xf32>
    %1069 = vector.shape_cast %1068 : vector<1x16x1xf32> to vector<16x1xf32>
    %1070 = vector.shape_cast %1067 : vector<16x1xf32> to vector<1x16x1xf32>
    tpu.vector_store %arg19[%c0_458, %c0_459, %c0_460], %1070 {strides = array<i32>} : memref<1x16x1xf32, #tpu.memory_space<vmem>>, vector<1x16x1xf32>,
    return
  }
  func.func @transform_0(%arg0: i32) -> (i32, i32, i32) {
    %c0_i32 = arith.constant 0 : i32
    %c0_i32_0 = arith.constant 0 : i32
    %c0_i32_1 = arith.constant 0 : i32
    return %arg0, %c0_i32, %c0_i32_0 : i32, i32, i32
  }
  func.func @transform_1(%arg0: i32) -> (i32, i32) {
    %c0_i32 = arith.constant 0 : i32
    %c0_i32_0 = arith.constant 0 : i32
    %c0_i32_1 = arith.constant 0 : i32
    return %c0_i32, %c0_i32_0 : i32, i32
  }
  func.func @transform_2(%arg0: i32) -> (i32, i32) {
    %c0_i32 = arith.constant 0 : i32
    %c0_i32_0 = arith.constant 0 : i32
    %c0_i32_1 = arith.constant 0 : i32
    return %c0_i32, %c0_i32_0 : i32, i32
  }
  func.func @transform_3(%arg0: i32) -> (i32, i32) {
    %c0_i32 = arith.constant 0 : i32
    %c0_i32_0 = arith.constant 0 : i32
    %c0_i32_1 = arith.constant 0 : i32
    return %c0_i32, %c0_i32_0 : i32, i32
  }
  func.func @transform_4(%arg0: i32) -> (i32, i32) {
    %c0_i32 = arith.constant 0 : i32
    %c0_i32_0 = arith.constant 0 : i32
    %c0_i32_1 = arith.constant 0 : i32
    return %c0_i32, %c0_i32_0 : i32, i32
  }
  func.func @transform_5(%arg0: i32) -> (i32, i32) {
    %c0_i32 = arith.constant 0 : i32
    %c0_i32_0 = arith.constant 0 : i32
    %c0_i32_1 = arith.constant 0 : i32
    return %c0_i32, %c0_i32_0 : i32, i32
  }
  func.func @transform_6(%arg0: i32) -> (i32, i32) {
    %c0_i32 = arith.constant 0 : i32
    %c0_i32_0 = arith.constant 0 : i32
    %c0_i32_1 = arith.constant 0 : i32
    return %c0_i32, %c0_i32_0 : i32, i32
  }
  func.func @transform_7(%arg0: i32) -> (i32, i32) {
    %c0_i32 = arith.constant 0 : i32
    %c0_i32_0 = arith.constant 0 : i32
    %c0_i32_1 = arith.constant 0 : i32
    return %c0_i32, %c0_i32_0 : i32, i32
  }
  func.func @transform_8(%arg0: i32) -> (i32, i32) {
    %c0_i32 = arith.constant 0 : i32
    %c0_i32_0 = arith.constant 0 : i32
    %c0_i32_1 = arith.constant 0 : i32
    return %c0_i32, %c0_i32_0 : i32, i32
  }
  func.func @transform_9(%arg0: i32) -> (i32, i32) {
    %c0_i32 = arith.constant 0 : i32
    %c0_i32_0 = arith.constant 0 : i32
    %c0_i32_1 = arith.constant 0 : i32
    return %c0_i32, %c0_i32_0 : i32, i32
  }
  func.func @transform_10(%arg0: i32) -> (i32, i32) {
    %c0_i32 = arith.constant 0 : i32
    %c0_i32_0 = arith.constant 0 : i32
    %c0_i32_1 = arith.constant 0 : i32
    return %c0_i32, %c0_i32_0 : i32, i32
  }
  func.func @transform_11(%arg0: i32) -> (i32, i32) {
    %c0_i32 = arith.constant 0 : i32
    %c0_i32_0 = arith.constant 0 : i32
    %c0_i32_1 = arith.constant 0 : i32
    return %c0_i32, %c0_i32_0 : i32, i32
  }
  func.func @transform_12(%arg0: i32) -> (i32, i32) {
    %c0_i32 = arith.constant 0 : i32
    %c0_i32_0 = arith.constant 0 : i32
    %c0_i32_1 = arith.constant 0 : i32
    return %c0_i32, %c0_i32_0 : i32, i32
  }
  func.func @transform_13(%arg0: i32) -> (i32, i32) {
    %c0_i32 = arith.constant 0 : i32
    %c0_i32_0 = arith.constant 0 : i32
    %c0_i32_1 = arith.constant 0 : i32
    return %c0_i32, %c0_i32_0 : i32, i32
  }
  func.func @transform_14(%arg0: i32) -> (i32, i32) {
    %c0_i32 = arith.constant 0 : i32
    %c0_i32_0 = arith.constant 0 : i32
    %c0_i32_1 = arith.constant 0 : i32
    return %c0_i32, %c0_i32_0 : i32, i32
  }
  func.func @transform_15(%arg0: i32) -> (i32, i32) {
    %c0_i32 = arith.constant 0 : i32
    %c0_i32_0 = arith.constant 0 : i32
    %c0_i32_1 = arith.constant 0 : i32
    return %c0_i32, %c0_i32_0 : i32, i32
  }
  func.func @transform_16(%arg0: i32) -> (i32, i32, i32) {
    %c0_i32 = arith.constant 0 : i32
    %c0_i32_0 = arith.constant 0 : i32
    %c0_i32_1 = arith.constant 0 : i32
    return %arg0, %c0_i32, %c0_i32_0 : i32, i32, i32
  }
  func.func @transform_17(%arg0: i32) -> (i32, i32, i32) {
    %c0_i32 = arith.constant 0 : i32
    %c0_i32_0 = arith.constant 0 : i32
    %c0_i32_1 = arith.constant 0 : i32
    return %arg0, %c0_i32, %c0_i32_0 : i32, i32, i32
  }
  func.func @transform_18(%arg0: i32) -> (i32, i32, i32) {
    %c0_i32 = arith.constant 0 : i32
    %c0_i32_0 = arith.constant 0 : i32
    %c0_i32_1 = arith.constant 0 : i32
    return %arg0, %c0_i32, %c0_i32_0 : i32, i32, i32
  }
}

</mosaic_0001>

<bundles_post_ra>
// kernel: swin_backbone_forward.1
= control target key start
LH: loop header
LB: loop body
LE: loop exit
PB: predicated region body
PF: predicated region fallthrough
CT: control target
= control target key end

     0   :  { %s10611_s0 = inlined_call_operand.vmem [shape: f32[2,4,512], index: 0, kind: input, shape index: {}]   ;;  %s10612_s1 = inlined_call_operand.vmem [shape: f32[8,108], index: 1, kind: input, shape index: {}]   ;;  %s10613_s2 = inlined_call_operand.vmem [shape: f32[8,1], index: 2, kind: input, shape index: {}]   ;;  %s10614_s3 = inlined_call_operand.vmem [shape: f32[8,1], index: 3, kind: input, shape index: {}]   ;;  %s10615_s4 = inlined_call_operand.vmem [shape: f32[8,1], index: 4, kind: input, shape index: {}]   ;;  %s10616_s5 = inlined_call_operand.vmem [shape: f32[8,216], index: 5, kind: input, shape index: {}]   ;;  %s10617_s6 = inlined_call_operand.vmem [shape: f32[8,1], index: 6, kind: input, shape index: {}]   ;;  %s10618_s7 = inlined_call_operand.vmem [shape: f32[8,1], index: 7, kind: input, shape index: {}]   ;;  %s10619_s8 = inlined_call_operand.vmem [shape: f32[8,1], index: 8, kind: input, shape index: {}]   ;;  %s10620_s9 = inlined_call_operand.hbm [shape: f32[512,512], index: 9, kind: input, shape index: {}]   ;;  %s10621_s10 = inlined_call_operand.vmem [shape: f32[16,64], index: 10, kind: input, shape index: {}]   ;;  %s10622_s11 = inlined_call_operand.vmem [shape: f32[16,1], index: 11, kind: input, shape index: {}]   ;;  %s10623_s12 = inlined_call_operand.vmem [shape: f32[16,432], index: 12, kind: input, shape index: {}]   ;;  %s10624_s13 = inlined_call_operand.vmem [shape: f32[16,1], index: 13, kind: input, shape index: {}]   ;;  %s10625_s14 = inlined_call_operand.vmem [shape: f32[16,1], index: 14, kind: input, shape index: {}]   ;;  %s10626_s15 = inlined_call_operand.vmem [shape: f32[16,1], index: 15, kind: input, shape index: {}]   ;;  %s10627_s16 = inlined_call_operand.vmem [shape: f32[2,8,512], index: 16, kind: output, shape index: {0}]   ;;  %s10628_s17 = inlined_call_operand.vmem [shape: f32[2,16,64], index: 17, kind: output, shape index: {1}]   ;;  %s10629_s18 = inlined_call_operand.vmem [shape: f32[2,16,1], index: 18, kind: output, shape index: {2}]  }
   0x1   :  { %10845 = sst [smem:[#allocation104_spill]] %s10611_s0 }
   0x2   :  { %10846 = sst [smem:[#allocation105_spill]] %s10612_s1 }
   0x3   :  { %10847 = sst [smem:[#allocation106_spill]] %s10613_s2 }
   0x4   :  { %10848 = sst [smem:[#allocation107_spill]] %s10614_s3 }
   0x5   :  { %10849 = sst [smem:[#allocation108_spill]] %s10615_s4 }
   0x6   :  { %10850 = sst [smem:[#allocation109_spill]] %s10620_s9 }
   0x7   :  { %24 = vsyncpa [#allocation5], 0  ;;  %s6817_s27 = smov 0  }
   0x8 LB: > { %10851 = sst [smem:[#allocation7_spill]] %s6646_s27  ;;  %s6823_s28 = sadd.s32 4294967295, %s6646_s27   ;;  %s6646_s27 = sphi %s6817_s27, %s30_s27  }
   0x9   : > { %p6018_p0 = scmp.ge.s32.totalorder %s6646_s27, 1  ;;  %p454_p1 = scmp.lt.s32.totalorder %s6646_s27, 3 }
   0xa   : > { %s6648_s29 = smov [#allocation4]   ;;  %p6259_p3 = scmp.eq.s32.totalorder %s6823_s28, 0 }
   0xb   : > { %s490_s30 = sshll.u32 %s6648_s29, 4  ;;  %p6827_p2 = pnand %p6018_p0, %p454_p1  ;;  %s491_s30 = int_to_ptr.vmem [resolvable:$true] %s490_s30 }
   0xc   : > { %s6621_s19 = scalar_lea.vmem %s491_s30, 32768  ;;  %p6629_p10 = scmp.lt.s32.totalorder %s491_s30, %s491_s30 }
   0xd   : > { %p6255_p4 = pneg %p6827_p2  ;;  %p6622_p7 = scmp.ne.s32.totalorder %s491_s30, %s6621_s19 }
   0xe   : > { %p6630_p11 = scmp.lt.s32.totalorder %s6621_s19, %s6621_s19 }
   0xf   : > { %p6256_p5 = pnand %p6259_p3, %p6255_p4 }
  0x10   : > { %p6631_p12 = por %p6630_p11, %p6629_p10 }
  0x11   : > { %p6612_p6 = pneg %p6256_p5 }
  0x13   : > { %p6624_p8 = pnand %p6622_p7, %p6612_p6 }
  0x15   : > { %p6625_p9 = pneg %p6624_p8 }
  0x17   : > { %p6632_p13 = pnand %p6631_p12, %p6625_p9 }
  0x19   : > { %6635 = shalt.err (!%p6632_p13)
}
  0x1a   : > { %s6649_s1 = smov 512   ;;  %s6650_s20 = smov 32  }
  0x1b   : > { %s10853_s9 = sld [smem:[#allocation109_spill]] }
  0x1d   : > { %532 = sbr.rel (%p6827_p2) target bundleno = 3698 (0xe72), region = 84 }
  0x21   : > { %6258 = dma.hbm_to_vmem [thread:$0]  (!%p6256_p5), %s10853_s9, 32768, %s491_s30, [#allocation5], %s6649_s1, %s6649_s1, %s6650_s20  }
  0x22   : > { %6641 = dma.done.wait (%p6259_p3), [#allocation5], 32768  }
  0x23   : > { %6643 = vsyncadd (%p6259_p3), [#allocation5], 4294934528  ;;  %p596_p0 = scmp.lt.s32.totalorder %s6823_s28, 1  ;;  %v653_v0 = vlaneseq  ;;  %v10681_v1 = vmov 0.0   ;;  %s10855_s25 = sld [smem:[#allocation104_spill]]  ;;  %v10856_v25 = vmov 0 }
  0x24   : > { %618 = vst [vmem:[#allocation2] sm:$0xf] %v10681_v1  ;;  %619 = vst [vmem:[#allocation2 + $0x8] sm:$0xf] %v10681_v1  ;;  %2856 = vmatprep.mubr.f32.mxu0 %v10681_v1  ;;  %2927 = vmatprep.mubr.f32.mxu1 %v10681_v1  ;;  %s10737_s29 = smov 73   ;;  %v10862_v30 = vmov 0 }
  0x25   : > { %620 = vst [vmem:[#allocation2 + $0x10] sm:$0xf] %v10681_v1  ;;  %621 = vst [vmem:[#allocation2 + $0x18] sm:$0xf] %v10681_v1  ;;  %s11479_s28 = smov (!%p596_p0, %s6823_s28), 1  ;;  %v6856_v2 = vand.u32 127, %v653_v0 }
  0x26   : > { %622 = vst [vmem:[#allocation2 + $0x20] sm:$0xf] %v10681_v1  ;;  %s6859_s2 = sshll.u32 %s11479_s28, 4  ;;  %v10864_v33 = vmov 0  ;;  %v10866_v37 = vmov 0  ;;  %v10870_v44 = vmov 0 }
  0x27   : > { %10854 = vst [vmem:[#allocation8_spill] sm:$0xff] %v6856_v2  ;;  %v6862_v3 = vadd.s32 256, %v6856_v2  ;;  %v6865_v4 = vadd.s32 384, %v6856_v2  ;;  %v6868_v5 = vadd.s32 128, %v6856_v2  ;;  %v662_v6 = vshra.s32 %v6856_v2, 3  ;;  %s10677_s30 = smov 10  }
  0x28   : > { %v6887_v16 = vshra.s32 %v6856_v2, 6  ;;  %v658_v31 = vand.u32 7, %v6856_v2  ;;  %v10872_v46 = vmov 0  ;;  %v10874_v48 = vmov 0  ;;  %s10712_s0 = smov 17   ;;  %s10721_s19 = smov 18  }
  0x29   : > { %s600_s26 = scalar_lea.vmem %s10855_s25, %s6859_s2  ;;  %v660_v7 = vand.u32 7, %v6862_v3  ;;  %v661_v8 = vand.u32 7, %v6865_v4  ;;  %v664_v9 = vshra.s32 %v6862_v3, 3  ;;  %v665_v10 = vshra.s32 %v6865_v4, 3  ;;  %s10707_s1 = smov 16  }
  0x2a   : > { %v617_v11 = vld [vmem:[%s600_s26 + $0x8] sm:$0xff]  ;;  %v616_v12 = vld [vmem:[%s600_s26] sm:$0xff]  ;;  %v6880_v13 = vshra.s32 %v6862_v3, 6  ;;  %v6883_v14 = vshra.s32 %v6865_v4, 6  ;;  %v663_v15 = vshra.s32 %v6868_v5, 3  ;;  %v6924_v28 = vshra.s32 %v6868_v5, 6 }
  0x2b   : > { %633 = vrot.lane.b32.xlu0 %v617_v11, %s10737_s29  ;;  %v628_v17 = vcombine.high %v617_v11, %v617_v11  ;;  %629 = vrot.lane.b32.xlu1 %v616_v12, %s10737_s29  ;;  %v627_v18 = vcombine.high %v616_v12, %v616_v12  ;;  %v6891_v19 = vand.u32 7, %v664_v9  ;;  %v6893_v20 = vand.u32 7, %v665_v10  ;;  %s10728_s20 = smov 8   ;;  %s10731_s21 = smov 9  }
  0x2c   : > { %v704_v21 = vadd.s32 1, %v6880_v13  ;;  %v705_v22 = vadd.s32 1, %v6883_v14  ;;  %v6899_v23 = vadd.s32 1, %v660_v7  ;;  %v6903_v24 = vadd.s32 1, %v661_v8  ;;  %s10696_s22 = smov 1   ;;  %s10708_s23 = smov 2  }
  0x2d   : > { %vm736_vm0 = vcmp.ge.s32.totalorder %v6891_v19, 0  ;;  %vm737_vm1 = vcmp.ge.s32.totalorder %v6893_v20, 0  ;;  %vm740_vm2 = vcmp.le.s32.totalorder %v6891_v19, 7  ;;  %vm741_vm3 = vcmp.le.s32.totalorder %v6893_v20, 7  ;;  %s6661_s24 = smov 82   ;;  %s6662_s25 = smov 80  }
  0x2e   : > { %vm708_vm4 = vcmp.ge.s32.totalorder %v704_v21, 0  ;;  %vm709_vm5 = vcmp.ge.s32.totalorder %v705_v22, 0  ;;  %vm712_vm6 = vcmp.le.s32.totalorder %v704_v21, 7  ;;  %vm713_vm7 = vcmp.le.s32.totalorder %v705_v22, 7  ;;  %vm6909_vm8 = vmand %vm736_vm0, %vm740_vm2  ;;  %s6663_s26 = smov 81   ;;  %s11263_s4 = sld [smem:[#allocation108_spill]] }
  0x2f   : > { %v10857_v25 = vsel %vm6909_vm8, 4294967295, %v10856_v25  ;;  %635 = vrot.lane.b32.xlu1 %v628_v17, %s10737_s29  ;;  %631 = vrot.lane.b32.xlu0 %v627_v18, %s10737_s29  ;;  %vm6915_vm9 = vmand %vm708_vm4, %vm712_vm6  ;;  %v702_v29 = vadd.s32 1, %v6887_v16  ;;  %vm10630_vm12 = vcmp.le.s32.totalorder %v6899_v23, 7  ;;  %v6933_v32 = vand.u32 7, %v662_v6  ;;  %s11273_s3 = sld [smem:[#allocation107_spill]]  ;;  %s11300_s9 = smov 118  }
  0x30   : > { %vm6919_vm10 = vmand %vm709_vm5, %vm713_vm7  ;;  %vm10633_vm13 = vcmp.le.s32.totalorder %v6903_v24, 7  ;;  %v659_v34 = vand.u32 7, %v6868_v5  ;;  %v6945_v35 = vand.u32 7, %v663_v15  ;;  %v703_v36 = vadd.s32 1, %v6924_v28  ;;  %s11310_s27 = smov 46  }
  0x31   : > { %vm6927_vm11 = vmand %vm737_vm1, %vm741_vm3  ;;  %vm706_vm0 = vcmp.ge.s32.totalorder %v702_v29, 0  ;;  %vm710_vm1 = vcmp.le.s32.totalorder %v702_v29, 7  ;;  %vm734_vm6 = vcmp.ge.s32.totalorder %v6933_v32, 0  ;;  %vm738_vm7 = vcmp.le.s32.totalorder %v6933_v32, 7 }
  0x32   : > { %v10863_v30 = vsel %vm6927_vm11, 4294967295, %v10862_v30  ;;  %vm6940_vm14 = vmand %vm6915_vm9, %vm6909_vm8  ;;  %vm707_vm3 = vcmp.ge.s32.totalorder %v703_v36, 0  ;;  %vm711_vm4 = vcmp.le.s32.totalorder %v703_v36, 7  ;;  %v6969_v39 = vadd.s32 1, %v658_v31 }
  0x33   : > { %v10865_v33 = vsel %vm6940_vm14, 4294967295, %v10864_v33  ;;  %vm6952_vm15 = vmand %vm6919_vm10, %vm6927_vm11  ;;  %vm735_vm11 = vcmp.ge.s32.totalorder %v6945_v35, 0  ;;  %v6980_v42 = vadd.s32 1, %v659_v34  ;;  %v748_v45 = vadd.s32 1, %v6891_v19 }
  0x34   : > { %v10867_v37 = vsel %vm6952_vm15, 4294967295, %v10866_v37  ;;  %vm2424_vm2 = vmand %vm6940_vm14, %vm10630_vm12  ;;  %v749_v47 = vadd.s32 1, %v6893_v20  ;;  %v10876_v49 = vmov 0  ;;  %v746_v51 = vadd.s32 1, %v6933_v32 }
  0x35   : > { %vm2425_vm5 = vmand %vm6952_vm15, %vm10633_vm13  ;;  %v6125_v38 = vsel %vm2424_vm2, 1.0, %v10681_v1  ;;  %vm739_vm13 = vcmp.le.s32.totalorder %v6945_v35, 7  ;;  %v747_v52 = vadd.s32 1, %v6945_v35  ;;  %vm10880_vm8 = vcmp.le.s32.totalorder %v6980_v42, 7 }
  0x36   : > { %v6126_v40 = vsel %vm2425_vm5, 1.0, %v10681_v1  ;;  %vm6972_vm12 = vmand %vm706_vm0, %vm710_vm1  ;;  %vm10644_vm1 = vcmp.le.s32.totalorder %v6969_v39, 7  ;;  %v10881_v55 = vmov 0  ;;  %v10883_v57 = vmov 0 }
  0x37   : > { %v6348_v43 = vpack.i.bf16 %v6126_v40, %v6125_v38  ;;  %vm6982_vm2 = vmand %vm707_vm3, %vm711_vm4  ;;  %vm753_vm3 = vcmp.ge.s32.totalorder %v749_v47, 0  ;;  %v10889_v62 = vmov 0  ;;  %v10891_v0 = vmov 0 }
  0x38   : > { %v10871_v44 = vsel %vm6982_vm2, 4294967295, %v10870_v44  ;;  %vm6987_vm5 = vmand %vm734_vm6, %vm738_vm7  ;;  %vm756_vm6 = vcmp.le.s32.totalorder %v748_v45, 7  ;;  %v7068_v6 = vadd.s32 4294967295, %v660_v7  ;;  %v7080_v10 = vadd.s32 4294967295, %v661_v8 }
  0x39   : > { %v10873_v46 = vsel %vm6987_vm5, 4294967295, %v10872_v46  ;;  %6349 = vrot.lane.b32.xlu1 %v6348_v43, %s10677_s30  ;;  %vm6993_vm0 = vmand %vm735_vm11, %vm739_vm13  ;;  %vm752_vm13 = vcmp.ge.s32.totalorder %v748_v45, 0  ;;  %v7096_v4 = vadd.s32 4294967295, %v658_v31  ;;  %v7107_v11 = vadd.s32 4294967295, %v659_v34 }
  0x3a   : > { %v10875_v48 = vsel %vm6993_vm0, 4294967295, %v10874_v48  ;;  %vm7003_vm4 = vmand %vm6972_vm12, %vm6987_vm5  ;;  %vm757_vm5 = vcmp.le.s32.totalorder %v749_v47, 7  ;;  %v720_v5 = vadd.s32 4294967295, %v6891_v19  ;;  %v721_v22 = vadd.s32 4294967295, %v6893_v20 }
  0x3b   : > { %v10877_v49 = vsel %vm7003_vm4, 4294967295, %v10876_v49  ;;  %vm7011_vm11 = vmand %vm6982_vm2, %vm6993_vm0  ;;  %v10910_v50 = vmov 0 }
  0x3c   : > { %vm2422_vm7 = vmand %vm7003_vm4, %vm10644_vm1  ;;  %vm750_vm1 = vcmp.ge.s32.totalorder %v746_v51, 0  ;;  %vm754_vm4 = vcmp.le.s32.totalorder %v746_v51, 7 }
  0x3d   : > { %vm2423_vm0 = vmand %vm7011_vm11, %vm10880_vm8  ;;  %v6123_v53 = vsel %vm2422_vm7, 1.0, %v10681_v1 }
  0x3e   : > { %v6124_v54 = vsel %vm2423_vm0, 1.0, %v10681_v1  ;;  %vm7027_vm15 = vmand %vm752_vm13, %vm756_vm6  ;;  %vm751_vm0 = vcmp.ge.s32.totalorder %v747_v52, 0  ;;  %vm755_vm13 = vcmp.le.s32.totalorder %v747_v52, 7 }
  0x3f   : > { %v10882_v55 = vsel %vm7027_vm15, 4294967295, %v10881_v55  ;;  %v6343_v56 = vpack.i.bf16 %v6124_v54, %v6123_v53  ;;  %vm7031_vm14 = vmand %vm753_vm3, %vm757_vm5 }
  0x40   : > { %v10884_v57 = vsel %vm7031_vm14, 4294967295, %v10883_v57  ;;  %vm7039_vm8 = vmand %vm6915_vm9, %vm7027_vm15 }
  0x41   : > { %6344 = vrot.lane.b32.xlu0 %v6343_v56, %s10677_s30  ;;  %vm7048_vm5 = vmand %vm6919_vm10, %vm7031_vm14  ;;  %v6133_v60 = vsel %vm7039_vm8, 1.0, %v10681_v1  ;;  %vm10656_vm14 = vcmp.ge.s32.totalorder %v7068_v6, 0 }
  0x42   : > { %v6134_v61 = vsel %vm7048_vm5, 1.0, %v10681_v1  ;;  %vm7058_vm3 = vmand %vm750_vm1, %vm754_vm4  ;;  %vm623_vm4 = vcmask 142336  }
  0x43   : > { %v10890_v62 = vsel %vm7058_vm3, 4294967295, %v10889_v62  ;;  %v6358_v63 = vpack.i.bf16 %v6134_v61, %v6133_v60  ;;  %vm7062_vm6 = vmand %vm751_vm0, %vm755_vm13  ;;  %vm10897_vm0 = vcmp.le.s32.totalorder %v6899_v23, 7  ;;  %624 = vst.msk [vmem:[#allocation2 + $0x28] sm:$0xf] %vm623_vm4, %v10681_v1 }
  0x44   : > { %v10892_v0 = vsel %vm7062_vm6, 4294967295, %v10891_v0  ;;  %vm7074_vm7 = vmand %vm6972_vm12, %vm7058_vm3 }
  0x45   : > { %6359 = vrot.lane.b32.xlu1 %v6358_v63, %s10712_s0  ;;  %vm7087_vm1 = vmand %vm6982_vm2, %vm7062_vm6  ;;  %v6131_v7 = vsel %vm7074_vm7, 1.0, %v10681_v1  ;;  %vm10898_vm6 = vcmp.le.s32.totalorder %v6903_v24, 7  ;;  %vm10660_vm2 = vcmp.ge.s32.totalorder %v7080_v10, 0  ;;  %v718_v63 = vadd.s32 4294967295, %v6933_v32 }
  0x46   : > { %v6132_v8 = vsel %vm7087_vm1, 1.0, %v10681_v1  ;;  %vm2645_vm13 = vmand %vm7039_vm8, %vm10897_vm0  ;;  %vm10899_vm0 = vcmp.le.s32.totalorder %v6969_v39, 7  ;;  %v719_v32 = vadd.s32 4294967295, %v6945_v35 }
  0x47   : > { %v6353_v12 = vpack.i.bf16 %v6132_v8, %v6131_v7  ;;  %vm2646_vm3 = vmand %vm7048_vm5, %vm10898_vm6  ;;  %v6137_v15 = vsel %vm2645_vm13, 1.0, %v10681_v1  ;;  %vm10900_vm6 = vcmp.le.s32.totalorder %v6980_v42, 7  ;;  %v6120_v7 = vsel %vm7011_vm11, 1.0, %v10681_v1 }
  0x48   : > { %v6138_v17 = vsel %vm2646_vm3, 1.0, %v10681_v1  ;;  %vm2643_vm15 = vmand %vm7074_vm7, %vm10899_vm0  ;;  %vm10659_vm3 = vcmp.ge.s32.totalorder %v7096_v4, 0  ;;  %vm10658_vm0 = vcmp.ge.s32.totalorder %v7107_v11, 0  ;;  %v10906_v8 = vmov 0 }
  0x49   : > { %6354 = vrot.lane.b32.xlu0 %v6353_v12, %s10712_s0  ;;  %v6368_v18 = vpack.i.bf16 %v6138_v17, %v6137_v15  ;;  %vm2644_vm4 = vmand %vm7087_vm1, %vm10900_vm6  ;;  %v6135_v21 = vsel %vm2643_vm15, 1.0, %v10681_v1  ;;  %vm10901_vm6 = vnez %v10865_v33  ;;  %v10912_v17 = vmov 0 }
  0x4a   : > { %v6136_v29 = vsel %vm2644_vm4, 1.0, %v10681_v1  ;;  %vm2502_vm13 = vmand %vm7039_vm8, %vm10656_vm14  ;;  %v6121_v34 = vsel %vm10901_vm6, 1.0, %v10681_v1  ;;  %vm10902_vm4 = vnez %v10867_v37  ;;  %v7160_v43 = vld [vmem:[#allocation2 + $0x28] sm:$0xf]  ;;  %vm10657_vm14 = vcmask 146432  }
  0x4b   : > { %6369 = vrot.lane.b32.xlu1 %v6368_v18, %s10721_s19  ;;  %v6363_v19 = vpack.i.bf16 %v6136_v29, %v6135_v21  ;;  %vm2503_vm15 = vmand %vm7048_vm5, %vm10660_vm2  ;;  %v6129_v20 = vsel %vm2502_vm13, 1.0, %v10681_v1  ;;  %v6122_v36 = vsel %vm10902_vm4, 1.0, %v10681_v1  ;;  %v7162_v45 = vld [vmem:[#allocation2 + $0x28] sm:$0xf]  ;;  %vm10903_vm13 = vcmp.ge.s32.totalorder %v7068_v6, 0 }
  0x4c   : > { %v6130_v31 = vsel %vm2503_vm15, 1.0, %v10681_v1  ;;  %vm2500_vm8 = vmand %vm7074_vm7, %vm10659_vm3  ;;  %vm725_vm7 = vcmp.ge.s32.totalorder %v721_v22, 0  ;;  %v7169_v51 = vld [vmem:[#allocation2 + $0x28] sm:$0xf]  ;;  %v6398_v15 = vpack.i.bf16 %v6122_v36, %v6121_v34  ;;  %v10914_v18 = vmov 0 }
  0x4d   : > { %6364 = vrot.lane.b32.xlu0 %v6363_v19, %s10721_s19  ;;  %v6378_v38 = vpack.i.bf16 %v6130_v31, %v6129_v20  ;;  %vm2501_vm5 = vmand %vm7087_vm1, %vm10658_vm0  ;;  %v6127_v40 = vsel %vm2500_vm8, 1.0, %v10681_v1  ;;  %v7171_v52 = vld [vmem:[#allocation2 + $0x28] sm:$0xf]  ;;  %vm728_vm8 = vcmp.le.s32.totalorder %v720_v5, 7  ;;  %v10916_v21 = vmov 0 }
  0x4e   : > { %v6128_v47 = vsel %vm2501_vm5, 1.0, %v10681_v1  ;;  %vm2281_vm15 = vmand %vm10901_vm6, %vm10903_vm13  ;;  %v7179_v56 = vld [vmem:[#allocation2 + $0x28] sm:$0xf]  ;;  %vm10904_vm6 = vnez %v10877_v49  ;;  %vm729_vm13 = vcmp.le.s32.totalorder %v721_v22, 7  ;;  %v10908_v49 = vmov 0 }
  0x4f   : > { %6379 = vrot.lane.b32.xlu1 %v6378_v38, %s10707_s1  ;;  %v6373_v53 = vpack.i.bf16 %v6128_v47, %v6127_v40  ;;  %vm2282_vm1 = vmand %vm10902_vm4, %vm10660_vm2  ;;  %v6117_v54 = vsel %vm2281_vm15, 1.0, %v10681_v1  ;;  %v7181_v33 = vld [vmem:[#allocation2 + $0x28] sm:$0xf]  ;;  %v6119_v3 = vsel %vm10904_vm6, 1.0, %v10681_v1  ;;  %vm10905_vm15 = vcmp.ge.s32.totalorder %v720_v5, 0 }
  0x50   : > { %v6118_v58 = vsel %vm2282_vm1, 1.0, %v10681_v1  ;;  %vm2279_vm5 = vmand %vm10904_vm6, %vm10659_vm3  ;;  %v7188_v59 = vld [vmem:[#allocation2 + $0x28] sm:$0xf]  ;;  %v6393_v35 = vpack.i.bf16 %v6120_v7, %v6119_v3  ;;  %v10918_v22 = vmov 0  ;;  %v10921_v29 = vmov 0 }
  0x51   : > { %v7190_v60 = vld [vmem:[#allocation2 + $0x28] sm:$0xf]  ;;  %6374 = vrot.lane.b32.xlu0 %v6373_v53, %s10707_s1  ;;  %v6388_v37 = vpack.i.bf16 %v6118_v58, %v6117_v54  ;;  %vm2280_vm4 = vmand %vm7011_vm11, %vm10658_vm0  ;;  %v6115_v61 = vsel %vm2279_vm5, 1.0, %v10681_v1  ;;  %vm723_vm5 = vcmp.ge.s32.totalorder %v719_v32, 0  ;;  %vm696_vm0 = vcmp.le.s32.totalorder %v6880_v13, 7 }
  0x52   : > { %2998 = vst.msk [vmem:[#allocation2 + $0x28] sm:$0xff] %vm10657_vm14, %v10681_v1  ;;  %v6116_v9 = vsel %vm2280_vm4, 1.0, %v10681_v1  ;;  %vm7210_vm1 = vmand %vm10905_vm15, %vm728_vm8  ;;  %vm692_vm14 = vcmp.ge.s32.totalorder %v6880_v13, 0  ;;  %vm10925_vm3 = vcmp.le.s32.totalorder %v6969_v39, 7  ;;  %vm693_vm2 = vcmp.ge.s32.totalorder %v6883_v14, 0 }
  0x53   : > { %v10907_v8 = vsel %vm7210_vm1, 4294967295, %v10906_v8  ;;  %6389 = vrot.lane.b32.xlu1 %v6388_v37, %s10728_s20  ;;  %v6383_v12 = vpack.i.bf16 %v6116_v9, %v6115_v61  ;;  %vm7218_vm6 = vmand %vm725_vm7, %vm729_vm13  ;;  %vm722_vm7 = vcmp.ge.s32.totalorder %v718_v63, 0  ;;  %vm727_vm13 = vcmp.le.s32.totalorder %v719_v32, 7 }
  0x54   : > { %v10909_v49 = vsel %vm7218_vm6, 4294967295, %v10908_v49  ;;  %vm7226_vm11 = vmand %vm6915_vm9, %vm7210_vm1  ;;  %vm726_vm9 = vcmp.le.s32.totalorder %v718_v63, 7  ;;  %v676_v3 = vadd.s32 4294967295, %v6880_v13 }
  0x55   : > { %v10911_v50 = vsel %vm7226_vm11, 4294967295, %v10910_v50  ;;  %6384 = vrot.lane.b32.xlu0 %v6383_v12, %s10728_s20  ;;  %vm7235_vm8 = vmand %vm6919_vm10, %vm7218_vm6  ;;  %v6109_v5 = vsel %vm7226_vm11, 1.0, %v10681_v1 }
  0x56   : > { %v10913_v17 = vsel %vm7235_vm8, 4294967295, %v10912_v17  ;;  %v6110_v26 = vsel %vm7235_vm8, 1.0, %v10681_v1  ;;  %vm7246_vm10 = vmand %vm722_vm7, %vm726_vm9  ;;  %vm10920_vm7 = vnez %v10871_v44 }
  0x57   : > { %6399 = vrot.lane.b32.xlu1 %v6398_v15, %s10731_s21  ;;  %v6408_v27 = vpack.i.bf16 %v6110_v26, %v6109_v5  ;;  %v10915_v18 = vsel %vm7246_vm10, 4294967295, %v10914_v18  ;;  %vm7251_vm4 = vmand %vm723_vm5, %vm727_vm13  ;;  %vm10924_vm13 = vcmp.le.s32.totalorder %v6903_v24, 7 }
  0x58   : > { %v10917_v21 = vsel %vm7251_vm4, 4294967295, %v10916_v21  ;;  %vm7259_vm15 = vmand %vm6972_vm12, %vm7246_vm10  ;;  %vm10923_vm12 = vcmp.le.s32.totalorder %v6899_v23, 7 }
  0x59   : > { %6394 = vrot.lane.b32.xlu0 %v6393_v35, %s10731_s21  ;;  %v10919_v22 = vsel %vm7259_vm15, 4294967295, %v10918_v22  ;;  %vm7268_vm9 = vmand %vm10920_vm7, %vm7251_vm4  ;;  %v6107_v19 = vsel %vm7259_vm15, 1.0, %v10681_v1 }
  0x5a   : > { %v10922_v29 = vsel %vm7268_vm9, 4294967295, %v10921_v29  ;;  %v6108_v41 = vsel %vm7268_vm9, 1.0, %v10681_v1  ;;  %vm2208_vm5 = vmand %vm7226_vm11, %vm10923_vm12  ;;  %vm697_vm11 = vcmp.le.s32.totalorder %v6883_v14, 7 }
  0x5b   : > { %6409 = vrot.lane.b32.xlu1 %v6408_v27, %s10696_s22  ;;  %v6403_v20 = vpack.i.bf16 %v6108_v41, %v6107_v19  ;;  %vm2209_vm7 = vmand %vm7235_vm8, %vm10924_vm13  ;;  %v6113_v44 = vsel %vm2208_vm5, 1.0, %v10681_v1  ;;  %vm10926_vm13 = vcmp.le.s32.totalorder %v6980_v42, 7  ;;  %vm695_vm8 = vcmp.le.s32.totalorder %v6924_v28, 7 }
  0x5c   : > { %v6114_v31 = vsel %vm2209_vm7, 1.0, %v10681_v1  ;;  %vm2206_vm12 = vmand %vm7259_vm15, %vm10925_vm3  ;;  %vm10931_vm15 = vnez %v10882_v55 }
  0x5d   : > { %6404 = vrot.lane.b32.xlu0 %v6403_v20, %s10696_s22  ;;  %v6418_v34 = vpack.i.bf16 %v6114_v31, %v6113_v44  ;;  %vm2207_vm5 = vmand %vm7268_vm9, %vm10926_vm13  ;;  %v6111_v36 = vsel %vm2206_vm12, 1.0, %v10681_v1  ;;  %vm10937_vm12 = vcmp.le.s32.totalorder %v6899_v23, 7  ;;  %vm691_vm9 = vcmp.ge.s32.totalorder %v6924_v28, 0 }
  0x5e   : > { %v6112_v38 = vsel %vm2207_vm5, 1.0, %v10681_v1  ;;  %vm7303_vm7 = vmand %vm692_vm14, %vm696_vm0  ;;  %vm10934_vm14 = vnez %v10884_v57 }
  0x5f   : > { %6419 = vrot.lane.b32.xlu1 %v6418_v34, %s10708_s23  ;;  %v6413_v47 = vpack.i.bf16 %v6112_v38, %v6111_v36  ;;  %vm7308_vm3 = vmand %vm693_vm2, %vm697_vm11  ;;  %vm690_vm2 = vcmp.ge.s32.totalorder %v6887_v16, 0  ;;  %vm694_vm11 = vcmp.le.s32.totalorder %v6887_v16, 7 }
  0x60   : > { %vm7316_vm13 = vmand %vm7303_vm7, %vm10931_vm15  ;;  %vm10938_vm15 = vcmp.le.s32.totalorder %v6903_v24, 7 }
  0x61   : > { %6414 = vrot.lane.b32.xlu0 %v6413_v47, %s10708_s23  ;;  %vm7325_vm0 = vmand %vm7308_vm3, %vm10934_vm14  ;;  %v6097_v27 = vsel %vm7316_vm13, 1.0, %v10681_v1 }
  0x62   : > { %vm2030_vm5 = vmand %vm7316_vm13, %vm10937_vm12  ;;  %vm10943_vm12 = vnez %v10890_v62  ;;  %v6098_v19 = vsel %vm7325_vm0, 1.0, %v10681_v1 }
  0x63   : > { %vm2031_vm14 = vmand %vm7325_vm0, %vm10938_vm15  ;;  %v6101_v37 = vsel %vm2030_vm5, 1.0, %v10681_v1  ;;  %vm10946_vm15 = vnez %v10892_v0  ;;  %vm10951_vm5 = vcmp.ge.s32.totalorder %v7068_v6, 0  ;;  %v6448_v47 = vpack.i.bf16 %v6098_v19, %v6097_v27 }
  0x64   : > { %v6102_v61 = vsel %vm2031_vm14, 1.0, %v10681_v1  ;;  %vm7343_vm4 = vmand %vm690_vm2, %vm694_vm11  ;;  %vm10950_vm2 = vcmp.le.s32.totalorder %v6980_v42, 7 }
  0x65   : > { %v6428_v9 = vpack.i.bf16 %v6102_v61, %v6101_v37  ;;  %vm7347_vm10 = vmand %vm691_vm9, %vm695_vm8  ;;  %vm10949_vm8 = vcmp.le.s32.totalorder %v6969_v39, 7  ;;  %v675_v61 = vadd.s32 4294967295, %v6924_v28 }
  0x66   : > { %vm7355_vm6 = vmand %vm7343_vm4, %vm10943_vm12  ;;  %vm10952_vm12 = vcmp.ge.s32.totalorder %v7080_v10, 0 }
  0x67   : > { %6429 = vrot.lane.b32.xlu1 %v6428_v9, %s6661_s24  ;;  %vm7363_vm14 = vmand %vm7347_vm10, %vm10946_vm15  ;;  %v6095_v31 = vsel %vm7355_vm6, 1.0, %v10681_v1 }
  0x68   : > { %vm2028_vm9 = vmand %vm7355_vm6, %vm10949_vm8  ;;  %v6096_v34 = vsel %vm7363_vm14, 1.0, %v10681_v1 }
  0x69   : > { %vm2029_vm11 = vmand %vm7363_vm14, %vm10950_vm2  ;;  %v6099_v12 = vsel %vm2028_vm9, 1.0, %v10681_v1  ;;  %vm10953_vm2 = vcmp.ge.s32.totalorder %v7096_v4, 0  ;;  %v6443_v9 = vpack.i.bf16 %v6096_v34, %v6095_v31 }
  0x6a   : > { %v6100_v15 = vsel %vm2029_vm11, 1.0, %v10681_v1  ;;  %vm1883_vm15 = vmand %vm7316_vm13, %vm10951_vm5  ;;  %vm10955_vm13 = vnez %v10857_v25  ;;  %vm10958_vm11 = vnez %v10863_v30 }
  0x6b   : > { %v6423_v35 = vpack.i.bf16 %v6100_v15, %v6099_v12  ;;  %vm1884_vm8 = vmand %vm7325_vm0, %vm10952_vm12  ;;  %v6093_v5 = vsel %vm1883_vm15, 1.0, %v10681_v1  ;;  %vm10954_vm12 = vcmp.ge.s32.totalorder %v7107_v11, 0 }
  0x6c   : > { %v6094_v26 = vsel %vm1884_vm8, 1.0, %v10681_v1  ;;  %vm1881_vm9 = vmand %vm7355_vm6, %vm10953_vm2  ;;  %vm10964_vm8 = vnez %v10875_v48 }
  0x6d   : > { %6424 = vrot.lane.b32.xlu0 %v6423_v35, %s6661_s24  ;;  %v6438_v41 = vpack.i.bf16 %v6094_v26, %v6093_v5  ;;  %vm1882_vm15 = vmand %vm7363_vm14, %vm10954_vm12  ;;  %v6091_v20 = vsel %vm1881_vm9, 1.0, %v10681_v1  ;;  %vm10961_vm14 = vnez %v10873_v46  ;;  %vm10967_vm9 = vcmp.le.s32.totalorder %v6899_v23, 7  ;;  %s6664_s24 = smov 74  }
  0x6e   : > { %v6092_v44 = vsel %vm1882_vm15, 1.0, %v10681_v1  ;;  %vm7413_vm0 = vmand %vm7303_vm7, %vm10955_vm13  ;;  %vm10968_vm15 = vcmp.le.s32.totalorder %v6903_v24, 7 }
  0x6f   : > { %6439 = vrot.lane.b32.xlu1 %v6438_v41, %s6662_s25  ;;  %v6433_v38 = vpack.i.bf16 %v6092_v44, %v6091_v20  ;;  %vm7421_vm6 = vmand %vm7308_vm3, %vm10958_vm11  ;;  %v6085_v58 = vsel %vm7413_vm0, 1.0, %v10681_v1 }
  0x70   : > { %v6086_v37 = vsel %vm7421_vm6, 1.0, %v10681_v1  ;;  %vm7435_vm5 = vmand %vm7343_vm4, %vm10961_vm14  ;;  %vm10969_vm14 = vcmp.le.s32.totalorder %v6969_v39, 7 }
  0x71   : > { %6434 = vrot.lane.b32.xlu0 %v6433_v38, %s6662_s25  ;;  %vm7443_vm2 = vmand %vm7347_vm10, %vm10964_vm8  ;;  %v6083_v32 = vsel %vm7435_vm5, 1.0, %v10681_v1  ;;  %v6458_v15 = vpack.i.bf16 %v6086_v37, %v6085_v58  ;;  %s6665_s25 = smov 66  }
  0x72   : > { %v6084_v12 = vsel %vm7443_vm2, 1.0, %v10681_v1  ;;  %vm1808_vm12 = vmand %vm7413_vm0, %vm10967_vm9  ;;  %vm10970_vm9 = vcmp.le.s32.totalorder %v6980_v42, 7 }
  0x73   : > { %6449 = vrot.lane.b32.xlu1 %v6448_v47, %s6663_s26  ;;  %vm1809_vm8 = vmand %vm7421_vm6, %vm10968_vm15  ;;  %v6089_v35 = vsel %vm1808_vm12, 1.0, %v10681_v1  ;;  %v6453_v26 = vpack.i.bf16 %v6084_v12, %v6083_v32  ;;  %v677_v32 = vadd.s32 4294967295, %v6883_v14  ;;  %v674_v14 = vadd.s32 4294967295, %v6887_v16 }
  0x74   : > { %v6090_v5 = vsel %vm1809_vm8, 1.0, %v10681_v1  ;;  %vm1806_vm11 = vmand %vm7435_vm5, %vm10969_vm14  ;;  %vm10973_vm14 = vnez %v10909_v49 }
  0x75   : > { %6444 = vrot.lane.b32.xlu0 %v6443_v9, %s6663_s26  ;;  %vm1807_vm13 = vmand %vm7443_vm2, %vm10970_vm9  ;;  %v6087_v27 = vsel %vm1806_vm11, 1.0, %v10681_v1  ;;  %v6468_v20 = vpack.i.bf16 %v6090_v5, %v6089_v35  ;;  %s6666_s26 = smov 72  }
  0x76   : > { %v6088_v19 = vsel %vm1807_vm13, 1.0, %v10681_v1  ;;  %vm7477_vm8 = vmand %vm7303_vm7, %vm7210_vm1  ;;  %vm10976_vm13 = vcmp.le.s32.totalorder %v6899_v23, 7 }
  0x77   : > { %6459 = vrot.lane.b32.xlu1 %v6458_v15, %s10737_s29  ;;  %vm7486_vm12 = vmand %vm7308_vm3, %vm10973_vm14  ;;  %v6463_v40 = vpack.i.bf16 %v6088_v19, %v6087_v27  ;;  %vm10978_vm3 = vnez %v10915_v18  ;;  %v6073_v16 = vsel %vm7477_vm8, 1.0, %v10681_v1 }
  0x78   : > { %vm1582_vm11 = vmand %vm7477_vm8, %vm10976_vm13  ;;  %vm10981_vm13 = vnez %v10917_v21  ;;  %v6074_v28 = vsel %vm7486_vm12, 1.0, %v10681_v1 }
  0x79   : > { %6454 = vrot.lane.b32.xlu0 %v6453_v26, %s10737_s29  ;;  %vm10977_vm7 = vmmov %vm10968_vm15  ;;  %v6077_v31 = vsel %vm1582_vm11, 1.0, %v10681_v1  ;;  %vm10984_vm11 = vcmp.le.s32.totalorder %v6969_v39, 7  ;;  %s10821_s29 = smov 54  }
  0x7a   : > { %vm1583_vm15 = vmand %vm7486_vm12, %vm10977_vm7 }
  0x7b   : > { %v6078_v53 = vsel %vm1583_vm15, 1.0, %v10681_v1  ;;  %vm7505_vm9 = vmand %vm7343_vm4, %vm10978_vm3  ;;  %6469 = vrot.lane.b32.xlu1 %v6468_v20, %s6664_s24  ;;  %vm10985_vm4 = vcmp.le.s32.totalorder %v6980_v42, 7  ;;  %v10993_v20 = vmov 0 }
  0x7c   : > { %v6478_v38 = vpack.i.bf16 %v6078_v53, %v6077_v31  ;;  %vm7513_vm7 = vmand %vm7347_vm10, %vm10981_vm13  ;;  %vm10986_vm10 = vcmp.ge.s32.totalorder %v7068_v6, 0  ;;  %v6071_v19 = vsel %vm7505_vm9, 1.0, %v10681_v1  ;;  %v10995_v31 = vmov 0 }
  0x7d   : > { %vm1580_vm15 = vmand %vm7505_vm9, %vm10984_vm11  ;;  %6464 = vrot.lane.b32.xlu0 %v6463_v40, %s6664_s24  ;;  %vm10987_vm11 = vcmp.ge.s32.totalorder %v7080_v10, 0  ;;  %v6072_v41 = vsel %vm7513_vm7, 1.0, %v10681_v1  ;;  %s10795_s24 = smov 64   ;;  %v6508_v40 = vpack.i.bf16 %v6074_v28, %v6073_v16 }
  0x7e   : > { %vm1581_vm3 = vmand %vm7513_vm7, %vm10985_vm4  ;;  %v6075_v63 = vsel %vm1580_vm15, 1.0, %v10681_v1  ;;  %vm10989_vm15 = vcmp.ge.s32.totalorder %v7107_v11, 0  ;;  %v6503_v34 = vpack.i.bf16 %v6072_v41, %v6071_v19 }
  0x7f   : > { %v6076_v58 = vsel %vm1581_vm3, 1.0, %v10681_v1  ;;  %vm1662_vm13 = vmand %vm7413_vm0, %vm10986_vm10  ;;  %6479 = vrot.lane.b32.xlu1 %v6478_v38, %s6665_s25  ;;  %vm10988_vm3 = vcmp.ge.s32.totalorder %v7096_v4, 0 }
  0x80   : > { %v6473_v37 = vpack.i.bf16 %v6076_v58, %v6075_v63  ;;  %vm1663_vm14 = vmand %vm7421_vm6, %vm10987_vm11  ;;  %v6081_v9 = vsel %vm1662_vm13, 1.0, %v10681_v1  ;;  %vm680_vm13 = vcmp.ge.s32.totalorder %v676_v3, 0  ;;  %v11003_v63 = vmov 0 }
  0x81   : > { %v6082_v12 = vsel %vm1663_vm14, 1.0, %v10681_v1  ;;  %vm1660_vm0 = vmand %vm7435_vm5, %vm10988_vm3  ;;  %v11005_v58 = vmov 0 }
  0x82   : > { %6474 = vrot.lane.b32.xlu0 %v6473_v37, %s6665_s25  ;;  %v6488_v13 = vpack.i.bf16 %v6082_v12, %v6081_v9  ;;  %vm1661_vm4 = vmand %vm7443_vm2, %vm10989_vm15  ;;  %v6079_v36 = vsel %vm1660_vm0, 1.0, %v10681_v1  ;;  %vm685_vm15 = vcmp.le.s32.totalorder %v677_v32, 7  ;;  %s6668_s25 = smov 65  }
  0x83   : > { %v6080_v54 = vsel %vm1661_vm4, 1.0, %v10681_v1  ;;  %vm10990_vm6 = vmmov %vm10986_vm10  ;;  %vm681_vm10 = vcmp.ge.s32.totalorder %v677_v32, 0  ;;  %vm10992_vm4 = vcmp.ge.s32.totalorder %v7107_v11, 0 }
  0x84   : > { %vm1436_vm14 = vmand %vm7477_vm8, %vm10990_vm6  ;;  %6489 = vrot.lane.b32.xlu1 %v6488_v13, %s6666_s26  ;;  %v6483_v15 = vpack.i.bf16 %v6080_v54, %v6079_v36 }
  0x85   : > { %vm10991_vm5 = vmmov %vm10987_vm11  ;;  %v6069_v7 = vsel %vm1436_vm14, 1.0, %v10681_v1  ;;  %vm684_vm11 = vcmp.le.s32.totalorder %v676_v3, 7  ;;  %vm682_vm14 = vcmp.le.s32.totalorder %v674_v14, 7 }
  0x86   : > { %vm1437_vm2 = vmand %vm7486_vm12, %vm10991_vm5  ;;  %6484 = vrot.lane.b32.xlu0 %v6483_v15, %s6666_s26  ;;  %vm10997_vm5 = vnez %v10882_v55  ;;  %s10836_s26 = smov 110  }
  0x87   : > { %v6070_v35 = vsel %vm1437_vm2, 1.0, %v10681_v1  ;;  %vm1434_vm0 = vmand %vm7505_vm9, %vm10988_vm3  ;;  %vm678_vm9 = vcmp.ge.s32.totalorder %v674_v14, 0  ;;  %vm683_vm2 = vcmp.le.s32.totalorder %v675_v61, 7 }
  0x88   : > { %v6498_v5 = vpack.i.bf16 %v6070_v35, %v6069_v7  ;;  %vm1435_vm6 = vmand %vm7513_vm7, %vm10992_vm4  ;;  %v6067_v26 = vsel %vm1434_vm0, 1.0, %v10681_v1 }
  0x89   : > { %v6068_v27 = vsel %vm1435_vm6, 1.0, %v10681_v1  ;;  %vm7584_vm8 = vmand %vm680_vm13, %vm684_vm11  ;;  %vm679_vm13 = vcmp.ge.s32.totalorder %v675_v61, 0  ;;  %vm11010_vm6 = vnez %v10892_v0 }
  0x8a   : > { %v10994_v20 = vsel %vm7584_vm8, 4294967295, %v10993_v20  ;;  %6499 = vrot.lane.b32.xlu1 %v6498_v5, %s10795_s24  ;;  %v6493_v44 = vpack.i.bf16 %v6068_v27, %v6067_v26  ;;  %vm7590_vm12 = vmand %vm681_vm10, %vm685_vm15  ;;  %vm11000_vm10 = vnez %v10884_v57  ;;  %vm11007_vm15 = vnez %v10890_v62 }
  0x8b   : > { %v10996_v31 = vsel %vm7590_vm12, 4294967295, %v10995_v31  ;;  %vm7598_vm7 = vmand %vm7584_vm8, %vm10997_vm5  ;;  %v11029_v26 = vmov 0 }
  0x8c   : > { %6494 = vrot.lane.b32.xlu0 %v6493_v44, %s10795_s24  ;;  %vm7607_vm11 = vmand %vm7590_vm12, %vm11000_vm10  ;;  %v6061_v55 = vsel %vm7598_vm7, 1.0, %v10681_v1  ;;  %vm11015_vm10 = vcmp.le.s32.totalorder %v6969_v39, 7 }
  0x8d   : > { %v6062_v47 = vsel %vm7607_vm11, 1.0, %v10681_v1  ;;  %vm7617_vm3 = vmand %vm678_vm9, %vm682_vm14  ;;  %vm11013_vm14 = vcmp.le.s32.totalorder %v6899_v23, 7 }
  0x8e   : > { %v11004_v63 = vsel %vm7617_vm3, 4294967295, %v11003_v63  ;;  %6509 = vrot.lane.b32.xlu1 %v6508_v40, %s6668_s25  ;;  %v6518_v57 = vpack.i.bf16 %v6062_v47, %v6061_v55  ;;  %vm7621_vm0 = vmand %vm679_vm13, %vm683_vm2  ;;  %vm11014_vm13 = vcmp.le.s32.totalorder %v6903_v24, 7 }
  0x8f   : > { %v11006_v58 = vsel %vm7621_vm0, 4294967295, %v11005_v58  ;;  %vm7629_vm4 = vmand %vm7617_vm3, %vm11007_vm15 }
  0x90   : > { %6504 = vrot.lane.b32.xlu0 %v6503_v34, %s6668_s25  ;;  %vm7637_vm9 = vmand %vm7621_vm0, %vm11010_vm6  ;;  %v6059_v9 = vsel %vm7629_vm4, 1.0, %v10681_v1  ;;  %vm11016_vm6 = vcmp.le.s32.totalorder %v6980_v42, 7  ;;  %s10832_s25 = smov 112  }
  0x91   : > { %v6060_v62 = vsel %vm7637_vm9, 1.0, %v10681_v1  ;;  %vm1361_vm5 = vmand %vm7598_vm7, %vm11013_vm14 }
  0x92   : > { %6519 = vrot.lane.b32.xlu1 %v6518_v57, %s10712_s0  ;;  %v6513_v0 = vpack.i.bf16 %v6060_v62, %v6059_v9  ;;  %vm1362_vm2 = vmand %vm7607_vm11, %vm11014_vm13  ;;  %v6065_v32 = vsel %vm1361_vm5, 1.0, %v10681_v1  ;;  %vm11017_vm5 = vnez %v10857_v25 }
  0x93   : > { %v6066_v12 = vsel %vm1362_vm2, 1.0, %v10681_v1  ;;  %vm1359_vm15 = vmand %vm7629_vm4, %vm11015_vm10  ;;  %vm11020_vm2 = vnez %v10863_v30 }
  0x94   : > { %6514 = vrot.lane.b32.xlu0 %v6513_v0, %s10712_s0  ;;  %v6528_v13 = vpack.i.bf16 %v6066_v12, %v6065_v32  ;;  %vm1360_vm14 = vmand %vm7637_vm9, %vm11016_vm6  ;;  %v6063_v36 = vsel %vm1359_vm15, 1.0, %v10681_v1  ;;  %vm11023_vm15 = vcmp.le.s32.totalorder %v6899_v23, 7  ;;  %s10740_s0 = smov 120  }
  0x95   : > { %v6064_v54 = vsel %vm1360_vm14, 1.0, %v10681_v1  ;;  %vm7673_vm13 = vmand %vm7584_vm8, %vm11017_vm5  ;;  %vm11024_vm14 = vcmp.le.s32.totalorder %v6903_v24, 7  ;;  %vm11035_vm8 = vcmp.le.s32.totalorder %v6969_v39, 7 }
  0x96   : > { %6529 = vrot.lane.b32.xlu1 %v6528_v13, %s10721_s19  ;;  %v6523_v61 = vpack.i.bf16 %v6064_v54, %v6063_v36  ;;  %vm7682_vm10 = vmand %vm7590_vm12, %vm11020_vm2  ;;  %v7689_v25 = vsel %vm7673_vm13, 1.0, %v10681_v1  ;;  %vm11025_vm2 = vnez %v10873_v46  ;;  %vm11028_vm12 = vnez %v10875_v48 }
  0x97   : > { %vm1134_vm6 = vmand %vm7673_vm13, %vm11023_vm15  ;;  %v7698_v30 = vsel %vm7682_vm10, 1.0, %v10681_v1  ;;  %v11033_v46 = vmov 0 }
  0x98   : > { %6524 = vrot.lane.b32.xlu0 %v6523_v61, %s10721_s19  ;;  %vm1135_vm5 = vmand %vm7682_vm10, %vm11024_vm14  ;;  %v6053_v7 = vsel %vm1134_vm6, 1.0, %v10681_v1  ;;  %v6568_v35 = vpack.i.bf16 %v7698_v30, %v7689_v25  ;;  %vm646_vm6 = vcmask 1044040   ;;  %s10748_s19 = smov 127  }
  0x99   : > { %v6054_v16 = vsel %vm1135_vm5, 1.0, %v10681_v1  ;;  %vm7713_vm15 = vmand %vm7617_vm3, %vm11025_vm2  ;;  %vm11031_vm5 = vcmp.ge.s32.totalorder %v7080_v10, 0  ;;  %vm11032_vm2 = vnez %v10913_v17 }
  0x9a   : > { %v6538_v5 = vpack.i.bf16 %v6054_v16, %v6053_v7  ;;  %vm7721_vm14 = vmand %vm7621_vm0, %vm11028_vm12  ;;  %v7728_v27 = vsel %vm7713_vm15, 1.0, %v10681_v1  ;;  %vm11036_vm0 = vcmp.le.s32.totalorder %v6980_v42, 7 }
  0x9b   : > { %v11030_v26 = vsel %vm7721_vm14, 4294967295, %v11029_v26  ;;  %vm7734_vm3 = vmand %vm11032_vm2, %vm11031_vm5  ;;  %v6048_v48 = vsel %vm7721_vm14, 1.0, %v10681_v1  ;;  %vm11038_vm2 = vcmp.ge.s32.totalorder %v7080_v10, 0 }
  0x9c   : > { %v11034_v46 = vsel %vm7734_vm3, 4294967295, %v11033_v46  ;;  %vm1132_vm12 = vmand %vm7713_vm15, %vm11035_vm8  ;;  %6539 = vrot.lane.b32.xlu1 %v6538_v5, %s10677_s30  ;;  %v6563_v19 = vpack.i.bf16 %v6048_v48, %v7728_v27  ;;  %vm11037_vm8 = vcmp.ge.s32.totalorder %v7068_v6, 0  ;;  %vm651_vm3 = vcmask 592896  }
  0x9d   : > { %vm1133_vm1 = vmand %vm7721_vm14, %vm11036_vm0  ;;  %v6051_v17 = vsel %vm1132_vm12, 1.0, %v10681_v1  ;;  %v634_v41 = vpop.permute.xlu0 %633  ;;  %v630_v44 = vpop.permute.xlu1 %629  ;;  %vm10783_vm12 = vcmask 596992  }
  0x9e   : > { %v6052_v40 = vsel %vm1133_vm1, 1.0, %v10681_v1  ;;  %vm1214_vm5 = vmand %vm7598_vm7, %vm11037_vm8  ;;  %647 = vst.msk [vmem:[#allocation2] sm:$0xf] %vm646_vm6, %v630_v44  ;;  %vm11039_vm1 = vcmp.ge.s32.totalorder %v7096_v4, 0  ;;  %vm11040_vm7 = vcmp.ge.s32.totalorder %v7107_v11, 0 }
  0x9f   : > { %v6533_v34 = vpack.i.bf16 %v6052_v40, %v6051_v17  ;;  %vm1215_vm0 = vmand %vm7607_vm11, %vm11038_vm2  ;;  %v6057_v55 = vsel %vm1214_vm5, 1.0, %v10681_v1  ;;  %vm11045_vm5 = vnez %v11030_v26 }
  0xa0   : > { %v6058_v47 = vsel %vm1215_vm0, 1.0, %v10681_v1  ;;  %vm1212_vm14 = vmand %vm7629_vm4, %vm11039_vm1  ;;  %vm11047_vm0 = vnez %v10994_v20 }
  0xa1   : > { %6534 = vrot.lane.b32.xlu0 %v6533_v34, %s10677_s30  ;;  %v6548_v53 = vpack.i.bf16 %v6058_v47, %v6057_v55  ;;  %vm1213_vm6 = vmand %vm7637_vm9, %vm11040_vm7  ;;  %v6055_v38 = vsel %vm1212_vm14, 1.0, %v10681_v1  ;;  %v636_v57 = vpop.permute.xlu1 %635  ;;  %v632_v9 = vpop.permute.xlu0 %631  ;;  %s10825_s30 = smov 119  }
  0xa2   : > { %v6056_v62 = vsel %vm1213_vm6, 1.0, %v10681_v1  ;;  %vm11041_vm11 = vmmov %vm11037_vm8  ;;  %v640_v3 = vsel %vm10783_vm12, %v634_v41, %v636_v57  ;;  %652 = vst.msk [vmem:[#allocation2 + $0x20] sm:$0xf] %vm651_vm3, %v636_v57  ;;  %v638_v0 = vsel %vm10783_vm12, %v630_v44, %v632_v9  ;;  %v639_v32 = vsel %vm10783_vm12, %v632_v9, %v634_v41 }
  0xa3   : > { %vm987_vm8 = vmand %vm7673_vm13, %vm11041_vm11  ;;  %6549 = vrot.lane.b32.xlu1 %v6548_v53, %s10707_s1  ;;  %v6543_v37 = vpack.i.bf16 %v6056_v62, %v6055_v38  ;;  %650 = vst [vmem:[#allocation2 + $0x18] sm:$0xf] %v640_v3  ;;  %vm11053_vm6 = vnez %v10996_v31 }
  0xa4   : > { %vm11042_vm4 = vmmov %vm11038_vm2  ;;  %v6045_v12 = vsel %vm987_vm8, 1.0, %v10681_v1  ;;  %648 = vst [vmem:[#allocation2 + $0x8] sm:$0xf] %v638_v0  ;;  %vm11046_vm2 = vnez %v10907_v8  ;;  %vm11056_vm8 = vnez %v10915_v18 }
  0xa5   : > { %vm988_vm9 = vmand %vm7682_vm10, %vm11042_vm4  ;;  %649 = vst [vmem:[#allocation2 + $0x10] sm:$0xf] %v639_v32  ;;  %6544 = vrot.lane.b32.xlu0 %v6543_v37, %s10707_s1  ;;  %vm11057_vm4 = vnez %v11004_v63  ;;  %v8108_v2 = vld [vmem:[#allocation2] sm:$0xf]  ;;  %s10830_s1 = smov 118  }
  0xa6   : > { %v6046_v13 = vsel %vm988_vm9, 1.0, %v10681_v1  ;;  %vm11043_vm3 = vmmov %vm11039_vm1 }
  0xa7   : > { %vm985_vm13 = vmand %vm7713_vm15, %vm11043_vm3  ;;  %v6558_v36 = vpack.i.bf16 %v6046_v13, %v6045_v12  ;;  %vm11050_vm15 = vnez %v11034_v46  ;;  %vm11060_vm3 = vnez %v10917_v21  ;;  %v822_v21 = vld [vmem:[#allocation2] sm:$0xf] }
  0xa8   : > { %vm11044_vm14 = vmmov %vm11040_vm7  ;;  %v6043_v54 = vsel %vm985_vm13, 1.0, %v10681_v1  ;;  %v7810_v15 = vsel %vm11050_vm15, 1.0, %v10681_v1  ;;  %vm11052_vm7 = vnez %v10909_v49  ;;  %vm11061_vm13 = vnez %v11006_v58 }
  0xa9   : > { %vm986_vm10 = vmand %vm11045_vm5, %vm11044_vm14  ;;  %11051 = vst [vmem:[#allocation9_spill] sm:$0xff] %v7810_v15  ;;  %6559 = vrot.lane.b32.xlu1 %v6558_v36, %s10728_s20  ;;  %v2123_v5 = vld [vmem:[#allocation2 + $0x20] sm:$0xf]  ;;  %vm11064_vm5 = vcmp.ge.s32.totalorder %v7096_v4, 0  ;;  %vm11067_vm15 = vcmp.le.s32.totalorder %v6903_v24, 7 }
  0xaa   : > { %v6044_v14 = vsel %vm986_vm10, 1.0, %v10681_v1  ;;  %vm7803_vm1 = vmand %vm11047_vm0, %vm11046_vm2  ;;  %v2127_v31 = vmul.f32 %v7810_v15, %v2123_v5  ;;  %vm11066_vm2 = vcmp.le.s32.totalorder %v6899_v23, 7  ;;  %v2658_v38 = vld [vmem:[#allocation2 + $0x20] sm:$0xf] }
  0xab   : > { %v6553_v7 = vpack.i.bf16 %v6044_v14, %v6043_v54  ;;  %vm7817_vm11 = vmand %vm11053_vm6, %vm11052_vm7  ;;  %v6037_v20 = vsel %vm7803_vm1, 1.0, %v10681_v1  ;;  %vm11068_vm6 = vcmp.le.s32.totalorder %v6969_v39, 7  ;;  %v7885_v46 = vpop.permute.xlu1 %6349  ;;  %v2657_v54 = vld [vmem:[#allocation2 + $0x18] sm:$0xf]  ;;  %v7918_v14 = vld [vmem:[#allocation2 + $0x28] sm:$0xff] }
  0xac   : > { %v6038_v16 = vsel %vm7817_vm11, 1.0, %v10681_v1  ;;  %vm7832_vm9 = vmand %vm11057_vm4, %vm11056_vm8  ;;  %2131 = vst [vmem:[#allocation3 + $0x138] sm:$0xf] %v2127_v31  ;;  %vm11069_vm4 = vcmp.le.s32.totalorder %v6980_v42, 7  ;;  %v2656_v37 = vld [vmem:[#allocation2 + $0x10] sm:$0xf] }
  0xad   : > { %6554 = vrot.lane.b32.xlu0 %v6553_v7, %s10728_s20  ;;  %v6578_v28 = vpack.i.bf16 %v6038_v16, %v6037_v20  ;;  %6569 = vrot.lane.b32.xlu1 %v6568_v35, %s10731_s21  ;;  %vm7845_vm14 = vmand %vm11061_vm13, %vm11060_vm3  ;;  %v6035_v18 = vsel %vm7832_vm9, 1.0, %v10681_v1  ;;  %v8160_v15 = vld [vmem:[#allocation2 + $0x20] sm:$0xf]  ;;  %s10762_s20 = smov 47  }
  0xae   : > { %vm810_vm10 = vmand %vm7832_vm9, %vm11064_vm5  ;;  %v6036_v63 = vsel %vm7845_vm14, 1.0, %v10681_v1 }
  0xaf   : > { %v6573_v58 = vpack.i.bf16 %v6036_v63, %v6035_v18  ;;  %v7861_v25 = vsel %vm810_vm10, 1.0, %v10681_v1  ;;  %vm912_vm0 = vmand %vm7803_vm1, %vm11066_vm2  ;;  %vm1241_vm10 = vcmask 130048   ;;  %vm11081_vm2 = vcmp.ge.s32.totalorder %v7068_v6, 0 }
  0xb0   : > { %11065 = vst [vmem:[#allocation10_spill] sm:$0xff] %v7861_v25  ;;  %vm913_vm7 = vmand %vm7817_vm11, %vm11067_vm15  ;;  %v6041_v30 = vsel %vm912_vm0, 1.0, %v10681_v1  ;;  %v826_v35 = vmul.f32 %v7861_v25, %v822_v21  ;;  %vm11082_vm0 = vnez %v10911_v50  ;;  %v2120_v50 = vld [vmem:[#allocation2 + $0x8] sm:$0xf]  ;;  %v8164_v25 = vld [vmem:[#allocation2 + $0x20] sm:$0xf] }
  0xb1   : > { %6564 = vrot.lane.b32.xlu0 %v6563_v19, %s10731_s21  ;;  %6579 = vrot.lane.b32.xlu1 %v6578_v28, %s10696_s22  ;;  %v6042_v27 = vsel %vm913_vm7, 1.0, %v10681_v1  ;;  %vm910_vm8 = vmand %vm7832_vm9, %vm11068_vm6  ;;  %vm11071_vm9 = vcmask 146432   ;;  %vm11086_vm7 = vcmp.ge.s32.totalorder %v7096_v4, 0  ;;  %vm11087_vm6 = vnez %v10919_v22  ;;  %s10760_s21 = smov 46  }
  0xb2   : > { %v6588_v23 = vpack.i.bf16 %v6042_v27, %v6041_v30  ;;  %vm911_vm3 = vmand %vm7845_vm14, %vm11069_vm4  ;;  %v6039_v24 = vsel %vm910_vm8, 1.0, %v10681_v1  ;;  %830 = vst [vmem:[#allocation3] sm:$0xf] %v826_v35  ;;  %v2655_v30 = vld [vmem:[#allocation2 + $0x8] sm:$0xf]  ;;  %vm1312_vm4 = vcmask 138240  }
  0xb3   : > { %v6040_v48 = vsel %vm911_vm3, 1.0, %v10681_v1  ;;  %v7890_v17 = vpop.permute.xlu0 %6344  ;;  %vm11073_vm13 = vmmov %vm11071_vm9  ;;  %v2513_v27 = vld [vmem:[#allocation2 + $0x10] sm:$0xf]  ;;  %vm11090_vm3 = vcmp.ge.s32.totalorder %v7107_v11, 0 }
  0xb4   : > { %v6583_v39 = vpack.i.bf16 %v6040_v48, %v6039_v24  ;;  %vm11075_vm5 = vmmov %vm11071_vm9  ;;  %v2367_v48 = vld [vmem:[#allocation2 + $0x18] sm:$0xf] }
  0xb5   : > { %6574 = vrot.lane.b32.xlu0 %v6573_v58, %s10696_s22  ;;  %6589 = vrot.lane.b32.xlu1 %v6588_v23, %s10708_s23  ;;  %vm7940_vm15 = vmand %vm11082_vm0, %vm11081_vm2  ;;  %vm1161_vm0 = vcmask 80896   ;;  %v8106_v23 = vld [vmem:[#allocation2] sm:$0xf]  ;;  %s10834_s22 = smov 111  }
  0xb6   : > { %vm7954_vm8 = vmand %vm11087_vm6, %vm11086_vm7  ;;  %vm11099_vm7 = vcmp.ge.s32.totalorder %v7080_v10, 0 }
  0xb7   : > { %v7892_v19 = vpop.permute.xlu1 %6359  ;;  %vm7994_vm6 = vmand %vm7817_vm11, %vm11099_vm7  ;;  %v8011_v8 = vsel %vm7954_vm8, 1.0, %v10681_v1  ;;  %vm1014_vm8 = vcmask 64512   ;;  %vm1689_vm7 = vcmask 588800  }
  0xb8   : > { %v10679_v18 = vunpack.i.l.bf16 %v7892_v19  ;;  %11104 = vst [vmem:[#allocation24_spill] sm:$0xff] %v8011_v8  ;;  %vm11105_vm11 = vmmov %vm11090_vm3 }
  0xb9   : > { %6584 = vrot.lane.b32.xlu0 %v6583_v39, %s10708_s23  ;;  %v7988_v39 = vsel %vm7940_vm15, 1.0, %v10681_v1  ;;  %vm8017_vm15 = vmand %vm7845_vm14, %vm11105_vm11  ;;  %vm939_vm14 = vcmask 15360   ;;  %s10752_s23 = smov 126   ;;  %vm1609_vm11 = vcmask 539648  }
  0xba   : > { %11098 = vst [vmem:[#allocation21_spill] sm:$0xff] %v7988_v39 }
  0xbb   : > { %v6355_v42 = vpop.permute.xlu0 %6354 }
  0xbc   : > { %v6357_v63 = vunpack.i.h.bf16 %v6355_v42  ;;  %v7945_v21 = vunpack.i.l.bf16 %v6355_v42  ;;  %v2514_v42 = vld [vmem:[#allocation2 + $0x18] sm:$0xf] }
  0xbd   : > { %v6370_v41 = vpop.permute.xlu1 %6369 }
  0xbe   : > { %v6372_v44 = vunpack.i.h.bf16 %v6370_v41  ;;  %v6371_v40 = vunpack.i.l.bf16 %v6370_v41  ;;  %11085 = vst [vmem:[#allocation19_spill] sm:$0xff] %v7945_v21  ;;  %v8002_v41 = vsel %vm1312_vm4, %v6357_v63, %v10679_v18  ;;  %v8006_v10 = vsel %vm1312_vm4, %v7945_v21, %v6357_v63  ;;  %v2122_v18 = vld [vmem:[#allocation2 + $0x18] sm:$0xf] }
  0xbf   : > { %v6365_v34 = vpop.permute.xlu0 %6364  ;;  %11102 = vst [vmem:[#allocation22_spill] sm:$0xff] %v8002_v41  ;;  %11103 = vst [vmem:[#allocation23_spill] sm:$0xff] %v8006_v10 }
  0xc0   : > { %v6367_v55 = vunpack.i.h.bf16 %v6365_v34  ;;  %v7894_v47 = vunpack.i.l.bf16 %v6365_v34  ;;  %v2684_v53 = vmul.f32 %v6372_v44, %v7160_v43  ;;  %v7898_v57 = vsel %vm11071_vm9, %v6371_v40, %v6372_v44 }
  0xc1   : > { %11072 = vst [vmem:[#allocation12_spill] sm:$0xff] %v7898_v57  ;;  %v7900_v9 = vpop.permute.xlu1 %6379  ;;  %v2683_v62 = vmul.f32 %v7898_v57, %v2658_v38  ;;  %v7925_v28 = vmul.f32 %v6372_v44, %v7918_v14  ;;  %vm11091_vm9 = vnez %v10922_v29  ;;  %v2581_v38 = vld [vmem:[#allocation2 + $0x8] sm:$0xf]  ;;  %v8150_v57 = vld [vmem:[#allocation2 + $0x20] sm:$0xf] }
  0xc2   : > { %11070 = vst [vmem:[#allocation11_spill] sm:$0xff] %v7894_v47  ;;  %2698 = vrot.lane.b32.xlu0 %v2684_v53, %s10836_s26  ;;  %v7906_v3 = vsel %vm11073_vm13, %v7894_v47, %v6367_v55  ;;  %v7909_v0 = vsel %vm11075_vm5, %v6367_v55, %v6371_v40  ;;  %v7912_v43 = vunpack.i.h.bf16 %v7900_v9  ;;  %v10680_v7 = vunpack.i.l.bf16 %v7900_v9  ;;  %vm7963_vm13 = vmand %vm11091_vm9, %vm11090_vm3  ;;  %v2512_v53 = vld [vmem:[#allocation2 + $0x8] sm:$0xf] }
  0xc3   : > { %11074 = vst [vmem:[#allocation13_spill] sm:$0xff] %v7906_v3  ;;  %11076 = vst [vmem:[#allocation14_spill] sm:$0xff] %v7909_v0  ;;  %v6375_v32 = vpop.permute.xlu0 %6374  ;;  %2696 = vrot.lane.b32.xlu1 %v2683_v62, %s10836_s26  ;;  %v2681_v36 = vmul.f32 %v7906_v3, %v2656_v37  ;;  %v2682_v16 = vmul.f32 %v7909_v0, %v2657_v54  ;;  %v2680_v35 = vmul.f32 %v7894_v47, %v2655_v30  ;;  %v2583_v37 = vld [vmem:[#allocation2 + $0x18] sm:$0xf]  ;;  %v2121_v30 = vld [vmem:[#allocation2 + $0x10] sm:$0xf] }
  0xc4   : > { %v6377_v12 = vunpack.i.h.bf16 %v6375_v32  ;;  %v7915_v13 = vunpack.i.l.bf16 %v6375_v32  ;;  %11078 = vst [vmem:[#allocation16_spill] sm:$0xff] %v7925_v28  ;;  %v7929_v5 = vmul.f32 %v7912_v43, %v7918_v14  ;;  %vm11095_vm5 = vmmov %vm11081_vm2  ;;  %v8027_v62 = vsel %vm7963_vm13, 1.0, %v10681_v1  ;;  %v8121_v47 = vld [vmem:[#allocation2] sm:$0xf] }
  0xc5   : > { %v7921_v20 = vpop.permute.xlu1 %6389  ;;  %vm7979_vm2 = vmand %vm7803_vm1, %vm11095_vm5  ;;  %vm1090_vm1 = vcmask 72704   ;;  %11109 = vst [vmem:[#allocation26_spill] sm:$0xff] %v8027_v62  ;;  %v2608_v31 = vmul.f32 %v8002_v41, %v2583_v37  ;;  %v8119_v41 = vld [vmem:[#allocation2] sm:$0xf]  ;;  %vm10767_vm3 = vcmask 7168   ;;  %vm1986_vm9 = vcmask 662528  }
  0xc6   : > { %11077 = vst [vmem:[#allocation15_spill] sm:$0xff] %v7915_v13  ;;  %11079 = vst [vmem:[#allocation17_spill] sm:$0xff] %v7929_v5  ;;  %2692 = vrot.lane.b32.xlu0 %v2681_v36, %s10836_s26  ;;  %v7934_v49 = vsel %vm1241_vm10, %v7915_v13, %v6377_v12  ;;  %v7973_v22 = vsel %vm1241_vm10, %v6377_v12, %v10680_v7  ;;  %v8032_v11 = vsel %vm7979_vm2, 1.0, %v10681_v1  ;;  %v2582_v36 = vld [vmem:[#allocation2 + $0x10] sm:$0xf]  ;;  %vm2057_vm13 = vcmask 670720  }
  0xc7   : > { %11080 = vst [vmem:[#allocation18_spill] sm:$0xff] %v7934_v49  ;;  %v7947_v58 = vpop.permute.xlu0 %6384  ;;  %2694 = vrot.lane.b32.xlu1 %v2682_v16, %s10836_s26  ;;  %v2538_v4 = vmul.f32 %v7934_v49, %v2513_v27  ;;  %11094 = vst [vmem:[#allocation20_spill] sm:$0xff] %v7973_v22  ;;  %v2539_v55 = vmul.f32 %v7973_v22, %v2514_v42  ;;  %v2537_v32 = vmul.f32 %v7915_v13, %v2512_v53  ;;  %v8094_v7 = vld [vmem:[#allocation2] sm:$0xf]  ;;  %vm1910_vm5 = vcmask 654336  }
  0xc8   : > { %v8038_v12 = vmul.f32 %v7945_v21, %v2581_v38  ;;  %v8052_v63 = vmul.f32 %v8006_v10, %v2582_v36  ;;  %v8062_v27 = vsel %vm8017_vm15, 1.0, %v10681_v1  ;;  %v8071_v42 = vunpack.i.l.bf16 %v7890_v17  ;;  %v2365_v36 = vld [vmem:[#allocation2 + $0x8] sm:$0xf]  ;;  %v8114_v13 = vld [vmem:[#allocation2] sm:$0xf]  ;;  %11119 = vst [vmem:[#allocation36_spill] sm:$0xff] %v8119_v41 }
  0xc9   : > { %v7967_v24 = vpop.permute.xlu1 %6399  ;;  %v2125_v38 = vmul.f32 %v8027_v62, %v2121_v30  ;;  %v2436_v30 = vld [vmem:[#allocation2 + $0x18] sm:$0xf]  ;;  %11117 = vst [vmem:[#allocation34_spill] sm:$0xff] %v8114_v13  ;;  %v2126_v49 = vmul.f32 %v7988_v39, %v2122_v18  ;;  %11120 = vst [vmem:[#allocation37_spill] sm:$0xff] %v8121_v47  ;;  %v11121_v22 = vunpack.i.l.bf16 %v7885_v46  ;;  %v8135_v18 = vld [vmem:[#allocation2] sm:$0xf] }
  0xca   : > { %v10678_v29 = vunpack.i.l.bf16 %v7967_v24  ;;  %2690 = vrot.lane.b32.xlu0 %v2680_v35, %s10836_s26  ;;  %v8057_v35 = vsel %vm7994_vm6, 1.0, %v10681_v1  ;;  %11112 = vst [vmem:[#allocation29_spill] sm:$0xff] %v8071_v42  ;;  %v8096_v1 = vld [vmem:[#allocation2] sm:$0xf]  ;;  %11125 = vst [vmem:[#allocation41_spill] sm:$0xff] %v8135_v18  ;;  %v11134_v47 = vmov 0.0  }
  0xcb   : > { %v6395_v61 = vpop.permute.xlu0 %6394  ;;  %2549 = vrot.lane.b32.xlu1 %v2538_v4, %s10832_s25  ;;  %v8066_v4 = vunpack.i.h.bf16 %v7967_v24  ;;  %2129 = vst [vmem:[#allocation3 + $0x128] sm:$0xf] %v2125_v38  ;;  %v8133_v38 = vld [vmem:[#allocation2] sm:$0xf]  ;;  %2130 = vst [vmem:[#allocation3 + $0x130] sm:$0xf] %v2126_v49 }
  0xcc   : > { %v6397_v40 = vunpack.i.h.bf16 %v6395_v61  ;;  %v8021_v34 = vunpack.i.l.bf16 %v6395_v61  ;;  %v6347_v61 = vunpack.i.h.bf16 %v7890_v17  ;;  %v2618_v17 = vrot.slane %v2608_v31, 4  ;;  %v8100_v31 = vld [vmem:[#allocation2] sm:$0xf]  ;;  %11124 = vst [vmem:[#allocation40_spill] sm:$0xff] %v8133_v38 }
  0xcd   : > { %v8034_v26 = vpop.permute.xlu1 %6409  ;;  %v8084_v37 = vmul.f32 %v8066_v4, %v7918_v14  ;;  %v8154_v49 = vld [vmem:[#allocation2 + $0x20] sm:$0xf]  ;;  %vm1835_vm2 = vcmask 605184   ;;  %vm10766_vm6 = vcmask 900096   ;;  %vm1538_vm15 = vcmask 531456  }
  0xce   : > { %11108 = vst [vmem:[#allocation25_spill] sm:$0xff] %v8021_v34  ;;  %2551 = vrot.lane.b32.xlu0 %v2539_v55, %s10832_s25  ;;  %v8044_v54 = vsel %vm1090_vm1, %v6397_v40, %v10678_v29  ;;  %v8048_v16 = vsel %vm1090_vm1, %v8021_v34, %v6397_v40  ;;  %v8074_v6 = vunpack.i.h.bf16 %v8034_v26  ;;  %v2366_v40 = vld [vmem:[#allocation2 + $0x10] sm:$0xf]  ;;  %v8104_v29 = vld [vmem:[#allocation2] sm:$0xf]  ;;  %v2390_v3 = vmul.f32 %v8021_v34, %v2365_v36 }
  0xcf   : > { %11110 = vst [vmem:[#allocation27_spill] sm:$0xff] %v8044_v54  ;;  %11111 = vst [vmem:[#allocation28_spill] sm:$0xff] %v8048_v16  ;;  %2547 = vrot.lane.b32.xlu1 %v2537_v32, %s10832_s25  ;;  %v2392_v44 = vmul.f32 %v8044_v54, %v2367_v48  ;;  %v8077_v55 = vpop.permute.xlu0 %6404  ;;  %v2391_v53 = vmul.f32 %v8048_v16, %v2366_v40  ;;  %v2124_v32 = vmul.f32 %v8011_v8, %v2120_v50  ;;  %v2435_v50 = vld [vmem:[#allocation2 + $0x10] sm:$0xf]  ;;  %v8102_v48 = vld [vmem:[#allocation2] sm:$0xf] }
  0xd0   : > { %11113 = vst [vmem:[#allocation30_spill] sm:$0xff] %v8084_v37  ;;  %v8091_v40 = vmul.f32 %v8074_v6, %v7918_v14  ;;  %v8110_v16 = vld [vmem:[#allocation2] sm:$0xf]  ;;  %v8127_v21 = vsel %vm1161_vm0, %v6347_v61, %v11121_v22  ;;  %v8131_v10 = vsel %vm1161_vm0, %v8071_v42, %v6347_v61 }
  0xd1   : > { %11115 = vst [vmem:[#allocation32_spill] sm:$0xff] %v8110_v16  ;;  %2128 = vst [vmem:[#allocation3 + $0x120] sm:$0xf] %v2124_v32  ;;  %v8117_v54 = vld [vmem:[#allocation2] sm:$0xf]  ;;  %v8139_v0 = vpop.permute.xlu1 %6419 }
  0xd2   : > { %2404 = vrot.lane.b32.xlu0 %v2392_v44, %s10825_s30  ;;  %11114 = vst [vmem:[#allocation31_spill] sm:$0xff] %v8091_v40  ;;  %v8098_v44 = vld [vmem:[#allocation2] sm:$0xf]  ;;  %11118 = vst [vmem:[#allocation35_spill] sm:$0xff] %v8117_v54  ;;  %v825_v16 = vld [vmem:[#allocation2 + $0x18] sm:$0xf] }
  0xd3   : > { %2402 = vrot.lane.b32.xlu1 %v2391_v53, %s10825_s30  ;;  %v8112_v53 = vld [vmem:[#allocation2] sm:$0xf]  ;;  %11122 = vst [vmem:[#allocation38_spill] sm:$0xff] %v8127_v21  ;;  %11123 = vst [vmem:[#allocation39_spill] sm:$0xff] %v8131_v10  ;;  %v6415_v13 = vpop.permute.xlu0 %6414 }
  0xd4   : > { %11116 = vst [vmem:[#allocation33_spill] sm:$0xff] %v8112_v53  ;;  %v8137_v32 = vld [vmem:[#allocation2] sm:$0xf]  ;;  %v8196_v53 = vunpack.i.h.bf16 %v8139_v0 }
  0xd5   : > { %11126 = vst [vmem:[#allocation42_spill] sm:$0xff] %v8137_v32  ;;  %v8142_v36 = vld [vmem:[#allocation2 + $0x20] sm:$0xf]  ;;  %2993 = vst [vmem:[#allocation2] sm:$0xff] %v11134_v47 }
  0xd6   : > { %2625 = vrot.lane.b32.xlu0 %v2618_v17, %s10834_s22  ;;  %v8144_v22 = vld [vmem:[#allocation2 + $0x20] sm:$0xf] }
  0xd7   : > { %v8146_v34 = vld [vmem:[#allocation2 + $0x20] sm:$0xf]  ;;  %2400 = vrot.lane.b32.xlu1 %v2390_v3, %s10825_s30  ;;  %v2434_v3 = vld [vmem:[#allocation2 + $0x8] sm:$0xf] }
  0xd8   : > { %v8148_v61 = vld [vmem:[#allocation2 + $0x20] sm:$0xf] }
  0xd9   : > { %v8152_v8 = vld [vmem:[#allocation2 + $0x20] sm:$0xf] }
  0xda   : > { %v8156_v39 = vld [vmem:[#allocation2 + $0x20] sm:$0xf] }
  0xdb   : > { %v8158_v62 = vld [vmem:[#allocation2 + $0x20] sm:$0xf] }
  0xdc   : > { %v8162_v17 = vld [vmem:[#allocation2 + $0x20] sm:$0xf] }
  0xdd   : > { %v8166_v40 = vld [vmem:[#allocation2 + $0x20] sm:$0xf] }
  0xde   : > { %v8168_v37 = vld [vmem:[#allocation2 + $0x20] sm:$0xf] }
  0xdf   : > { %11127 = vst [vmem:[#allocation43_spill] sm:$0xff] %v8168_v37  ;;  %v8170_v5 = vld [vmem:[#allocation2 + $0x20] sm:$0xf] }
  0xe0   : > { %11128 = vst [vmem:[#allocation44_spill] sm:$0xff] %v8170_v5  ;;  %v8172_v28 = vld [vmem:[#allocation2 + $0x20] sm:$0xf] }
  0xe1   : > { %11129 = vst [vmem:[#allocation45_spill] sm:$0xff] %v8172_v28  ;;  %v8174_v32 = vld [vmem:[#allocation2 + $0x20] sm:$0xf]  ;;  %v2461_v28 = vmul.f32 %v8127_v21, %v2436_v30  ;;  %v8202_v30 = vunpack.i.l.bf16 %v7947_v58  ;;  %v8204_v21 = vunpack.i.l.bf16 %v6415_v13 }
  0xe2   : > { %11130 = vst [vmem:[#allocation46_spill] sm:$0xff] %v8174_v32  ;;  %v8176_v38 = vld [vmem:[#allocation2 + $0x20] sm:$0xf]  ;;  %v2460_v32 = vmul.f32 %v8131_v10, %v2435_v50  ;;  %v6417_v50 = vunpack.i.h.bf16 %v6415_v13  ;;  %v11141_v10 = vrot.slane %v8038_v12, 4  ;;  %v10709_v12 = vunpack.i.l.bf16 %v8139_v0 }
  0xe3   : > { %11131 = vst [vmem:[#allocation47_spill] sm:$0xff] %v8176_v38  ;;  %v8178_v18 = vld [vmem:[#allocation2 + $0x20] sm:$0xf]  ;;  %11139 = vst [vmem:[#allocation54_spill] sm:$0xff] %v8202_v30  ;;  %v2471_v13 = vrot.slane %v2461_v28, 4  ;;  %v8229_v28 = vpop.permute.xlu1 %6429 }
  0xe4   : > { %11132 = vst [vmem:[#allocation48_spill] sm:$0xff] %v8178_v18  ;;  %v8180_v41 = vld [vmem:[#allocation2 + $0x20] sm:$0xf]  ;;  %v823_v18 = vld [vmem:[#allocation2 + $0x8] sm:$0xf]  ;;  %11140 = vst [vmem:[#allocation55_spill] sm:$0xff] %v8204_v21  ;;  %2621 = vrot.lane.b32.xlu0 %v11141_v10, %s10834_s22  ;;  %v10710_v10 = vunpack.i.l.bf16 %v7921_v20 }
  0xe5   : > { %11133 = vst [vmem:[#allocation49_spill] sm:$0xff] %v8180_v41  ;;  %v8184_v54 = vld [vmem:[#allocation2 + $0x20] sm:$0xf]  ;;  %v6387_v41 = vunpack.i.h.bf16 %v7947_v58  ;;  %v8215_v58 = vmul.f32 %v8196_v53, %v7918_v14 }
  0xe6   : > { %11135 = vst [vmem:[#allocation50_spill] sm:$0xff] %v8184_v54  ;;  %v8186_v37 = vld [vmem:[#allocation2 + $0x20] sm:$0xf]  ;;  %v824_v54 = vld [vmem:[#allocation2 + $0x10] sm:$0xf] }
  0xe7   : > { %11136 = vst [vmem:[#allocation51_spill] sm:$0xff] %v8186_v37  ;;  %v8188_v5 = vld [vmem:[#allocation2 + $0x20] sm:$0xf]  ;;  %v827_v37 = vmul.f32 %v8062_v27, %v823_v18  ;;  %v8227_v14 = vsel %vm1014_vm8, %v8202_v30, %v6387_v41  ;;  %v8236_v18 = vsel %vm939_vm14, %v6417_v50, %v10709_v12  ;;  %v8253_v12 = vpop.permute.xlu1 %6439 }
  0xe8   : > { %11137 = vst [vmem:[#allocation52_spill] sm:$0xff] %v8188_v5  ;;  %v8192_v38 = vld [vmem:[#allocation2 + $0x20] sm:$0xf]  ;;  %v829_v5 = vmul.f32 %v8057_v35, %v825_v16  ;;  %v2459_v16 = vmul.f32 %v8071_v42, %v2434_v3  ;;  %2478 = vrot.lane.b32.xlu0 %v2471_v13, %s10830_s1  ;;  %11144 = vst [vmem:[#allocation57_spill] sm:$0xff] %v8227_v14  ;;  %v8242_v3 = vsel %vm1014_vm8, %v6387_v41, %v10710_v10 }
  0xe9   : > { %11138 = vst [vmem:[#allocation53_spill] sm:$0xff] %v8192_v38  ;;  %2997 = vst [vmem:[#allocation2 + $0x20] sm:$0xff] %v11134_v47  ;;  %v828_v38 = vmul.f32 %v8032_v11, %v824_v54  ;;  %v11142_v47 = vrot.slane %v8052_v63, 4  ;;  %v2470_v54 = vrot.slane %v2460_v32, 4  ;;  %v2219_v63 = vld [vmem:[#allocation2 + $0x10] sm:$0xf]  ;;  %v8245_v13 = vunpack.i.h.bf16 %v7892_v19 }
  0xea   : > { %831 = vst [vmem:[#allocation3 + $0x8] sm:$0xf] %v827_v37  ;;  %833 = vst [vmem:[#allocation3 + $0x18] sm:$0xf] %v829_v5  ;;  %v2469_v5 = vrot.slane %v2459_v16, 4  ;;  %v8248_v16 = vpop.permute.xlu0 %6424  ;;  %v11147_v10 = vunpack.i.l.bf16 %v7900_v9  ;;  %v11153_v42 = vunpack.i.l.bf16 %v8034_v26 }
  0xeb   : > { %2623 = vrot.lane.b32.xlu1 %v11142_v47, %s10834_s22  ;;  %832 = vst [vmem:[#allocation3 + $0x10] sm:$0xf] %v828_v38  ;;  %v8223_v47 = vsel %vm939_vm14, %v8204_v21, %v6417_v50  ;;  %v2292_v37 = vld [vmem:[#allocation2 + $0x10] sm:$0xf]  ;;  %11145 = vst [vmem:[#allocation58_spill] sm:$0xff] %v8236_v18 }
  0xec   : > { %11143 = vst [vmem:[#allocation56_spill] sm:$0xff] %v8223_v47  ;;  %v2244_v38 = vmul.f32 %v8223_v47, %v2219_v63  ;;  %v2317_v32 = vmul.f32 %v8227_v14, %v2292_v37  ;;  %11146 = vst [vmem:[#allocation59_spill] sm:$0xff] %v8242_v3  ;;  %2474 = vrot.lane.b32.xlu0 %v2469_v5, %s10830_s1  ;;  %v2293_v50 = vld [vmem:[#allocation2 + $0x18] sm:$0xf]  ;;  %v8260_v5 = vsel %vm1241_vm10, %v11147_v10, %v7912_v43 }
  0xed   : > { %v2318_v37 = vmul.f32 %v8242_v3, %v2293_v50  ;;  %11148 = vst [vmem:[#allocation60_spill] sm:$0xff] %v8260_v5  ;;  %v8271_v50 = vpop.permute.xlu1 %6449  ;;  %v2540_v9 = vmul.f32 %v8260_v5, %v8142_v36  ;;  %v2610_v36 = vmul.f32 %v8245_v13, %v7169_v51 }
  0xee   : > { %v2327_v41 = vrot.slane %v2317_v32, 4 }
  0xef   : > { %2476 = vrot.lane.b32.xlu1 %v2470_v54, %s10830_s1  ;;  %v2220_v54 = vld [vmem:[#allocation2 + $0x18] sm:$0xf]  ;;  %v2328_v32 = vrot.slane %v2318_v37, 4  ;;  %v2541_v37 = vmul.f32 %v7912_v43, %v7162_v45  ;;  %v2620_v45 = vrot.slane %v2610_v36, 4  ;;  %v2218_v43 = vld [vmem:[#allocation2 + $0x8] sm:$0xf] }
  0xf0   : > { %v2245_v63 = vmul.f32 %v8236_v18, %v2220_v54  ;;  %v8268_v54 = vpop.permute.xlu0 %6434  ;;  %v2145_v18 = vld [vmem:[#allocation2 + $0x10] sm:$0xf]  ;;  %v2146_v36 = vld [vmem:[#allocation2 + $0x18] sm:$0xf] }
  0xf2   : > { %2257 = vrot.lane.b32.xlu0 %v2245_v63, %s10752_s23  ;;  %v6407_v63 = vunpack.i.h.bf16 %v8077_v55 }
  0xf3   : > { %2255 = vrot.lane.b32.xlu1 %v2244_v38, %s10752_s23  ;;  %v11149_v38 = vunpack.i.l.bf16 %v7892_v19  ;;  %v8279_v19 = vunpack.i.l.bf16 %v8077_v55 }
  0xf5   : > { %v8266_v47 = vsel %vm1312_vm4, %v11149_v38, %v8245_v13  ;;  %11151 = vst [vmem:[#allocation62_spill] sm:$0xff] %v8279_v19  ;;  %v8282_v38 = vpop.permute.xlu0 %6444  ;;  %v8295_v55 = vsel %vm10767_vm3, %v8279_v19, %v6407_v63 }
  0xf6   : > { %11150 = vst [vmem:[#allocation61_spill] sm:$0xff] %v8266_v47  ;;  %v2609_v10 = vmul.f32 %v8266_v47, %v8144_v22  ;;  %2335 = vrot.lane.b32.xlu0 %v2328_v32, %s10740_s0  ;;  %11152 = vst [vmem:[#allocation63_spill] sm:$0xff] %v8295_v55  ;;  %v8302_v22 = vunpack.i.h.bf16 %v7885_v46  ;;  %v2170_v14 = vmul.f32 %v8295_v55, %v2145_v18  ;;  %v11155_v18 = vunpack.i.l.bf16 %v7885_v46 }
  0xf7   : > { %2333 = vrot.lane.b32.xlu1 %v2327_v41, %s10740_s0  ;;  %v8290_v41 = vpop.permute.xlu1 %6459  ;;  %v8311_v47 = vsel %vm10767_vm3, %v6407_v63, %v11153_v42  ;;  %v11157_v42 = vunpack.i.l.bf16 %v7967_v24 }
  0xf8   : > { %v2619_v3 = vrot.slane %v2609_v10, 4  ;;  %11154 = vst [vmem:[#allocation64_spill] sm:$0xff] %v8311_v47 }
  0xf9   : > { %v8297_v32 = vpop.permute.xlu0 %6454  ;;  %v8331_v63 = vsel %vm1090_vm1, %v11157_v42, %v8066_v4  ;;  %v6447_v42 = vunpack.i.h.bf16 %v8282_v38 }
  0xfa   : > { %2555 = vrot.lane.b32.xlu0 %v2541_v37, %s10832_s25  ;;  %v2243_v37 = vmul.f32 %v8204_v21, %v2218_v43  ;;  %v2180_v43 = vrot.slane %v2170_v14, 4  ;;  %v8324_v21 = vsel %vm1161_vm0, %v11155_v18, %v8302_v22  ;;  %11158 = vst [vmem:[#allocation66_spill] sm:$0xff] %v8331_v63  ;;  %v6427_v18 = vunpack.i.h.bf16 %v8248_v16 }
  0xfb   : > { %2553 = vrot.lane.b32.xlu1 %v2540_v9, %s10832_s25  ;;  %v2291_v9 = vld [vmem:[#allocation2 + $0x8] sm:$0xf]  ;;  %v8304_v10 = vpop.permute.xlu1 %6469  ;;  %11156 = vst [vmem:[#allocation65_spill] sm:$0xff] %v8324_v21  ;;  %v2462_v46 = vmul.f32 %v8324_v21, %v8148_v61  ;;  %v1971_v21 = vld [vmem:[#allocation2 + $0x10] sm:$0xf] }
  0xfc   : > { %v2316_v51 = vmul.f32 %v8202_v30, %v2291_v9  ;;  %v2171_v30 = vmul.f32 %v8311_v47, %v2146_v36  ;;  %v2144_v36 = vld [vmem:[#allocation2 + $0x8] sm:$0xf] }
  0xfd   : > { %v2169_v61 = vmul.f32 %v8279_v19, %v2144_v36  ;;  %v1970_v47 = vld [vmem:[#allocation2 + $0x8] sm:$0xf] }
  0xfe   : > { %2629 = vrot.lane.b32.xlu0 %v2620_v45, %s10834_s22  ;;  %v2326_v9 = vrot.slane %v2316_v51, 4  ;;  %v2181_v14 = vrot.slane %v2171_v30, 4  ;;  %v2463_v30 = vmul.f32 %v8302_v22, %v7179_v56  ;;  %v2041_v19 = vld [vmem:[#allocation2 + $0x8] sm:$0xf] }
  0xff   : > { %2627 = vrot.lane.b32.xlu1 %v2619_v3, %s10834_s22  ;;  %v8314_v3 = vpop.permute.xlu0 %6464  ;;  %v8318_v5 = vpop.permute.xlu1 %6479  ;;  %v2179_v36 = vrot.slane %v2169_v61, 4 }
 0x102   : > { %2331 = vrot.lane.b32.xlu0 %v2326_v9, %s10740_s0  ;;  %v2394_v9 = vmul.f32 %v8066_v4, %v7171_v52  ;;  %v10727_v4 = vunpack.i.l.bf16 %v8271_v50 }
 0x103   : > { %2253 = vrot.lane.b32.xlu1 %v2243_v37, %s10752_s23  ;;  %v8333_v45 = vpop.permute.xlu0 %6474  ;;  %v8338_v51 = vpop.permute.xlu1 %6489  ;;  %v2393_v37 = vmul.f32 %v8331_v63, %v8146_v34  ;;  %v8353_v34 = vunpack.i.l.bf16 %v8248_v16  ;;  %v2473_v16 = vrot.slane %v2463_v30, 4  ;;  %v2042_v63 = vld [vmem:[#allocation2 + $0x10] sm:$0xf] }
 0x105   : > { %11159 = vst [vmem:[#allocation67_spill] sm:$0xff] %v8353_v34  ;;  %v8375_v52 = vsel %vm2057_vm13, %v8353_v34, %v6427_v18 }
 0x106   : > { %2188 = vrot.lane.b32.xlu0 %v2181_v14, %s10748_s19  ;;  %v8357_v14 = vunpack.i.l.bf16 %v8282_v38  ;;  %11162 = vst [vmem:[#allocation70_spill] sm:$0xff] %v8375_v52 }
 0x107   : > { %2186 = vrot.lane.b32.xlu1 %v2180_v43, %s10748_s19  ;;  %v8343_v24 = vpop.permute.xlu0 %6484  ;;  %v2472_v43 = vrot.slane %v2462_v46, 4 }
 0x108   : > { %11160 = vst [vmem:[#allocation68_spill] sm:$0xff] %v8357_v14  ;;  %v8371_v38 = vsel %vm1986_vm9, %v8357_v14, %v6447_v42 }
 0x109   : > { %11161 = vst [vmem:[#allocation69_spill] sm:$0xff] %v8371_v38  ;;  %v1996_v55 = vmul.f32 %v8371_v38, %v1970_v47 }
 0x10a   : > { %2408 = vrot.lane.b32.xlu0 %v2394_v9, %s10825_s30  ;;  %v8381_v9 = vsel %vm1986_vm9, %v6447_v42, %v10727_v4  ;;  %v8394_v42 = vunpack.i.h.bf16 %v7921_v20 }
 0x10b   : > { %2406 = vrot.lane.b32.xlu1 %v2393_v37, %s10825_s30  ;;  %v8359_v37 = vpop.permute.xlu1 %6499  ;;  %v8364_v56 = vpop.permute.xlu0 %6494  ;;  %11163 = vst [vmem:[#allocation71_spill] sm:$0xff] %v8381_v9  ;;  %v1997_v4 = vmul.f32 %v8381_v9, %v1971_v21  ;;  %v11167_v21 = vunpack.i.l.bf16 %v7921_v20 }
 0x10e   : > { %2482 = vrot.lane.b32.xlu0 %v2473_v16, %s10830_s1  ;;  %v2067_v16 = vmul.f32 %v8375_v52, %v2041_v19  ;;  %v11166_v19 = vunpack.i.l.bf16 %v8139_v0 }
 0x10f   : > { %2480 = vrot.lane.b32.xlu1 %v2472_v43, %s10830_s1  ;;  %v8367_v46 = vpop.permute.xlu1 %6509  ;;  %v11164_v43 = vunpack.i.l.bf16 %v8229_v28  ;;  %v8388_v61 = vpop.permute.xlu0 %6504 }
 0x110   : > { %v2077_v47 = vrot.slane %v2067_v16, 4  ;;  %v8408_v52 = vsel %vm939_vm14, %v11166_v19, %v8196_v53  ;;  %v6467_v19 = vunpack.i.h.bf16 %v8314_v3 }
 0x111   : > { %v8386_v30 = vsel %vm2057_vm13, %v6427_v18, %v11164_v43 }
 0x112   : > { %11165 = vst [vmem:[#allocation72_spill] sm:$0xff] %v8386_v30  ;;  %v2068_v18 = vmul.f32 %v8386_v30, %v2042_v63  ;;  %2007 = vrot.lane.b32.xlu0 %v1996_v55, %s10762_s20  ;;  %v8414_v63 = vsel %vm1014_vm8, %v11167_v21, %v8394_v42  ;;  %v2246_v55 = vmul.f32 %v8408_v52, %v8150_v57  ;;  %v8440_v21 = vunpack.i.l.bf16 %v8314_v3  ;;  %v1820_v30 = vld [vmem:[#allocation2 + $0x10] sm:$0xf] }
 0x113   : > { %2184 = vrot.lane.b32.xlu1 %v2179_v36, %s10748_s19  ;;  %v8399_v43 = vpop.permute.xlu1 %6519  ;;  %v8401_v36 = vpop.permute.xlu0 %6514  ;;  %v2319_v0 = vmul.f32 %v8414_v63, %v8152_v8  ;;  %v2066_v57 = vmul.f32 %v8353_v34, %v8096_v1  ;;  %v6437_v8 = vunpack.i.h.bf16 %v8268_v54 }
 0x114   : > { %v2078_v38 = vrot.slane %v2068_v18, 4  ;;  %v2247_v18 = vmul.f32 %v8196_v53, %v7181_v33  ;;  %v10735_v33 = vunpack.i.l.bf16 %v8253_v12  ;;  %v10736_v53 = vunpack.i.l.bf16 %v8304_v10 }
 0x116   : > { %2083 = vrot.lane.b32.xlu0 %v2077_v47, %s10760_s21 }
 0x117   : > { %2009 = vrot.lane.b32.xlu1 %v1997_v4, %s10762_s20  ;;  %v2320_v4 = vmul.f32 %v8394_v42, %v7188_v59  ;;  %v8424_v16 = vpop.permute.xlu1 %6529  ;;  %v8426_v20 = vpop.permute.xlu0 %6524  ;;  %v8436_v59 = vunpack.i.l.bf16 %v8268_v54  ;;  %v1995_v54 = vmul.f32 %v8357_v14, %v8094_v7  ;;  %v1819_v7 = vld [vmem:[#allocation2 + $0x8] sm:$0xf]  ;;  %v1745_v14 = vld [vmem:[#allocation2 + $0x10] sm:$0xf] }
 0x119   : > { %v2330_v47 = vrot.slane %v2320_v4, 4  ;;  %v8454_v3 = vsel %vm1910_vm5, %v8436_v59, %v6437_v8  ;;  %v2076_v4 = vrot.slane %v2066_v57, 4 }
 0x11a   : > { %2259 = vrot.lane.b32.xlu0 %v2246_v55, %s10752_s23  ;;  %11168 = vst [vmem:[#allocation73_spill] sm:$0xff] %v8454_v3 }
 0x11b   : > { %2085 = vrot.lane.b32.xlu1 %v2078_v38, %s10760_s21  ;;  %v2329_v38 = vrot.slane %v2319_v0, 4  ;;  %v8445_v55 = vpop.permute.xlu1 %6539  ;;  %v8447_v1 = vpop.permute.xlu0 %6534  ;;  %v8458_v0 = vsel %vm1835_vm2, %v8440_v21, %v6467_v19 }
 0x11c   : > { %11169 = vst [vmem:[#allocation74_spill] sm:$0xff] %v8458_v0  ;;  %v1845_v57 = vmul.f32 %v8458_v0, %v1819_v7 }
 0x11e   : > { %2337 = vrot.lane.b32.xlu0 %v2329_v38, %s10740_s0  ;;  %v8468_v38 = vsel %vm1835_vm2, %v6467_v19, %v10736_v53 }
 0x11f   : > { %2261 = vrot.lane.b32.xlu1 %v2247_v18, %s10752_s23  ;;  %v8463_v18 = vsel %vm1910_vm5, %v6437_v8, %v10735_v33  ;;  %11171 = vst [vmem:[#allocation76_spill] sm:$0xff] %v8468_v38  ;;  %v8472_v9 = vpop.permute.xlu0 %6544  ;;  %v1895_v8 = vld [vmem:[#allocation2 + $0x10] sm:$0xf]  ;;  %v11172_v33 = vunpack.i.l.bf16 %v8034_v26  ;;  %v8482_v53 = vpop.permute.xlu1 %6549  ;;  %v2173_v26 = vmul.f32 %v8074_v6, %v7190_v60  ;;  %v6487_v60 = vunpack.i.h.bf16 %v8343_v24  ;;  %s10819_s23 = smov 55  }
 0x120   : > { %11170 = vst [vmem:[#allocation75_spill] sm:$0xff] %v8463_v18 }
 0x121   : > { %v8480_v19 = vsel %vm10767_vm3, %v11172_v33, %v8074_v6  ;;  %v8506_v6 = vunpack.i.l.bf16 %v8343_v24 }
 0x122   : > { %2005 = vrot.lane.b32.xlu0 %v1995_v54, %s10762_s20  ;;  %v1846_v54 = vmul.f32 %v8468_v38, %v1820_v30 }
 0x123   : > { %2339 = vrot.lane.b32.xlu1 %v2330_v47, %s10740_s0  ;;  %v1894_v47 = vld [vmem:[#allocation2 + $0x8] sm:$0xf]  ;;  %v8492_v0 = vpop.permute.xlu0 %6554  ;;  %s10823_s0 = smov 48   ;;  %v8495_v30 = vpop.permute.xlu1 %6559  ;;  %v8522_v24 = vsel %vm1689_vm7, %v8506_v6, %v6487_v60 }
 0x124   : > { %v1920_v34 = vmul.f32 %v8454_v3, %v1894_v47  ;;  %v2172_v47 = vmul.f32 %v8480_v19, %v8154_v49  ;;  %v6457_v49 = vunpack.i.h.bf16 %v8297_v32  ;;  %11174 = vst [vmem:[#allocation78_spill] sm:$0xff] %v8522_v24  ;;  %v1674_v3 = vld [vmem:[#allocation2 + $0x10] sm:$0xf] }
 0x126   : > { %1856 = vrot.lane.b32.xlu0 %v1845_v57, %s10821_s29  ;;  %v1930_v7 = vrot.slane %v1920_v34, 4  ;;  %v2182_v57 = vrot.slane %v2172_v47, 4  ;;  %v1919_v34 = vmul.f32 %v8436_v59, %v8100_v31 }
 0x127   : > { %2081 = vrot.lane.b32.xlu1 %v2076_v4, %s10760_s21  ;;  %v1921_v4 = vmul.f32 %v8463_v18, %v1895_v8  ;;  %v2183_v8 = vrot.slane %v2173_v26, 4  ;;  %v8512_v31 = vpop.permute.xlu0 %6564  ;;  %v8524_v26 = vpop.permute.xlu1 %6569  ;;  %v1744_v18 = vld [vmem:[#allocation2 + $0x8] sm:$0xf] }
 0x129   : > { %v1931_v33 = vrot.slane %v1921_v4, 4  ;;  %v10746_v4 = vunpack.i.l.bf16 %v8290_v41 }
 0x12a   : > { %1936 = vrot.lane.b32.xlu0 %v1930_v7, %s10823_s0  ;;  %v10747_v7 = vunpack.i.l.bf16 %v8338_v51 }
 0x12b   : > { %1858 = vrot.lane.b32.xlu1 %v1846_v54, %s10821_s29  ;;  %v8502_v54 = vunpack.i.l.bf16 %v8297_v32  ;;  %v1844_v32 = vmul.f32 %v8440_v21, %v8098_v44 }
 0x12c   : > { %v8534_v44 = vsel %vm1689_vm7, %v6487_v60, %v10747_v7  ;;  %v8548_v7 = vpop.permute.xlu0 %6574 }
 0x12d   : > { %v8518_v47 = vsel %vm10783_vm12, %v8502_v54, %v6457_v49  ;;  %11176 = vst [vmem:[#allocation80_spill] sm:$0xff] %v8534_v44  ;;  %v1700_v60 = vmul.f32 %v8534_v44, %v1674_v3 }
 0x12e   : > { %2190 = vrot.lane.b32.xlu0 %v2182_v57, %s10748_s19  ;;  %11173 = vst [vmem:[#allocation77_spill] sm:$0xff] %v8518_v47  ;;  %v8529_v57 = vsel %vm10783_vm12, %v6457_v49, %v10746_v4  ;;  %v8541_v49 = vunpack.i.h.bf16 %v8229_v28  ;;  %v8544_v4 = vunpack.i.h.bf16 %v8271_v50 }
 0x12f   : > { %1938 = vrot.lane.b32.xlu1 %v1931_v33, %s10823_s0  ;;  %v1929_v33 = vrot.slane %v1919_v34, 4  ;;  %11175 = vst [vmem:[#allocation79_spill] sm:$0xff] %v8529_v57  ;;  %v1769_v34 = vmul.f32 %v8518_v47, %v1744_v18 }
 0x130   : > { %11177 = vst [vmem:[#allocation81_spill] sm:$0xff] %v8541_v49  ;;  %11178 = vst [vmem:[#allocation82_spill] sm:$0xff] %v8544_v4 }
 0x131   : > { %v1779_v18 = vrot.slane %v1769_v34, 4  ;;  %v2043_v34 = vld [vmem:[#allocation2 + $0x18] sm:$0xf] }
 0x132   : > { %1854 = vrot.lane.b32.xlu0 %v1844_v32, %s10821_s29  ;;  %v1770_v32 = vmul.f32 %v8529_v57, %v1745_v14  ;;  %v11181_v14 = vunpack.i.l.bf16 %v8229_v28  ;;  %v1593_v57 = vld [vmem:[#allocation2 + $0x8] sm:$0xf] }
 0x133   : > { %2192 = vrot.lane.b32.xlu1 %v2183_v8, %s10748_s19  ;;  %v1673_v8 = vld [vmem:[#allocation2 + $0x8] sm:$0xf]  ;;  %s10817_s19 = smov 56  }
 0x134   : > { %v1699_v38 = vmul.f32 %v8522_v24, %v1673_v8  ;;  %v1780_v8 = vrot.slane %v1770_v32, 4  ;;  %v11179_v24 = vunpack.i.l.bf16 %v8271_v50  ;;  %v8564_v3 = vsel %vm2057_vm13, %v11181_v14, %v8541_v49 }
 0x135   : > { %11182 = vst [vmem:[#allocation84_spill] sm:$0xff] %v8564_v3  ;;  %v2070_v32 = vmul.f32 %v8541_v49, %v8158_v62  ;;  %v1999_v14 = vmul.f32 %v8544_v4, %v8156_v39  ;;  %v8584_v62 = vunpack.i.l.bf16 %v8333_v45  ;;  %v8588_v39 = vunpack.i.l.bf16 %v8388_v61 }
 0x136   : > { %1710 = vrot.lane.b32.xlu0 %v1699_v38, %s10817_s19  ;;  %v8558_v47 = vsel %vm1986_vm9, %v11179_v24, %v8544_v4  ;;  %v1972_v38 = vld [vmem:[#allocation2 + $0x18] sm:$0xf]  ;;  %v2069_v24 = vmul.f32 %v8564_v3, %v2043_v34  ;;  %v6477_v34 = vunpack.i.h.bf16 %v8333_v45  ;;  %vm2779_vm9 = vcmask 1043456  }
 0x137   : > { %1934 = vrot.lane.b32.xlu1 %v1929_v33, %s10823_s0  ;;  %v8551_v33 = vpop.permute.xlu1 %6579  ;;  %11180 = vst [vmem:[#allocation83_spill] sm:$0xff] %v8558_v47  ;;  %v1998_v50 = vmul.f32 %v8558_v47, %v1972_v38  ;;  %v2080_v44 = vrot.slane %v2070_v32, 4  ;;  %v1768_v38 = vmul.f32 %v8502_v54, %v8104_v29  ;;  %v6507_v47 = vunpack.i.h.bf16 %v8388_v61 }
 0x138   : > { %v1698_v32 = vmul.f32 %v8506_v6, %v8102_v48  ;;  %v8599_v61 = vsel %vm1609_vm11, %v8584_v62, %v6477_v34  ;;  %v11187_v48 = vunpack.i.l.bf16 %v8318_v5  ;;  %vm1270_vm13 = vcmask 916480  }
 0x139   : > { %11183 = vst [vmem:[#allocation85_spill] sm:$0xff] %v8599_v61  ;;  %v1778_v3 = vrot.slane %v1768_v38, 4  ;;  %v1522_v38 = vld [vmem:[#allocation2 + $0x8] sm:$0xf] }
 0x13a   : > { %1785 = vrot.lane.b32.xlu0 %v1779_v18, %s10819_s23  ;;  %v8616_v4 = vsel %vm1609_vm11, %v6477_v34, %v11187_v48  ;;  %v6683_v48 = vmov 0  }
 0x13b   : > { %1712 = vrot.lane.b32.xlu1 %v1700_v60, %s10817_s19  ;;  %v8568_v60 = vpop.permute.xlu0 %6584  ;;  %v8574_v28 = vpop.permute.xlu1 %6589  ;;  %11188 = vst [vmem:[#allocation88_spill] sm:$0xff] %v8616_v4  ;;  %6594 = vset.pattern.permute.xlu0 %v6683_v48 }
 0x13c   : > { %6593 = vset.pattern.permute.xlu1 %v6683_v48 }
 0x13e   : > { %2011 = vrot.lane.b32.xlu0 %v1998_v50, %s10762_s20 }
 0x13f   : > { %1787 = vrot.lane.b32.xlu1 %v1780_v8, %s10819_s23  ;;  %v2699_v18 = vpop.permute.xlu0 %2698  ;;  %v2079_v8 = vrot.slane %v2069_v24, 4  ;;  %v2697_v50 = vpop.permute.xlu1 %2696 }
 0x140   : > { %v2703_v24 = vsel %vm10766_vm6, %v2697_v50, %v2699_v18 }
 0x141   : > { %2711 = vst [vmem:[#allocation3 + $0x1b8] sm:$0xf] %v2703_v24 }
 0x142   : > { %2087 = vrot.lane.b32.xlu0 %v2079_v8, %s10760_s21  ;;  %v11185_v8 = vunpack.i.l.bf16 %v8367_v46 }
 0x143   : > { %2013 = vrot.lane.b32.xlu1 %v1999_v14, %s10762_s20  ;;  %v2693_v45 = vpop.permute.xlu0 %2692  ;;  %v8603_v14 = vsel %vm1538_vm15, %v8588_v39, %v6507_v47  ;;  %v2695_v18 = vpop.permute.xlu1 %2694  ;;  %s10811_s20 = smov 62  }
 0x144   : > { %11184 = vst [vmem:[#allocation86_spill] sm:$0xff] %v8603_v14  ;;  %v8608_v24 = vsel %vm1538_vm15, %v6507_v47, %v11185_v8  ;;  %v2702_v29 = vsel %vm10766_vm6, %v2695_v18, %v2697_v50  ;;  %v1548_v47 = vmul.f32 %v8603_v14, %v1522_v38  ;;  %v1523_v8 = vld [vmem:[#allocation2 + $0x10] sm:$0xf]  ;;  %v1619_v50 = vmul.f32 %v8599_v61, %v1593_v57 }
 0x145   : > { %11186 = vst [vmem:[#allocation87_spill] sm:$0xff] %v8608_v24  ;;  %2710 = vst [vmem:[#allocation3 + $0x1b0] sm:$0xf] %v2702_v29  ;;  %v11201_v61 = vunpack.i.l.bf16 %v8338_v51 }
 0x146   : > { %1708 = vrot.lane.b32.xlu0 %v1698_v32, %s10817_s19  ;;  %v8622_v32 = vunpack.i.h.bf16 %v8253_v12 }
 0x147   : > { %2089 = vrot.lane.b32.xlu1 %v2080_v44, %s10760_s21  ;;  %v2701_v44 = vsel %vm10766_vm6, %v2693_v45, %v2695_v18  ;;  %v2691_v49 = vpop.permute.xlu0 %2690  ;;  %v8625_v18 = vunpack.i.h.bf16 %v8304_v10  ;;  %v2550_v29 = vpop.permute.xlu1 %2549  ;;  %s10803_s21 = smov 63  }
 0x148   : > { %2709 = vst [vmem:[#allocation3 + $0x1a8] sm:$0xf] %v2701_v44  ;;  %v2700_v34 = vsel %vm10766_vm6, %v2691_v49, %v2693_v45  ;;  %v1594_v44 = vld [vmem:[#allocation2 + $0x10] sm:$0xf]  ;;  %v2768_v57 = vld [vmem:[#allocation3 + $0x1b8] sm:$0xf] }
 0x149   : > { %2708 = vst [vmem:[#allocation3 + $0x1a0] sm:$0xf] %v2700_v34  ;;  %v1620_v38 = vmul.f32 %v8616_v4, %v1594_v44  ;;  %6142 = vmatprep.subr.msk.mxu1 %vm2779_vm9, %v2768_v57  ;;  %v1629_v45 = vrot.slane %v1619_v50, 4  ;;  %vm11194_vm6 = vcmask 146432   ;;  %v1447_v4 = vld [vmem:[#allocation2 + $0x8] sm:$0xf] }
 0x14a   : > { %1559 = vrot.lane.b32.xlu0 %v1548_v47, %s10803_s21  ;;  %v11191_v47 = vunpack.i.l.bf16 %v8304_v10  ;;  %v1821_v10 = vld [vmem:[#allocation2 + $0x18] sm:$0xf]  ;;  %vm11197_vm3 = vmmov %vm11194_vm6 }
 0x14b   : > { %1783 = vrot.lane.b32.xlu1 %v1778_v3, %s10819_s23  ;;  %v1549_v3 = vmul.f32 %v8608_v24, %v1523_v8  ;;  %v8633_v49 = vpop.permute.xlu0 %2551  ;;  %v11189_v8 = vunpack.i.l.bf16 %v8253_v12  ;;  %v2548_v57 = vpop.permute.xlu1 %2547  ;;  %v1547_v24 = vmul.f32 %v8588_v39, %v8106_v23 }
 0x14c   : > { %v8645_v34 = vsel %vm1835_vm2, %v11191_v47, %v8625_v18  ;;  %v2558_v44 = vsel %vm1270_vm13, %v2550_v29, %v8633_v49  ;;  %v2767_v50 = vld [vmem:[#allocation3 + $0x1b0] sm:$0xf]  ;;  %v1896_v47 = vld [vmem:[#allocation2 + $0x18] sm:$0xf]  ;;  %vm1463_vm2 = vcmask 523264  }
 0x14d   : > { %v8639_v48 = vsel %vm1910_vm5, %v11189_v8, %v8622_v32  ;;  %11192 = vst [vmem:[#allocation90_spill] sm:$0xff] %v8645_v34  ;;  %2566 = vst [vmem:[#allocation3 + $0x188] sm:$0xf] %v2558_v44  ;;  %v1630_v8 = vrot.slane %v1620_v38, 4  ;;  %6143 = vmatpush1.msk.msra.mxu1 %vm2779_vm9, %v2767_v50  ;;  %vm1119_vm5 = vcmask 973824  }
 0x14e   : > { %11190 = vst [vmem:[#allocation89_spill] sm:$0xff] %v8639_v48  ;;  %1635 = vrot.lane.b32.xlu0 %v1629_v45, %s10811_s20  ;;  %v1922_v44 = vmul.f32 %v8639_v48, %v1896_v47  ;;  %v8671_v47 = vunpack.i.l.bf16 %v8364_v56  ;;  %v1297_v48 = vld [vmem:[#allocation2 + $0x10] sm:$0xf] }
 0x14f   : > { %1561 = vrot.lane.b32.xlu1 %v1549_v3, %s10803_s21  ;;  %v2557_v3 = vsel %vm1270_vm13, %v2548_v57, %v2550_v29  ;;  %v2766_v12 = vld [vmem:[#allocation3 + $0x1a8] sm:$0xf]  ;;  %v8654_v14 = vpop.permute.xlu0 %2404  ;;  %v1847_v29 = vmul.f32 %v8645_v34, %v1821_v10  ;;  %v2403_v45 = vpop.permute.xlu1 %2402  ;;  %v6497_v10 = vunpack.i.h.bf16 %v8364_v56  ;;  %v10770_v56 = vunpack.i.l.bf16 %v8424_v16 }
 0x150   : > { %2565 = vst [vmem:[#allocation3 + $0x180] sm:$0xf] %v2557_v3  ;;  %6139 = vmatprep.subr.msk.mxu0 %vm2779_vm9, %v2766_v12  ;;  %v2765_v57 = vld [vmem:[#allocation3 + $0x1a0] sm:$0xf]  ;;  %v2411_v38 = vsel %vm1119_vm5, %v2403_v45, %v8654_v14  ;;  %v1848_v3 = vmul.f32 %v8625_v18, %v8160_v15  ;;  %v1923_v12 = vmul.f32 %v8622_v32, %v8162_v17 }
 0x151   : > { %6140 = vmatpush1.msk.msra.mxu0 %vm2779_vm9, %v2765_v57  ;;  %2419 = vst [vmem:[#allocation3 + $0x168] sm:$0xf] %v2411_v38  ;;  %v6527_v57 = vunpack.i.h.bf16 %v8426_v20  ;;  %vm1346_vm9 = vcmask 908288  }
 0x152   : > { %1860 = vrot.lane.b32.xlu0 %v1847_v29, %s10821_s29  ;;  %v8675_v29 = vunpack.i.l.bf16 %v8426_v20  ;;  %v1933_v38 = vrot.slane %v1923_v12, 4 }
 0x153   : > { %1637 = vrot.lane.b32.xlu1 %v1630_v8, %s10811_s20  ;;  %v8667_v50 = vpop.permute.xlu0 %2625  ;;  %v1932_v8 = vrot.slane %v1922_v44, 4  ;;  %v2401_v15 = vpop.permute.xlu1 %2400  ;;  %v1618_v44 = vmul.f32 %v8584_v62, %v8108_v2 }
 0x154   : > { %v2410_v17 = vsel %vm1119_vm5, %v2401_v15, %v2403_v45  ;;  %v8688_v45 = vsel %vm1463_vm2, %v8671_v47, %v6497_v10  ;;  %v8692_v12 = vsel %vm11194_vm6, %v8675_v29, %v6527_v57  ;;  %vm10790_vm6 = vcmask 965632  }
 0x155   : > { %2418 = vst [vmem:[#allocation3 + $0x160] sm:$0xf] %v2410_v17  ;;  %11193 = vst [vmem:[#allocation91_spill] sm:$0xff] %v8688_v45  ;;  %v1628_v17 = vrot.slane %v1618_v44, 4  ;;  %v1473_v44 = vmul.f32 %v8688_v45, %v1447_v4  ;;  %v11199_v45 = vunpack.i.l.bf16 %v8290_v41 }
 0x156   : > { %1940 = vrot.lane.b32.xlu0 %v1932_v8, %s10823_s0  ;;  %11195 = vst [vmem:[#allocation92_spill] sm:$0xff] %v8692_v12 }
 0x157   : > { %1862 = vrot.lane.b32.xlu1 %v1848_v3, %s10821_s29  ;;  %v10769_v3 = vunpack.i.l.bf16 %v8359_v37  ;;  %v2622_v20 = vpop.permute.xlu0 %2621  ;;  %s11262_s29 = sld [smem:[#allocation106_spill]] }
 0x159   : > { %v8701_v23 = vsel %vm1463_vm2, %v6497_v10, %v10769_v3  ;;  %v8714_v10 = vunpack.i.h.bf16 %v8290_v41  ;;  %v8717_v3 = vunpack.i.h.bf16 %v8338_v51  ;;  %v1675_v41 = vld [vmem:[#allocation2 + $0x18] sm:$0xf] }
 0x15a   : > { %1557 = vrot.lane.b32.xlu0 %v1547_v24, %s10803_s21  ;;  %11196 = vst [vmem:[#allocation93_spill] sm:$0xff] %v8701_v23 }
 0x15b   : > { %1942 = vrot.lane.b32.xlu1 %v1933_v38, %s10823_s0  ;;  %v8706_v38 = vsel %vm11197_vm3, %v6527_v57, %v10770_v56  ;;  %v8729_v34 = vsel %vm10783_vm12, %v11199_v45, %v8714_v10  ;;  %vm968_vm3 = vcmask 1031168   ;;  %v1746_v45 = vld [vmem:[#allocation2 + $0x18] sm:$0xf]  ;;  %vm897_vm12 = vcmask 1039360   ;;  %s11271_s0 = sld [smem:[#allocation105_spill]] }
 0x15c   : > { %11198 = vst [vmem:[#allocation94_spill] sm:$0xff] %v8706_v38  ;;  %11200 = vst [vmem:[#allocation95_spill] sm:$0xff] %v8729_v34 }
 0x15d   : > { %v2624_v2 = vpop.permute.xlu1 %2623 }
 0x15e   : > { %v2631_v8 = vsel %vm1346_vm9, %v2622_v20, %v2624_v2  ;;  %v2632_v15 = vsel %vm1346_vm9, %v2624_v2, %v8667_v50  ;;  %v1372_v20 = vld [vmem:[#allocation2 + $0x8] sm:$0xf]  ;;  %v8709_v2 = vpop.permute.xlu0 %2478 }
 0x15f   : > { %2639 = vst [vmem:[#allocation3 + $0x180] sm:$0xf0] %v2631_v8  ;;  %2640 = vst [vmem:[#allocation3 + $0x188] sm:$0xf0] %v2632_v15  ;;  %1633 = vrot.lane.b32.xlu1 %v1628_v17, %s10811_s20  ;;  %v1398_v24 = vmul.f32 %v8692_v12, %v1372_v20  ;;  %v1373_v8 = vld [vmem:[#allocation2 + $0x10] sm:$0xf] }
 0x160   : > { %v1448_v15 = vld [vmem:[#allocation2 + $0x10] sm:$0xf]  ;;  %v1399_v17 = vmul.f32 %v8706_v38, %v1373_v8  ;;  %v1483_v12 = vrot.slane %v1473_v44, 4 }
 0x161   : > { %v2477_v57 = vpop.permute.xlu1 %2476  ;;  %1409 = vrot.lane.b32.xlu0 %v1398_v24, %s10836_s26  ;;  %v1474_v20 = vmul.f32 %v8701_v23, %v1448_v15  ;;  %v8735_v24 = vsel %vm1689_vm7, %v11201_v61, %v8717_v3  ;;  %vm10798_vm7 = vcmask 982016   ;;  %v10780_v23 = vunpack.i.l.bf16 %v8482_v53 }
 0x162   : > { %v2485_v56 = vsel %vm10790_vm6, %v2477_v57, %v8709_v2  ;;  %v2475_v4 = vpop.permute.xlu0 %2474  ;;  %11202 = vst [vmem:[#allocation96_spill] sm:$0xff] %v8735_v24  ;;  %v1701_v61 = vmul.f32 %v8735_v24, %v1675_v41 }
 0x163   : > { %2493 = vst [vmem:[#allocation3 + $0x168] sm:$0xf0] %v2485_v56  ;;  %1411 = vrot.lane.b32.xlu1 %v1399_v17, %s10836_s26  ;;  %v2484_v8 = vsel %vm10790_vm6, %v2475_v4, %v2477_v57  ;;  %v1484_v44 = vrot.slane %v1474_v20, 4  ;;  %v1771_v57 = vmul.f32 %v8729_v34, %v1746_v45  ;;  %v1702_v20 = vmul.f32 %v8717_v3, %v8164_v25  ;;  %v11204_v34 = vld [vmem:[#allocation32_spill] sm:$0xff] }
 0x164   : > { %2492 = vst [vmem:[#allocation3 + $0x160] sm:$0xf0] %v2484_v8  ;;  %v8761_v45 = vunpack.i.l.bf16 %v8401_v36  ;;  %v8765_v25 = vunpack.i.l.bf16 %v8472_v9 }
 0x165   : > { %v8738_v15 = vpop.permute.xlu1 %2255  ;;  %1489 = vrot.lane.b32.xlu0 %v1483_v12, %s10795_s24  ;;  %v1781_v41 = vrot.slane %v1771_v57, 4  ;;  %v11203_v57 = vld [vmem:[#allocation33_spill] sm:$0xff] }
 0x166   : > { %v2762_v56 = vld [vmem:[#allocation3 + $0x188] sm:$0xff]  ;;  %v2761_v17 = vld [vmem:[#allocation3 + $0x180] sm:$0xff]  ;;  %v8742_v51 = vpop.permute.xlu0 %2257  ;;  %v1472_v38 = vmul.f32 %v8671_v47, %v11203_v57 }
 0x167   : > { %2798 = vmatprep.subr.mxu0 %v2762_v56  ;;  %1491 = vrot.lane.b32.xlu1 %v1484_v44, %s10795_s24  ;;  %v2264_v12 = vsel %vm968_vm3, %v8738_v15, %v8742_v51  ;;  %v1772_v56 = vmul.f32 %v8714_v10, %v8166_v40  ;;  %v6517_v44 = vunpack.i.h.bf16 %v8401_v36 }
 0x168   : > { %2799 = vmatpush1.msra.mxu0 %v2761_v17  ;;  %2272 = vst [vmem:[#allocation3 + $0x148] sm:$0xf] %v2264_v12 }
 0x169   : > { %v8749_v4 = vpop.permute.xlu1 %2333  ;;  %1714 = vrot.lane.b32.xlu0 %v1701_v61, %s10817_s19  ;;  %v6547_v61 = vunpack.i.h.bf16 %v8472_v9  ;;  %v1782_v36 = vrot.slane %v1772_v56, 4  ;;  %v10779_v9 = vunpack.i.l.bf16 %v8399_v43 }
 0x16a   : > { %v2758_v8 = vld [vmem:[#allocation3 + $0x168] sm:$0xff]  ;;  %v8758_v17 = vpop.permute.xlu0 %2335 }
 0x16b   : > { %2800 = vmatprep.subr.mxu0 %v2758_v8  ;;  %1716 = vrot.lane.b32.xlu1 %v1702_v20, %s10817_s19  ;;  %v2342_v40 = vsel %vm10798_vm7, %v8749_v4, %v8758_v17  ;;  %v2757_v8 = vld [vmem:[#allocation3 + $0x160] sm:$0xff]  ;;  %v8786_v56 = vsel %vm1241_vm10, %v8765_v25, %v6547_v61  ;;  %v8800_v57 = vsel %vm1241_vm10, %v6547_v61, %v10780_v23  ;;  %s11287_s19 = smov 54  }
 0x16c   : > { %2350 = vst [vmem:[#allocation3 + $0x148] sm:$0xf0] %v2342_v40  ;;  %2801 = vmatpush1.msra.mxu0 %v2757_v8  ;;  %v1397_v40 = vmul.f32 %v8675_v29, %v11204_v34  ;;  %11206 = vst [vmem:[#allocation32_spill] sm:$0xff] %v8786_v56  ;;  %v8795_v34 = vsel %vm1312_vm4, %v6517_v44, %v10779_v9 }
 0x16d   : > { %v2554_v12 = vpop.permute.xlu1 %2553  ;;  %1789 = vrot.lane.b32.xlu0 %v1781_v41, %s10819_s23  ;;  %11207 = vst [vmem:[#allocation97_spill] sm:$0xff] %v8795_v34  ;;  %11208 = vst [vmem:[#allocation98_spill] sm:$0xff] %v8800_v57 }
 0x16e   : > { %v2559_v20 = vsel %vm1270_vm13, %v8633_v49, %v2554_v12  ;;  %v2556_v24 = vpop.permute.xlu0 %2555  ;;  %v8782_v49 = vsel %vm1312_vm4, %v8761_v45, %v6517_v44  ;;  %v8809_v44 = vunpack.i.h.bf16 %v8367_v46 }
 0x16f   : > { %2567 = vst [vmem:[#allocation3 + $0x190] sm:$0xf] %v2559_v20  ;;  %1791 = vrot.lane.b32.xlu1 %v1782_v36, %s10819_s23  ;;  %11205 = vst [vmem:[#allocation33_spill] sm:$0xff] %v8782_v49  ;;  %v2560_v41 = vsel %vm1270_vm13, %v2554_v12, %v2556_v24  ;;  %v1482_v36 = vrot.slane %v1472_v38, 4  ;;  %v1225_v24 = vld [vmem:[#allocation2 + $0x8] sm:$0xf] }
 0x170   : > { %2568 = vst [vmem:[#allocation3 + $0x198] sm:$0xf] %v2560_v41  ;;  %v1296_v12 = vld [vmem:[#allocation2 + $0x8] sm:$0xf]  ;;  %s11289_s23 = smov 55  }
 0x171   : > { %v2628_v8 = vpop.permute.xlu1 %2627  ;;  %1407 = vrot.lane.b32.xlu0 %v1397_v40, %s10836_s26  ;;  %v1322_v38 = vmul.f32 %v8782_v49, %v1296_v12  ;;  %v8806_v40 = vunpack.i.h.bf16 %v8318_v5  ;;  %v1323_v12 = vmul.f32 %v8795_v34, %v1297_v48  ;;  %v9092_v49 = vunpack.i.h.bf16 %v8495_v30 }
 0x172   : > { %v2633_v20 = vsel %vm1346_vm9, %v8667_v50, %v2628_v8  ;;  %v2630_v41 = vpop.permute.xlu0 %2629  ;;  %v1251_v50 = vmul.f32 %v8786_v56, %v1225_v24 }
 0x173   : > { %2641 = vst [vmem:[#allocation3 + $0x190] sm:$0xf0] %v2633_v20  ;;  %1487 = vrot.lane.b32.xlu1 %v1482_v36, %s10795_s24  ;;  %v2634_v9 = vsel %vm1346_vm9, %v2628_v8, %v2630_v41  ;;  %v2754_v23 = vld [vmem:[#allocation3 + $0x148] sm:$0xff]  ;;  %v1226_v20 = vld [vmem:[#allocation2 + $0x10] sm:$0xf]  ;;  %v1332_v8 = vrot.slane %v1322_v38, 4  ;;  %v11209_v41 = vunpack.i.l.bf16 %v8318_v5 }
 0x174   : > { %2642 = vst [vmem:[#allocation3 + $0x198] sm:$0xf0] %v2634_v9  ;;  %2802 = vmatprep.subr.mxu0 %v2754_v23  ;;  %v1252_v24 = vmul.f32 %v8800_v57, %v1226_v20  ;;  %v1333_v38 = vrot.slane %v1323_v12, 4  ;;  %v1595_v5 = vld [vmem:[#allocation2 + $0x18] sm:$0xf] }
 0x175   : > { %v2254_v61 = vpop.permute.xlu1 %2253  ;;  %1262 = vrot.lane.b32.xlu0 %v1251_v50, %s10832_s25  ;;  %v8822_v9 = vsel %vm1609_vm11, %v11209_v41, %v8806_v40  ;;  %vm10828_vm11 = vcmask 384000  }
 0x176   : > { %v2263_v36 = vsel %vm968_vm3, %v2254_v61, %v8738_v15  ;;  %v2332_v56 = vpop.permute.xlu0 %2331  ;;  %v11210_v15 = vunpack.i.l.bf16 %v8367_v46  ;;  %v1524_v61 = vld [vmem:[#allocation2 + $0x18] sm:$0xf] }
 0x177   : > { %2271 = vst [vmem:[#allocation3 + $0x140] sm:$0xf] %v2263_v36  ;;  %1264 = vrot.lane.b32.xlu1 %v1252_v24, %s10832_s25  ;;  %v2341_v48 = vsel %vm10798_vm7, %v2332_v56, %v8749_v4  ;;  %v1621_v36 = vmul.f32 %v8822_v9, %v1595_v5 }
 0x178   : > { %v8828_v23 = vsel %vm1538_vm15, %v11210_v15, %v8809_v44  ;;  %2349 = vst [vmem:[#allocation3 + $0x140] sm:$0xf0] %v2341_v48  ;;  %v11213_v48 = vld [vmem:[#allocation44_spill] sm:$0xff]  ;;  %vm10827_vm15 = vcmask 375808  }
 0x179   : > { %11211 = vst [vmem:[#allocation99_spill] sm:$0xff] %v8828_v23  ;;  %v2187_v50 = vpop.permute.xlu1 %2186  ;;  %1338 = vrot.lane.b32.xlu0 %v1332_v8, %s10834_s22  ;;  %v1550_v46 = vmul.f32 %v8828_v23, %v1524_v61  ;;  %v11212_v8 = vld [vmem:[#allocation43_spill] sm:$0xff]  ;;  %v6537_v61 = vunpack.i.h.bf16 %v8447_v1 }
 0x17a   : > { %v8834_v20 = vpop.permute.xlu0 %2188  ;;  %v1551_v41 = vmul.f32 %v8809_v44, %v11212_v8  ;;  %v2763_v15 = vld [vmem:[#allocation3 + $0x190] sm:$0xff] }
 0x17b   : > { %1340 = vrot.lane.b32.xlu1 %v1333_v38, %s10834_s22  ;;  %v2195_v24 = vsel %vm897_vm12, %v2187_v50, %v8834_v20  ;;  %v2764_v56 = vld [vmem:[#allocation3 + $0x198] sm:$0xff]  ;;  %v1622_v38 = vmul.f32 %v8806_v40, %v11213_v48 }
 0x17c   : > { %2203 = vst [vmem:[#allocation3 + $0x128] sm:$0xf0] %v2195_v24  ;;  %2869 = vmatprep.subr.mxu1 %v2764_v56  ;;  %v1631_v24 = vrot.slane %v1621_v36, 4  ;;  %v8854_v56 = vunpack.i.l.bf16 %v8512_v31 }
 0x17d   : > { %v2407_v4 = vpop.permute.xlu1 %2406  ;;  %1563 = vrot.lane.b32.xlu0 %v1550_v46, %s10803_s21  ;;  %2870 = vmatpush1.msra.mxu1 %v2763_v15  ;;  %v6567_v46 = vunpack.i.h.bf16 %v8512_v31  ;;  %v1632_v36 = vrot.slane %v1622_v38, 4  ;;  %v10787_v15 = vunpack.i.l.bf16 %v8445_v55  ;;  %v10786_v31 = vunpack.i.l.bf16 %v8524_v26 }
 0x17e   : > { %v2412_v12 = vsel %vm1119_vm5, %v8654_v14, %v2407_v4  ;;  %v2409_v5 = vpop.permute.xlu0 %2408  ;;  %v8850_v14 = vunpack.i.l.bf16 %v8447_v1 }
 0x17f   : > { %2420 = vst [vmem:[#allocation3 + $0x170] sm:$0xf] %v2412_v12  ;;  %1565 = vrot.lane.b32.xlu1 %v1551_v41, %s10803_s21  ;;  %v2413_v8 = vsel %vm1119_vm5, %v2407_v4, %v2409_v5  ;;  %v2753_v48 = vld [vmem:[#allocation3 + $0x140] sm:$0xff]  ;;  %v11214_v41 = vld [vmem:[#allocation35_spill] sm:$0xff]  ;;  %v11215_v5 = vld [vmem:[#allocation34_spill] sm:$0xff]  ;;  %v8873_v38 = vsel %vm1090_vm1, %v8854_v56, %v6567_v46  ;;  %v8886_v34 = vsel %vm1090_vm1, %v6567_v46, %v10786_v31  ;;  %s11238_s21 = smov 120  }
 0x180   : > { %2421 = vst [vmem:[#allocation3 + $0x178] sm:$0xf] %v2413_v8  ;;  %2803 = vmatpush1.msra.mxu0 %v2753_v48  ;;  %v1321_v1 = vmul.f32 %v8761_v45, %v11214_v41  ;;  %v1250_v8 = vmul.f32 %v8765_v25, %v11215_v5  ;;  %11217 = vst [vmem:[#allocation44_spill] sm:$0xff] %v8873_v38  ;;  %v8881_v5 = vsel %vm1161_vm0, %v6537_v61, %v10787_v15 }
 0x181   : > { %v2481_v57 = vpop.permute.xlu1 %2480  ;;  %1639 = vrot.lane.b32.xlu0 %v1631_v24, %s10811_s20  ;;  %11218 = vst [vmem:[#allocation35_spill] sm:$0xff] %v8881_v5  ;;  %11219 = vst [vmem:[#allocation34_spill] sm:$0xff] %v8886_v34  ;;  %v11220_v15 = vunpack.i.l.bf16 %v8359_v37 }
 0x182   : > { %v2486_v12 = vsel %vm10790_vm6, %v8709_v2, %v2481_v57  ;;  %v2483_v4 = vpop.permute.xlu0 %2482  ;;  %v8869_v2 = vsel %vm1161_vm0, %v8850_v14, %v6537_v61  ;;  %v8894_v61 = vunpack.i.h.bf16 %v8359_v37 }
 0x183   : > { %2494 = vst [vmem:[#allocation3 + $0x170] sm:$0xf0] %v2486_v12  ;;  %1641 = vrot.lane.b32.xlu1 %v1632_v36, %s10811_s20  ;;  %11216 = vst [vmem:[#allocation43_spill] sm:$0xff] %v8869_v2  ;;  %v2487_v24 = vsel %vm10790_vm6, %v2481_v57, %v2483_v4  ;;  %v2750_v41 = vld [vmem:[#allocation3 + $0x128] sm:$0xff]  ;;  %v1331_v36 = vrot.slane %v1321_v1, 4  ;;  %vm11223_vm6 = vcmask 146432  }
 0x184   : > { %2495 = vst [vmem:[#allocation3 + $0x178] sm:$0xf0] %v2487_v24  ;;  %2804 = vmatprep.subr.mxu0 %v2750_v41  ;;  %v1074_v57 = vld [vmem:[#allocation2 + $0x8] sm:$0xf]  ;;  %v8897_v24 = vunpack.i.h.bf16 %v8424_v16  ;;  %v1146_v41 = vld [vmem:[#allocation2 + $0x10] sm:$0xf] }
 0x185   : > { %v2185_v48 = vpop.permute.xlu1 %2184  ;;  %1260 = vrot.lane.b32.xlu0 %v1250_v8, %s10832_s25  ;;  %v1145_v4 = vld [vmem:[#allocation2 + $0x8] sm:$0xf]  ;;  %v1100_v1 = vmul.f32 %v8873_v38, %v1074_v57  ;;  %v1172_v57 = vmul.f32 %v8881_v5, %v1146_v41  ;;  %v8912_v38 = vsel %vm1463_vm2, %v11220_v15, %v8894_v61  ;;  %v1374_v15 = vld [vmem:[#allocation2 + $0x18] sm:$0xf]  ;;  %s11250_s20 = smov 127  }
 0x186   : > { %v2194_v12 = vsel %vm897_vm12, %v2185_v48, %v2187_v50  ;;  %v8889_v50 = vpop.permute.xlu0 %2007  ;;  %v1171_v8 = vmul.f32 %v8869_v2, %v1145_v4  ;;  %v1075_v48 = vld [vmem:[#allocation2 + $0x10] sm:$0xf]  ;;  %11221 = vst [vmem:[#allocation100_spill] sm:$0xff] %v8912_v38  ;;  %v11222_v2 = vunpack.i.l.bf16 %v8424_v16  ;;  %v1449_v16 = vld [vmem:[#allocation2 + $0x18] sm:$0xf] }
 0x187   : > { %2202 = vst [vmem:[#allocation3 + $0x120] sm:$0xf0] %v2194_v12  ;;  %1336 = vrot.lane.b32.xlu1 %v1331_v36, %s10834_s22  ;;  %v1101_v36 = vmul.f32 %v8886_v34, %v1075_v48  ;;  %v1475_v5 = vmul.f32 %v8912_v38, %v1449_v16 }
 0x188   : > { %v1181_v31 = vrot.slane %v1171_v8, 4  ;;  %v1182_v8 = vrot.slane %v1172_v57, 4 }
 0x189   : > { %v8899_v46 = vpop.permute.xlu1 %2009  ;;  %1111 = vrot.lane.b32.xlu0 %v1100_v1, %s10825_s30  ;;  %v8918_v1 = vsel %vm11223_vm6, %v11222_v2, %v8897_v24  ;;  %v1485_v16 = vrot.slane %v1475_v5, 4  ;;  %v11227_v5 = vld [vmem:[#allocation37_spill] sm:$0xff]  ;;  %vm1864_vm6 = vcmask 441344  }
 0x18a   : > { %v2017_v12 = vsel %vm10828_vm11, %v8889_v50, %v8899_v46  ;;  %v2084_v4 = vpop.permute.xlu0 %2083  ;;  %11224 = vst [vmem:[#allocation101_spill] sm:$0xff] %v8918_v1  ;;  %v1400_v34 = vmul.f32 %v8918_v1, %v1374_v15  ;;  %v10797_v1 = vunpack.i.l.bf16 %v8574_v28 }
 0x18b   : > { %2025 = vst [vmem:[#allocation3 + $0x108] sm:$0xf] %v2017_v12  ;;  %1113 = vrot.lane.b32.xlu1 %v1101_v36, %s10825_s30  ;;  %v2760_v41 = vld [vmem:[#allocation3 + $0x178] sm:$0xff]  ;;  %v2759_v36 = vld [vmem:[#allocation3 + $0x170] sm:$0xff] }
 0x18c   : > { %2871 = vmatprep.subr.mxu1 %v2760_v41  ;;  %v11225_v41 = vld [vmem:[#allocation45_spill] sm:$0xff] }
 0x18d   : > { %v8920_v48 = vpop.permute.xlu1 %2085  ;;  %1187 = vrot.lane.b32.xlu0 %v1181_v31, %s10830_s1  ;;  %2872 = vmatpush1.msra.mxu1 %v2759_v36  ;;  %v6557_v36 = vunpack.i.h.bf16 %v8492_v0 }
 0x18e   : > { %v2093_v12 = vsel %vm10827_vm15, %v2084_v4, %v8920_v48  ;;  %v2749_v37 = vld [vmem:[#allocation3 + $0x120] sm:$0xff]  ;;  %v2260_v2 = vpop.permute.xlu0 %2259 }
 0x18f   : > { %2101 = vst [vmem:[#allocation3 + $0x108] sm:$0xf0] %v2093_v12  ;;  %2805 = vmatpush1.msra.mxu0 %v2749_v37  ;;  %1189 = vrot.lane.b32.xlu1 %v1182_v8, %s10830_s1  ;;  %v2265_v23 = vsel %vm968_vm3, %v8742_v51, %v2260_v2  ;;  %v1401_v12 = vmul.f32 %v8897_v24, %v11225_v41  ;;  %v11226_v37 = vld [vmem:[#allocation46_spill] sm:$0xff]  ;;  %v8939_v51 = vunpack.i.l.bf16 %v8492_v0 }
 0x190   : > { %2273 = vst [vmem:[#allocation3 + $0x150] sm:$0xf] %v2265_v23  ;;  %v1476_v8 = vmul.f32 %v8894_v61, %v11226_v37  ;;  %v6587_v23 = vunpack.i.h.bf16 %v8568_v60  ;;  %v1170_v0 = vmul.f32 %v8850_v14, %v11227_v5  ;;  %v10799_v37 = vunpack.i.l.bf16 %v8495_v30 }
 0x191   : > { %v2262_v31 = vpop.permute.xlu1 %2261  ;;  %1413 = vrot.lane.b32.xlu0 %v1400_v34, %s10836_s26  ;;  %v8943_v34 = vunpack.i.l.bf16 %v8568_v60 }
 0x192   : > { %v2266_v57 = vsel %vm968_vm3, %v2260_v2, %v2262_v31  ;;  %v2338_v15 = vpop.permute.xlu0 %2337  ;;  %v1486_v41 = vrot.slane %v1476_v8, 4  ;;  %v8976_v5 = vsel %vm939_vm14, %v6587_v23, %v10797_v1 }
 0x193   : > { %2274 = vst [vmem:[#allocation3 + $0x158] sm:$0xf] %v2266_v57  ;;  %1415 = vrot.lane.b32.xlu1 %v1401_v12, %s10836_s26  ;;  %v2343_v2 = vsel %vm10798_vm7, %v8758_v17, %v2338_v15  ;;  %v11228_v17 = vld [vmem:[#allocation36_spill] sm:$0xff]  ;;  %v8962_v8 = vsel %vm939_vm14, %v8943_v34, %v6587_v23  ;;  %v924_v23 = vld [vmem:[#allocation2 + $0x10] sm:$0xf] }
 0x194   : > { %2351 = vst [vmem:[#allocation3 + $0x150] sm:$0xf0] %v2343_v2  ;;  %v1099_v2 = vmul.f32 %v8854_v56, %v11228_v17  ;;  %11230 = vst [vmem:[#allocation46_spill] sm:$0xff] %v8962_v8 }
 0x195   : > { %v2340_v31 = vpop.permute.xlu1 %2339  ;;  %1493 = vrot.lane.b32.xlu0 %v1485_v16, %s10795_s24  ;;  %11232 = vst [vmem:[#allocation36_spill] sm:$0xff] %v8976_v5 }
 0x196   : > { %v2344_v57 = vsel %vm10798_vm7, %v2338_v15, %v2340_v31  ;;  %v2746_v12 = vld [vmem:[#allocation3 + $0x108] sm:$0xff]  ;;  %v2006_v60 = vpop.permute.xlu0 %2005  ;;  %v8958_v15 = vsel %vm1014_vm8, %v8939_v51, %v6557_v36  ;;  %vm10840_vm7 = vcmask 392192  }
 0x197   : > { %2352 = vst [vmem:[#allocation3 + $0x158] sm:$0xf0] %v2344_v57  ;;  %2806 = vmatprep.subr.mxu0 %v2746_v12  ;;  %1495 = vrot.lane.b32.xlu1 %v1486_v41, %s10795_s24  ;;  %11229 = vst [vmem:[#allocation45_spill] sm:$0xff] %v8958_v15  ;;  %v2016_v16 = vsel %vm10828_vm11, %v2006_v60, %v8889_v50  ;;  %v1180_v41 = vrot.slane %v1170_v0, 4  ;;  %v8971_v12 = vsel %vm1014_vm8, %v6557_v36, %v10799_v37  ;;  %v923_v50 = vld [vmem:[#allocation2 + $0x8] sm:$0xf] }
 0x198   : > { %2024 = vst [vmem:[#allocation3 + $0x100] sm:$0xf] %v2016_v16  ;;  %11231 = vst [vmem:[#allocation37_spill] sm:$0xff] %v8971_v12  ;;  %v998_v60 = vld [vmem:[#allocation2 + $0x8] sm:$0xf]  ;;  %v949_v17 = vmul.f32 %v8962_v8, %v923_v50  ;;  %v8985_v36 = vunpack.i.h.bf16 %v8482_v53  ;;  %s11233_s24 = smov 126  }
 0x199   : > { %v2082_v31 = vpop.permute.xlu1 %2081  ;;  %1109 = vrot.lane.b32.xlu0 %v1099_v2, %s10825_s30  ;;  %v1024_v0 = vmul.f32 %v8958_v15, %v998_v60  ;;  %v8982_v2 = vunpack.i.h.bf16 %v8399_v43  ;;  %v11234_v15 = vunpack.i.l.bf16 %v8399_v43  ;;  %v1227_v43 = vld [vmem:[#allocation2 + $0x18] sm:$0xf] }
 0x19a   : > { %v2092_v57 = vsel %vm10827_vm15, %v2082_v31, %v2084_v4  ;;  %v1857_v4 = vpop.permute.xlu0 %1856  ;;  %v999_v31 = vld [vmem:[#allocation2 + $0x10] sm:$0xf] }
 0x19b   : > { %2100 = vst [vmem:[#allocation3 + $0x100] sm:$0xf0] %v2092_v57  ;;  %1185 = vrot.lane.b32.xlu1 %v1180_v41, %s10830_s1  ;;  %v950_v41 = vmul.f32 %v8976_v5, %v924_v23  ;;  %v1025_v60 = vmul.f32 %v8971_v12, %v999_v31  ;;  %v2755_v1 = vld [vmem:[#allocation3 + $0x150] sm:$0xff]  ;;  %v1034_v8 = vrot.slane %v1024_v0, 4  ;;  %v8999_v38 = vsel %vm1312_vm4, %v11234_v15, %v8982_v2  ;;  %v1298_v15 = vld [vmem:[#allocation2 + $0x18] sm:$0xf] }
 0x19c   : > { %11235 = vst [vmem:[#allocation102_spill] sm:$0xff] %v8999_v38  ;;  %v9017_v5 = vunpack.i.l.bf16 %v8548_v7  ;;  %v10808_v12 = vunpack.i.l.bf16 %v8551_v33 }
 0x19d   : > { %v8987_v16 = vpop.permute.xlu1 %1858  ;;  %960 = vrot.lane.b32.xlu0 %v949_v17, %s11233_s24  ;;  %v11236_v17 = vunpack.i.l.bf16 %v8482_v53 }
 0x19e   : > { %v1866_v57 = vsel %vm1864_vm6, %v1857_v4, %v8987_v16  ;;  %v2756_v50 = vld [vmem:[#allocation3 + $0x158] sm:$0xff]  ;;  %v1937_v37 = vpop.permute.xlu0 %1936 }
 0x19f   : > { %1874 = vst [vmem:[#allocation3 + $0xe8] sm:$0xf] %v1866_v57  ;;  %2873 = vmatprep.subr.mxu1 %v2756_v50  ;;  %962 = vrot.lane.b32.xlu1 %v950_v41, %s11233_s24  ;;  %v9005_v23 = vsel %vm1241_vm10, %v11236_v17, %v8985_v36  ;;  %v1324_v50 = vmul.f32 %v8999_v38, %v1298_v15  ;;  %v6577_v17 = vunpack.i.h.bf16 %v8548_v7  ;;  %vm11241_vm10 = vcmask 7168  }
 0x1a0   : > { %2874 = vmatpush1.msra.mxu1 %v2755_v1  ;;  %11237 = vst [vmem:[#allocation103_spill] sm:$0xff] %v9005_v23  ;;  %v1035_v1 = vrot.slane %v1025_v60, 4  ;;  %v1253_v53 = vmul.f32 %v9005_v23, %v1227_v43  ;;  %v11240_v43 = vld [vmem:[#allocation48_spill] sm:$0xff]  ;;  %vm11244_vm4 = vmmov %vm11241_vm10 }
 0x1a1   : > { %v9007_v31 = vpop.permute.xlu1 %1938  ;;  %1040 = vrot.lane.b32.xlu0 %v1034_v8, %s11238_s21  ;;  %v1325_v15 = vmul.f32 %v8982_v2, %v11240_v43  ;;  %v1334_v23 = vrot.slane %v1324_v50, 4  ;;  %v11243_v43 = vld [vmem:[#allocation41_spill] sm:$0xff]  ;;  %v9041_v50 = vsel %vm11244_vm4, %v6577_v17, %v10808_v12  ;;  %vm1793_vm4 = vcmask 449536  }
 0x1a2   : > { %v1946_v57 = vsel %vm10840_vm7, %v1937_v37, %v9007_v31  ;;  %v2745_v0 = vld [vmem:[#allocation3 + $0x100] sm:$0xff]  ;;  %v2191_v41 = vpop.permute.xlu0 %2190  ;;  %11245 = vst [vmem:[#allocation48_spill] sm:$0xff] %v9041_v50 }
 0x1a3   : > { %1954 = vst [vmem:[#allocation3 + $0xe8] sm:$0xf0] %v1946_v57  ;;  %2807 = vmatpush1.msra.mxu0 %v2745_v0  ;;  %1042 = vrot.lane.b32.xlu1 %v1035_v1, %s11238_s21  ;;  %v2196_v8 = vsel %vm897_vm12, %v8834_v20, %v2191_v41  ;;  %v11239_v1 = vld [vmem:[#allocation47_spill] sm:$0xff]  ;;  %v9031_v20 = vsel %vm11241_vm10, %v9017_v5, %v6577_v17  ;;  %vm1718_vm10 = vcmask 457728  }
 0x1a4   : > { %2204 = vst [vmem:[#allocation3 + $0x130] sm:$0xf0] %v2196_v8  ;;  %v1254_v0 = vmul.f32 %v8985_v36, %v11239_v1  ;;  %11242 = vst [vmem:[#allocation47_spill] sm:$0xff] %v9031_v20 }
 0x1a5   : > { %v2193_v60 = vpop.permute.xlu1 %2192  ;;  %1266 = vrot.lane.b32.xlu0 %v1253_v53, %s10832_s25 }
 0x1a6   : > { %v2197_v57 = vsel %vm897_vm12, %v2191_v41, %v2193_v60  ;;  %v1855_v7 = vpop.permute.xlu0 %1854  ;;  %v1335_v60 = vrot.slane %v1325_v15, 4 }
 0x1a7   : > { %2205 = vst [vmem:[#allocation3 + $0x138] sm:$0xf0] %v2197_v57  ;;  %1268 = vrot.lane.b32.xlu1 %v1254_v0, %s10832_s25  ;;  %v1865_v41 = vsel %vm1864_vm6, %v1855_v7, %v1857_v4  ;;  %v1023_v57 = vmul.f32 %v8939_v51, %v11243_v43  ;;  %v847_v4 = vld [vmem:[#allocation2 + $0x8] sm:$0xf]  ;;  %v9050_v7 = vunpack.i.h.bf16 %v8445_v55 }
 0x1a8   : > { %1873 = vst [vmem:[#allocation3 + $0xe0] sm:$0xf] %v1865_v41  ;;  %v873_v15 = vmul.f32 %v9031_v20, %v847_v4  ;;  %v9053_v41 = vunpack.i.h.bf16 %v8524_v26  ;;  %v11247_v20 = vunpack.i.l.bf16 %v8445_v55  ;;  %v1076_v55 = vld [vmem:[#allocation2 + $0x18] sm:$0xf] }
 0x1a9   : > { %v1935_v53 = vpop.permute.xlu1 %1934  ;;  %1342 = vrot.lane.b32.xlu0 %v1334_v23, %s10834_s22 }
 0x1aa   : > { %v1945_v8 = vsel %vm10840_vm7, %v1935_v53, %v1937_v37  ;;  %v2742_v1 = vld [vmem:[#allocation3 + $0xe8] sm:$0xff]  ;;  %v9044_v0 = vpop.permute.xlu0 %1710  ;;  %v11246_v37 = vld [vmem:[#allocation40_spill] sm:$0xff]  ;;  %v848_v53 = vld [vmem:[#allocation2 + $0x10] sm:$0xf]  ;;  %v883_v12 = vrot.slane %v873_v15, 4  ;;  %v9067_v38 = vsel %vm1161_vm0, %v11247_v20, %v9050_v7  ;;  %vm11258_vm0 = vcmask 7168  }
 0x1ab   : > { %1953 = vst [vmem:[#allocation3 + $0xe0] sm:$0xf0] %v1945_v8  ;;  %2808 = vmatprep.subr.mxu0 %v2742_v1  ;;  %1344 = vrot.lane.b32.xlu1 %v1335_v60, %s10834_s22  ;;  %v948_v23 = vmul.f32 %v8943_v34, %v11246_v37  ;;  %v1033_v60 = vrot.slane %v1023_v57, 4  ;;  %v874_v43 = vmul.f32 %v9041_v50, %v848_v53  ;;  %v2751_v4 = vld [vmem:[#allocation3 + $0x130] sm:$0xff]  ;;  %v11248_v57 = vunpack.i.l.bf16 %v8524_v26  ;;  %v1147_v20 = vld [vmem:[#allocation2 + $0x18] sm:$0xf] }
 0x1ad   : > { %v9055_v17 = vpop.permute.xlu1 %1712  ;;  %958 = vrot.lane.b32.xlu0 %v948_v23, %s11233_s24  ;;  %v9073_v23 = vsel %vm1090_vm1, %v11248_v57, %v9053_v41  ;;  %v884_v15 = vrot.slane %v874_v43, 4  ;;  %v11251_v43 = vld [vmem:[#allocation49_spill] sm:$0xff]  ;;  %vm10829_vm1 = vcmask 515072  }
 0x1ae   : > { %v1720_v8 = vsel %vm1718_vm10, %v9044_v0, %v9055_v17  ;;  %v2752_v1 = vld [vmem:[#allocation3 + $0x138] sm:$0xff]  ;;  %v1786_v37 = vpop.permute.xlu0 %1785  ;;  %11249 = vst [vmem:[#allocation41_spill] sm:$0xff] %v9073_v23  ;;  %v1102_v26 = vmul.f32 %v9073_v23, %v1076_v55  ;;  %v9095_v55 = vunpack.i.h.bf16 %v8574_v28 }
 0x1af   : > { %1728 = vst [vmem:[#allocation3 + $0xc8] sm:$0xf] %v1720_v8  ;;  %2875 = vmatprep.subr.mxu1 %v2752_v1  ;;  %1038 = vrot.lane.b32.xlu1 %v1033_v60, %s11238_s21 }
 0x1b0   : > { %2876 = vmatpush1.msra.mxu1 %v2751_v4  ;;  %v1173_v4 = vmul.f32 %v9067_v38, %v1147_v20 }
 0x1b1   : > { %v9075_v53 = vpop.permute.xlu1 %1787  ;;  %889 = vrot.lane.b32.xlu0 %v883_v12, %s11250_s20 }
 0x1b2   : > { %v1795_v8 = vsel %vm1793_vm4, %v1786_v37, %v9075_v53  ;;  %v2741_v60 = vld [vmem:[#allocation3 + $0xe0] sm:$0xff]  ;;  %v2012_v1 = vpop.permute.xlu0 %2011  ;;  %v1183_v20 = vrot.slane %v1173_v4, 4  ;;  %v9111_v4 = vunpack.i.h.bf16 %v8551_v33 }
 0x1b3   : > { %1803 = vst [vmem:[#allocation3 + $0xc8] sm:$0xf0] %v1795_v8  ;;  %2809 = vmatpush1.msra.mxu0 %v2741_v60  ;;  %891 = vrot.lane.b32.xlu1 %v884_v15, %s11250_s20  ;;  %v2018_v57 = vsel %vm10828_vm11, %v8899_v46, %v2012_v1  ;;  %v1103_v8 = vmul.f32 %v9053_v41, %v11251_v43  ;;  %v11252_v60 = vld [vmem:[#allocation50_spill] sm:$0xff] }
 0x1b4   : > { %2026 = vst [vmem:[#allocation3 + $0x110] sm:$0xf] %v2018_v57  ;;  %v1174_v15 = vmul.f32 %v9050_v7, %v11252_v60 }
 0x1b5   : > { %v2014_v50 = vpop.permute.xlu1 %2013  ;;  %1115 = vrot.lane.b32.xlu0 %v1102_v26, %s10825_s30 }
 0x1b6   : > { %v2019_v12 = vsel %vm10828_vm11, %v2012_v1, %v2014_v50  ;;  %v2088_v46 = vpop.permute.xlu0 %2087  ;;  %v11253_v50 = vld [vmem:[#allocation42_spill] sm:$0xff]  ;;  %v1184_v60 = vrot.slane %v1174_v15, 4 }
 0x1b7   : > { %2027 = vst [vmem:[#allocation3 + $0x118] sm:$0xf] %v2019_v12  ;;  %1117 = vrot.lane.b32.xlu1 %v1103_v8, %s10825_s30  ;;  %v872_v1 = vmul.f32 %v9017_v5, %v11253_v50  ;;  %v2094_v26 = vsel %vm10827_vm15, %v8920_v48, %v2088_v46  ;;  %v11254_v12 = vunpack.i.l.bf16 %v8495_v30  ;;  %v11255_v48 = vunpack.i.l.bf16 %v8574_v28  ;;  %s11282_s30 = smov 73  }
 0x1b8   : > { %2102 = vst [vmem:[#allocation3 + $0x110] sm:$0xf0] %v2094_v26  ;;  %v925_v26 = vld [vmem:[#allocation2 + $0x18] sm:$0xf] }
 0x1b9   : > { %v2090_v57 = vpop.permute.xlu1 %2089  ;;  %1191 = vrot.lane.b32.xlu0 %v1183_v20, %s10830_s1  ;;  %v9108_v8 = vsel %vm1014_vm8, %v11254_v12, %v9092_v49  ;;  %v9117_v50 = vsel %vm939_vm14, %v11255_v48, %v9095_v55  ;;  %v11260_v48 = vld [vmem:[#allocation52_spill] sm:$0xff]  ;;  %vm1643_vm14 = vcmask 506880   ;;  %vm11264_vm8 = vcmask 900096  }
 0x1ba   : > { %v2095_v43 = vsel %vm10827_vm15, %v2088_v46, %v2090_v57  ;;  %v2738_v23 = vld [vmem:[#allocation3 + $0xc8] sm:$0xff]  ;;  %11256 = vst [vmem:[#allocation40_spill] sm:$0xff] %v9117_v50  ;;  %v1709_v15 = vpop.permute.xlu0 %1708  ;;  %v882_v46 = vrot.slane %v872_v1, 4  ;;  %v1000_v57 = vld [vmem:[#allocation2 + $0x18] sm:$0xf]  ;;  %v951_v28 = vmul.f32 %v9117_v50, %v925_v26 }
 0x1bb   : > { %2103 = vst [vmem:[#allocation3 + $0x118] sm:$0xf0] %v2095_v43  ;;  %2810 = vmatprep.subr.mxu0 %v2738_v23  ;;  %1193 = vrot.lane.b32.xlu1 %v1184_v60, %s10830_s1  ;;  %v1719_v30 = vsel %vm1718_vm10, %v1709_v15, %v9044_v0  ;;  %v1026_v43 = vmul.f32 %v9108_v8, %v1000_v57  ;;  %v11257_v23 = vunpack.i.l.bf16 %v8551_v33  ;;  %v11259_v60 = vld [vmem:[#allocation51_spill] sm:$0xff] }
 0x1bc   : > { %1727 = vst [vmem:[#allocation3 + $0xc0] sm:$0xf] %v1719_v30  ;;  %v1027_v15 = vmul.f32 %v9092_v49, %v11260_v48  ;;  %v849_v30 = vld [vmem:[#allocation2 + $0x18] sm:$0xf] }
 0x1bd   : > { %v1784_v20 = vpop.permute.xlu1 %1783  ;;  %887 = vrot.lane.b32.xlu0 %v882_v46, %s11250_s20  ;;  %v9130_v1 = vsel %vm11258_vm0, %v11257_v23, %v9111_v4  ;;  %vm11265_vm0 = vmmov %vm11264_vm8 }
 0x1be   : > { %v1794_v12 = vsel %vm1793_vm4, %v1784_v20, %v1786_v37  ;;  %v1560_v0 = vpop.permute.xlu0 %1559  ;;  %v952_v37 = vmul.f32 %v9095_v55, %v11259_v60  ;;  %v1036_v20 = vrot.slane %v1026_v43, 4  ;;  %v875_v57 = vmul.f32 %v9130_v1, %v849_v30  ;;  %v11261_v60 = vld [vmem:[#allocation53_spill] sm:$0xff]  ;;  %vm11267_vm15 = vmmov %vm11265_vm0 }
 0x1bf   : > { %1802 = vst [vmem:[#allocation3 + $0xc0] sm:$0xf0] %v1794_v12  ;;  %964 = vrot.lane.b32.xlu1 %v951_v28, %s11233_s24  ;;  %v2747_v12 = vld [vmem:[#allocation3 + $0x110] sm:$0xff]  ;;  %v1037_v23 = vrot.slane %v1027_v15, 4  ;;  %v876_v48 = vmul.f32 %v9111_v4, %v11261_v60 }
 0x1c0   : > { %v885_v43 = vrot.slane %v875_v57, 4 }
 0x1c1   : > { %v9137_v46 = vpop.permute.xlu1 %1561  ;;  %966 = vrot.lane.b32.xlu0 %v952_v37, %s11233_s24 }
 0x1c2   : > { %v1569_v33 = vsel %vm10829_vm1, %v1560_v0, %v9137_v46  ;;  %v2748_v26 = vld [vmem:[#allocation3 + $0x118] sm:$0xff]  ;;  %v1636_v28 = vpop.permute.xlu0 %1635 }
 0x1c3   : > { %1577 = vst [vmem:[#allocation3 + $0xa8] sm:$0xf] %v1569_v33  ;;  %2877 = vmatprep.subr.mxu1 %v2748_v26  ;;  %1044 = vrot.lane.b32.xlu1 %v1036_v20, %s11238_s21  ;;  %v886_v20 = vrot.slane %v876_v48, 4  ;;  %v2769_v26 = vld [vmem:[%s11262_s29] sm:$0xff]  ;;  %s11276_s29 = smov 119  }
 0x1c4   : > { %2878 = vmatpush1.msra.mxu1 %v2747_v12 }
 0x1c5   : > { %v9146_v50 = vpop.permute.xlu1 %1637  ;;  %1046 = vrot.lane.b32.xlu0 %v1037_v23, %s11238_s21 }
 0x1c6   : > { %v2737_v37 = vld [vmem:[#allocation3 + $0xc0] sm:$0xff]  ;;  %v1645_v30 = vsel %vm1643_vm14, %v1636_v28, %v9146_v50  ;;  %v1861_v33 = vpop.permute.xlu0 %1860 }
 0x1c7   : > { %2811 = vmatpush1.msra.mxu0 %v2737_v37  ;;  %1653 = vst [vmem:[#allocation3 + $0xa8] sm:$0xf0] %v1645_v30  ;;  %893 = vrot.lane.b32.xlu1 %v885_v43, %s11250_s20  ;;  %v1867_v15 = vsel %vm1864_vm6, %v8987_v16, %v1861_v33  ;;  %v2971_v16 = vld [vmem:[%s11263_s4] sm:$0xff]  ;;  %s11299_s4 = smov 112  }
 0x1c8   : > { %1875 = vst [vmem:[#allocation3 + $0xf0] sm:$0xf] %v1867_v15  ;;  %v6605_v15 = vld [vmem:[#allocation2 + $0x28] sm:$0xff] }
 0x1c9   : > { %v1863_v12 = vpop.permute.xlu1 %1862  ;;  %895 = vrot.lane.b32.xlu0 %v886_v20, %s11250_s20 }
 0x1ca   : > { %v1868_v57 = vsel %vm1864_vm6, %v1861_v33, %v1863_v12  ;;  %v1941_v23 = vpop.permute.xlu0 %1940 }
 0x1cb   : > { %1876 = vst [vmem:[#allocation3 + $0xf8] sm:$0xf] %v1868_v57  ;;  %2772 = vperm.xlu1 %6593, %v2769_v26   ;;  %v1947_v60 = vsel %vm10840_vm7, %v9007_v31, %v1941_v23  ;;  %v3909_v31 = vmul.f32 %v6605_v15, %v8245_v13 }
 0x1cc   : > { %1955 = vst [vmem:[#allocation3 + $0xf0] sm:$0xf0] %v1947_v60 }
 0x1cd   : > { %v1943_v48 = vpop.permute.xlu1 %1942 }
 0x1ce   : > { %v1948_v43 = vsel %vm10840_vm7, %v1941_v23, %v1943_v48  ;;  %v2734_v37 = vld [vmem:[#allocation3 + $0xa8] sm:$0xff]  ;;  %v1558_v30 = vpop.permute.xlu0 %1557  ;;  %v3835_v23 = vmul.f32 %v6605_v15, %v8302_v22  ;;  %v3761_v48 = vmul.f32 %v6605_v15, %v8394_v42 }
 0x1cf   : > { %1956 = vst [vmem:[#allocation3 + $0xf8] sm:$0xf0] %v1948_v43  ;;  %2974 = vperm.xlu1 %6593, %v2971_v16   ;;  %2812 = vmatprep.subr.mxu0 %v2734_v37  ;;  %v1568_v33 = vsel %vm10829_vm1, %v1558_v30, %v1560_v0 }
 0x1d0   : > { %1576 = vst [vmem:[#allocation3 + $0xa0] sm:$0xf] %v1568_v33 }
 0x1d1   : > { %v1634_v20 = vpop.permute.xlu1 %1633 }
 0x1d2   : > { %v1644_v26 = vsel %vm1643_vm14, %v1634_v20, %v1636_v28 }
 0x1d3   : > { %1652 = vst [vmem:[#allocation3 + $0xa0] sm:$0xf0] %v1644_v26  ;;  %3923 = vrot.lane.b32.xlu1 %v3909_v31, %s10834_s22  ;;  %v1410_v12 = vpop.permute.xlu0 %1409  ;;  %v2743_v13 = vld [vmem:[#allocation3 + $0xf0] sm:$0xff]  ;;  %s11293_s22 = smov 64  }
 0x1d5   : > { %v9169_v57 = vpop.permute.xlu1 %1411 }
 0x1d6   : > { %v1419_v60 = vsel %vm11264_vm8, %v1410_v12, %v9169_v57  ;;  %v2744_v16 = vld [vmem:[#allocation3 + $0xf8] sm:$0xff]  ;;  %vm11266_vm8 = vcmask 965632  }
 0x1d7   : > { %1427 = vst [vmem:[#allocation3 + $0x88] sm:$0xf] %v1419_v60  ;;  %3849 = vrot.lane.b32.xlu1 %v3835_v23, %s10830_s1  ;;  %2879 = vmatprep.subr.mxu1 %v2744_v16  ;;  %v1490_v0 = vpop.permute.xlu0 %1489  ;;  %s11291_s1 = smov 62  }
 0x1d8   : > { %2880 = vmatpush1.msra.mxu1 %v2743_v13 }
 0x1d9   : > { %v9175_v28 = vpop.permute.xlu1 %1491 }
 0x1da   : > { %v1498_v43 = vsel %vm1463_vm2, %v1490_v0, %v9175_v28  ;;  %v2733_v37 = vld [vmem:[#allocation3 + $0xa0] sm:$0xff] }
 0x1db   : > { %1506 = vst [vmem:[#allocation3 + $0x88] sm:$0xf0] %v1498_v43  ;;  %3775 = vrot.lane.b32.xlu1 %v3761_v48, %s11238_s21  ;;  %2813 = vmatpush1.msra.mxu0 %v2733_v37  ;;  %v1715_v22 = vpop.permute.xlu0 %1714 }
 0x1dc   : > { %v1721_v30 = vsel %vm1718_vm10, %v9055_v17, %v1715_v22 }
 0x1dd   : > { %1729 = vst [vmem:[#allocation3 + $0xd0] sm:$0xf] %v1721_v30  ;;  %v1717_v33 = vpop.permute.xlu1 %1716 }
 0x1de   : > { %v1722_v20 = vsel %vm1718_vm10, %v1715_v22, %v1717_v33 }
 0x1df   : > { %1730 = vst [vmem:[#allocation3 + $0xd8] sm:$0xf] %v1722_v20  ;;  %v1790_v31 = vpop.permute.xlu0 %1789 }
 0x1e0   : > { %v1796_v42 = vsel %vm1793_vm4, %v9075_v53, %v1790_v31 }
 0x1e1   : > { %1804 = vst [vmem:[#allocation3 + $0xd0] sm:$0xf0] %v1796_v42  ;;  %v1792_v15 = vpop.permute.xlu1 %1791 }
 0x1e2   : > { %v1797_v26 = vsel %vm1793_vm4, %v1790_v31, %v1792_v15  ;;  %v2730_v23 = vld [vmem:[#allocation3 + $0x88] sm:$0xff] }
 0x1e3   : > { %1805 = vst [vmem:[#allocation3 + $0xd8] sm:$0xf0] %v1797_v26  ;;  %2814 = vmatprep.subr.mxu0 %v2730_v23  ;;  %v1408_v60 = vpop.permute.xlu0 %1407 }
 0x1e4   : > { %v1418_v16 = vsel %vm11265_vm0, %v1408_v60, %v1410_v12 }
 0x1e5   : > { %1426 = vst [vmem:[#allocation3 + $0x80] sm:$0xf] %v1418_v16  ;;  %v1488_v17 = vpop.permute.xlu1 %1487 }
 0x1e6   : > { %v1497_v13 = vsel %vm1463_vm2, %v1488_v17, %v1490_v0 }
 0x1e7   : > { %1505 = vst [vmem:[#allocation3 + $0x80] sm:$0xf0] %v1497_v13  ;;  %v1263_v48 = vpop.permute.xlu0 %1262 }
 0x1e8   : > { %v2739_v30 = vld [vmem:[#allocation3 + $0xd0] sm:$0xff] }
 0x1e9   : > { %v9189_v43 = vpop.permute.xlu1 %1264 }
 0x1ea   : > { %v1272_v53 = vsel %vm1270_vm13, %v1263_v48, %v9189_v43  ;;  %v2740_v37 = vld [vmem:[#allocation3 + $0xd8] sm:$0xff] }
 0x1eb   : > { %1280 = vst [vmem:[#allocation3 + $0x68] sm:$0xf] %v1272_v53  ;;  %2881 = vmatprep.subr.mxu1 %v2740_v37  ;;  %v1339_v22 = vpop.permute.xlu0 %1338 }
 0x1ec   : > { %2882 = vmatpush1.msra.mxu1 %v2739_v30 }
 0x1ed   : > { %v9193_v33 = vpop.permute.xlu1 %1340 }
 0x1ee   : > { %v1348_v12 = vsel %vm1346_vm9, %v1339_v22, %v9193_v33  ;;  %v2729_v20 = vld [vmem:[#allocation3 + $0x80] sm:$0xff] }
 0x1ef   : > { %1356 = vst [vmem:[#allocation3 + $0x68] sm:$0xf0] %v1348_v12  ;;  %2815 = vmatpush1.msra.mxu0 %v2729_v20  ;;  %v1564_v0 = vpop.permute.xlu0 %1563 }
 0x1f0   : > { %v1570_v31 = vsel %vm10829_vm1, %v9137_v46, %v1564_v0 }
 0x1f1   : > { %1578 = vst [vmem:[#allocation3 + $0xb0] sm:$0xf] %v1570_v31  ;;  %v1566_v42 = vpop.permute.xlu1 %1565 }
 0x1f2   : > { %v1571_v15 = vsel %vm10829_vm1, %v1564_v0, %v1566_v42  ;;  %vm11283_vm1 = vcmask 596992  }
 0x1f3   : > { %1579 = vst [vmem:[#allocation3 + $0xb8] sm:$0xf] %v1571_v15  ;;  %v1640_v26 = vpop.permute.xlu0 %1639 }
 0x1f4   : > { %v1646_v23 = vsel %vm1643_vm14, %v9146_v50, %v1640_v26 }
 0x1f5   : > { %1654 = vst [vmem:[#allocation3 + $0xb0] sm:$0xf0] %v1646_v23  ;;  %v1642_v60 = vpop.permute.xlu1 %1641 }
 0x1f6   : > { %v1647_v16 = vsel %vm1643_vm14, %v1640_v26, %v1642_v60  ;;  %v2726_v17 = vld [vmem:[#allocation3 + $0x68] sm:$0xff] }
 0x1f7   : > { %1655 = vst [vmem:[#allocation3 + $0xb8] sm:$0xf0] %v1647_v16  ;;  %2816 = vmatprep.subr.mxu0 %v2726_v17  ;;  %v1261_v13 = vpop.permute.xlu0 %1260 }
 0x1f8   : > { %v1271_v53 = vsel %vm1270_vm13, %v1261_v13, %v1263_v48 }
 0x1f9   : > { %1279 = vst [vmem:[#allocation3 + $0x60] sm:$0xf] %v1271_v53  ;;  %v1337_v46 = vpop.permute.xlu1 %1336 }
 0x1fa   : > { %v1347_v37 = vsel %vm1346_vm9, %v1337_v46, %v1339_v22 }
 0x1fb   : > { %1355 = vst [vmem:[#allocation3 + $0x60] sm:$0xf0] %v1347_v37  ;;  %v1112_v30 = vpop.permute.xlu0 %1111 }
 0x1fc   : > { %v2735_v31 = vld [vmem:[#allocation3 + $0xb0] sm:$0xff] }
 0x1fd   : > { %v9205_v12 = vpop.permute.xlu1 %1113 }
 0x1fe   : > { %v1121_v50 = vsel %vm1119_vm5, %v1112_v30, %v9205_v12  ;;  %v2736_v20 = vld [vmem:[#allocation3 + $0xb8] sm:$0xff] }
 0x1ff   : > { %1129 = vst [vmem:[#allocation3 + $0x48] sm:$0xf] %v1121_v50  ;;  %2883 = vmatprep.subr.mxu1 %v2736_v20  ;;  %v1188_v0 = vpop.permute.xlu0 %1187 }
 0x200   : > { %2884 = vmatpush1.msra.mxu1 %v2735_v31 }
 0x201   : > { %v9209_v42 = vpop.permute.xlu1 %1189 }
 0x202   : > { %v1197_v48 = vsel %vm11266_vm8, %v1188_v0, %v9209_v42  ;;  %v2725_v15 = vld [vmem:[#allocation3 + $0x60] sm:$0xff] }
 0x203   : > { %1205 = vst [vmem:[#allocation3 + $0x48] sm:$0xf0] %v1197_v48  ;;  %2817 = vmatpush1.msra.mxu0 %v2725_v15  ;;  %v1414_v22 = vpop.permute.xlu0 %1413 }
 0x204   : > { %v1420_v26 = vsel %vm11265_vm0, %v9169_v57, %v1414_v22 }
 0x205   : > { %1428 = vst [vmem:[#allocation3 + $0x90] sm:$0xf] %v1420_v26  ;;  %v1416_v23 = vpop.permute.xlu1 %1415 }
 0x206   : > { %v1421_v60 = vsel %vm11267_vm15, %v1414_v22, %v1416_v23  ;;  %vm11268_vm15 = vcmask 982016  }
 0x207   : > { %1429 = vst [vmem:[#allocation3 + $0x98] sm:$0xf] %v1421_v60  ;;  %v1494_v16 = vpop.permute.xlu0 %1493  ;;  %vm11269_vm0 = vmmov %vm11268_vm15 }
 0x208   : > { %v1499_v17 = vsel %vm1463_vm2, %v9175_v28, %v1494_v16 }
 0x209   : > { %1507 = vst [vmem:[#allocation3 + $0x90] sm:$0xf0] %v1499_v17  ;;  %v1496_v13 = vpop.permute.xlu1 %1495 }
 0x20a   : > { %v1500_v53 = vsel %vm1463_vm2, %v1494_v16, %v1496_v13  ;;  %v2722_v46 = vld [vmem:[#allocation3 + $0x48] sm:$0xff] }
 0x20b   : > { %1508 = vst [vmem:[#allocation3 + $0x98] sm:$0xf0] %v1500_v53  ;;  %2818 = vmatprep.subr.mxu0 %v2722_v46  ;;  %v1110_v37 = vpop.permute.xlu0 %1109 }
 0x20c   : > { %v1120_v50 = vsel %vm1119_vm5, %v1110_v37, %v1112_v30 }
 0x20d   : > { %1128 = vst [vmem:[#allocation3 + $0x40] sm:$0xf] %v1120_v50  ;;  %v1186_v57 = vpop.permute.xlu1 %1185 }
 0x20e   : > { %v1196_v20 = vsel %vm11266_vm8, %v1186_v57, %v1188_v0 }
 0x20f   : > { %1204 = vst [vmem:[#allocation3 + $0x40] sm:$0xf0] %v1196_v20  ;;  %v961_v31 = vpop.permute.xlu0 %960 }
 0x210   : > { %v2731_v26 = vld [vmem:[#allocation3 + $0x90] sm:$0xff] }
 0x211   : > { %v963_v48 = vpop.permute.xlu1 %962 }
 0x212   : > { %v970_v15 = vsel %vm968_vm3, %v961_v31, %v963_v48  ;;  %v2732_v28 = vld [vmem:[#allocation3 + $0x98] sm:$0xff] }
 0x213   : > { %978 = vst [vmem:[#allocation3 + $0x28] sm:$0xf] %v970_v15  ;;  %2885 = vmatprep.subr.mxu1 %v2732_v28  ;;  %v1041_v22 = vpop.permute.xlu0 %1040 }
 0x214   : > { %2886 = vmatpush1.msra.mxu1 %v2731_v26 }
 0x215   : > { %v1043_v23 = vpop.permute.xlu1 %1042 }
 0x216   : > { %v1050_v60 = vsel %vm11268_vm15, %v1041_v22, %v1043_v23  ;;  %v2721_v16 = vld [vmem:[#allocation3 + $0x40] sm:$0xff]  ;;  %vm11270_vm15 = vmmov %vm11266_vm8 }
 0x217   : > { %1058 = vst [vmem:[#allocation3 + $0x28] sm:$0xf0] %v1050_v60  ;;  %2819 = vmatpush1.msra.mxu0 %v2721_v16  ;;  %v1267_v30 = vpop.permute.xlu0 %1266 }
 0x218   : > { %v1273_v0 = vsel %vm1270_vm13, %v9189_v43, %v1267_v30 }
 0x219   : > { %1281 = vst [vmem:[#allocation3 + $0x70] sm:$0xf] %v1273_v0  ;;  %v1269_v17 = vpop.permute.xlu1 %1268 }
 0x21a   : > { %v1274_v13 = vsel %vm1270_vm13, %v1267_v30, %v1269_v17 }
 0x21b   : > { %1282 = vst [vmem:[#allocation3 + $0x78] sm:$0xf] %v1274_v13  ;;  %v1343_v53 = vpop.permute.xlu0 %1342 }
 0x21c   : > { %v1349_v46 = vsel %vm1346_vm9, %v9193_v33, %v1343_v53 }
 0x21d   : > { %1357 = vst [vmem:[#allocation3 + $0x70] sm:$0xf0] %v1349_v46  ;;  %v1345_v37 = vpop.permute.xlu1 %1344 }
 0x21e   : > { %v1350_v50 = vsel %vm1346_vm9, %v1343_v53, %v1345_v37  ;;  %v2718_v57 = vld [vmem:[#allocation3 + $0x28] sm:$0xff] }
 0x21f   : > { %1358 = vst [vmem:[#allocation3 + $0x78] sm:$0xf0] %v1350_v50  ;;  %2820 = vmatprep.subr.mxu0 %v2718_v57  ;;  %v959_v20 = vpop.permute.xlu0 %958 }
 0x220   : > { %v969_v15 = vsel %vm968_vm3, %v959_v20, %v961_v31 }
 0x221   : > { %977 = vst [vmem:[#allocation3 + $0x20] sm:$0xf] %v969_v15  ;;  %v1039_v43 = vpop.permute.xlu1 %1038 }
 0x222   : > { %v1049_v28 = vsel %vm11269_vm0, %v1039_v43, %v1041_v22 }
 0x223   : > { %1057 = vst [vmem:[#allocation3 + $0x20] sm:$0xf0] %v1049_v28  ;;  %v890_v26 = vpop.permute.xlu0 %889 }
 0x224   : > { %v2727_v0 = vld [vmem:[#allocation3 + $0x70] sm:$0xff] }
 0x225   : > { %v892_v60 = vpop.permute.xlu1 %891 }
 0x226   : > { %v899_v16 = vsel %vm897_vm12, %v890_v26, %v892_v60  ;;  %v2728_v33 = vld [vmem:[#allocation3 + $0x78] sm:$0xff] }
 0x227   : > { %907 = vst [vmem:[#allocation3 + $0x8] sm:$0xf0] %v899_v16  ;;  %2887 = vmatprep.subr.mxu1 %v2728_v33  ;;  %v1116_v30 = vpop.permute.xlu0 %1115 }
 0x228   : > { %v1122_v17 = vsel %vm1119_vm5, %v9205_v12, %v1116_v30  ;;  %2888 = vmatpush1.msra.mxu1 %v2727_v0 }
 0x229   : > { %1130 = vst [vmem:[#allocation3 + $0x50] sm:$0xf] %v1122_v17  ;;  %v1118_v31 = vpop.permute.xlu1 %1117 }
 0x22a   : > { %v1123_v13 = vsel %vm1119_vm5, %v1116_v30, %v1118_v31  ;;  %v2717_v53 = vld [vmem:[#allocation3 + $0x20] sm:$0xff] }
 0x22b   : > { %1131 = vst [vmem:[#allocation3 + $0x58] sm:$0xf] %v1123_v13  ;;  %2821 = vmatpush1.msra.mxu0 %v2717_v53  ;;  %v1192_v22 = vpop.permute.xlu0 %1191 }
 0x22c   : > { %v1198_v46 = vsel %vm11266_vm8, %v9209_v42, %v1192_v22  ;;  %vm2775_vm8 = vcmask 883712  }
 0x22d   : > { %1206 = vst [vmem:[#allocation3 + $0x50] sm:$0xf0] %v1198_v46  ;;  %v1194_v37 = vpop.permute.xlu1 %1193 }
 0x22e   : > { %v1199_v50 = vsel %vm11270_vm15, %v1192_v22, %v1194_v37  ;;  %v2714_v57 = vld [vmem:[#allocation3 + $0x8] sm:$0xff]  ;;  %vm11272_vm15 = vmmov %vm11269_vm0 }
 0x22f   : > { %1207 = vst [vmem:[#allocation3 + $0x58] sm:$0xf0] %v1199_v50  ;;  %2822 = vmatprep.subr.mxu0 %v2714_v57  ;;  %v888_v12 = vpop.permute.xlu0 %887 }
 0x230   : > { %v898_v20 = vsel %vm897_vm12, %v888_v12, %v890_v26  ;;  %v2712_v26 = vld [vmem:[%s11271_s0] sm:$0xff]  ;;  %s11286_s0 = smov 48  }
 0x231   : > { %906 = vst [vmem:[#allocation3] sm:$0xf0] %v898_v20  ;;  %v965_v15 = vpop.permute.xlu1 %964 }
 0x232   : > { %v971_v43 = vsel %vm968_vm3, %v963_v48, %v965_v15 }
 0x233   : > { %979 = vst [vmem:[#allocation3 + $0x30] sm:$0xf] %v971_v43  ;;  %v967_v28 = vpop.permute.xlu0 %966 }
 0x234   : > { %v972_v16 = vsel %vm968_vm3, %v965_v15, %v967_v28  ;;  %v2723_v17 = vld [vmem:[#allocation3 + $0x50] sm:$0xff] }
 0x235   : > { %980 = vst [vmem:[#allocation3 + $0x38] sm:$0xf] %v972_v16  ;;  %v1045_v42 = vpop.permute.xlu1 %1044 }
 0x236   : > { %v1051_v33 = vsel %vm11269_vm0, %v1043_v23, %v1045_v42  ;;  %v2724_v30 = vld [vmem:[#allocation3 + $0x58] sm:$0xff] }
 0x237   : > { %1059 = vst [vmem:[#allocation3 + $0x30] sm:$0xf0] %v1051_v33  ;;  %2889 = vmatprep.subr.mxu1 %v2724_v30  ;;  %v1047_v0 = vpop.permute.xlu0 %1046 }
 0x238   : > { %v1052_v48 = vsel %vm11272_vm15, %v1045_v42, %v1047_v0  ;;  %2890 = vmatpush1.msra.mxu1 %v2723_v17  ;;  %v2713_v31 = vld [vmem:[#allocation3] sm:$0xff] }
 0x239   : > { %1060 = vst [vmem:[#allocation3 + $0x38] sm:$0xf0] %v1052_v48  ;;  %v894_v13 = vpop.permute.xlu1 %893  ;;  %2823 = vmatpush1.msra.mxu0 %v2713_v31  ;;  %v2961_v48 = vld [vmem:[%s11273_s3] sm:$0xff]  ;;  %v11275_v31 = vld [vmem:[#allocation17_spill] sm:$0xff]  ;;  %s11298_s3 = smov 111  }
 0x23a   : > { %v900_v53 = vsel %vm897_vm12, %v892_v60, %v894_v13  ;;  %6141 = vmatmul.mubr.msk.f32.vlgmr.msra.gmra.mxu0 %vm2775_vm8, %v2712_v26 }
 0x23b   : > { %908 = vst [vmem:[#allocation3 + $0x10] sm:$0xf0] %v900_v53  ;;  %v896_v23 = vpop.permute.xlu0 %895  ;;  %v11278_v53 = vld [vmem:[#allocation31_spill] sm:$0xff] }
 0x23c   : > { %v901_v22 = vsel %vm897_vm12, %v894_v13, %v896_v23  ;;  %v11277_v13 = vld [vmem:[#allocation30_spill] sm:$0xff] }
 0x23d   : > { %909 = vst [vmem:[#allocation3 + $0x18] sm:$0xf0] %v901_v22 }
 0x23e   : > { %v2719_v37 = vld [vmem:[#allocation3 + $0x30] sm:$0xff] }
 0x240   : > { %v2720_v46 = vld [vmem:[#allocation3 + $0x38] sm:$0xff] }
 0x241   : > { %2891 = vmatprep.subr.mxu1 %v2720_v46 }
 0x242   : > { %2892 = vmatpush1.msra.mxu1 %v2719_v37  ;;  %v2715_v57 = vld [vmem:[#allocation3 + $0x10] sm:$0xff] }
 0x244   : > { %v2716_v50 = vld [vmem:[#allocation3 + $0x18] sm:$0xff] }
 0x245   : > { %2893 = vmatprep.subr.mxu1 %v2716_v50 }
 0x246   : > { %2894 = vmatpush1.msra.mxu1 %v2715_v57  ;;  %v2773_v60 = vpop.permute.xlu1 %2772 }
 0x247   : > { %6144 = vmatmul.mubr.msk.f32.vlgmr.msra.gmra.mxu1 %vm2775_vm8, %v2712_v26  ;;  %v11274_v26 = vld [vmem:[#allocation16_spill] sm:$0xff] }
 0x2fa   : > { %v2858_v12 = vpop.f32.mrf.mxu0 }
 0x2fb   : > { %v2859_v15 = vadd.f32 %v2858_v12, %v2773_v60 }
 0x2fc   : > { %v2860_v20 = vpop.f32.mrf.mxu0 }
 0x2fd   : > { %v2861_v43 = vadd.f32 %v2860_v20, %v2773_v60 }
 0x2ff   : > { %v2934_v16 = vadd.f32 %v2861_v43, %v2859_v15 }
 0x307   : > { %v2929_v28 = vpop.f32.mrf.mxu1 }
 0x308   : > { %v2930_v42 = vadd.f32 %v2929_v28, %v2773_v60 }
 0x309   : > { %v2931_v33 = vpop.f32.mrf.mxu1 }
 0x30a   : > { %v2935_v30 = vadd.f32 %v2934_v16, %v2930_v42  ;;  %v2932_v0 = vadd.f32 %v2931_v33, %v2773_v60 }
 0x30c   : > { %v2936_v17 = vadd.f32 %v2935_v30, %v2932_v0 }
 0x30e   : > { %2937 = vadd.xlane.f32.xlu0 %v2936_v17  ;;  %v2975_v17 = vpop.permute.xlu1 %2974 }
 0x324   : > { %2964 = vperm.xlu0 %6594, %v2961_v48   ;;  %v9263_v48 = vpop.permute.xlu1 %3923 }
 0x325   : > { %11279 = vst [vmem:[#allocation49_spill] sm:$0xff] %v9263_v48 }
 0x328   : > { %3960 = vrot.lane.b32.xlu0 %v11274_v26, %s10836_s26 }
 0x32c   : > { %3886 = vrot.lane.b32.xlu0 %v11275_v31, %s10832_s25  ;;  %s11292_s25 = smov 63  }
 0x330   : > { %3812 = vrot.lane.b32.xlu0 %v11277_v13, %s11276_s29 }
 0x334   : > { %3738 = vrot.lane.b32.xlu0 %v8215_v58, %s11233_s24  ;;  %v9265_v58 = vpop.permute.xlu1 %3849 }
 0x335   : > { %11280 = vst [vmem:[#allocation50_spill] sm:$0xff] %v9265_v58 }
 0x338   : > { %3701 = vrot.lane.b32.xlu0 %v11278_v53, %s11250_s20  ;;  %v9267_v26 = vpop.permute.xlu1 %3775 }
 0x339   : > { %11281 = vst [vmem:[#allocation42_spill] sm:$0xff] %v9267_v26 }
 0x397   : > { %v2938_v23 = vpop.xlane.xlu0 %2937 }
 0x398   : > { %v2940_v22 = vmul.f32 0.001953125, %v2938_v23 }
 0x39a   : > { %v2941_v46 = vsub.f32 %v2859_v15, %v2940_v22  ;;  %v2942_v37 = vsub.f32 %v2861_v43, %v2940_v22  ;;  %v2943_v50 = vsub.f32 %v2930_v42, %v2940_v22  ;;  %v2944_v57 = vsub.f32 %v2932_v0, %v2940_v22 }
 0x39c   : > { %v2945_v12 = vmul.f32 %v2941_v46, %v2941_v46  ;;  %v2946_v20 = vmul.f32 %v2942_v37, %v2942_v37  ;;  %v2947_v60 = vmul.f32 %v2943_v50, %v2943_v50  ;;  %v2948_v16 = vmul.f32 %v2944_v57, %v2944_v57 }
 0x39e   : > { %v2949_v28 = vadd.f32 %v2946_v20, %v2945_v12 }
 0x39f   : > { %v2965_v23 = vpop.permute.xlu0 %2964 }
 0x3a0   : > { %v2950_v33 = vadd.f32 %v2949_v28, %v2947_v60 }
 0x3a2   : > { %v2951_v30 = vadd.f32 %v2950_v33, %v2948_v16 }
 0x3a4   : > { %2952 = vadd.xlane.f32.xlu1 %v2951_v30 }
 0x42d   : > { %v2953_v31 = vpop.xlane.xlu1 %2952 }
 0x42e   : > { %v2954_v15 = vmul.f32 0.001953125, %v2953_v31 }
 0x430   : > { %v2955_v43 = vadd.f32 1e-05, %v2954_v15 }
 0x432   : > { %6597 = vrsqrt.f32 %v2955_v43 }
 0x43f   : > { %v6598_v42 = vpop.eup %6597 }
 0x440   : > { %v2957_v0 = vmul.f32 %v6598_v42, %v2941_v46  ;;  %v2958_v13 = vmul.f32 %v6598_v42, %v2942_v37  ;;  %v2959_v53 = vmul.f32 %v6598_v42, %v2943_v50  ;;  %v2960_v16 = vmul.f32 %v6598_v42, %v2944_v57 }
 0x442   : > { %v2967_v22 = vmul.f32 %v2965_v23, %v2957_v0  ;;  %v2968_v12 = vmul.f32 %v2965_v23, %v2958_v13  ;;  %v2969_v28 = vmul.f32 %v2965_v23, %v2959_v53  ;;  %v2970_v48 = vmul.f32 %v2965_v23, %v2960_v16 }
 0x444   : > { %v2977_v20 = vadd.f32 %v2975_v17, %v2967_v22  ;;  %v2978_v60 = vadd.f32 %v2975_v17, %v2968_v12  ;;  %v2979_v26 = vadd.f32 %v2975_v17, %v2969_v28  ;;  %v2980_v37 = vadd.f32 %v2975_v17, %v2970_v48 }
 0x446   : > { %vm2981_vm0 = vcmp.ge.f32.partialorder %v2977_v20, 0.0  ;;  %v2985_v33 = vmul.f32 0.01, %v2977_v20  ;;  %v2986_v58 = vmul.f32 0.01, %v2978_v60  ;;  %vm2982_vm8 = vcmp.ge.f32.partialorder %v2978_v60, 0.0 }
 0x447   : > { %v2987_v46 = vmul.f32 0.01, %v2979_v26  ;;  %vm2983_vm15 = vcmp.ge.f32.partialorder %v2979_v26, 0.0  ;;  %v2988_v15 = vmul.f32 0.01, %v2980_v37  ;;  %vm2984_vm11 = vcmp.ge.f32.partialorder %v2980_v37, 0.0 }
 0x448   : > { %v2989_v30 = vsel %vm2981_vm0, %v2977_v20, %v2985_v33  ;;  %v2990_v31 = vsel %vm2982_vm8, %v2978_v60, %v2986_v58  ;;  %vm3019_vm0 = vcmask 1048136   ;;  %vm11288_vm8 = vmmov %vm11283_vm1  ;;  %v11294_v33 = vld [vmem:[#allocation9_spill] sm:$0xff] }
 0x449   : > { %3003 = vrot.lane.b32.xlu1 %v2989_v30, %s11282_s30  ;;  %v2991_v50 = vsel %vm2983_vm15, %v2979_v26, %v2987_v46  ;;  %v2992_v57 = vsel %vm2984_vm11, %v2980_v37, %v2988_v15  ;;  %v11284_v26 = vld [vmem:[#allocation10_spill] sm:$0xff]  ;;  %vm11285_vm11 = vmmov %vm11283_vm1  ;;  %vm11356_vm15 = vcmask 900096  }
 0x44d   : > { %3005 = vrot.lane.b32.xlu1 %v2990_v31, %s11282_s30  ;;  %v11295_v31 = vld [vmem:[#allocation26_spill] sm:$0xff] }
 0x451   : > { %3007 = vrot.lane.b32.xlu1 %v2991_v50, %s11282_s30 }
 0x455   : > { %3009 = vrot.lane.b32.xlu1 %v2992_v57, %s11282_s30  ;;  %s11290_s30 = smov 56  }
 0x4bb   : > { %v3004_v43 = vpop.permute.xlu1 %3003 }
 0x4bc   : > { %3020 = vst.msk [vmem:[#allocation2] sm:$0xff] %vm3019_vm0, %v3004_v43  ;;  %vm11363_vm0 = vcmask 965632  }
 0x4bf   : > { %v3006_v42 = vpop.permute.xlu1 %3005 }
 0x4c0   : > { %v9274_v0 = vsel %vm11283_vm1, %v3004_v43, %v3006_v42  ;;  %v11301_v43 = vld [vmem:[#allocation12_spill] sm:$0xff] }
 0x4c1   : > { %3021 = vst [vmem:[#allocation2 + $0x8] sm:$0xff] %v9274_v0  ;;  %v3030_v17 = vmul.f32 %v8062_v27, %v9274_v0 }
 0x4c3   : > { %v9279_v48 = vld [vmem:[#allocation2] sm:$0xff]  ;;  %3034 = vst [vmem:[#allocation3 + $0x8] sm:$0xff] %v3030_v17  ;;  %v3008_v58 = vpop.permute.xlu1 %3007  ;;  %v11303_v17 = vld [vmem:[#allocation61_spill] sm:$0xff] }
 0x4c4   : > { %v3029_v13 = vmul.f32 %v11284_v26, %v9279_v48  ;;  %v9284_v53 = vsel %vm11285_vm11, %v3006_v42, %v3008_v58  ;;  %v3560_v23 = vmul.f32 %v8436_v59, %v9279_v48  ;;  %v3523_v22 = vmul.f32 %v8440_v21, %v9279_v48  ;;  %v11302_v42 = vld [vmem:[#allocation60_spill] sm:$0xff] }
 0x4c5   : > { %3022 = vst [vmem:[#allocation2 + $0x10] sm:$0xff] %v9284_v53  ;;  %v3031_v27 = vmul.f32 %v8032_v11, %v9284_v53  ;;  %v3486_v59 = vmul.f32 %v8502_v54, %v9279_v48  ;;  %v3449_v54 = vmul.f32 %v8506_v6, %v9279_v48  ;;  %v3375_v6 = vmul.f32 %v8588_v39, %v9279_v48  ;;  %v11296_v39 = vld [vmem:[#allocation21_spill] sm:$0xff] }
 0x4c6   : > { %3033 = vst [vmem:[#allocation3] sm:$0xff] %v3029_v13  ;;  %3570 = vrot.lane.b32.xlu0 %v3560_v23, %s11286_s0  ;;  %3533 = vrot.lane.b32.xlu1 %v3523_v22, %s11287_s19  ;;  %v11305_v13 = vld [vmem:[#allocation65_spill] sm:$0xff]  ;;  %vm11367_vm11 = vcmask 982016  }
 0x4c7   : > { %3035 = vst [vmem:[#allocation3 + $0x10] sm:$0xff] %v3031_v27  ;;  %v3010_v12 = vpop.permute.xlu1 %3009 }
 0x4c8   : > { %v9296_v20 = vsel %vm11283_vm1, %v3008_v58, %v3010_v12  ;;  %3024 = vst.msk [vmem:[#allocation2 + $0x20] sm:$0xff] %vm11288_vm8, %v3010_v12  ;;  %v11304_v58 = vld [vmem:[#allocation66_spill] sm:$0xff]  ;;  %v11306_v12 = vld [vmem:[#allocation68_spill] sm:$0xff]  ;;  %vm4090_vm1 = vcmask 719872  }
 0x4c9   : > { %3023 = vst [vmem:[#allocation2 + $0x18] sm:$0xff] %v9296_v20  ;;  %v3032_v11 = vmul.f32 %v8057_v35, %v9296_v20  ;;  %v3412_v35 = vmul.f32 %v8584_v62, %v9279_v48  ;;  %v3338_v62 = vmul.f32 %v8671_v47, %v9279_v48  ;;  %v3672_v37 = vmul.f32 %v11296_v39, %v9296_v20  ;;  %v11297_v47 = vld [vmem:[#allocation24_spill] sm:$0xff] }
 0x4ca   : > { %3496 = vrot.lane.b32.xlu0 %v3486_v59, %s11289_s23  ;;  %v3670_v50 = vmul.f32 %v11297_v47, %v9274_v0  ;;  %v3597_v59 = vmul.f32 %v11306_v12, %v9279_v48  ;;  %v11318_v39 = vld [vmem:[#allocation80_spill] sm:$0xff]  ;;  %v11332_v12 = vld [vmem:[#allocation33_spill] sm:$0xff] }
 0x4cb   : > { %3036 = vst [vmem:[#allocation3 + $0x18] sm:$0xff] %v3032_v11  ;;  %3676 = vst [vmem:[#allocation3 + $0x250] sm:$0xff] %v3672_v37  ;;  %v11308_v11 = vld [vmem:[#allocation67_spill] sm:$0xff]  ;;  %v3451_v37 = vmul.f32 %v9284_v53, %v11318_v39 }
 0x4cc   : > { %v3667_v16 = vld [vmem:[#allocation2 + $0x10] sm:$0xff]  ;;  %3674 = vst [vmem:[#allocation3 + $0x240] sm:$0xff] %v3670_v50 }
 0x4cd   : > { %v3671_v46 = vmul.f32 %v11295_v31, %v3667_v16  ;;  %v11317_v31 = vld [vmem:[#allocation79_spill] sm:$0xff]  ;;  %v11319_v50 = vld [vmem:[#allocation78_spill] sm:$0xff] }
 0x4cf   : > { %v9305_v21 = vld [vmem:[#allocation2 + $0x20] sm:$0xff]  ;;  %3675 = vst [vmem:[#allocation3 + $0x248] sm:$0xff] %v3671_v46  ;;  %v3488_v46 = vmul.f32 %v9284_v53, %v11317_v31  ;;  %v11338_v31 = vld [vmem:[#allocation43_spill] sm:$0xff] }
 0x4d0   : > { %v3564_v60 = vmul.f32 %v8622_v32, %v9305_v21  ;;  %v3527_v28 = vmul.f32 %v8625_v18, %v9305_v21  ;;  %v3490_v32 = vmul.f32 %v8714_v10, %v9305_v21  ;;  %v3453_v18 = vmul.f32 %v8717_v3, %v9305_v21 }
 0x4d1   : > { %v3416_v10 = vmul.f32 %v8806_v40, %v9305_v21  ;;  %v3379_v3 = vmul.f32 %v8809_v44, %v9305_v21  ;;  %v3673_v30 = vmul.f32 %v11294_v33, %v9305_v21  ;;  %v3301_v40 = vmul.f32 %v8675_v29, %v9279_v48  ;;  %v11316_v33 = vld [vmem:[#allocation89_spill] sm:$0xff] }
 0x4d2   : > { %3578 = vrot.lane.b32.xlu1 %v3564_v60, %s11286_s0  ;;  %3541 = vrot.lane.b32.xlu0 %v3527_v28, %s11287_s19  ;;  %v3264_v44 = vmul.f32 %v8761_v45, %v9279_v48  ;;  %v3342_v15 = vmul.f32 %v8894_v61, %v9305_v21  ;;  %v3305_v57 = vmul.f32 %v8897_v24, %v9305_v21  ;;  %v11309_v60 = vld [vmem:[#allocation81_spill] sm:$0xff] }
 0x4d3   : > { %3677 = vst [vmem:[#allocation3 + $0x258] sm:$0xff] %v3673_v30  ;;  %v3227_v29 = vmul.f32 %v8765_v25, %v9279_v48  ;;  %v3190_v45 = vmul.f32 %v8850_v14, %v9279_v48  ;;  %v3268_v61 = vmul.f32 %v8982_v2, %v9305_v21  ;;  %v3231_v24 = vmul.f32 %v8985_v36, %v9305_v21  ;;  %v11311_v28 = vld [vmem:[#allocation73_spill] sm:$0xff] }
 0x4d4   : > { %v3153_v25 = vmul.f32 %v8854_v56, %v9279_v48  ;;  %v3116_v14 = vmul.f32 %v8939_v51, %v9279_v48  ;;  %v3194_v2 = vmul.f32 %v9050_v7, %v9305_v21  ;;  %v3157_v36 = vmul.f32 %v9053_v41, %v9305_v21 }
 0x4d5   : > { %v3079_v56 = vmul.f32 %v8943_v34, %v9279_v48  ;;  %v3042_v51 = vmul.f32 %v9017_v5, %v9279_v48  ;;  %v3120_v7 = vmul.f32 %v9092_v49, %v9305_v21  ;;  %v3083_v41 = vmul.f32 %v9095_v55, %v9305_v21 }
 0x4d6   : > { %3459 = vrot.lane.b32.xlu1 %v3449_v54, %s11290_s30  ;;  %3422 = vrot.lane.b32.xlu0 %v3412_v35, %s11291_s1  ;;  %v3945_v34 = vmul.f32 %v9305_v21, %v11301_v43  ;;  %v3046_v5 = vmul.f32 %v9111_v4, %v9305_v21  ;;  %v3871_v49 = vmul.f32 %v9305_v21, %v11302_v42  ;;  %v11312_v54 = vld [vmem:[#allocation76_spill] sm:$0xff] }
 0x4d7   : > { %v3908_v55 = vmul.f32 %v9305_v21, %v11303_v17  ;;  %v3797_v26 = vmul.f32 %v9305_v21, %v11304_v58  ;;  %v3834_v4 = vmul.f32 %v9305_v21, %v11305_v13  ;;  %v3723_v23 = vmul.f32 %v9305_v21, %v8408_v52  ;;  %v11328_v58 = vld [vmem:[#allocation93_spill] sm:$0xff]  ;;  %v11329_v13 = vld [vmem:[#allocation94_spill] sm:$0xff] }
 0x4d8   : > { %v3760_v22 = vmul.f32 %v9305_v21, %v8414_v63  ;;  %v3686_v27 = vmul.f32 %v9305_v21, %v8480_v19  ;;  %v3634_v52 = vmul.f32 %v11308_v11, %v9279_v48  ;;  %v3638_v63 = vmul.f32 %v11309_v60, %v9305_v21  ;;  %v11313_v48 = vld [vmem:[#allocation75_spill] sm:$0xff] }
 0x4d9   : > { %v3561_v19 = vmul.f32 %v9274_v0, %v11311_v28  ;;  %v3525_v35 = vmul.f32 %v9284_v53, %v11312_v54  ;;  %v3563_v30 = vmul.f32 %v9296_v20, %v11316_v33  ;;  %v11333_v60 = vld [vmem:[#allocation99_spill] sm:$0xff]  ;;  %v11334_v28 = vld [vmem:[#allocation100_spill] sm:$0xff] }
 0x4da   : > { %3504 = vrot.lane.b32.xlu1 %v3490_v32, %s11289_s23  ;;  %3467 = vrot.lane.b32.xlu0 %v3453_v18, %s11290_s30  ;;  %v9432_v32 = vpop.permute.xlu0 %3960  ;;  %v3562_v18 = vmul.f32 %v9284_v53, %v11313_v48  ;;  %v11335_v48 = vld [vmem:[#allocation97_spill] sm:$0xff]  ;;  %v11337_v33 = vld [vmem:[#allocation32_spill] sm:$0xff] }
 0x4de   : > { %3385 = vrot.lane.b32.xlu1 %v3375_v6, %s11292_s25  ;;  %3348 = vrot.lane.b32.xlu0 %v3338_v62, %s11293_s22  ;;  %v11314_v6 = vld [vmem:[#allocation77_spill] sm:$0xff]  ;;  %v9442_v16 = vpop.permute.xlu0 %3886 }
 0x4df   : > { %v3487_v62 = vmul.f32 %v9274_v0, %v11314_v6  ;;  %v11336_v6 = vld [vmem:[#allocation98_spill] sm:$0xff] }
 0x4e2   : > { %3430 = vrot.lane.b32.xlu1 %v3416_v10, %s11291_s1  ;;  %3393 = vrot.lane.b32.xlu0 %v3379_v3, %s11292_s25  ;;  %v11315_v10 = vld [vmem:[#allocation74_spill] sm:$0xff]  ;;  %v9454_v47 = vpop.permute.xlu0 %3812 }
 0x4e3   : > { %v3524_v3 = vmul.f32 %v9274_v0, %v11315_v10 }
 0x4e6   : > { %3311 = vrot.lane.b32.xlu1 %v3301_v40, %s10836_s26  ;;  %3274 = vrot.lane.b32.xlu0 %v3264_v44, %s11298_s3  ;;  %v3450_v40 = vmul.f32 %v9274_v0, %v11319_v50  ;;  %v11320_v44 = vld [vmem:[#allocation85_spill] sm:$0xff] }
 0x4e7   : > { %v11339_v50 = vld [vmem:[#allocation101_spill] sm:$0xff] }
 0x4ea   : > { %3356 = vrot.lane.b32.xlu1 %v3342_v15, %s11293_s22  ;;  %3319 = vrot.lane.b32.xlu0 %v3305_v57, %s10836_s26  ;;  %v3413_v15 = vmul.f32 %v9274_v0, %v11320_v44  ;;  %v9464_v57 = vpop.permute.xlu0 %3738  ;;  %v11340_v44 = vld [vmem:[#allocation102_spill] sm:$0xff] }
 0x4ee   : > { %3237 = vrot.lane.b32.xlu1 %v3227_v29, %s11299_s4  ;;  %3200 = vrot.lane.b32.xlu0 %v3190_v45, %s11300_s9  ;;  %v11321_v29 = vld [vmem:[#allocation90_spill] sm:$0xff] }
 0x4ef   : > { %v3526_v45 = vmul.f32 %v9296_v20, %v11321_v29 }
 0x4f2   : > { %3282 = vrot.lane.b32.xlu1 %v3268_v61, %s11298_s3  ;;  %3245 = vrot.lane.b32.xlu0 %v3231_v24, %s11299_s4  ;;  %v11322_v61 = vld [vmem:[#allocation95_spill] sm:$0xff] }
 0x4f3   : > { %v3489_v24 = vmul.f32 %v9296_v20, %v11322_v61  ;;  %v11341_v61 = vld [vmem:[#allocation35_spill] sm:$0xff] }
 0x4f6   : > { %3163 = vrot.lane.b32.xlu1 %v3153_v25, %s11276_s29  ;;  %3126 = vrot.lane.b32.xlu0 %v3116_v14, %s11238_s21  ;;  %v11323_v25 = vld [vmem:[#allocation88_spill] sm:$0xff] }
 0x4f7   : > { %v3414_v14 = vmul.f32 %v9284_v53, %v11323_v25  ;;  %v11342_v25 = vld [vmem:[#allocation34_spill] sm:$0xff] }
 0x4fa   : > { %3208 = vrot.lane.b32.xlu1 %v3194_v2, %s11300_s9  ;;  %3171 = vrot.lane.b32.xlu0 %v3157_v36, %s11276_s29  ;;  %v11324_v2 = vld [vmem:[#allocation87_spill] sm:$0xff] }
 0x4fb   : > { %v3377_v36 = vmul.f32 %v9284_v53, %v11324_v2 }
 0x4fe   : > { %3089 = vrot.lane.b32.xlu1 %v3079_v56, %s11233_s24  ;;  %3052 = vrot.lane.b32.xlu0 %v3042_v51, %s11250_s20  ;;  %v9476_v56 = vpop.permute.xlu0 %3701  ;;  %v11325_v51 = vld [vmem:[#allocation86_spill] sm:$0xff] }
 0x502   : > { %3134 = vrot.lane.b32.xlu1 %v3120_v7, %s11238_s21  ;;  %3097 = vrot.lane.b32.xlu0 %v3083_v41, %s11233_s24  ;;  %v3376_v7 = vmul.f32 %v9274_v0, %v11325_v51  ;;  %v11326_v41 = vld [vmem:[#allocation91_spill] sm:$0xff]  ;;  %v11343_v51 = vld [vmem:[#allocation44_spill] sm:$0xff] }
 0x503   : > { %v3339_v43 = vmul.f32 %v9274_v0, %v11326_v41  ;;  %v11344_v41 = vld [vmem:[#allocation45_spill] sm:$0xff] }
 0x506   : > { %3958 = vrot.lane.b32.xlu1 %v3945_v34, %s10836_s26  ;;  %3060 = vrot.lane.b32.xlu0 %v3046_v5, %s11250_s20  ;;  %s11307_s26 = smov 47   ;;  %v11327_v5 = vld [vmem:[#allocation96_spill] sm:$0xff] }
 0x507   : > { %v3452_v42 = vmul.f32 %v9296_v20, %v11327_v5 }
 0x50a   : > { %3884 = vrot.lane.b32.xlu1 %v3871_v49, %s11299_s4  ;;  %3921 = vrot.lane.b32.xlu0 %v3908_v55, %s11298_s3  ;;  %v3415_v49 = vmul.f32 %v9296_v20, %v8822_v9 }
 0x50e   : > { %3810 = vrot.lane.b32.xlu1 %v3797_v26, %s11276_s29  ;;  %3847 = vrot.lane.b32.xlu0 %v3834_v4, %s11300_s9  ;;  %v3340_v26 = vmul.f32 %v9284_v53, %v11328_v58  ;;  %v3303_v4 = vmul.f32 %v9284_v53, %v11329_v13 }
 0x512   : > { %3736 = vrot.lane.b32.xlu1 %v3723_v23, %s11233_s24  ;;  %3773 = vrot.lane.b32.xlu0 %v3760_v22, %s11238_s21  ;;  %v11331_v22 = vld [vmem:[#allocation92_spill] sm:$0xff] }
 0x516   : > { %3699 = vrot.lane.b32.xlu1 %v3686_v27, %s11250_s20  ;;  %3607 = vrot.lane.b32.xlu0 %v3597_v59, %s11307_s26  ;;  %v3302_v27 = vmul.f32 %v9274_v0, %v11331_v22  ;;  %v3265_v59 = vmul.f32 %v9274_v0, %v11332_v12  ;;  %v11346_v22 = vld [vmem:[#allocation37_spill] sm:$0xff]  ;;  %v11347_v12 = vld [vmem:[#allocation36_spill] sm:$0xff] }
 0x51a   : > { %3644 = vrot.lane.b32.xlu1 %v3634_v52, %s11310_s27  ;;  %3652 = vrot.lane.b32.xlu0 %v3638_v63, %s11310_s27  ;;  %v3378_v63 = vmul.f32 %v9296_v20, %v11333_v60 }
 0x51e   : > { %3572 = vrot.lane.b32.xlu1 %v3561_v19, %s11286_s0  ;;  %3537 = vrot.lane.b32.xlu0 %v3525_v35, %s11287_s19  ;;  %v3341_v19 = vmul.f32 %v9296_v20, %v11334_v28 }
 0x522   : > { %3574 = vrot.lane.b32.xlu1 %v3562_v18, %s11286_s0  ;;  %3498 = vrot.lane.b32.xlu0 %v3487_v62, %s11289_s23  ;;  %v3266_v18 = vmul.f32 %v9284_v53, %v11335_v48  ;;  %v3229_v62 = vmul.f32 %v9284_v53, %v11336_v6 }
 0x526   : > { %3535 = vrot.lane.b32.xlu1 %v3524_v3, %s11287_s19  ;;  %3576 = vrot.lane.b32.xlu0 %v3563_v30, %s11286_s0  ;;  %s11330_s0 = smov 110   ;;  %v3228_v30 = vmul.f32 %v9274_v0, %v11337_v33 }
 0x52a   : > { %3500 = vrot.lane.b32.xlu1 %v3488_v46, %s11289_s23  ;;  %3463 = vrot.lane.b32.xlu0 %v3451_v37, %s11290_s30  ;;  %v3191_v46 = vmul.f32 %v9274_v0, %v11338_v31 }
 0x52e   : > { %3461 = vrot.lane.b32.xlu1 %v3450_v40, %s11290_s30  ;;  %3424 = vrot.lane.b32.xlu0 %v3413_v15, %s11291_s1  ;;  %v3304_v40 = vmul.f32 %v9296_v20, %v11339_v50  ;;  %v3267_v15 = vmul.f32 %v9296_v20, %v11340_v44  ;;  %v11351_v50 = vld [vmem:[#allocation48_spill] sm:$0xff]  ;;  %v11352_v44 = vld [vmem:[#allocation14_spill] sm:$0xff] }
 0x532   : > { %3539 = vrot.lane.b32.xlu1 %v3526_v45, %s11287_s19  ;;  %3502 = vrot.lane.b32.xlu0 %v3489_v24, %s11289_s23  ;;  %v3192_v24 = vmul.f32 %v9284_v53, %v11341_v61  ;;  %s6181_s19 = sshll.u32 %s11479_s28, 5  ;;  %s6687_s23 = smov 38  }
 0x533   : > { %s11447_s28 = smov 9  }
 0x536   : > { %3426 = vrot.lane.b32.xlu1 %v3414_v14, %s11291_s1  ;;  %3389 = vrot.lane.b32.xlu0 %v3377_v36, %s11292_s25  ;;  %v3155_v14 = vmul.f32 %v9284_v53, %v11342_v25 }
 0x538   : > { %v9484_v34 = vpop.permute.xlu0 %3570  ;;  %v9494_v17 = vpop.permute.xlu1 %3533 }
 0x53a   : > { %3387 = vrot.lane.b32.xlu1 %v3376_v7, %s11292_s25  ;;  %3350 = vrot.lane.b32.xlu0 %v3339_v43, %s11293_s22  ;;  %v3154_v7 = vmul.f32 %v9274_v0, %v11343_v51  ;;  %v3117_v43 = vmul.f32 %v9274_v0, %v11344_v41 }
 0x53c   : > { %v9496_v55 = vpop.permute.xlu0 %3496 }
 0x53e   : > { %3465 = vrot.lane.b32.xlu1 %v3452_v42, %s11290_s30  ;;  %3428 = vrot.lane.b32.xlu0 %v3415_v49, %s11291_s1  ;;  %v11345_v49 = vld [vmem:[#allocation103_spill] sm:$0xff]  ;;  %s605_s30 = scalar_lea.vmem %s10627_s16, %s6181_s19  ;;  %s6689_s1 = smov 36  }
 0x53f   : > { %v3230_v58 = vmul.f32 %v9296_v20, %v11345_v49  ;;  %s6691_s19 = smov 34  }
 0x542   : > { %3352 = vrot.lane.b32.xlu1 %v3340_v26, %s11293_s22  ;;  %3315 = vrot.lane.b32.xlu0 %v3303_v4, %s11330_s0  ;;  %v3193_v26 = vmul.f32 %v9296_v20, %v9067_v38 }
 0x544   : > { %v9504_v23 = vpop.permute.xlu0 %3541  ;;  %v9506_v9 = vpop.permute.xlu1 %3578 }
 0x546   : > { %3313 = vrot.lane.b32.xlu1 %v3302_v27, %s11330_s0  ;;  %3276 = vrot.lane.b32.xlu0 %v3265_v59, %s11298_s3  ;;  %v3118_v27 = vmul.f32 %v9284_v53, %v11346_v22  ;;  %v3081_v59 = vmul.f32 %v9284_v53, %v11347_v12  ;;  %v11357_v12 = vld [vmem:[#allocation20_spill] sm:$0xff] }
 0x548   : > { %v9514_v11 = vpop.permute.xlu0 %3422  ;;  %v9516_v52 = vpop.permute.xlu1 %3459 }
 0x54a   : > { %3391 = vrot.lane.b32.xlu1 %v3378_v63, %s11292_s25  ;;  %3354 = vrot.lane.b32.xlu0 %v3341_v19, %s11293_s22  ;;  %v11348_v63 = vld [vmem:[#allocation46_spill] sm:$0xff]  ;;  %v11349_v19 = vld [vmem:[#allocation47_spill] sm:$0xff]  ;;  %s6690_s25 = smov 22  }
 0x54b   : > { %v3080_v28 = vmul.f32 %v9274_v0, %v11348_v63  ;;  %v3043_v48 = vmul.f32 %v9274_v0, %v11349_v19  ;;  %v11358_v63 = vld [vmem:[#allocation13_spill] sm:$0xff] }
 0x54c   : > { %v9524_v54 = vpop.permute.xlu0 %3467  ;;  %v9526_v35 = vpop.permute.xlu1 %3504 }
 0x54e   : > { %3278 = vrot.lane.b32.xlu1 %v3266_v18, %s11298_s3  ;;  %3241 = vrot.lane.b32.xlu0 %v3229_v62, %s11299_s4  ;;  %v11350_v62 = vld [vmem:[#allocation41_spill] sm:$0xff] }
 0x54f   : > { %v3156_v33 = vmul.f32 %v9296_v20, %v11350_v62 }
 0x550   : > { %v9534_v10 = vpop.permute.xlu0 %3348  ;;  %v9536_v3 = vpop.permute.xlu1 %3385 }
 0x552   : > { %3239 = vrot.lane.b32.xlu1 %v3228_v30, %s11299_s4  ;;  %3202 = vrot.lane.b32.xlu0 %v3191_v46, %s11300_s9  ;;  %v3119_v30 = vmul.f32 %v9296_v20, %v9108_v8 }
 0x554   : > { %v9544_v39 = vpop.permute.xlu0 %3393  ;;  %v9546_v37 = vpop.permute.xlu1 %3430 }
 0x556   : > { %3317 = vrot.lane.b32.xlu1 %v3304_v40, %s11330_s0  ;;  %3280 = vrot.lane.b32.xlu0 %v3267_v15, %s11298_s3  ;;  %v3044_v40 = vmul.f32 %v9284_v53, %v11351_v50  ;;  %v3944_v15 = vmul.f32 %v9296_v20, %v11352_v44  ;;  %v11361_v50 = vld [vmem:[#allocation11_spill] sm:$0xff]  ;;  %v11362_v44 = vld [vmem:[#allocation50_spill] sm:$0xff] }
 0x558   : > { %v9554_v29 = vpop.permute.xlu0 %3274  ;;  %v9556_v45 = vpop.permute.xlu1 %3311 }
 0x55a   : > { %3204 = vrot.lane.b32.xlu1 %v3192_v24, %s11300_s9  ;;  %3167 = vrot.lane.b32.xlu0 %v3155_v14, %s11276_s29  ;;  %v11353_v24 = vld [vmem:[#allocation23_spill] sm:$0xff]  ;;  %v11354_v14 = vld [vmem:[#allocation40_spill] sm:$0xff] }
 0x55b   : > { %v3906_v25 = vmul.f32 %v9284_v53, %v11353_v24  ;;  %v3082_v51 = vmul.f32 %v9296_v20, %v11354_v14  ;;  %v11364_v14 = vld [vmem:[#allocation29_spill] sm:$0xff] }
 0x55c   : > { %v9564_v2 = vpop.permute.xlu0 %3319  ;;  %v9566_v36 = vpop.permute.xlu1 %3356 }
 0x55e   : > { %3165 = vrot.lane.b32.xlu1 %v3154_v7, %s11276_s29  ;;  %3128 = vrot.lane.b32.xlu0 %v3117_v43, %s11238_s21  ;;  %v11355_v43 = vld [vmem:[#allocation19_spill] sm:$0xff] }
 0x55f   : > { %v3905_v49 = vmul.f32 %v11355_v43, %v9274_v0  ;;  %v11365_v43 = vld [vmem:[#allocation22_spill] sm:$0xff] }
 0x560   : > { %v9574_v5 = vpop.permute.xlu0 %3200  ;;  %v9576_v42 = vpop.permute.xlu1 %3237 }
 0x562   : > { %3243 = vrot.lane.b32.xlu1 %v3230_v58, %s11299_s4  ;;  %3206 = vrot.lane.b32.xlu0 %v3193_v26, %s11300_s9  ;;  %v3045_v58 = vmul.f32 %v9296_v20, %v9130_v1  ;;  %v11359_v1 = vld [vmem:[#allocation49_spill] sm:$0xff] }
 0x564   : > { %v9584_v13 = vpop.permute.xlu0 %3245  ;;  %v9586_v4 = vpop.permute.xlu1 %3282 }
 0x566   : > { %3130 = vrot.lane.b32.xlu1 %v3118_v27, %s11238_s21  ;;  %3093 = vrot.lane.b32.xlu0 %v3081_v59, %s11233_s24  ;;  %v3870_v59 = vmul.f32 %v9296_v20, %v11357_v12 }
 0x568   : > { %v9594_v60 = vpop.permute.xlu0 %3126  ;;  %v9596_v38 = vpop.permute.xlu1 %3163 }
 0x56a   : > { %3091 = vrot.lane.b32.xlu1 %v3080_v28, %s11233_s24  ;;  %3054 = vrot.lane.b32.xlu0 %v3043_v48, %s11250_s20  ;;  %v3943_v28 = vmul.f32 %v9284_v53, %v11358_v63 }
 0x56c   : > { %v9604_v18 = vpop.permute.xlu0 %3171  ;;  %v9606_v6 = vpop.permute.xlu1 %3208 }
 0x56e   : > { %3169 = vrot.lane.b32.xlu1 %v3156_v33, %s11276_s29  ;;  %3132 = vrot.lane.b32.xlu0 %v3119_v30, %s11238_s21  ;;  %v11360_v33 = vld [vmem:[#allocation39_spill] sm:$0xff] }
 0x56f   : > { %v3832_v30 = vmul.f32 %v9284_v53, %v11360_v33  ;;  %v11371_v33 = vld [vmem:[#allocation18_spill] sm:$0xff] }
 0x570   : > { %v9614_v31 = vpop.permute.xlu0 %3052  ;;  %v9616_v46 = vpop.permute.xlu1 %3089 }
 0x572   : > { %3056 = vrot.lane.b32.xlu1 %v3044_v40, %s11250_s20  ;;  %3956 = vrot.lane.b32.xlu0 %v3944_v15, %s11330_s0  ;;  %v3942_v40 = vmul.f32 %v11361_v50, %v9274_v0 }
 0x574   : > { %v9624_v61 = vpop.permute.xlu0 %3097  ;;  %v9626_v8 = vpop.permute.xlu1 %3134 }
 0x576   : > { %3917 = vrot.lane.b32.xlu0 %v3906_v25, %s11298_s3  ;;  %3095 = vrot.lane.b32.xlu1 %v3082_v51, %s11233_s24  ;;  %v3831_v51 = vmul.f32 %v11364_v14, %v9274_v0 }
 0x578   : > { %v9634_v7 = vpop.permute.xlu0 %3060  ;;  %v9636_v41 = vpop.permute.xlu1 %3958 }
 0x579   : > { %v9645_v26 = vsel %vm11356_vm15, %v9636_v41, %v9432_v32 }
 0x57a   : > { %3915 = vrot.lane.b32.xlu0 %v3905_v49, %s11298_s3  ;;  %3058 = vrot.lane.b32.xlu1 %v3045_v58, %s11250_s20  ;;  %v3907_v49 = vmul.f32 %v9296_v20, %v11365_v43  ;;  %v11366_v58 = vld [vmem:[#allocation42_spill] sm:$0xff] }
 0x57c   : > { %v9649_v22 = vpop.permute.xlu0 %3921  ;;  %v9651_v27 = vpop.permute.xlu1 %3884 }
 0x57d   : > { %v9660_v19 = vsel %vm1346_vm9, %v9649_v22, %v11359_v1  ;;  %v9665_v32 = vsel %vm1270_vm13, %v9651_v27, %v9442_v16 }
 0x57e   : > { %3882 = vrot.lane.b32.xlu0 %v3870_v59, %s11299_s4  ;;  %3954 = vrot.lane.b32.xlu1 %v3943_v28, %s11330_s0  ;;  %v11370_v28 = vld [vmem:[#allocation27_spill] sm:$0xff] }
 0x57f   : > { %v3796_v1 = vmul.f32 %v9296_v20, %v11370_v28 }
 0x580   : > { %v9669_v48 = vpop.permute.xlu0 %3847  ;;  %v9671_v62 = vpop.permute.xlu1 %3810 }
 0x581   : > { %v9680_v15 = vsel %vm11363_vm0, %v9669_v48, %v11362_v44  ;;  %v9685_v16 = vsel %vm1119_vm5, %v9671_v62, %v9454_v47  ;;  %v11374_v44 = vld [vmem:[#allocation57_spill] sm:$0xff] }
 0x582   : > { %3843 = vrot.lane.b32.xlu0 %v3832_v30, %s11300_s9  ;;  %3952 = vrot.lane.b32.xlu1 %v3942_v40, %s11330_s0  ;;  %v3869_v30 = vmul.f32 %v9284_v53, %v11371_v33  ;;  %v3758_v14 = vmul.f32 %v9284_v53, %v11374_v44 }
 0x584   : > { %v9689_v24 = vpop.permute.xlu0 %3773  ;;  %v9691_v25 = vpop.permute.xlu1 %3736 }
 0x585   : > { %v9700_v12 = vsel %vm11367_vm11, %v9689_v24, %v11366_v58  ;;  %v9705_v47 = vsel %vm968_vm3, %v9691_v25, %v9464_v57  ;;  %v11376_v58 = vld [vmem:[#allocation54_spill] sm:$0xff] }
 0x586   : > { %3841 = vrot.lane.b32.xlu0 %v3831_v51, %s11300_s9  ;;  %3919 = vrot.lane.b32.xlu1 %v3907_v49, %s11298_s3  ;;  %v11375_v51 = vld [vmem:[#allocation15_spill] sm:$0xff]  ;;  %v3757_v28 = vmul.f32 %v11376_v58, %v9274_v0 }
 0x587   : > { %v3868_v43 = vmul.f32 %v11375_v51, %v9274_v0  ;;  %v11378_v51 = vld [vmem:[#allocation58_spill] sm:$0xff] }
 0x588   : > { %v9709_v59 = vpop.permute.xlu0 %3607  ;;  %v9711_v63 = vpop.permute.xlu1 %3699 }
 0x589   : > { %11368 = vst [vmem:[#allocation51_spill] sm:$0xff] %v9709_v59  ;;  %11369 = vst [vmem:[#allocation52_spill] sm:$0xff] %v9711_v63  ;;  %v9720_v50 = vsel %vm897_vm12, %v9711_v63, %v9476_v56 }
 0x58a   : > { %3808 = vrot.lane.b32.xlu0 %v3796_v1, %s11276_s29  ;;  %3880 = vrot.lane.b32.xlu1 %v3869_v30, %s11299_s4  ;;  %v11377_v1 = vld [vmem:[#allocation38_spill] sm:$0xff] }
 0x58b   : > { %v3833_v33 = vmul.f32 %v9296_v20, %v11377_v1 }
 0x58c   : > { %v9724_v57 = vpop.permute.xlu0 %3652  ;;  %v9726_v40 = vpop.permute.xlu1 %3644 }
 0x58d   : > { %11372 = vst [vmem:[#allocation53_spill] sm:$0xff] %v9724_v57  ;;  %11373 = vst [vmem:[#allocation16_spill] sm:$0xff] %v9726_v40  ;;  %v11379_v57 = vld [vmem:[#allocation28_spill] sm:$0xff] }
 0x58e   : > { %3769 = vrot.lane.b32.xlu0 %v3758_v14, %s11238_s21  ;;  %3878 = vrot.lane.b32.xlu1 %v3868_v43, %s11299_s4  ;;  %v3722_v43 = vmul.f32 %v9296_v20, %v11378_v51  ;;  %v3795_v40 = vmul.f32 %v9284_v53, %v11379_v57  ;;  %v11381_v51 = vld [vmem:[#allocation25_spill] sm:$0xff] }
 0x58f   : > { %v3794_v59 = vmul.f32 %v11381_v51, %v9274_v0  ;;  %v11385_v51 = vld [vmem:[#allocation56_spill] sm:$0xff] }
 0x590   : > { %v9734_v56 = vpop.permute.xlu0 %3537  ;;  %v3573_v49 = vpop.permute.xlu1 %3572 }
 0x591   : > { %v3580_v30 = vsel %vm10840_vm7, %v9484_v34, %v3573_v49 }
 0x592   : > { %3588 = vst [vmem:[#allocation3 + $0x1e0] sm:$0xff] %v3580_v30  ;;  %3767 = vrot.lane.b32.xlu0 %v3757_v28, %s11238_s21  ;;  %3845 = vrot.lane.b32.xlu1 %v3833_v33, %s11300_s9  ;;  %v11380_v33 = vld [vmem:[#allocation63_spill] sm:$0xff] }
 0x593   : > { %v3684_v63 = vmul.f32 %v9284_v53, %v11380_v33 }
 0x594   : > { %v3499_v44 = vpop.permute.xlu0 %3498  ;;  %v3575_v14 = vpop.permute.xlu1 %3574 }
 0x595   : > { %v3506_v58 = vsel %vm1793_vm4, %v9496_v55, %v3499_v44  ;;  %v3581_v1 = vsel %vm10840_vm7, %v3573_v49, %v3575_v14 }
 0x596   : > { %3514 = vst [vmem:[#allocation3 + $0x1a0] sm:$0xff] %v3506_v58  ;;  %3734 = vrot.lane.b32.xlu0 %v3722_v43, %s11233_s24  ;;  %3806 = vrot.lane.b32.xlu1 %v3795_v40, %s11276_s29 }
 0x597   : > { %4094 = vmatprep.subr.mxu0 %v3581_v1 }
 0x598   : > { %v3577_v34 = vpop.permute.xlu0 %3576  ;;  %v3536_v28 = vpop.permute.xlu1 %3535  ;;  %4095 = vmatpush1.msra.mxu0 %v3580_v30 }
 0x599   : > { %v3582_v57 = vsel %vm10840_vm7, %v3575_v14, %v3577_v34  ;;  %v3583_v55 = vsel %vm10840_vm7, %v3577_v34, %v9506_v9  ;;  %v3543_v49 = vsel %vm1864_vm6, %v9494_v17, %v3536_v28  ;;  %v3544_v40 = vsel %vm1864_vm6, %v3536_v28, %v9734_v56  ;;  %v11382_v14 = vld [vmem:[#allocation62_spill] sm:$0xff]  ;;  %v11383_v9 = vld [vmem:[#allocation59_spill] sm:$0xff]  ;;  %v11384_v28 = vld [vmem:[#allocation72_spill] sm:$0xff] }
 0x59a   : > { %3551 = vst [vmem:[#allocation3 + $0x1c0] sm:$0xff] %v3543_v49  ;;  %3695 = vrot.lane.b32.xlu0 %v3684_v63, %s11250_s20  ;;  %3804 = vrot.lane.b32.xlu1 %v3794_v59, %s11276_s29  ;;  %v3683_v1 = vmul.f32 %v11382_v14, %v9274_v0  ;;  %v3759_v34 = vmul.f32 %v9296_v20, %v11383_v9 }
 0x59b   : > { %4165 = vmatprep.subr.mxu1 %v3583_v55  ;;  %4096 = vmatprep.subr.mxu0 %v3544_v40  ;;  %v3636_v33 = vmul.f32 %v9284_v53, %v11384_v28  ;;  %v3721_v55 = vmul.f32 %v9284_v53, %v11385_v51 }
 0x59c   : > { %v9766_v43 = vpop.permute.xlu0 %3463  ;;  %v3501_v30 = vpop.permute.xlu1 %3500  ;;  %4097 = vmatpush1.msra.mxu0 %v3543_v49  ;;  %4166 = vmatpush1.msra.mxu1 %v3582_v57 }
 0x59d   : > { %v3507_v17 = vsel %vm1793_vm4, %v3499_v44, %v3501_v30 }
 0x59e   : > { %3515 = vst [vmem:[#allocation3 + $0x1a8] sm:$0xff] %v3507_v17  ;;  %3693 = vrot.lane.b32.xlu0 %v3683_v1, %s11250_s20  ;;  %3771 = vrot.lane.b32.xlu1 %v3759_v34, %s11238_s21 }
 0x59f   : > { %4098 = vmatprep.subr.mxu0 %v3507_v17 }
 0x5a0   : > { %v3425_v59 = vpop.permute.xlu0 %3424  ;;  %v3462_v63 = vpop.permute.xlu1 %3461  ;;  %4099 = vmatpush1.msra.mxu0 %v3506_v58  ;;  %v11386_v58 = vld [vmem:[#allocation69_spill] sm:$0xff] }
 0x5a1   : > { %v3432_v57 = vsel %vm1643_vm14, %v9514_v11, %v3425_v59  ;;  %v3469_v44 = vsel %vm1718_vm10, %v9516_v52, %v3462_v63  ;;  %v3470_v49 = vsel %vm1718_vm10, %v3462_v63, %v9766_v43  ;;  %v3598_v1 = vmul.f32 %v9274_v0, %v11386_v58  ;;  %v11387_v11 = vld [vmem:[#allocation55_spill] sm:$0xff] }
 0x5a2   : > { %3440 = vst [vmem:[#allocation3 + $0x160] sm:$0xff] %v3432_v57  ;;  %3477 = vst [vmem:[#allocation3 + $0x180] sm:$0xff] %v3469_v44  ;;  %3648 = vrot.lane.b32.xlu0 %v3636_v33, %s11310_s27  ;;  %3732 = vrot.lane.b32.xlu1 %v3721_v55, %s11233_s24  ;;  %v3720_v9 = vmul.f32 %v11387_v11, %v9274_v0  ;;  %v11393_v58 = vld [vmem:[#allocation71_spill] sm:$0xff] }
 0x5a3   : > { %3478 = vst [vmem:[#allocation3 + $0x188] sm:$0xff] %v3470_v49  ;;  %4100 = vmatprep.subr.mxu0 %v3470_v49  ;;  %v11390_v49 = vld [vmem:[#allocation70_spill] sm:$0xff] }
 0x5a4   : > { %v3503_v40 = vpop.permute.xlu0 %3502  ;;  %v3540_v14 = vpop.permute.xlu1 %3539  ;;  %4101 = vmatpush1.msra.mxu0 %v3469_v44 }
 0x5a5   : > { %v3508_v52 = vsel %vm1793_vm4, %v3501_v30, %v3503_v40  ;;  %v3509_v34 = vsel %vm1793_vm4, %v3503_v40, %v9526_v35  ;;  %v3545_v17 = vsel %vm1864_vm6, %v9734_v56, %v3540_v14  ;;  %v3546_v63 = vsel %vm1864_vm6, %v3540_v14, %v9504_v23  ;;  %v11388_v30 = vld [vmem:[#allocation82_spill] sm:$0xff]  ;;  %v11389_v35 = vld [vmem:[#allocation64_spill] sm:$0xff] }
 0x5a6   : > { %3516 = vst [vmem:[#allocation3 + $0x1b0] sm:$0xff] %v3508_v52  ;;  %3517 = vst [vmem:[#allocation3 + $0x1b8] sm:$0xff] %v3509_v34  ;;  %3609 = vrot.lane.b32.xlu0 %v3598_v1, %s11307_s26  ;;  %3730 = vrot.lane.b32.xlu1 %v3720_v9, %s11233_s24  ;;  %v3601_v51 = vmul.f32 %v11388_v30, %v9305_v21  ;;  %v3685_v55 = vmul.f32 %v9296_v20, %v11389_v35  ;;  %vm11391_vm6 = vcmask 515072   ;;  %v11395_v30 = vld [vmem:[#allocation83_spill] sm:$0xff] }
 0x5a7   : > { %4167 = vmatprep.subr.mxu1 %v3546_v63  ;;  %v3635_v40 = vmul.f32 %v9274_v0, %v11390_v49  ;;  %vm11392_vm4 = vmmov %vm11391_vm6  ;;  %v3975_v0 = vld [vmem:[%s10616_s5 + $0x8] sm:$0xff] }
 0x5a8   : > { %v9800_v28 = vpop.permute.xlu0 %3389  ;;  %v3427_v33 = vpop.permute.xlu1 %3426  ;;  %4168 = vmatpush1.msra.mxu1 %v3545_v17  ;;  %6145 = vmatprep.mubr.msk.f32.mxu0 %vm4090_vm1, %v3975_v0  ;;  %v11394_v17 = vld [vmem:[#allocation84_spill] sm:$0xff]  ;;  %vm11398_vm8 = vmmov %vm11392_vm4 }
 0x5a9   : > { %v3433_v56 = vsel %vm1643_vm14, %v3425_v59, %v3427_v33  ;;  %4169 = vmatprep.subr.mxu1 %v3509_v34  ;;  %6146 = vmatprep.mubr.msk.f32.mxu1 %vm4090_vm1, %v3975_v0  ;;  %v3637_v63 = vmul.f32 %v9296_v20, %v11394_v17  ;;  %vm11403_vm1 = vcmask 982016  }
 0x5aa   : > { %3441 = vst [vmem:[#allocation3 + $0x168] sm:$0xff] %v3433_v56  ;;  %3615 = vrot.lane.b32.xlu0 %v3601_v51, %s11307_s26  ;;  %3697 = vrot.lane.b32.xlu1 %v3685_v55, %s11250_s20 }
 0x5ab   : > { %4170 = vmatpush1.msra.mxu1 %v3508_v52  ;;  %4102 = vmatprep.subr.mxu0 %v3433_v56  ;;  %v4084_v56 = vld [vmem:[%s10617_s6] sm:$0xff] }
 0x5ac   : > { %v3351_v23 = vpop.permute.xlu0 %3350  ;;  %v3388_v44 = vpop.permute.xlu1 %3387  ;;  %4103 = vmatpush1.msra.mxu0 %v3432_v57 }
 0x5ad   : > { %v3358_v21 = vsel %vm1463_vm2, %v9534_v10, %v3351_v23  ;;  %v3395_v59 = vsel %vm11391_vm6, %v9536_v3, %v3388_v44  ;;  %v3396_v14 = vsel %vm11392_vm4, %v3388_v44, %v9800_v28  ;;  %v3599_v3 = vmul.f32 %v9284_v53, %v11393_v58 }
 0x5ae   : > { %3366 = vst [vmem:[#allocation3 + $0x120] sm:$0xff] %v3358_v21  ;;  %3403 = vst [vmem:[#allocation3 + $0x140] sm:$0xff] %v3395_v59  ;;  %3646 = vrot.lane.b32.xlu1 %v3635_v40, %s11310_s27  ;;  %4104 = vmatprep.subr.mxu0 %v3396_v14 }
 0x5af   : > { %3404 = vst [vmem:[#allocation3 + $0x148] sm:$0xff] %v3396_v14  ;;  %4105 = vmatpush1.msra.mxu0 %v3395_v59 }
 0x5b0   : > { %v3429_v10 = vpop.permute.xlu0 %3428  ;;  %v3466_v57 = vpop.permute.xlu1 %3465 }
 0x5b1   : > { %v3434_v1 = vsel %vm1643_vm14, %v3427_v33, %v3429_v10  ;;  %v3435_v11 = vsel %vm1643_vm14, %v3429_v10, %v9546_v37  ;;  %v3471_v9 = vsel %vm1718_vm10, %v9766_v43, %v3466_v57  ;;  %v3472_v52 = vsel %vm1718_vm10, %v3466_v57, %v9524_v54  ;;  %v3595_v43 = vld [vmem:[#allocation2 + $0x18] sm:$0xff]  ;;  %vm11396_vm10 = vmmov %vm11356_vm15 }
 0x5b2   : > { %3442 = vst [vmem:[#allocation3 + $0x170] sm:$0xff] %v3434_v1  ;;  %3443 = vst [vmem:[#allocation3 + $0x178] sm:$0xff] %v3435_v11  ;;  %3611 = vrot.lane.b32.xlu1 %v3599_v3, %s11307_s26  ;;  %4171 = vmatprep.subr.mxu1 %v3472_v52  ;;  %v3600_v51 = vmul.f32 %v3595_v43, %v11395_v30 }
 0x5b3   : > { %3479 = vst [vmem:[#allocation3 + $0x190] sm:$0xff] %v3471_v9  ;;  %3480 = vst [vmem:[#allocation3 + $0x198] sm:$0xff] %v3472_v52  ;;  %4172 = vmatpush1.msra.mxu1 %v3471_v9 }
 0x5b4   : > { %v3316_v53 = vpop.permute.xlu0 %3315  ;;  %v3353_v34 = vpop.permute.xlu1 %3352  ;;  %4173 = vmatprep.subr.mxu1 %v3435_v11  ;;  %vm11397_vm14 = vmmov %vm11396_vm10 }
 0x5b5   : > { %v3359_v37 = vsel %vm1463_vm2, %v3351_v23, %v3353_v34  ;;  %4174 = vmatpush1.msra.mxu1 %v3434_v1  ;;  %vm11399_vm15 = vmmov %vm11392_vm4 }
 0x5b6   : > { %3367 = vst [vmem:[#allocation3 + $0x128] sm:$0xff] %v3359_v37  ;;  %3650 = vrot.lane.b32.xlu1 %v3637_v63, %s11310_s27  ;;  %4106 = vmatprep.subr.mxu0 %v3359_v37  ;;  %vm11400_vm11 = vmmov %vm11396_vm10  ;;  %s11456_s27 = smov 8  }
 0x5b7   : > { %4107 = vmatpush1.msra.mxu0 %v3358_v21  ;;  %vm11401_vm6 = vmmov %vm11396_vm10 }
 0x5b8   : > { %v3277_v54 = vpop.permute.xlu0 %3276  ;;  %v3314_v33 = vpop.permute.xlu1 %3313  ;;  %vm11402_vm4 = vmmov %vm11363_vm0 }
 0x5b9   : > { %v3284_v35 = vsel %vm1346_vm9, %v9554_v29, %v3277_v54  ;;  %v3321_v20 = vsel %vm11396_vm10, %v9556_v45, %v3314_v33  ;;  %v3322_v55 = vsel %vm11397_vm14, %v3314_v33, %v3316_v53  ;;  %vm11404_vm10 = vmmov %vm11363_vm0 }
 0x5ba   : > { %3292 = vst [vmem:[#allocation3 + $0xe0] sm:$0xff] %v3284_v35  ;;  %3329 = vst [vmem:[#allocation3 + $0x100] sm:$0xff] %v3321_v20  ;;  %3613 = vrot.lane.b32.xlu1 %v3600_v51, %s11307_s26  ;;  %4108 = vmatprep.subr.mxu0 %v3322_v55  ;;  %s6692_s26 = smov 21  }
 0x5bb   : > { %3330 = vst [vmem:[#allocation3 + $0x108] sm:$0xff] %v3322_v55  ;;  %4109 = vmatpush1.msra.mxu0 %v3321_v20  ;;  %vm11405_vm14 = vmmov %vm11363_vm0 }
 0x5bc   : > { %v3355_v23 = vpop.permute.xlu0 %3354  ;;  %v3392_v44 = vpop.permute.xlu1 %3391 }
 0x5bd   : > { %v3360_v29 = vsel %vm1463_vm2, %v3353_v34, %v3355_v23  ;;  %v3361_v45 = vsel %vm1463_vm2, %v3355_v23, %v9566_v36  ;;  %v3397_v49 = vsel %vm11398_vm8, %v9800_v28, %v3392_v44  ;;  %v3398_v40 = vsel %vm11399_vm15, %v3392_v44, %v9544_v39  ;;  %vm11406_vm8 = vmmov %vm11403_vm1 }
 0x5be   : > { %3368 = vst [vmem:[#allocation3 + $0x130] sm:$0xff] %v3360_v29  ;;  %3369 = vst [vmem:[#allocation3 + $0x138] sm:$0xff] %v3361_v45  ;;  %4087 = vperm.xlu1 %6593, %v4084_v56   ;;  %4175 = vmatprep.subr.mxu1 %v3398_v40 }
 0x5bf   : > { %3405 = vst [vmem:[#allocation3 + $0x150] sm:$0xff] %v3397_v49  ;;  %3406 = vst [vmem:[#allocation3 + $0x158] sm:$0xff] %v3398_v40  ;;  %4176 = vmatpush1.msra.mxu1 %v3397_v49 }
 0x5c0   : > { %v3242_v21 = vpop.permute.xlu0 %3241  ;;  %v3279_v59 = vpop.permute.xlu1 %3278  ;;  %4177 = vmatprep.subr.mxu1 %v3361_v45  ;;  %vm11407_vm15 = vmmov %vm11403_vm1 }
 0x5c1   : > { %v3285_v14 = vsel %vm1346_vm9, %v3277_v54, %v3279_v59  ;;  %4178 = vmatpush1.msra.mxu1 %v3360_v29 }
 0x5c2   : > { %3293 = vst [vmem:[#allocation3 + $0xe8] sm:$0xff] %v3285_v14  ;;  %4110 = vmatprep.subr.mxu0 %v3285_v14  ;;  %v3976_v14 = vld [vmem:[#allocation3] sm:$0xff] }
 0x5c3   : > { %4111 = vmatpush1.msra.mxu0 %v3284_v35 }
 0x5c4   : > { %v3203_v36 = vpop.permute.xlu0 %3202  ;;  %v3240_v28 = vpop.permute.xlu1 %3239 }
 0x5c5   : > { %v3210_v39 = vsel %vm11363_vm0, %v9574_v5, %v3203_v36  ;;  %v3247_v0 = vsel %vm1270_vm13, %v9576_v42, %v3240_v28  ;;  %v3248_v10 = vsel %vm1270_vm13, %v3240_v28, %v3242_v21  ;;  %vm11408_vm0 = vmmov %vm11403_vm1 }
 0x5c6   : > { %3218 = vst [vmem:[#allocation3 + $0xa0] sm:$0xff] %v3210_v39  ;;  %3255 = vst [vmem:[#allocation3 + $0xc0] sm:$0xff] %v3247_v0  ;;  %4112 = vmatprep.subr.mxu0 %v3248_v10 }
 0x5c7   : > { %3256 = vst [vmem:[#allocation3 + $0xc8] sm:$0xff] %v3248_v10  ;;  %4113 = vmatpush1.msra.mxu0 %v3247_v0 }
 0x5c8   : > { %v3281_v57 = vpop.permute.xlu0 %3280  ;;  %v3318_v58 = vpop.permute.xlu1 %3317 }
 0x5c9   : > { %v3286_v3 = vsel %vm1346_vm9, %v3279_v59, %v3281_v57  ;;  %v3287_v1 = vsel %vm1346_vm9, %v3281_v57, %v9586_v4  ;;  %v3323_v11 = vsel %vm11400_vm11, %v3316_v53, %v3318_v58  ;;  %v3324_v5 = vsel %vm11401_vm6, %v3318_v58, %v9564_v2  ;;  %vm11409_vm11 = vmmov %vm11401_vm6 }
 0x5ca   : > { %3294 = vst [vmem:[#allocation3 + $0xf0] sm:$0xff] %v3286_v3  ;;  %3295 = vst [vmem:[#allocation3 + $0xf8] sm:$0xff] %v3287_v1  ;;  %4179 = vmatprep.subr.mxu1 %v3324_v5 }
 0x5cb   : > { %3331 = vst [vmem:[#allocation3 + $0x110] sm:$0xff] %v3323_v11  ;;  %3332 = vst [vmem:[#allocation3 + $0x118] sm:$0xff] %v3324_v5  ;;  %4180 = vmatpush1.msra.mxu1 %v3323_v11 }
 0x5cc   : > { %v3168_v42 = vpop.permute.xlu0 %3167  ;;  %v3205_v9 = vpop.permute.xlu1 %3204  ;;  %4181 = vmatprep.subr.mxu1 %v3287_v1  ;;  %v3978_v1 = vld [vmem:[#allocation3 + $0x10] sm:$0xff] }
 0x5cd   : > { %v3211_v52 = vsel %vm11402_vm4, %v3203_v36, %v3205_v9  ;;  %4182 = vmatpush1.msra.mxu1 %v3286_v3  ;;  %vm11410_vm4 = vmmov %vm11401_vm6 }
 0x5ce   : > { %3219 = vst [vmem:[#allocation3 + $0xa8] sm:$0xff] %v3211_v52  ;;  %4114 = vmatprep.subr.mxu0 %v3211_v52 }
 0x5cf   : > { %4115 = vmatpush1.msra.mxu0 %v3210_v39 }
 0x5d0   : > { %v3129_v4 = vpop.permute.xlu0 %3128  ;;  %v3166_v53 = vpop.permute.xlu1 %3165 }
 0x5d1   : > { %v3136_v2 = vsel %vm11403_vm1, %v9594_v60, %v3129_v4  ;;  %v3173_v34 = vsel %vm1119_vm5, %v9596_v38, %v3166_v53  ;;  %v3174_v17 = vsel %vm1119_vm5, %v3166_v53, %v3168_v42  ;;  %vm11411_vm1 = vmmov %vm11404_vm10 }
 0x5d2   : > { %3144 = vst [vmem:[#allocation3 + $0x60] sm:$0xff] %v3136_v2  ;;  %3181 = vst [vmem:[#allocation3 + $0x80] sm:$0xff] %v3173_v34  ;;  %4116 = vmatprep.subr.mxu0 %v3174_v17 }
 0x5d3   : > { %3182 = vst [vmem:[#allocation3 + $0x88] sm:$0xff] %v3174_v17  ;;  %4117 = vmatpush1.msra.mxu0 %v3173_v34 }
 0x5d4   : > { %v3207_v63 = vpop.permute.xlu0 %3206  ;;  %v3244_v37 = vpop.permute.xlu1 %3243 }
 0x5d5   : > { %v3212_v43 = vsel %vm11404_vm10, %v3205_v9, %v3207_v63  ;;  %v3213_v54 = vsel %vm11405_vm14, %v3207_v63, %v9606_v6  ;;  %v3249_v33 = vsel %vm1270_vm13, %v3242_v21, %v3244_v37  ;;  %v3250_v60 = vsel %vm1270_vm13, %v3244_v37, %v9584_v13  ;;  %vm11413_vm10 = vmmov %vm11411_vm1 }
 0x5d6   : > { %3220 = vst [vmem:[#allocation3 + $0xb0] sm:$0xff] %v3212_v43  ;;  %3221 = vst [vmem:[#allocation3 + $0xb8] sm:$0xff] %v3213_v54  ;;  %4183 = vmatprep.subr.mxu1 %v3250_v60 }
 0x5d7   : > { %3257 = vst [vmem:[#allocation3 + $0xd0] sm:$0xff] %v3249_v33  ;;  %3258 = vst [vmem:[#allocation3 + $0xd8] sm:$0xff] %v3250_v60  ;;  %4184 = vmatpush1.msra.mxu1 %v3249_v33 }
 0x5d8   : > { %v3094_v38 = vpop.permute.xlu0 %3093  ;;  %v3131_v30 = vpop.permute.xlu1 %3130  ;;  %4185 = vmatprep.subr.mxu1 %v3213_v54  ;;  %vm11414_vm14 = vmmov %vm11411_vm1 }
 0x5d9   : > { %v3137_v51 = vsel %vm11406_vm8, %v3129_v4, %v3131_v30  ;;  %4186 = vmatpush1.msra.mxu1 %v3212_v43  ;;  %vm11416_vm8 = vmmov %vm11408_vm0 }
 0x5da   : > { %3145 = vst [vmem:[#allocation3 + $0x68] sm:$0xff] %v3137_v51  ;;  %4118 = vmatprep.subr.mxu0 %v3137_v51 }
 0x5db   : > { %4119 = vmatpush1.msra.mxu0 %v3136_v2 }
 0x5dc   : > { %v3055_v6 = vpop.permute.xlu0 %3054  ;;  %v3092_v35 = vpop.permute.xlu1 %3091 }
 0x5dd   : > { %v3062_v13 = vsel %vm897_vm12, %v9614_v31, %v3055_v6  ;;  %v3099_v20 = vsel %vm968_vm3, %v9616_v46, %v3092_v35  ;;  %v3100_v55 = vsel %vm968_vm3, %v3092_v35, %v3094_v38 }
 0x5de   : > { %3070 = vst [vmem:[#allocation3 + $0x20] sm:$0xff] %v3062_v13  ;;  %3107 = vst [vmem:[#allocation3 + $0x40] sm:$0xff] %v3099_v20  ;;  %4120 = vmatprep.subr.mxu0 %v3100_v55 }
 0x5df   : > { %3108 = vst [vmem:[#allocation3 + $0x48] sm:$0xff] %v3100_v55  ;;  %4121 = vmatpush1.msra.mxu0 %v3099_v20 }
 0x5e0   : > { %v3133_v56 = vpop.permute.xlu0 %3132  ;;  %v3170_v23 = vpop.permute.xlu1 %3169 }
 0x5e1   : > { %v3138_v44 = vsel %vm11407_vm15, %v3131_v30, %v3133_v56  ;;  %v3139_v29 = vsel %vm11408_vm0, %v3133_v56, %v9626_v8  ;;  %v3175_v45 = vsel %vm1119_vm5, %v3168_v42, %v3170_v23  ;;  %v3176_v31 = vsel %vm1119_vm5, %v3170_v23, %v9604_v18  ;;  %v3977_v8 = vld [vmem:[#allocation3 + $0x8] sm:$0xff] }
 0x5e2   : > { %3146 = vst [vmem:[#allocation3 + $0x70] sm:$0xff] %v3138_v44  ;;  %3147 = vst [vmem:[#allocation3 + $0x78] sm:$0xff] %v3139_v29  ;;  %4187 = vmatprep.subr.mxu1 %v3176_v31 }
 0x5e3   : > { %3183 = vst [vmem:[#allocation3 + $0x90] sm:$0xff] %v3175_v45  ;;  %3184 = vst [vmem:[#allocation3 + $0x98] sm:$0xff] %v3176_v31  ;;  %4188 = vmatpush1.msra.mxu1 %v3175_v45 }
 0x5e4   : > { %v3957_v46 = vpop.permute.xlu0 %3956  ;;  %v3057_v49 = vpop.permute.xlu1 %3056  ;;  %4189 = vmatprep.subr.mxu1 %v3139_v29  ;;  %v11417_v29 = vld [vmem:[#allocation51_spill] sm:$0xff] }
 0x5e5   : > { %v3964_v40 = vsel %vm11409_vm11, %v3957_v46, %v9636_v41  ;;  %v3063_v21 = vsel %vm897_vm12, %v3055_v6, %v3057_v49  ;;  %4190 = vmatpush1.msra.mxu1 %v3138_v44 }
 0x5e6   : > { %3071 = vst [vmem:[#allocation3 + $0x28] sm:$0xff] %v3063_v21  ;;  %4122 = vmatprep.subr.mxu0 %v3063_v21  ;;  %v6607_v21 = vld [vmem:[#allocation3 + $0x248] sm:$0xff] }
 0x5e7   : > { %4123 = vmatpush1.msra.mxu0 %v3062_v13 }
 0x5e8   : > { %v3918_v18 = vpop.permute.xlu0 %3917  ;;  %v3096_v59 = vpop.permute.xlu1 %3095  ;;  %4124 = vmatprep.subr.mxu0 %v3977_v8  ;;  %v6608_v8 = vld [vmem:[#allocation3 + $0x250] sm:$0xff] }
 0x5e9   : > { %v3101_v36 = vsel %vm968_vm3, %v3094_v38, %v3096_v59  ;;  %v3102_v28 = vsel %vm968_vm3, %v3096_v59, %v9624_v61  ;;  %4125 = vmatpush1.msra.mxu0 %v3976_v14  ;;  %v3979_v61 = vld [vmem:[#allocation3 + $0x18] sm:$0xff] }
 0x5ea   : > { %3109 = vst [vmem:[#allocation3 + $0x50] sm:$0xff] %v3101_v36  ;;  %3110 = vst [vmem:[#allocation3 + $0x58] sm:$0xff] %v3102_v28  ;;  %4191 = vmatprep.subr.mxu1 %v3102_v28 }
 0x5eb   : > { %4192 = vmatpush1.msra.mxu1 %v3101_v36  ;;  %v6609_v36 = vld [vmem:[#allocation3 + $0x240] sm:$0xff] }
 0x5ec   : > { %v3916_v41 = vpop.permute.xlu0 %3915  ;;  %v3059_v39 = vpop.permute.xlu1 %3058 }
 0x5ed   : > { %v3925_v0 = vsel %vm1346_vm9, %v3916_v41, %v3918_v18  ;;  %v3064_v10 = vsel %vm897_vm12, %v3057_v49, %v3059_v39  ;;  %v3065_v57 = vsel %vm897_vm12, %v3059_v39, %v9634_v7  ;;  %v3974_v39 = vld [vmem:[%s10616_s5] sm:$0xff] }
 0x5ee   : > { %3933 = vst [vmem:[#allocation3 + $0x320] sm:$0xff] %v3925_v0  ;;  %3072 = vst [vmem:[#allocation3 + $0x30] sm:$0xff] %v3064_v10  ;;  %4193 = vmatprep.subr.mxu1 %v3065_v57 }
 0x5ef   : > { %3073 = vst [vmem:[#allocation3 + $0x38] sm:$0xff] %v3065_v57  ;;  %4194 = vmatpush1.msra.mxu1 %v3064_v10  ;;  %v11425_v57 = vld [vmem:[#allocation53_spill] sm:$0xff] }
 0x5f0   : > { %v3883_v58 = vpop.permute.xlu0 %3882  ;;  %v3955_v3 = vpop.permute.xlu1 %3954  ;;  %4195 = vmatprep.subr.mxu1 %v3979_v61 }
 0x5f1   : > { %v3890_v11 = vsel %vm1270_vm13, %v3883_v58, %v9651_v27  ;;  %v3963_v5 = vsel %vm11401_vm6, %v3955_v3, %v3957_v46  ;;  %4196 = vmatpush1.msra.mxu1 %v3978_v1  ;;  %v11419_v46 = vld [vmem:[#allocation52_spill] sm:$0xff] }
 0x5f2   : > { %4136 = vmatprep.subr.mxu0 %v3963_v5  ;;  %4207 = vmatprep.subr.mxu1 %v9645_v26 }
 0x5f3   : > { %4208 = vmatpush2.msra.mxu1 %v3964_v40 }
 0x5f4   : > { %v3844_v7 = vpop.permute.xlu0 %3843  ;;  %v3953_v42 = vpop.permute.xlu1 %3952  ;;  %4209 = vmatprep.subr.mxu1 %v9660_v19 }
 0x5f5   : > { %v3962_v9 = vsel %vm11410_vm4, %v3953_v42, %v3955_v3 }
 0x5f6   : > { %3970 = vst [vmem:[#allocation3 + $0x340] sm:$0xff] %v3962_v9  ;;  %4137 = vmatpush2.msra.mxu0 %v3962_v9 }
 0x5f8   : > { %v3842_v52 = vpop.permute.xlu0 %3841  ;;  %v3920_v4 = vpop.permute.xlu1 %3919 }
 0x5f9   : > { %v3851_v53 = vsel %vm11411_vm1, %v3842_v52, %v3844_v7  ;;  %v3926_v27 = vsel %vm1346_vm9, %v3918_v18, %v3920_v4  ;;  %v3927_v2 = vsel %vm1346_vm9, %v3920_v4, %v9649_v22  ;;  %vm11412_vm9 = vmmov %vm11408_vm0  ;;  %v11420_v18 = vld [vmem:[#allocation16_spill] sm:$0xff] }
 0x5fa   : > { %3859 = vst [vmem:[#allocation3 + $0x2e0] sm:$0xff] %v3851_v53  ;;  %4138 = vmatprep.subr.mxu0 %v3926_v27  ;;  %4210 = vmatpush2.msra.mxu1 %v3927_v2 }
 0x5fb   : > { %4139 = vmatpush2.msra.mxu0 %v3925_v0  ;;  %4211 = vmatprep.subr.mxu1 %v9665_v32 }
 0x5fc   : > { %v3809_v26 = vpop.permute.xlu0 %3808  ;;  %v3881_v19 = vpop.permute.xlu1 %3880  ;;  %4212 = vmatpush2.msra.mxu1 %v3890_v11 }
 0x5fd   : > { %v3816_v34 = vsel %vm1119_vm5, %v3809_v26, %v9671_v62  ;;  %v3889_v17 = vsel %vm1270_vm13, %v3881_v19, %v3883_v58  ;;  %4213 = vmatprep.subr.mxu1 %v9680_v15 }
 0x5fe   : > { %4140 = vmatprep.subr.mxu0 %v3889_v17  ;;  %v4262_v17 = vld [vmem:[%s10618_s7] sm:$0xff] }
 0x600   : > { %v3770_v63 = vpop.permute.xlu0 %3769  ;;  %v3879_v37 = vpop.permute.xlu1 %3878 }
 0x601   : > { %v3888_v22 = vsel %vm1270_vm13, %v3879_v37, %v3881_v19  ;;  %vm11415_vm13 = vmmov %vm11408_vm0  ;;  %v4487_v37 = vld [vmem:[#allocation4 + $0x5e8] sm:$0xff] }
 0x602   : > { %3896 = vst [vmem:[#allocation3 + $0x300] sm:$0xff] %v3888_v22  ;;  %4141 = vmatpush2.msra.mxu0 %v3888_v22  ;;  %v4358_v22 = vld [vmem:[#allocation4 + $0x1e0] sm:$0xff] }
 0x604   : > { %v3768_v43 = vpop.permute.xlu0 %3767  ;;  %v3846_v54 = vpop.permute.xlu1 %3845 }
 0x605   : > { %v3777_v32 = vsel %vm11412_vm9, %v3768_v43, %v3770_v63  ;;  %v3852_v33 = vsel %vm11413_vm10, %v3844_v7, %v3846_v54  ;;  %v3853_v62 = vsel %vm11414_vm14, %v3846_v54, %v9669_v48  ;;  %v4486_v43 = vld [vmem:[#allocation4 + $0x5e0] sm:$0xff]  ;;  %v4355_v54 = vld [vmem:[#allocation4 + $0x1c8] sm:$0xff] }
 0x606   : > { %3785 = vst [vmem:[#allocation3 + $0x2a0] sm:$0xff] %v3777_v32  ;;  %4142 = vmatprep.subr.mxu0 %v3852_v33  ;;  %4214 = vmatpush2.msra.mxu1 %v3853_v62  ;;  %v4354_v33 = vld [vmem:[#allocation4 + $0x1c0] sm:$0xff] }
 0x607   : > { %4143 = vmatpush2.msra.mxu0 %v3851_v53  ;;  %4215 = vmatprep.subr.mxu1 %v9685_v16  ;;  %v4482_v62 = vld [vmem:[#allocation4 + $0x5c0] sm:$0xff] }
 0x608   : > { %v3735_v15 = vpop.permute.xlu0 %3734  ;;  %v3807_v60 = vpop.permute.xlu1 %3806  ;;  %4216 = vmatpush2.msra.mxu1 %v3816_v34 }
 0x609   : > { %v3742_v38 = vsel %vm968_vm3, %v3735_v15, %v9691_v25  ;;  %v3815_v30 = vsel %vm1119_vm5, %v3807_v60, %v3809_v26  ;;  %4217 = vmatprep.subr.mxu1 %v9700_v12 }
 0x60a   : > { %4144 = vmatprep.subr.mxu0 %v3815_v30  ;;  %v4478_v30 = vld [vmem:[#allocation4 + $0x5a0] sm:$0xff] }
 0x60c   : > { %v3696_v51 = vpop.permute.xlu0 %3695  ;;  %v3805_v6 = vpop.permute.xlu1 %3804 }
 0x60d   : > { %v3814_v48 = vsel %vm1119_vm5, %v3805_v6, %v3807_v60  ;;  %vm11418_vm5 = vcmask 384000   ;;  %v4479_v60 = vld [vmem:[#allocation4 + $0x5a8] sm:$0xff] }
 0x60e   : > { %3822 = vst [vmem:[#allocation3 + $0x2c0] sm:$0xff] %v3814_v48  ;;  %4145 = vmatpush2.msra.mxu0 %v3814_v48  ;;  %vm11427_vm6 = vmmov %vm11418_vm5  ;;  %v4475_v6 = vld [vmem:[#allocation4 + $0x588] sm:$0xff]  ;;  %v4346_v48 = vld [vmem:[#allocation4 + $0x180] sm:$0xff] }
 0x60f   : > { %vm11428_vm4 = vmmov %vm11418_vm5 }
 0x610   : > { %v3694_v35 = vpop.permute.xlu0 %3693  ;;  %v3772_v13 = vpop.permute.xlu1 %3771 }
 0x611   : > { %v3703_v16 = vsel %vm897_vm12, %v3694_v35, %v3696_v51  ;;  %v3778_v20 = vsel %vm11415_vm13, %v3770_v63, %v3772_v13  ;;  %v3779_v25 = vsel %vm11416_vm8, %v3772_v13, %v9689_v24  ;;  %v4359_v63 = vld [vmem:[#allocation4 + $0x1e8] sm:$0xff]  ;;  %v4474_v35 = vld [vmem:[#allocation4 + $0x580] sm:$0xff] }
 0x612   : > { %3711 = vst [vmem:[#allocation3 + $0x260] sm:$0xff] %v3703_v16  ;;  %4146 = vmatprep.subr.mxu0 %v3778_v20  ;;  %4218 = vmatpush2.msra.mxu1 %v3779_v25  ;;  %v4343_v13 = vld [vmem:[#allocation4 + $0x168] sm:$0xff]  ;;  %v4342_v20 = vld [vmem:[#allocation4 + $0x160] sm:$0xff] }
 0x613   : > { %4147 = vmatpush2.msra.mxu0 %v3777_v32  ;;  %4219 = vmatprep.subr.mxu1 %v9705_v47  ;;  %v4483_v32 = vld [vmem:[#allocation4 + $0x5c8] sm:$0xff]  ;;  %v4470_v25 = vld [vmem:[#allocation4 + $0x560] sm:$0xff] }
 0x614   : > { %v3649_v12 = vpop.permute.xlu0 %3648  ;;  %v3733_v55 = vpop.permute.xlu1 %3732  ;;  %4220 = vmatpush2.msra.mxu1 %v3742_v38  ;;  %v4350_v38 = vld [vmem:[#allocation4 + $0x1a0] sm:$0xff] }
 0x615   : > { %v3741_v56 = vsel %vm968_vm3, %v3733_v55, %v3735_v15  ;;  %4221 = vmatprep.subr.mxu1 %v9720_v50  ;;  %v6606_v50 = vld [vmem:[#allocation3 + $0x258] sm:$0xff]  ;;  %v4351_v15 = vld [vmem:[#allocation4 + $0x1a8] sm:$0xff] }
 0x616   : > { %4148 = vmatprep.subr.mxu0 %v3741_v56  ;;  %v4338_v56 = vld [vmem:[#allocation4 + $0x140] sm:$0xff] }
 0x618   : > { %v3610_v23 = vpop.permute.xlu0 %3609  ;;  %v3731_v44 = vpop.permute.xlu1 %3730 }
 0x619   : > { %v3617_v45 = vsel %vm11418_vm5, %v11417_v29, %v3610_v23  ;;  %v3740_v24 = vsel %vm968_vm3, %v3731_v44, %v3733_v55  ;;  %vm11421_vm3 = vcmask 375808   ;;  %v4467_v55 = vld [vmem:[#allocation4 + $0x548] sm:$0xff] }
 0x61a   : > { %3625 = vst [vmem:[#allocation3 + $0x200] sm:$0xff] %v3617_v45  ;;  %3748 = vst [vmem:[#allocation3 + $0x280] sm:$0xff] %v3740_v24  ;;  %4149 = vmatpush2.msra.mxu0 %v3740_v24  ;;  %v4335_v44 = vld [vmem:[#allocation4 + $0x128] sm:$0xff]  ;;  %v4462_v24 = vld [vmem:[#allocation4 + $0x520] sm:$0xff] }
 0x61b   : > { %vm11422_vm15 = vmmov %vm11421_vm3  ;;  %v4463_v29 = vld [vmem:[#allocation4 + $0x528] sm:$0xff] }
 0x61c   : > { %v3698_v31 = vpop.permute.xlu1 %3697  ;;  %vm11424_vm0 = vmmov %vm11421_vm3  ;;  %v3616_v58 = vpop.permute.xlu0 %3615 }
 0x61d   : > { %v3704_v47 = vsel %vm897_vm12, %v3696_v51, %v3698_v31  ;;  %v3705_v49 = vsel %vm897_vm12, %v3698_v31, %v11419_v46  ;;  %vm11423_vm12 = vmmov %vm11418_vm5  ;;  %v4347_v51 = vld [vmem:[#allocation4 + $0x188] sm:$0xff]  ;;  %v4330_v46 = vld [vmem:[#allocation4 + $0x100] sm:$0xff] }
 0x61e   : > { %4150 = vmatprep.subr.mxu0 %v3704_v47  ;;  %4222 = vmatpush2.msra.mxu1 %v3705_v49  ;;  %vm11426_vm11 = vmmov %vm11424_vm0  ;;  %v4331_v31 = vld [vmem:[#allocation4 + $0x108] sm:$0xff]  ;;  %v4458_v49 = vld [vmem:[#allocation4 + $0x500] sm:$0xff] }
 0x61f   : > { %4151 = vmatpush2.msra.mxu0 %v3703_v16  ;;  %4223 = vmatprep.subr.mxu1 %v6606_v50  ;;  %v4471_v16 = vld [vmem:[#allocation4 + $0x568] sm:$0xff] }
 0x620   : > { %v3647_v40 = vpop.permute.xlu1 %3646  ;;  %4152 = vmatprep.subr.mxu0 %v6607_v21  ;;  %4224 = vmatpush2.msra.mxu1 %v6608_v8  ;;  %v4459_v47 = vld [vmem:[#allocation4 + $0x508] sm:$0xff]  ;;  %v4326_v21 = vld [vmem:[#allocation4 + $0xe0] sm:$0xff] }
 0x621   : > { %v3654_v59 = vsel %vm11421_vm3, %v11420_v18, %v3647_v40  ;;  %v3655_v14 = vsel %vm11422_vm15, %v3647_v40, %v3649_v12  ;;  %4153 = vmatpush2.msra.mxu0 %v6609_v36  ;;  %v4327_v50 = vld [vmem:[#allocation4 + $0xe8] sm:$0xff]  ;;  %v4454_v8 = vld [vmem:[#allocation4 + $0x4e0] sm:$0xff] }
 0x622   : > { %3662 = vst [vmem:[#allocation3 + $0x220] sm:$0xff] %v3654_v59  ;;  %4154 = vmatprep.subr.mxu0 %v3655_v14  ;;  %v4455_v40 = vld [vmem:[#allocation4 + $0x4e8] sm:$0xff]  ;;  %v4322_v14 = vld [vmem:[#allocation4 + $0xc0] sm:$0xff] }
 0x623   : > { %4155 = vmatpush2.msra.mxu0 %v3654_v59  ;;  %v4323_v18 = vld [vmem:[#allocation4 + $0xc8] sm:$0xff]  ;;  %v4450_v36 = vld [vmem:[#allocation4 + $0x4c0] sm:$0xff] }
 0x624   : > { %v3612_v28 = vpop.permute.xlu1 %3611  ;;  %v4451_v59 = vld [vmem:[#allocation4 + $0x4c8] sm:$0xff] }
 0x625   : > { %v3618_v41 = vsel %vm11423_vm12, %v3610_v23, %v3612_v28  ;;  %v4466_v23 = vld [vmem:[#allocation4 + $0x540] sm:$0xff] }
 0x626   : > { %4156 = vmatprep.subr.mxu0 %v3618_v41  ;;  %v4447_v41 = vld [vmem:[#allocation4 + $0x4a8] sm:$0xff] }
 0x627   : > { %4157 = vmatpush2.msra.mxu0 %v3617_v45  ;;  %v4334_v45 = vld [vmem:[#allocation4 + $0x120] sm:$0xff] }
 0x628   : > { %v3651_v0 = vpop.permute.xlu1 %3650  ;;  %4159 = vmatmul.mubr.f32.vlgmr.msra.gmra.mxu0 %v3974_v39  ;;  %4554 = vmatprep.subr.mxu0 %v4359_v63  ;;  %v4299_v63 = vld [vmem:[#allocation4 + $0x8] sm:$0xff] }
 0x629   : > { %v3656_v10 = vsel %vm11424_vm0, %v3649_v12, %v3651_v0  ;;  %v3657_v61 = vsel %vm11426_vm11, %v3651_v0, %v11425_v57  ;;  %4555 = vmatpush1.msra.mxu0 %v4358_v22  ;;  %v4339_v12 = vld [vmem:[#allocation4 + $0x148] sm:$0xff]  ;;  %v4446_v0 = vld [vmem:[#allocation4 + $0x4a0] sm:$0xff] }
 0x62a   : > { %4225 = vmatprep.subr.mxu1 %v3657_v61  ;;  %4556 = vmatprep.subr.mxu0 %v4355_v54  ;;  %v4443_v57 = vld [vmem:[#allocation4 + $0x488] sm:$0xff]  ;;  %v4314_v61 = vld [vmem:[#allocation4 + $0x80] sm:$0xff] }
 0x62b   : > { %4226 = vmatpush2.msra.mxu1 %v3656_v10  ;;  %4557 = vmatpush1.msra.mxu0 %v4354_v33  ;;  %v4315_v10 = vld [vmem:[#allocation4 + $0x88] sm:$0xff]  ;;  %v4298_v22 = vld [vmem:[#allocation4] sm:$0xff] }
 0x62c   : > { %v3614_v3 = vpop.permute.xlu1 %3613  ;;  %4558 = vmatprep.subr.mxu0 %v4351_v15  ;;  %v4423_v54 = vld [vmem:[#allocation4 + $0x3e8] sm:$0xff]  ;;  %v4422_v33 = vld [vmem:[#allocation4 + $0x3e0] sm:$0xff] }
 0x62d   : > { %v3619_v1 = vsel %vm11427_vm6, %v3612_v28, %v3614_v3  ;;  %v3620_v11 = vsel %vm11428_vm4, %v3614_v3, %v3616_v58  ;;  %4559 = vmatpush1.msra.mxu0 %v4350_v38  ;;  %v4319_v28 = vld [vmem:[#allocation4 + $0xa8] sm:$0xff]  ;;  %v4442_v58 = vld [vmem:[#allocation4 + $0x480] sm:$0xff] }
 0x62e   : > { %4227 = vmatprep.subr.mxu1 %v3620_v11  ;;  %4560 = vmatprep.subr.mxu0 %v4347_v51  ;;  %v4311_v3 = vld [vmem:[#allocation4 + $0x68] sm:$0xff]  ;;  %v4310_v11 = vld [vmem:[#allocation4 + $0x60] sm:$0xff] }
 0x62f   : > { %4228 = vmatpush2.msra.mxu1 %v3619_v1  ;;  %4561 = vmatpush1.msra.mxu0 %v4346_v48  ;;  %v4439_v1 = vld [vmem:[#allocation4 + $0x468] sm:$0xff]  ;;  %v4418_v38 = vld [vmem:[#allocation4 + $0x3c0] sm:$0xff] }
 0x630   : > { %4230 = vmatmul.mubr.f32.vlgmr.msra.gmra.mxu1 %v3974_v39  ;;  %4625 = vmatprep.subr.mxu1 %v4487_v37  ;;  %v4318_v39 = vld [vmem:[#allocation4 + $0xa0] sm:$0xff]  ;;  %v4427_v37 = vld [vmem:[#allocation4 + $0x408] sm:$0xff] }
 0x631   : > { %4626 = vmatpush1.msra.mxu1 %v4486_v43  ;;  %4562 = vmatprep.subr.mxu0 %v4343_v13  ;;  %v4426_v43 = vld [vmem:[#allocation4 + $0x400] sm:$0xff]  ;;  %v4419_v15 = vld [vmem:[#allocation4 + $0x3c8] sm:$0xff] }
 0x632   : > { %4627 = vmatprep.subr.mxu1 %v4483_v32  ;;  %4563 = vmatpush1.msra.mxu0 %v4342_v20  ;;  %v4551_v32 = vld [vmem:[#allocation4 + $0x7e8] sm:$0xff] }
 0x633   : > { %4628 = vmatpush1.msra.mxu1 %v4482_v62  ;;  %4564 = vmatprep.subr.mxu0 %v4339_v12  ;;  %v4550_v62 = vld [vmem:[#allocation4 + $0x7e0] sm:$0xff]  ;;  %v4415_v51 = vld [vmem:[#allocation4 + $0x3a8] sm:$0xff] }
 0x634   : > { %4629 = vmatprep.subr.mxu1 %v4479_v60  ;;  %4565 = vmatpush1.msra.mxu0 %v4338_v56  ;;  %v4547_v60 = vld [vmem:[#allocation4 + $0x7c8] sm:$0xff] }
 0x635   : > { %4630 = vmatpush1.msra.mxu1 %v4478_v30  ;;  %4566 = vmatprep.subr.mxu0 %v4335_v44  ;;  %v4546_v30 = vld [vmem:[#allocation4 + $0x7c0] sm:$0xff] }
 0x636   : > { %4631 = vmatprep.subr.mxu1 %v4475_v6  ;;  %4567 = vmatpush1.msra.mxu0 %v4334_v45  ;;  %v4543_v6 = vld [vmem:[#allocation4 + $0x7a8] sm:$0xff] }
 0x637   : > { %4632 = vmatpush1.msra.mxu1 %v4474_v35  ;;  %4568 = vmatprep.subr.mxu0 %v4331_v31  ;;  %v4411_v45 = vld [vmem:[#allocation4 + $0x388] sm:$0xff]  ;;  %v4410_v31 = vld [vmem:[#allocation4 + $0x380] sm:$0xff] }
 0x638   : > { %4633 = vmatprep.subr.mxu1 %v4471_v16  ;;  %4569 = vmatpush1.msra.mxu0 %v4330_v46  ;;  %v4407_v46 = vld [vmem:[#allocation4 + $0x368] sm:$0xff] }
 0x639   : > { %v4088_v42 = vpop.permute.xlu1 %4087  ;;  %4634 = vmatpush1.msra.mxu1 %v4470_v25  ;;  %4570 = vmatprep.subr.mxu0 %v4327_v50  ;;  %v4406_v50 = vld [vmem:[#allocation4 + $0x360] sm:$0xff] }
 0x63a   : > { %4635 = vmatprep.subr.mxu1 %v4467_v55  ;;  %4571 = vmatpush1.msra.mxu0 %v4326_v21  ;;  %v4403_v21 = vld [vmem:[#allocation4 + $0x348] sm:$0xff] }
 0x63b   : > { %4636 = vmatpush1.msra.mxu1 %v4466_v23  ;;  %4572 = vmatprep.subr.mxu0 %v4323_v18  ;;  %v4402_v18 = vld [vmem:[#allocation4 + $0x340] sm:$0xff] }
 0x63c   : > { %4637 = vmatprep.subr.mxu1 %v4463_v29  ;;  %4573 = vmatpush1.msra.mxu0 %v4322_v14  ;;  %v4542_v29 = vld [vmem:[#allocation4 + $0x7a0] sm:$0xff]  ;;  %v4399_v14 = vld [vmem:[#allocation4 + $0x328] sm:$0xff] }
 0x63d   : > { %4638 = vmatpush1.msra.mxu1 %v4462_v24  ;;  %4574 = vmatprep.subr.mxu0 %v4319_v28  ;;  %v4539_v24 = vld [vmem:[#allocation4 + $0x788] sm:$0xff]  ;;  %v4398_v28 = vld [vmem:[#allocation4 + $0x320] sm:$0xff] }
 0x63e   : > { %4639 = vmatprep.subr.mxu1 %v4459_v47  ;;  %4575 = vmatpush1.msra.mxu0 %v4318_v39  ;;  %v4538_v47 = vld [vmem:[#allocation4 + $0x780] sm:$0xff]  ;;  %v4395_v39 = vld [vmem:[#allocation4 + $0x308] sm:$0xff] }
 0x63f   : > { %4640 = vmatpush1.msra.mxu1 %v4458_v49  ;;  %4576 = vmatprep.subr.mxu0 %v4315_v10  ;;  %v4535_v49 = vld [vmem:[#allocation4 + $0x768] sm:$0xff]  ;;  %v4394_v10 = vld [vmem:[#allocation4 + $0x300] sm:$0xff] }
 0x640   : > { %4641 = vmatprep.subr.mxu1 %v4455_v40  ;;  %4577 = vmatpush1.msra.mxu0 %v4314_v61  ;;  %v4534_v40 = vld [vmem:[#allocation4 + $0x760] sm:$0xff]  ;;  %v4391_v61 = vld [vmem:[#allocation4 + $0x2e8] sm:$0xff] }
 0x641   : > { %4642 = vmatpush1.msra.mxu1 %v4454_v8  ;;  %4578 = vmatprep.subr.mxu0 %v4311_v3  ;;  %v4531_v8 = vld [vmem:[#allocation4 + $0x748] sm:$0xff]  ;;  %v4390_v3 = vld [vmem:[#allocation4 + $0x2e0] sm:$0xff] }
 0x642   : > { %4643 = vmatprep.subr.mxu1 %v4451_v59  ;;  %4579 = vmatpush1.msra.mxu0 %v4310_v11  ;;  %v4530_v59 = vld [vmem:[#allocation4 + $0x740] sm:$0xff]  ;;  %v4387_v11 = vld [vmem:[#allocation4 + $0x2c8] sm:$0xff] }
 0x643   : > { %4644 = vmatpush1.msra.mxu1 %v4450_v36  ;;  %v4527_v36 = vld [vmem:[#allocation4 + $0x728] sm:$0xff] }
 0x644   : > { %4645 = vmatprep.subr.mxu1 %v4447_v41  ;;  %v4526_v41 = vld [vmem:[#allocation4 + $0x720] sm:$0xff] }
 0x645   : > { %4646 = vmatpush1.msra.mxu1 %v4446_v0  ;;  %v4523_v0 = vld [vmem:[#allocation4 + $0x708] sm:$0xff] }
 0x646   : > { %4647 = vmatprep.subr.mxu1 %v4443_v57  ;;  %v4522_v57 = vld [vmem:[#allocation4 + $0x700] sm:$0xff] }
 0x647   : > { %4648 = vmatpush1.msra.mxu1 %v4442_v58  ;;  %v4519_v58 = vld [vmem:[#allocation4 + $0x6e8] sm:$0xff] }
 0x648   : > { %4649 = vmatprep.subr.mxu1 %v4439_v1  ;;  %v4518_v1 = vld [vmem:[#allocation4 + $0x6e0] sm:$0xff] }
 0x6e8   : > { %v4160_v5 = vpop.f32.mrf.mxu0 }
 0x6e9   : > { %v9951_v52 = vadd.f32 %v4160_v5, %v4088_v42  ;;  %v4438_v5 = vld [vmem:[#allocation4 + $0x460] sm:$0xff] }
 0x6ea   : > { %v4162_v7 = vpop.f32.mrf.mxu0  ;;  %4650 = vmatpush1.msra.mxu1 %v4438_v5  ;;  %v4515_v5 = vld [vmem:[#allocation4 + $0x6c8] sm:$0xff] }
 0x6eb   : > { %v9949_v9 = vadd.f32 %v4162_v7, %v4088_v42  ;;  %v4307_v7 = vld [vmem:[#allocation4 + $0x48] sm:$0xff] }
 0x6ec   : > { %4580 = vmatprep.subr.mxu0 %v4307_v7  ;;  %v4386_v7 = vld [vmem:[#allocation4 + $0x2c0] sm:$0xff] }
 0x6ed   : > { %v4236_v53 = vadd.f32 %v9949_v9, %v9951_v52 }
 0x6f0   : > { %v4231_v4 = vpop.f32.mrf.mxu1 }
 0x6f1   : > { %v9955_v27 = vadd.f32 %v4231_v4, %v4088_v42  ;;  %v4306_v4 = vld [vmem:[#allocation4 + $0x40] sm:$0xff] }
 0x6f2   : > { %v4233_v2 = vpop.f32.mrf.mxu1  ;;  %4581 = vmatpush1.msra.mxu0 %v4306_v4  ;;  %v4383_v4 = vld [vmem:[#allocation4 + $0x2a8] sm:$0xff] }
 0x6f3   : > { %v4237_v26 = vadd.f32 %v4236_v53, %v9955_v27  ;;  %v9958_v19 = vadd.f32 %v4233_v2, %v4088_v42  ;;  %v4435_v42 = vld [vmem:[#allocation4 + $0x448] sm:$0xff]  ;;  %v4434_v53 = vld [vmem:[#allocation4 + $0x440] sm:$0xff] }
 0x6f4   : > { %v4303_v2 = vld [vmem:[#allocation4 + $0x28] sm:$0xff]  ;;  %4651 = vmatprep.subr.mxu1 %v4435_v42  ;;  %v4514_v42 = vld [vmem:[#allocation4 + $0x6c0] sm:$0xff] }
 0x6f5   : > { %v4238_v34 = vadd.f32 %v4237_v26, %v9958_v19  ;;  %v4431_v26 = vld [vmem:[#allocation4 + $0x428] sm:$0xff]  ;;  %4652 = vmatpush1.msra.mxu1 %v4434_v53  ;;  %4582 = vmatprep.subr.mxu0 %v4303_v2  ;;  %v4382_v2 = vld [vmem:[#allocation4 + $0x2a0] sm:$0xff] }
 0x6f6   : > { %4653 = vmatprep.subr.mxu1 %v4431_v26  ;;  %v4511_v53 = vld [vmem:[#allocation4 + $0x6a8] sm:$0xff]  ;;  %v4510_v26 = vld [vmem:[#allocation4 + $0x6a0] sm:$0xff] }
 0x6f7   : > { %4239 = vadd.xlane.f32.xlu0 %v4238_v34  ;;  %v4302_v34 = vld [vmem:[#allocation4 + $0x20] sm:$0xff] }
 0x6f8   : > { %4583 = vmatpush1.msra.mxu0 %v4302_v34  ;;  %v4379_v34 = vld [vmem:[#allocation4 + $0x288] sm:$0xff] }
 0x6f9   : > { %4584 = vmatprep.subr.mxu0 %v4299_v63  ;;  %v4378_v63 = vld [vmem:[#allocation4 + $0x280] sm:$0xff] }
 0x6fa   : > { %4585 = vmatpush1.msra.mxu0 %v4298_v22  ;;  %v4375_v22 = vld [vmem:[#allocation4 + $0x268] sm:$0xff] }
 0x6fb   : > { %4586 = vmatprep.subr.mxu0 %v4423_v54  ;;  %v4374_v54 = vld [vmem:[#allocation4 + $0x260] sm:$0xff] }
 0x6fc   : > { %4587 = vmatpush2.msra.mxu0 %v4422_v33  ;;  %v4371_v33 = vld [vmem:[#allocation4 + $0x248] sm:$0xff] }
 0x6fd   : > { %4588 = vmatprep.subr.mxu0 %v4419_v15  ;;  %v4370_v15 = vld [vmem:[#allocation4 + $0x240] sm:$0xff] }
 0x6fe   : > { %4589 = vmatpush2.msra.mxu0 %v4418_v38  ;;  %v4367_v38 = vld [vmem:[#allocation4 + $0x228] sm:$0xff] }
 0x6ff   : > { %4590 = vmatprep.subr.mxu0 %v4415_v51  ;;  %v4366_v51 = vld [vmem:[#allocation4 + $0x220] sm:$0xff] }
 0x70d   : > { %4265 = vperm.xlu0 %6594, %v4262_v17   ;;  %v4430_v17 = vld [vmem:[#allocation4 + $0x420] sm:$0xff] }
 0x70e   : > { %4654 = vmatpush1.msra.mxu1 %v4430_v17  ;;  %v4507_v17 = vld [vmem:[#allocation4 + $0x688] sm:$0xff] }
 0x70f   : > { %4655 = vmatprep.subr.mxu1 %v4427_v37  ;;  %v4506_v37 = vld [vmem:[#allocation4 + $0x680] sm:$0xff] }
 0x710   : > { %4656 = vmatpush1.msra.mxu1 %v4426_v43  ;;  %v4503_v43 = vld [vmem:[#allocation4 + $0x668] sm:$0xff] }
 0x711   : > { %4657 = vmatprep.subr.mxu1 %v4551_v32  ;;  %v4502_v32 = vld [vmem:[#allocation4 + $0x660] sm:$0xff] }
 0x712   : > { %4658 = vmatpush2.msra.mxu1 %v4550_v62  ;;  %v4499_v62 = vld [vmem:[#allocation4 + $0x648] sm:$0xff] }
 0x713   : > { %4659 = vmatprep.subr.mxu1 %v4547_v60  ;;  %v4498_v60 = vld [vmem:[#allocation4 + $0x640] sm:$0xff] }
 0x714   : > { %4660 = vmatpush2.msra.mxu1 %v4546_v30  ;;  %v4495_v30 = vld [vmem:[#allocation4 + $0x628] sm:$0xff] }
 0x715   : > { %4661 = vmatprep.subr.mxu1 %v4543_v6  ;;  %v4494_v6 = vld [vmem:[#allocation4 + $0x620] sm:$0xff] }
 0x716   : > { %4662 = vmatpush2.msra.mxu1 %v4542_v29 }
 0x717   : > { %4663 = vmatprep.subr.mxu1 %v4539_v24 }
 0x718   : > { %4664 = vmatpush2.msra.mxu1 %v4538_v47 }
 0x719   : > { %4665 = vmatprep.subr.mxu1 %v4535_v49 }
 0x71a   : > { %4666 = vmatpush2.msra.mxu1 %v4534_v40 }
 0x71b   : > { %4667 = vmatprep.subr.mxu1 %v4531_v8 }
 0x71c   : > { %4668 = vmatpush2.msra.mxu1 %v4530_v59 }
 0x71d   : > { %4669 = vmatprep.subr.mxu1 %v4527_v36 }
 0x71e   : > { %4670 = vmatpush2.msra.mxu1 %v4526_v41  ;;  %v4488_v41 = vld [vmem:[#allocation4 + $0x5f0] sm:$0xff] }
 0x71f   : > { %4671 = vmatprep.subr.mxu1 %v4523_v0 }
 0x720   : > { %4672 = vmatpush2.msra.mxu1 %v4522_v57  ;;  %v4485_v57 = vld [vmem:[#allocation4 + $0x5d8] sm:$0xff] }
 0x721   : > { %4673 = vmatprep.subr.mxu1 %v4519_v58  ;;  %v4484_v58 = vld [vmem:[#allocation4 + $0x5d0] sm:$0xff] }
 0x722   : > { %4674 = vmatpush2.msra.mxu1 %v4518_v1  ;;  %v4481_v1 = vld [vmem:[#allocation4 + $0x5b8] sm:$0xff] }
 0x723   : > { %4675 = vmatprep.subr.mxu1 %v4515_v5  ;;  %v4480_v5 = vld [vmem:[#allocation4 + $0x5b0] sm:$0xff] }
 0x724   : > { %4676 = vmatpush2.msra.mxu1 %v4514_v42  ;;  %v4477_v42 = vld [vmem:[#allocation4 + $0x598] sm:$0xff] }
 0x725   : > { %4677 = vmatprep.subr.mxu1 %v4511_v53  ;;  %v4476_v53 = vld [vmem:[#allocation4 + $0x590] sm:$0xff] }
 0x726   : > { %4678 = vmatpush2.msra.mxu1 %v4510_v26  ;;  %v4473_v26 = vld [vmem:[#allocation4 + $0x578] sm:$0xff] }
 0x727   : > { %4679 = vmatprep.subr.mxu1 %v4507_v17  ;;  %v4472_v17 = vld [vmem:[#allocation4 + $0x570] sm:$0xff] }
 0x728   : > { %4680 = vmatpush2.msra.mxu1 %v4506_v37  ;;  %v4469_v37 = vld [vmem:[#allocation4 + $0x558] sm:$0xff] }
 0x729   : > { %4681 = vmatprep.subr.mxu1 %v4503_v43  ;;  %v4468_v43 = vld [vmem:[#allocation4 + $0x550] sm:$0xff] }
 0x72a   : > { %4682 = vmatpush2.msra.mxu1 %v4502_v32  ;;  %v4465_v32 = vld [vmem:[#allocation4 + $0x538] sm:$0xff] }
 0x72b   : > { %4683 = vmatprep.subr.mxu1 %v4499_v62  ;;  %v4464_v62 = vld [vmem:[#allocation4 + $0x530] sm:$0xff] }
 0x72c   : > { %4684 = vmatpush2.msra.mxu1 %v4498_v60  ;;  %v4461_v60 = vld [vmem:[#allocation4 + $0x518] sm:$0xff] }
 0x72d   : > { %4685 = vmatprep.subr.mxu1 %v4495_v30  ;;  %v4460_v30 = vld [vmem:[#allocation4 + $0x510] sm:$0xff] }
 0x72e   : > { %4686 = vmatpush2.msra.mxu1 %v4494_v6  ;;  %v4457_v6 = vld [vmem:[#allocation4 + $0x4f8] sm:$0xff] }
 0x780   : > { %v4240_v48 = vpop.xlane.xlu0 %4239 }
 0x781   : > { %v4241_v35 = vmul.f32 0.001953125, %v4240_v48  ;;  %v4363_v48 = vld [vmem:[#allocation4 + $0x208] sm:$0xff] }
 0x783   : > { %v9965_v13 = vsub.f32 %v9951_v52, %v4241_v35  ;;  %v9968_v16 = vsub.f32 %v9949_v9, %v4241_v35  ;;  %v9971_v20 = vsub.f32 %v9955_v27, %v4241_v35  ;;  %v9974_v25 = vsub.f32 %v9958_v19, %v4241_v35  ;;  %v4272_v27 = vld [vmem:[%s10619_s8] sm:$0xff]  ;;  %v4491_v35 = vld [vmem:[#allocation4 + $0x608] sm:$0xff] }
 0x784   : > { %v4414_v19 = vld [vmem:[#allocation4 + $0x3a0] sm:$0xff]  ;;  %4687 = vmatprep.subr.mxu1 %v4491_v35  ;;  %v4456_v35 = vld [vmem:[#allocation4 + $0x4f0] sm:$0xff] }
 0x785   : > { %v4246_v12 = vmul.f32 %v9965_v13, %v9965_v13  ;;  %v4247_v55 = vmul.f32 %v9968_v16, %v9968_v16  ;;  %v4248_v56 = vmul.f32 %v9971_v20, %v9971_v20  ;;  %v4249_v9 = vmul.f32 %v9974_v25, %v9974_v25  ;;  %4591 = vmatpush2.msra.mxu0 %v4414_v19 }
 0x786   : > { %4592 = vmatprep.subr.mxu0 %v4411_v45 }
 0x787   : > { %v4250_v52 = vadd.f32 %v4247_v55, %v4246_v12  ;;  %4593 = vmatpush2.msra.mxu0 %v4410_v31  ;;  %v4362_v12 = vld [vmem:[#allocation4 + $0x200] sm:$0xff] }
 0x788   : > { %4594 = vmatprep.subr.mxu0 %v4407_v46  ;;  %v4490_v55 = vld [vmem:[#allocation4 + $0x600] sm:$0xff]  ;;  %v4266_v31 = vpop.permute.xlu0 %4265 }
 0x789   : > { %v4251_v23 = vadd.f32 %v4250_v52, %v4248_v56  ;;  %4595 = vmatpush2.msra.mxu0 %v4406_v50  ;;  %v4361_v56 = vld [vmem:[#allocation4 + $0x1f8] sm:$0xff]  ;;  %4688 = vmatpush2.msra.mxu1 %v4490_v55 }
 0x78a   : > { %4596 = vmatprep.subr.mxu0 %v4403_v21  ;;  %v4489_v52 = vld [vmem:[#allocation4 + $0x5f8] sm:$0xff] }
 0x78b   : > { %v4252_v44 = vadd.f32 %v4251_v23, %v4249_v9  ;;  %4597 = vmatpush2.msra.mxu0 %v4402_v18  ;;  %4767 = vmatprep.subr.mxu1 %v4489_v52  ;;  %v4453_v55 = vld [vmem:[#allocation4 + $0x4d8] sm:$0xff]  ;;  %v4452_v52 = vld [vmem:[#allocation4 + $0x4d0] sm:$0xff] }
 0x78c   : > { %4598 = vmatprep.subr.mxu0 %v4399_v14 }
 0x78d   : > { %4253 = vadd.xlane.f32.xlu1 %v4252_v44  ;;  %4599 = vmatpush2.msra.mxu0 %v4398_v28  ;;  %v4360_v28 = vld [vmem:[#allocation4 + $0x1f0] sm:$0xff] }
 0x78e   : > { %4600 = vmatprep.subr.mxu0 %v4395_v39 }
 0x78f   : > { %4601 = vmatpush2.msra.mxu0 %v4394_v10  ;;  %v4357_v10 = vld [vmem:[#allocation4 + $0x1d8] sm:$0xff] }
 0x790   : > { %4602 = vmatprep.subr.mxu0 %v4391_v61  ;;  %v4356_v61 = vld [vmem:[#allocation4 + $0x1d0] sm:$0xff] }
 0x791   : > { %4603 = vmatpush2.msra.mxu0 %v4390_v3  ;;  %v4353_v3 = vld [vmem:[#allocation4 + $0x1b8] sm:$0xff] }
 0x792   : > { %4604 = vmatprep.subr.mxu0 %v4387_v11  ;;  %v4352_v11 = vld [vmem:[#allocation4 + $0x1b0] sm:$0xff] }
 0x793   : > { %4605 = vmatpush2.msra.mxu0 %v4386_v7  ;;  %v4349_v7 = vld [vmem:[#allocation4 + $0x198] sm:$0xff] }
 0x794   : > { %4606 = vmatprep.subr.mxu0 %v4383_v4  ;;  %v4348_v4 = vld [vmem:[#allocation4 + $0x190] sm:$0xff] }
 0x795   : > { %4607 = vmatpush2.msra.mxu0 %v4382_v2  ;;  %v4345_v2 = vld [vmem:[#allocation4 + $0x178] sm:$0xff] }
 0x796   : > { %4608 = vmatprep.subr.mxu0 %v4379_v34  ;;  %v4344_v34 = vld [vmem:[#allocation4 + $0x170] sm:$0xff] }
 0x797   : > { %4609 = vmatpush2.msra.mxu0 %v4378_v63  ;;  %v4341_v63 = vld [vmem:[#allocation4 + $0x158] sm:$0xff] }
 0x798   : > { %4610 = vmatprep.subr.mxu0 %v4375_v22  ;;  %v4340_v22 = vld [vmem:[#allocation4 + $0x150] sm:$0xff] }
 0x799   : > { %4611 = vmatpush2.msra.mxu0 %v4374_v54  ;;  %v4337_v54 = vld [vmem:[#allocation4 + $0x138] sm:$0xff] }
 0x79a   : > { %4612 = vmatprep.subr.mxu0 %v4371_v33  ;;  %v4336_v33 = vld [vmem:[#allocation4 + $0x130] sm:$0xff] }
 0x79b   : > { %4613 = vmatpush2.msra.mxu0 %v4370_v15  ;;  %v4333_v15 = vld [vmem:[#allocation4 + $0x118] sm:$0xff] }
 0x79c   : > { %4614 = vmatprep.subr.mxu0 %v4367_v38  ;;  %v4332_v38 = vld [vmem:[#allocation4 + $0x110] sm:$0xff] }
 0x79d   : > { %4615 = vmatpush2.msra.mxu0 %v4366_v51  ;;  %v4329_v51 = vld [vmem:[#allocation4 + $0xf8] sm:$0xff] }
 0x79e   : > { %4275 = vperm.xlu1 %6593, %v4272_v27   ;;  %4616 = vmatprep.subr.mxu0 %v4363_v48  ;;  %v4328_v48 = vld [vmem:[#allocation4 + $0xf0] sm:$0xff] }
 0x79f   : > { %4617 = vmatpush2.msra.mxu0 %v4362_v12  ;;  %v4325_v12 = vld [vmem:[#allocation4 + $0xd8] sm:$0xff] }
 0x7a0   : > { %4696 = vmatprep.subr.mxu0 %v4361_v56  ;;  %v4324_v56 = vld [vmem:[#allocation4 + $0xd0] sm:$0xff] }
 0x816   : > { %v4254_v9 = vpop.xlane.xlu1 %4253 }
 0x817   : > { %v4255_v23 = vmul.f32 0.001953125, %v4254_v9  ;;  %v4321_v9 = vld [vmem:[#allocation4 + $0xb8] sm:$0xff] }
 0x819   : > { %v4256_v44 = vadd.f32 1e-05, %v4255_v23  ;;  %v4449_v23 = vld [vmem:[#allocation4 + $0x4b8] sm:$0xff] }
 0x81a   : > { %v4276_v40 = vpop.permute.xlu1 %4275 }
 0x81b   : > { %6599 = vrsqrt.f32 %v4256_v44  ;;  %v4320_v44 = vld [vmem:[#allocation4 + $0xb0] sm:$0xff] }
 0x828   : > { %v6600_v27 = vpop.eup %6599 }
 0x829   : > { %v4259_v19 = vmul.f32 %v6600_v27, %v9968_v16  ;;  %v4261_v29 = vmul.f32 %v6600_v27, %v9974_v25  ;;  %v4258_v45 = vmul.f32 %v6600_v27, %v9965_v13  ;;  %v4260_v24 = vmul.f32 %v6600_v27, %v9971_v20  ;;  %v4448_v27 = vld [vmem:[#allocation4 + $0x4b0] sm:$0xff] }
 0x82b   : > { %v4269_v47 = vmul.f32 %v4266_v31, %v4259_v19  ;;  %v4271_v46 = vmul.f32 %v4266_v31, %v4261_v29  ;;  %v4268_v49 = vmul.f32 %v4266_v31, %v4258_v45  ;;  %v4270_v50 = vmul.f32 %v4266_v31, %v4260_v24  ;;  %v4317_v19 = vld [vmem:[#allocation4 + $0x98] sm:$0xff]  ;;  %v4316_v45 = vld [vmem:[#allocation4 + $0x90] sm:$0xff] }
 0x82c   : > { %v4445_v29 = vld [vmem:[#allocation4 + $0x498] sm:$0xff]  ;;  %v4444_v24 = vld [vmem:[#allocation4 + $0x490] sm:$0xff] }
 0x82d   : > { %v4279_v21 = vadd.f32 %v4276_v40, %v4269_v47  ;;  %v4281_v8 = vadd.f32 %v4276_v40, %v4271_v46  ;;  %v4278_v18 = vadd.f32 %v4276_v40, %v4268_v49  ;;  %v4280_v59 = vadd.f32 %v4276_v40, %v4270_v50  ;;  %v4313_v31 = vld [vmem:[#allocation4 + $0x78] sm:$0xff]  ;;  %v4312_v46 = vld [vmem:[#allocation4 + $0x70] sm:$0xff] }
 0x82e   : > { %v4441_v47 = vld [vmem:[#allocation4 + $0x478] sm:$0xff]  ;;  %v4440_v49 = vld [vmem:[#allocation4 + $0x470] sm:$0xff] }
 0x82f   : > { %vm4283_vm1 = vcmp.ge.f32.partialorder %v4279_v21, 0.0  ;;  %v4287_v16 = vmul.f32 0.01, %v4279_v21  ;;  %vm4285_vm9 = vcmp.ge.f32.partialorder %v4281_v8, 0.0  ;;  %v4289_v13 = vmul.f32 0.01, %v4281_v8 }
 0x830   : > { %vm4282_vm10 = vcmp.ge.f32.partialorder %v4278_v18, 0.0  ;;  %v4286_v20 = vmul.f32 0.01, %v4278_v18  ;;  %vm4284_vm14 = vcmp.ge.f32.partialorder %v4280_v59, 0.0  ;;  %v4288_v25 = vmul.f32 0.01, %v4280_v59 }
 0x831   : > { %v4291_v14 = vsel %vm4283_vm1, %v4279_v21, %v4287_v16  ;;  %v4293_v36 = vsel %vm4285_vm9, %v4281_v8, %v4289_v13  ;;  %v4309_v50 = vld [vmem:[#allocation4 + $0x58] sm:$0xff]  ;;  %v4308_v21 = vld [vmem:[#allocation4 + $0x50] sm:$0xff] }
 0x832   : > { %4295 = vst [vmem:[%s605_s30 + $0x8] sm:$0xff] %v4291_v14  ;;  %4618 = vmatprep.mubr.f32.mxu0 %v4291_v14  ;;  %4297 = vst [vmem:[%s605_s30 + $0x18] sm:$0xff] %v4293_v36  ;;  %4689 = vmatprep.mubr.f32.mxu1 %v4293_v36  ;;  %v9995_v39 = vsel %vm4282_vm10, %v4278_v18, %v4286_v20  ;;  %v9997_v0 = vsel %vm4284_vm14, %v4280_v59, %v4288_v25  ;;  %v4437_v40 = vld [vmem:[#allocation4 + $0x458] sm:$0xff]  ;;  %v4436_v8 = vld [vmem:[#allocation4 + $0x450] sm:$0xff] }
 0x833   : > { %4294 = vst [vmem:[%s605_s30] sm:$0xff] %v9995_v39  ;;  %4619 = vmatmul.mubr.f32.vlgmr.msra.gmra.mxu0 %v9995_v39  ;;  %4296 = vst [vmem:[%s605_s30 + $0x10] sm:$0xff] %v9997_v0  ;;  %4690 = vmatmul.mubr.f32.vlgmr.msra.gmra.mxu1 %v9997_v0  ;;  %v4305_v18 = vld [vmem:[#allocation4 + $0x38] sm:$0xff]  ;;  %v4304_v16 = vld [vmem:[#allocation4 + $0x30] sm:$0xff]  ;;  %s6688_s30 = smov 24  }
 0x834   : > { %4697 = vmatpush1.msra.mxu0 %v4360_v28  ;;  %4768 = vmatpush1.msra.mxu1 %v4488_v41  ;;  %v4433_v59 = vld [vmem:[#allocation4 + $0x438] sm:$0xff]  ;;  %v4432_v13 = vld [vmem:[#allocation4 + $0x430] sm:$0xff] }
 0x835   : > { %4698 = vmatprep.subr.mxu0 %v4357_v10  ;;  %4760 = vmatprep.mubr.f32.mxu0 %v4291_v14  ;;  %v4301_v20 = vld [vmem:[#allocation4 + $0x18] sm:$0xff]  ;;  %v4300_v14 = vld [vmem:[#allocation4 + $0x10] sm:$0xff] }
 0x836   : > { %4769 = vmatprep.subr.mxu1 %v4485_v57  ;;  %4831 = vmatprep.mubr.f32.mxu1 %v4293_v36  ;;  %v4429_v25 = vld [vmem:[#allocation4 + $0x418] sm:$0xff]  ;;  %v4428_v36 = vld [vmem:[#allocation4 + $0x410] sm:$0xff] }
 0x837   : > { %4699 = vmatpush1.msra.mxu0 %v4356_v61  ;;  %4770 = vmatpush1.msra.mxu1 %v4484_v58  ;;  %v4425_v28 = vld [vmem:[#allocation4 + $0x3f8] sm:$0xff]  ;;  %v4424_v10 = vld [vmem:[#allocation4 + $0x3f0] sm:$0xff] }
 0x838   : > { %4700 = vmatprep.subr.mxu0 %v4353_v3  ;;  %4771 = vmatprep.subr.mxu1 %v4481_v1  ;;  %v4553_v41 = vld [vmem:[#allocation4 + $0x7f8] sm:$0xff]  ;;  %v4552_v57 = vld [vmem:[#allocation4 + $0x7f0] sm:$0xff] }
 0x839   : > { %4701 = vmatpush1.msra.mxu0 %v4352_v11  ;;  %4772 = vmatpush1.msra.mxu1 %v4480_v5  ;;  %v4421_v61 = vld [vmem:[#allocation4 + $0x3d8] sm:$0xff]  ;;  %v4420_v3 = vld [vmem:[#allocation4 + $0x3d0] sm:$0xff] }
 0x83a   : > { %4702 = vmatprep.subr.mxu0 %v4349_v7  ;;  %4773 = vmatprep.subr.mxu1 %v4477_v42  ;;  %v4549_v58 = vld [vmem:[#allocation4 + $0x7d8] sm:$0xff]  ;;  %v4548_v1 = vld [vmem:[#allocation4 + $0x7d0] sm:$0xff] }
 0x83b   : > { %4703 = vmatpush1.msra.mxu0 %v4348_v4  ;;  %4774 = vmatpush1.msra.mxu1 %v4476_v53  ;;  %v4417_v11 = vld [vmem:[#allocation4 + $0x3b8] sm:$0xff]  ;;  %v4416_v7 = vld [vmem:[#allocation4 + $0x3b0] sm:$0xff] }
 0x83c   : > { %4704 = vmatprep.subr.mxu0 %v4345_v2  ;;  %4775 = vmatprep.subr.mxu1 %v4473_v26  ;;  %v4545_v5 = vld [vmem:[#allocation4 + $0x7b8] sm:$0xff]  ;;  %v4544_v42 = vld [vmem:[#allocation4 + $0x7b0] sm:$0xff] }
 0x83d   : > { %4705 = vmatpush1.msra.mxu0 %v4344_v34  ;;  %4776 = vmatpush1.msra.mxu1 %v4472_v17  ;;  %v4413_v4 = vld [vmem:[#allocation4 + $0x398] sm:$0xff]  ;;  %v4412_v2 = vld [vmem:[#allocation4 + $0x390] sm:$0xff] }
 0x83e   : > { %4706 = vmatprep.subr.mxu0 %v4341_v63  ;;  %4777 = vmatprep.subr.mxu1 %v4469_v37  ;;  %v4541_v53 = vld [vmem:[#allocation4 + $0x798] sm:$0xff]  ;;  %v4540_v26 = vld [vmem:[#allocation4 + $0x790] sm:$0xff] }
 0x83f   : > { %4707 = vmatpush1.msra.mxu0 %v4340_v22  ;;  %4778 = vmatpush1.msra.mxu1 %v4468_v43  ;;  %v4409_v34 = vld [vmem:[#allocation4 + $0x378] sm:$0xff]  ;;  %v4408_v63 = vld [vmem:[#allocation4 + $0x370] sm:$0xff] }
 0x840   : > { %4708 = vmatprep.subr.mxu0 %v4337_v54  ;;  %4779 = vmatprep.subr.mxu1 %v4465_v32  ;;  %v4537_v17 = vld [vmem:[#allocation4 + $0x778] sm:$0xff]  ;;  %v4536_v37 = vld [vmem:[#allocation4 + $0x770] sm:$0xff] }
 0x841   : > { %4709 = vmatpush1.msra.mxu0 %v4336_v33  ;;  %4780 = vmatpush1.msra.mxu1 %v4464_v62  ;;  %v4405_v22 = vld [vmem:[#allocation4 + $0x358] sm:$0xff]  ;;  %v4404_v54 = vld [vmem:[#allocation4 + $0x350] sm:$0xff] }
 0x842   : > { %4710 = vmatprep.subr.mxu0 %v4333_v15  ;;  %4781 = vmatprep.subr.mxu1 %v4461_v60  ;;  %v4533_v43 = vld [vmem:[#allocation4 + $0x758] sm:$0xff]  ;;  %v4532_v32 = vld [vmem:[#allocation4 + $0x750] sm:$0xff] }
 0x843   : > { %4711 = vmatpush1.msra.mxu0 %v4332_v38  ;;  %4782 = vmatpush1.msra.mxu1 %v4460_v30  ;;  %v4401_v33 = vld [vmem:[#allocation4 + $0x338] sm:$0xff]  ;;  %v4400_v15 = vld [vmem:[#allocation4 + $0x330] sm:$0xff] }
 0x844   : > { %4712 = vmatprep.subr.mxu0 %v4329_v51  ;;  %4783 = vmatprep.subr.mxu1 %v4457_v6  ;;  %v4529_v62 = vld [vmem:[#allocation4 + $0x738] sm:$0xff]  ;;  %v4528_v60 = vld [vmem:[#allocation4 + $0x730] sm:$0xff] }
 0x845   : > { %4713 = vmatpush1.msra.mxu0 %v4328_v48  ;;  %4784 = vmatpush1.msra.mxu1 %v4456_v35  ;;  %v4397_v38 = vld [vmem:[#allocation4 + $0x318] sm:$0xff]  ;;  %v4396_v51 = vld [vmem:[#allocation4 + $0x310] sm:$0xff] }
 0x846   : > { %4714 = vmatprep.subr.mxu0 %v4325_v12  ;;  %4785 = vmatprep.subr.mxu1 %v4453_v55  ;;  %v4525_v30 = vld [vmem:[#allocation4 + $0x718] sm:$0xff]  ;;  %v4524_v6 = vld [vmem:[#allocation4 + $0x710] sm:$0xff] }
 0x847   : > { %4715 = vmatpush1.msra.mxu0 %v4324_v56  ;;  %4786 = vmatpush1.msra.mxu1 %v4452_v52  ;;  %v4393_v48 = vld [vmem:[#allocation4 + $0x2f8] sm:$0xff]  ;;  %v4392_v12 = vld [vmem:[#allocation4 + $0x2f0] sm:$0xff] }
 0x848   : > { %4716 = vmatprep.subr.mxu0 %v4321_v9  ;;  %4787 = vmatprep.subr.mxu1 %v4449_v23  ;;  %v4521_v35 = vld [vmem:[#allocation4 + $0x6f8] sm:$0xff]  ;;  %v4520_v55 = vld [vmem:[#allocation4 + $0x6f0] sm:$0xff] }
 0x849   : > { %4717 = vmatpush1.msra.mxu0 %v4320_v44  ;;  %4788 = vmatpush1.msra.mxu1 %v4448_v27  ;;  %v4389_v56 = vld [vmem:[#allocation4 + $0x2d8] sm:$0xff]  ;;  %v4388_v9 = vld [vmem:[#allocation4 + $0x2d0] sm:$0xff] }
 0x84a   : > { %4718 = vmatprep.subr.mxu0 %v4317_v19  ;;  %4789 = vmatprep.subr.mxu1 %v4445_v29  ;;  %v4517_v52 = vld [vmem:[#allocation4 + $0x6d8] sm:$0xff]  ;;  %v4516_v23 = vld [vmem:[#allocation4 + $0x6d0] sm:$0xff] }
 0x84b   : > { %4719 = vmatpush1.msra.mxu0 %v4316_v45  ;;  %4790 = vmatpush1.msra.mxu1 %v4444_v24  ;;  %v4385_v44 = vld [vmem:[#allocation4 + $0x2b8] sm:$0xff]  ;;  %v4384_v19 = vld [vmem:[#allocation4 + $0x2b0] sm:$0xff] }
 0x84c   : > { %4720 = vmatprep.subr.mxu0 %v4313_v31  ;;  %4791 = vmatprep.subr.mxu1 %v4441_v47  ;;  %v4513_v27 = vld [vmem:[#allocation4 + $0x6b8] sm:$0xff]  ;;  %v4512_v29 = vld [vmem:[#allocation4 + $0x6b0] sm:$0xff] }
 0x84d   : > { %4721 = vmatpush1.msra.mxu0 %v4312_v46  ;;  %4792 = vmatpush1.msra.mxu1 %v4440_v49  ;;  %v4381_v45 = vld [vmem:[#allocation4 + $0x298] sm:$0xff]  ;;  %v4380_v31 = vld [vmem:[#allocation4 + $0x290] sm:$0xff] }
 0x84e   : > { %4722 = vmatprep.subr.mxu0 %v4309_v50  ;;  %4793 = vmatprep.subr.mxu1 %v4437_v40  ;;  %v4509_v24 = vld [vmem:[#allocation4 + $0x698] sm:$0xff]  ;;  %v4508_v47 = vld [vmem:[#allocation4 + $0x690] sm:$0xff] }
 0x84f   : > { %4723 = vmatpush1.msra.mxu0 %v4308_v21  ;;  %4794 = vmatpush1.msra.mxu1 %v4436_v8  ;;  %v4377_v46 = vld [vmem:[#allocation4 + $0x278] sm:$0xff]  ;;  %v4376_v50 = vld [vmem:[#allocation4 + $0x270] sm:$0xff] }
 0x850   : > { %4724 = vmatprep.subr.mxu0 %v4305_v18  ;;  %4795 = vmatprep.subr.mxu1 %v4433_v59  ;;  %v4505_v49 = vld [vmem:[#allocation4 + $0x678] sm:$0xff]  ;;  %v4504_v40 = vld [vmem:[#allocation4 + $0x670] sm:$0xff] }
 0x851   : > { %4725 = vmatpush1.msra.mxu0 %v4304_v16  ;;  %4796 = vmatpush1.msra.mxu1 %v4432_v13  ;;  %v4373_v21 = vld [vmem:[#allocation4 + $0x258] sm:$0xff]  ;;  %v4372_v18 = vld [vmem:[#allocation4 + $0x250] sm:$0xff] }
 0x852   : > { %4726 = vmatprep.subr.mxu0 %v4301_v20  ;;  %4797 = vmatprep.subr.mxu1 %v4429_v25  ;;  %v4501_v8 = vld [vmem:[#allocation4 + $0x658] sm:$0xff]  ;;  %v4500_v59 = vld [vmem:[#allocation4 + $0x650] sm:$0xff] }
 0x853   : > { %4727 = vmatpush1.msra.mxu0 %v4300_v14  ;;  %4798 = vmatpush1.msra.mxu1 %v4428_v36  ;;  %v4369_v16 = vld [vmem:[#allocation4 + $0x238] sm:$0xff]  ;;  %v4368_v20 = vld [vmem:[#allocation4 + $0x230] sm:$0xff] }
 0x854   : > { %4728 = vmatprep.subr.mxu0 %v4425_v28  ;;  %4799 = vmatprep.subr.mxu1 %v4553_v41  ;;  %v4497_v13 = vld [vmem:[#allocation4 + $0x638] sm:$0xff]  ;;  %v4496_v25 = vld [vmem:[#allocation4 + $0x630] sm:$0xff] }
 0x855   : > { %4729 = vmatpush2.msra.mxu0 %v4424_v10  ;;  %4800 = vmatpush2.msra.mxu1 %v4552_v57  ;;  %v4365_v14 = vld [vmem:[#allocation4 + $0x218] sm:$0xff]  ;;  %v4364_v28 = vld [vmem:[#allocation4 + $0x210] sm:$0xff]  ;;  %v11429_v10 = vmov 0.0  }
 0x856   : > { %4730 = vmatprep.subr.mxu0 %v4421_v61  ;;  %4801 = vmatprep.subr.mxu1 %v4549_v58  ;;  %v4493_v36 = vld [vmem:[#allocation4 + $0x618] sm:$0xff]  ;;  %v4492_v41 = vld [vmem:[#allocation4 + $0x610] sm:$0xff] }
 0x857   : > { %4731 = vmatpush2.msra.mxu0 %v4420_v3  ;;  %4802 = vmatpush2.msra.mxu1 %v4548_v1 }
 0x858   : > { %4732 = vmatprep.subr.mxu0 %v4417_v11  ;;  %4803 = vmatprep.subr.mxu1 %v4545_v5 }
 0x859   : > { %4733 = vmatpush2.msra.mxu0 %v4416_v7  ;;  %4804 = vmatpush2.msra.mxu1 %v4544_v42 }
 0x85a   : > { %4734 = vmatprep.subr.mxu0 %v4413_v4  ;;  %4805 = vmatprep.subr.mxu1 %v4541_v53 }
 0x85b   : > { %4735 = vmatpush2.msra.mxu0 %v4412_v2  ;;  %4806 = vmatpush2.msra.mxu1 %v4540_v26  ;;  %v4873_v2 = vld [vmem:[%s10622_s11 + $0x8] sm:$0xff]  ;;  %v4862_v26 = vld [vmem:[%s10621_s10] sm:$0xff] }
 0x85c   : > { %4736 = vmatprep.subr.mxu0 %v4409_v34  ;;  %4807 = vmatprep.subr.mxu1 %v4537_v17  ;;  %v11430_v34 = vld [vmem:[#allocation8_spill] sm:$0xff] }
 0x85d   : > { %4737 = vmatpush2.msra.mxu0 %v4408_v63  ;;  %4808 = vmatpush2.msra.mxu1 %v4536_v37  ;;  %v4979_v17 = vand.u32 3, %v11430_v34  ;;  %v4980_v63 = vshra.s32 %v11430_v34, 2  ;;  %v4982_v37 = vshra.s32 %v11430_v34, 4 }
 0x85e   : > { %4738 = vmatprep.subr.mxu0 %v4405_v22  ;;  %4809 = vmatprep.subr.mxu1 %v4533_v43 }
 0x85f   : > { %4739 = vmatpush2.msra.mxu0 %v4404_v54  ;;  %4810 = vmatpush2.msra.mxu1 %v4532_v32  ;;  %v4981_v22 = vand.u32 3, %v4980_v63  ;;  %v4990_v43 = vadd.s32 1, %v4982_v37  ;;  %v10027_v54 = vadd.s32 1, %v4979_v17  ;;  %vm4987_vm13 = vcmp.ge.s32.totalorder %v4982_v37, 0 }
 0x860   : > { %4740 = vmatprep.subr.mxu0 %v4401_v33  ;;  %4811 = vmatprep.subr.mxu1 %v4529_v62  ;;  %vm4988_vm8 = vcmp.le.s32.totalorder %v4982_v37, 3  ;;  %v10029_v32 = vadd.s32 4294967295, %v4979_v17 }
 0x861   : > { %4741 = vmatpush2.msra.mxu0 %v4400_v15  ;;  %4812 = vmatpush2.msra.mxu1 %v4528_v60  ;;  %vm4991_vm5 = vcmp.ge.s32.totalorder %v4990_v43, 0  ;;  %vm4992_vm3 = vcmp.le.s32.totalorder %v4990_v43, 3  ;;  %vm4998_vm15 = vcmp.ge.s32.totalorder %v4981_v22, 0  ;;  %vm4999_vm12 = vcmp.le.s32.totalorder %v4981_v22, 3  ;;  %vm10031_vm0 = vmand %vm4987_vm13, %vm4988_vm8 }
 0x862   : > { %4742 = vmatprep.subr.mxu0 %v4397_v38  ;;  %4813 = vmatprep.subr.mxu1 %v4525_v30  ;;  %vm10035_vm11 = vmand %vm4991_vm5, %vm4992_vm3  ;;  %vm5014_vm6 = vcmp.le.s32.totalorder %v10027_v54, 3  ;;  %v5001_v15 = vadd.s32 1, %v4981_v22  ;;  %v4983_v60 = vadd.s32 4294967295, %v4982_v37  ;;  %vm5006_vm13 = vcmp.ge.s32.totalorder %v10029_v32, 0 }
 0x863   : > { %4743 = vmatpush2.msra.mxu0 %v4396_v51  ;;  %4814 = vmatpush2.msra.mxu1 %v4524_v6  ;;  %vm10040_vm4 = vmand %vm4998_vm15, %vm4999_vm12 }
 0x864   : > { %4744 = vmatprep.subr.mxu0 %v4393_v48  ;;  %4815 = vmatprep.subr.mxu1 %v4521_v35  ;;  %vm10048_vm1 = vmand %vm10035_vm11, %vm10040_vm4  ;;  %vm5002_vm9 = vcmp.ge.s32.totalorder %v5001_v15, 0  ;;  %vm5003_vm10 = vcmp.le.s32.totalorder %v5001_v15, 3  ;;  %vm4984_vm5 = vcmp.ge.s32.totalorder %v4983_v60, 0  ;;  %vm4985_vm3 = vcmp.le.s32.totalorder %v4983_v60, 3 }
 0x865   : > { %4745 = vmatpush2.msra.mxu0 %v4392_v12  ;;  %4816 = vmatpush2.msra.mxu1 %v4520_v55  ;;  %vm5495_vm14 = vmand %vm10048_vm1, %vm5014_vm6  ;;  %v6171_v51 = vsel %vm10048_vm1, 1.0, %v11429_v10  ;;  %v4994_v12 = vadd.s32 4294967295, %v4981_v22 }
 0x866   : > { %4746 = vmatprep.subr.mxu0 %v4389_v56  ;;  %4817 = vmatprep.subr.mxu1 %v4517_v52  ;;  %v6172_v6 = vsel %vm5495_vm14, 1.0, %v11429_v10  ;;  %vm10061_vm8 = vmand %vm5002_vm9, %vm5003_vm10 }
 0x867   : > { %4747 = vmatpush2.msra.mxu0 %v4388_v9  ;;  %4818 = vmatpush2.msra.mxu1 %v4516_v23  ;;  %vm10069_vm15 = vmand %vm10031_vm0, %vm10061_vm8 }
 0x868   : > { %4748 = vmatprep.subr.mxu0 %v4385_v44  ;;  %4819 = vmatprep.subr.mxu1 %v4513_v27  ;;  %vm5325_vm12 = vmand %vm10069_vm15, %vm5006_vm13 }
 0x869   : > { %4749 = vmatpush2.msra.mxu0 %v4384_v19  ;;  %4820 = vmatpush2.msra.mxu1 %v4512_v29  ;;  %v6164_v55 = vsel %vm5325_vm12, 1.0, %v11429_v10  ;;  %vm10078_vm9 = vmand %vm4984_vm5, %vm4985_vm3  ;;  %vm4995_vm3 = vcmp.ge.s32.totalorder %v4994_v12, 0  ;;  %vm4996_vm12 = vcmp.le.s32.totalorder %v4994_v12, 3 }
 0x86a   : > { %4750 = vmatprep.subr.mxu0 %v4381_v45  ;;  %4821 = vmatprep.subr.mxu1 %v4509_v24  ;;  %vm10086_vm10 = vmand %vm10078_vm9, %vm10061_vm8 }
 0x86b   : > { %4751 = vmatpush2.msra.mxu0 %v4380_v31  ;;  %4822 = vmatpush2.msra.mxu1 %v4508_v47  ;;  %v6156_v9 = vsel %vm10086_vm10, 1.0, %v11429_v10  ;;  %vm5453_vm14 = vmand %vm10048_vm1, %vm5006_vm13 }
 0x86c   : > { %4752 = vmatprep.subr.mxu0 %v4377_v46  ;;  %4823 = vmatprep.subr.mxu1 %v4505_v49  ;;  %v6170_v23 = vsel %vm5453_vm14, 1.0, %v11429_v10  ;;  %vm10103_vm5 = vmand %vm10031_vm0, %vm10040_vm4 }
 0x86d   : > { %4753 = vmatpush2.msra.mxu0 %v4376_v50  ;;  %4824 = vmatpush2.msra.mxu1 %v4504_v40  ;;  %vm5303_vm7 = vmand %vm10103_vm5, %vm5014_vm6  ;;  %v6162_v47 = vsel %vm10103_vm5, 1.0, %v11429_v10 }
 0x86e   : > { %4754 = vmatprep.subr.mxu0 %v4373_v21  ;;  %4825 = vmatprep.subr.mxu1 %v4501_v8  ;;  %v6163_v27 = vsel %vm5303_vm7, 1.0, %v11429_v10  ;;  %vm5133_vm1 = vmand %vm10086_vm10, %vm5006_vm13 }
 0x86f   : > { %4755 = vmatpush2.msra.mxu0 %v4372_v18  ;;  %4826 = vmatpush2.msra.mxu1 %v4500_v59  ;;  %vm10116_vm14 = vmand %vm4995_vm3, %vm4996_vm12  ;;  %v6155_v29 = vsel %vm5133_vm1, 1.0, %v11429_v10 }
 0x870   : > { %4756 = vmatprep.subr.mxu0 %v4369_v16  ;;  %4827 = vmatprep.subr.mxu1 %v4497_v13  ;;  %vm10125_vm7 = vmand %vm10035_vm11, %vm10116_vm14 }
 0x871   : > { %4757 = vmatpush2.msra.mxu0 %v4368_v20  ;;  %4828 = vmatpush2.msra.mxu1 %v4496_v25  ;;  %vm5431_vm3 = vmand %vm10125_vm7, %vm5014_vm6  ;;  %v6168_v49 = vsel %vm10125_vm7, 1.0, %v11429_v10 }
 0x872   : > { %4758 = vmatprep.subr.mxu0 %v4365_v14  ;;  %4829 = vmatprep.subr.mxu1 %v4493_v36  ;;  %v6169_v24 = vsel %vm5431_vm3, 1.0, %v11429_v10  ;;  %vm10138_vm12 = vmand %vm10078_vm9, %vm10040_vm4  ;;  %v6165_v14 = vsel %vm10069_vm15, 1.0, %v11429_v10 }
 0x873   : > { %4759 = vmatpush2.msra.mxu0 %v4364_v28  ;;  %4830 = vmatpush2.msra.mxu1 %v4492_v41  ;;  %vm5111_vm1 = vmand %vm10138_vm12, %vm5014_vm6  ;;  %v6153_v21 = vsel %vm10138_vm12, 1.0, %v11429_v10 }
 0x874   : > { %4761 = vmatmul.mubr.f32.vlgmr.msra.gmra.mxu0 %v9995_v39  ;;  %4832 = vmatmul.mubr.f32.vlgmr.msra.gmra.mxu1 %v9997_v0  ;;  %v4872_v0 = vld [vmem:[%s10622_s11] sm:$0xff]  ;;  %v6154_v46 = vsel %vm5111_vm1, 1.0, %v11429_v10  ;;  %vm5261_vm4 = vmand %vm10103_vm5, %vm5006_vm13 }
 0x875   : > { %5735 = vmatprep.subr.mxu0 %v11429_v10  ;;  %6248 = vmatprep.mubr.msk.f32.mxu1 %vm1463_vm2, %v4862_v26  ;;  %v6161_v50 = vsel %vm5261_vm4, 1.0, %v11429_v10  ;;  %vm5389_vm3 = vmand %vm10125_vm7, %vm5006_vm13 }
 0x876   : > { %vm10168_vm5 = vmand %vm10031_vm0, %vm10116_vm14  ;;  %v6167_v8 = vsel %vm5389_vm3, 1.0, %v11429_v10 }
 0x877   : > { %vm5239_vm7 = vmand %vm10168_vm5, %vm5014_vm6  ;;  %v6159_v20 = vsel %vm10168_vm5, 1.0, %v11429_v10 }
 0x878   : > { %vm5069_vm0 = vmand %vm10138_vm12, %vm5006_vm13  ;;  %v6160_v18 = vsel %vm5239_vm7, 1.0, %v11429_v10 }
 0x879   : > { %v6152_v59 = vsel %vm5069_vm0, 1.0, %v11429_v10  ;;  %vm5367_vm1 = vmand %vm10069_vm15, %vm5014_vm6 }
 0x87a   : > { %vm10194_vm4 = vmand %vm10078_vm9, %vm10116_vm14  ;;  %v6166_v13 = vsel %vm5367_vm1, 1.0, %v11429_v10  ;;  %vm11475_vm1 = vcmask 7168  }
 0x87b   : > { %vm5047_vm12 = vmand %vm10194_vm4, %vm5014_vm6  ;;  %v6150_v41 = vsel %vm10194_vm4, 1.0, %v11429_v10 }
 0x87c   : > { %v6151_v25 = vsel %vm5047_vm12, 1.0, %v11429_v10  ;;  %vm5197_vm9 = vmand %vm10168_vm5, %vm5006_vm13 }
 0x87d   : > { %vm10220_vm14 = vmand %vm10035_vm11, %vm10061_vm8  ;;  %v6158_v28 = vsel %vm5197_vm9, 1.0, %v11429_v10  ;;  %vm4965_vm8 = vcmask 867328  }
 0x87e   : > { %vm5559_vm15 = vmand %vm10220_vm14, %vm5014_vm6  ;;  %4967 = vst.msk [vmem:[#allocation2 + $0x30] sm:$0xff] %vm4965_vm8, %v11429_v10  ;;  %v6174_v54 = vsel %vm10220_vm14, 1.0, %v11429_v10 }
 0x87f   : > { %vm5175_vm11 = vmand %vm10086_vm10, %vm5014_vm6  ;;  %4966 = vst.msk [vmem:[#allocation2] sm:$0xff] %vm4965_vm8, %v11429_v10  ;;  %vm4976_vm10 = vcmask 695464  }
 0x880   : > { %v6157_v26 = vsel %vm5175_vm11, 1.0, %v11429_v10  ;;  %vm5517_vm6 = vmand %vm10220_vm14, %vm5006_vm13 }
 0x881   : > { %v6173_v33 = vsel %vm5517_vm6, 1.0, %v11429_v10  ;;  %vm5017_vm3 = vmand %vm10194_vm4, %vm5006_vm13  ;;  %vm11473_vm13 = vcmask 392192  }
 0x882   : > { %v6149_v40 = vsel %vm5017_vm3, 1.0, %v11429_v10  ;;  %vm11474_vm5 = vmmov %vm11473_vm13 }
 0x883   : > { %vm11476_vm4 = vmmov %vm11475_vm1 }
 0x8f3   : > { %v4620_v57 = vpop.f32.mrf.mxu0  ;;  %v4691_v61 = vpop.f32.mrf.mxu1 }
 0x8f4   : > { %v4692_v58 = vadd.f32 %v4691_v61, %v4620_v57  ;;  %v6175_v57 = vsel %vm5559_vm15, 1.0, %v11429_v10 }
 0x8f5   : > { %v4622_v3 = vpop.f32.mrf.mxu0  ;;  %v4693_v1 = vpop.f32.mrf.mxu1 }
 0x8f6   : > { %4838 = vst.msk [vmem:[#allocation3] sm:$0xff] %vm1463_vm2, %v4692_v58  ;;  %v4694_v11 = vadd.f32 %v4693_v1, %v4622_v3 }
 0x8f8   : > { %4844 = vst.msk [vmem:[#allocation3 + $0x40] sm:$0xff] %vm1463_vm2, %v4694_v11 }
 0x934   : > { %v4762_v5 = vpop.f32.mrf.mxu0  ;;  %v4833_v7 = vpop.f32.mrf.mxu1 }
 0x935   : > { %v4834_v42 = vadd.f32 %v4833_v7, %v4762_v5 }
 0x936   : > { %v4764_v4 = vpop.f32.mrf.mxu0  ;;  %v4835_v53 = vpop.f32.mrf.mxu1 }
 0x937   : > { %4850 = vst.msk [vmem:[#allocation3 + $0x80] sm:$0xff] %vm1463_vm2, %v4834_v42  ;;  %v4836_v39 = vadd.f32 %v4835_v53, %v4764_v4  ;;  %4852 = vrot.lane.b32.xlu1 %v4834_v42, %s11293_s22  ;;  %v4866_v53 = vld [vmem:[#allocation3 + $0x40] sm:$0xff] }
 0x939   : > { %4856 = vst.msk [vmem:[#allocation3 + $0xc0] sm:$0xff] %vm1463_vm2, %v4836_v39  ;;  %4858 = vrot.lane.b32.xlu0 %v4836_v39, %s11293_s22 }
 0x93b   : > { %4840 = vrot.lane.b32.xlu1 %v4692_v58, %s11293_s22 }
 0x93d   : > { %4846 = vrot.lane.b32.xlu0 %v4694_v11, %s11293_s22  ;;  %s6686_s22 = smov 37  }
 0x93e   : > { %v4868_v42 = vld [vmem:[#allocation3 + $0x80] sm:$0xff] }
 0x93f   : > { %4876 = vperm.xlu1 %6593, %v4872_v0   ;;  %v4864_v0 = vld [vmem:[#allocation3] sm:$0xff] }
 0x940   : > { %v4870_v5 = vld [vmem:[#allocation3 + $0xc0] sm:$0xff] }
 0x941   : > { %4881 = vperm.xlu0 %6594, %v4873_v2   ;;  %v4863_v2 = vld [vmem:[%s10621_s10 + $0x8] sm:$0xff] }
 0x943   : > { %5480 = vrot.lane.b32.xlu1 %v6171_v51, %s6686_s22  ;;  %s6693_s22 = smov 6  }
 0x945   : > { %5501 = vrot.lane.b32.xlu0 %v6172_v6, %s6687_s23  ;;  %s6694_s23 = smov 33  }
 0x947   : > { %5160 = vrot.lane.b32.xlu1 %v6156_v9, %s11447_s28  ;;  %s6696_s28 = smov 5  }
 0x949   : > { %5331 = vrot.lane.b32.xlu0 %v6164_v55, %s6688_s30  ;;  %s6695_s30 = smov 20  }
 0x94b   : > { %5309 = vrot.lane.b32.xlu1 %v6163_v27, %s6690_s25  ;;  %s11461_s25 = smov 18  }
 0x94d   : > { %5459 = vrot.lane.b32.xlu0 %v6170_v23, %s6689_s1  ;;  %s6697_s1 = smov 32  }
 0x94f   : > { %5437 = vrot.lane.b32.xlu1 %v6169_v24, %s6691_s19  ;;  %s6699_s19 = smov 26  }
 0x951   : > { %5139 = vrot.lane.b32.xlu0 %v6155_v29, %s11456_s27  ;;  %s6698_s27 = smov 4  }
 0x953   : > { %5117 = vrot.lane.b32.xlu1 %v6154_v46, %s6693_s22  ;;  %s11462_s22 = smov 17  }
 0x955   : > { %5288 = vrot.lane.b32.xlu0 %v6162_v47, %s6692_s26 }
 0x957   : > { %5267 = vrot.lane.b32.xlu1 %v6161_v50, %s6695_s30  ;;  %s6700_s30 = smov 25  }
 0x959   : > { %5416 = vrot.lane.b32.xlu0 %v6168_v49, %s6694_s23  ;;  %s11465_s23 = smov 2  }
 0x95b   : > { %5395 = vrot.lane.b32.xlu1 %v6167_v8, %s6697_s1  ;;  %s11467_s1 = smov 1  }
 0x95d   : > { %5096 = vrot.lane.b32.xlu0 %v6153_v21, %s6696_s28  ;;  %s11466_s28 = smov 16  }
 0x95f   : > { %5075 = vrot.lane.b32.xlu1 %v6152_v59, %s6698_s27  ;;  %s10842_s27 = smov 107  }
 0x961   : > { %5245 = vrot.lane.b32.xlu0 %v6160_v18, %s11461_s25  ;;  %s6701_s25 = smov 42  }
 0x963   : > { %5224 = vrot.lane.b32.xlu1 %v6159_v20, %s11462_s22  ;;  %s11468_s22 = smov 10  }
 0x965   : > { %5373 = vrot.lane.b32.xlu0 %v6166_v13, %s6699_s19  ;;  %s6709_s19 = smov 92  }
 0x967   : > { %5352 = vrot.lane.b32.xlu1 %v6165_v14, %s6700_s30  ;;  %s6703_s30 = smov 40  }
 0x969   : > { %5053 = vrot.lane.b32.xlu0 %v6151_v25, %s11465_s23  ;;  %s6702_s23 = smov 41  }
 0x96b   : > { %5032 = vrot.lane.b32.xlu1 %v6150_v41, %s11467_s1  ;;  %s6706_s1 = smov 91  }
 0x96d   : > { %5203 = vrot.lane.b32.xlu0 %v6158_v28, %s11466_s28  ;;  %s6705_s28 = smov 104  }
 0x96f   : > { %5181 = vrot.lane.b32.xlu1 %v6157_v26, %s11468_s22  ;;  %s10841_s22 = smov 108  }
 0x971   : > { %5565 = vrot.lane.b32.xlu0 %v6175_v57, %s6701_s25  ;;  %s10843_s25 = smov 106  }
 0x9a9   : > { %v4853_v61 = vpop.permute.xlu1 %4852 }
 0x9aa   : > { %4855 = vst.msk [vmem:[#allocation3 + $0xa0] sm:$0xff] %vm1463_vm2, %v4853_v61 }
 0x9ab   : > { %v4859_v58 = vpop.permute.xlu0 %4858 }
 0x9ac   : > { %4861 = vst.msk [vmem:[#allocation3 + $0xe0] sm:$0xff] %vm1463_vm2, %v4859_v58 }
 0x9ad   : > { %v4841_v3 = vpop.permute.xlu1 %4840 }
 0x9ae   : > { %4843 = vst.msk [vmem:[#allocation3 + $0x20] sm:$0xff] %vm1463_vm2, %v4841_v3 }
 0x9af   : > { %v4847_v1 = vpop.permute.xlu0 %4846 }
 0x9b0   : > { %4849 = vst.msk [vmem:[#allocation3 + $0x60] sm:$0xff] %vm1463_vm2, %v4847_v1 }
 0x9b1   : > { %v4869_v7 = vld [vmem:[#allocation3 + $0xa0] sm:$0xff] }
 0x9b3   : > { %v4871_v11 = vld [vmem:[#allocation3 + $0xe0] sm:$0xff] }
 0x9b4   : > { %6232 = vmatprep.subr.mxu1 %v4871_v11 }
 0x9b5   : > { %6233 = vmatpush3.msra.mxu1 %v4871_v11  ;;  %v4865_v39 = vld [vmem:[#allocation3 + $0x20] sm:$0xff] }
 0x9b6   : > { %6234 = vmatprep.subr.mxu1 %v4870_v5 }
 0x9b7   : > { %6235 = vmatpush3.msra.mxu1 %v4870_v5  ;;  %v4867_v4 = vld [vmem:[#allocation3 + $0x60] sm:$0xff] }
 0x9b8   : > { %6236 = vmatprep.subr.mxu1 %v4869_v7 }
 0x9b9   : > { %6237 = vmatpush3.msra.mxu1 %v4869_v7 }
 0x9ba   : > { %6238 = vmatprep.subr.mxu1 %v4868_v42  ;;  %v4877_v37 = vpop.permute.xlu1 %4876 }
 0x9bb   : > { %6239 = vmatpush3.msra.mxu1 %v4868_v42 }
 0x9bc   : > { %6240 = vmatprep.subr.mxu1 %v4867_v4  ;;  %v4882_v34 = vpop.permute.xlu0 %4881 }
 0x9bd   : > { %6241 = vmatpush3.msra.mxu1 %v4867_v4 }
 0x9be   : > { %6242 = vmatprep.subr.mxu1 %v4866_v53  ;;  %v10264_v15 = vpop.permute.xlu1 %5480 }
 0x9bf   : > { %6243 = vmatpush3.msra.mxu1 %v4866_v53 }
 0x9c0   : > { %6244 = vmatprep.subr.mxu1 %v4865_v39  ;;  %v10262_v62 = vpop.permute.xlu0 %5501 }
 0x9c1   : > { %6245 = vmatpush3.msra.mxu1 %v4865_v39 }
 0x9c2   : > { %6246 = vmatprep.subr.mxu1 %v4864_v0  ;;  %v10268_v38 = vpop.permute.xlu1 %5160 }
 0x9c3   : > { %6247 = vmatpush3.msra.mxu1 %v4864_v0 }
 0x9c4   : > { %6249 = vmatmul.mubr.msk.f32.vlgmr.msra.gmra.mxu1 %vm1463_vm2, %v4863_v2  ;;  %v10266_v60 = vpop.permute.xlu0 %5331 }
 0x9c6   : > { %v10272_v51 = vpop.permute.xlu1 %5309 }
 0x9c8   : > { %v10270_v30 = vpop.permute.xlu0 %5459 }
 0x9ca   : > { %v10276_v48 = vpop.permute.xlu1 %5437 }
 0x9cc   : > { %v10274_v6 = vpop.permute.xlu0 %5139 }
 0x9ce   : > { %v10280_v12 = vpop.permute.xlu1 %5117 }
 0x9d0   : > { %v10278_v35 = vpop.permute.xlu0 %5288 }
 0x9d2   : > { %v10284_v56 = vpop.permute.xlu1 %5267 }
 0x9d4   : > { %v10282_v55 = vpop.permute.xlu0 %5416 }
 0x9d6   : > { %v10288_v9 = vpop.permute.xlu1 %5395 }
 0x9d8   : > { %v10286_v52 = vpop.permute.xlu0 %5096 }
 0x9da   : > { %v10292_v44 = vpop.permute.xlu1 %5075 }
 0x9dc   : > { %v10290_v23 = vpop.permute.xlu0 %5245 }
 0x9de   : > { %v10296_v19 = vpop.permute.xlu1 %5224 }
 0x9e0   : > { %v10294_v27 = vpop.permute.xlu0 %5373 }
 0x9e2   : > { %v10300_v45 = vpop.permute.xlu1 %5352 }
 0x9e4   : > { %v10298_v29 = vpop.permute.xlu0 %5053 }
 0x9e6   : > { %v10304_v31 = vpop.permute.xlu1 %5032 }
 0x9e8   : > { %v10302_v24 = vpop.permute.xlu0 %5203 }
 0x9ea   : > { %v5182_v46 = vpop.permute.xlu1 %5181 }
 0x9ec   : > { %v10306_v47 = vpop.permute.xlu0 %5565 }
 0xa84   : > { %v6250_v17 = vpop.f32.mrf.mxu1 }
 0xa85   : > { %v4962_v63 = vadd.f32 %v6250_v17, %v4882_v34 }
 0xa86   : > { %v4956_v22 = vpop.f32.mrf.mxu1 }
 0xa87   : > { %v4957_v43 = vadd.f32 %v4956_v22, %v4877_v37  ;;  %4972 = vrot.lane.b32.xlu0 %v4962_v63, %s6692_s26 }
 0xa89   : > { %4970 = vrot.lane.b32.xlu1 %v4957_v43, %s6692_s26  ;;  %s6704_s26 = smov 90  }
 0xa8b   : > { %5544 = vrot.lane.b32.xlu0 %v6174_v54, %s6702_s23  ;;  %s6711_s23 = smov 94  }
 0xa8d   : > { %5523 = vrot.lane.b32.xlu1 %v6173_v33, %s6703_s30  ;;  %s6712_s30 = smov 122  }
 0xaf9   : > { %v4973_v49 = vpop.permute.xlu0 %4972 }
 0xafa   : > { %4978 = vst.msk [vmem:[#allocation2 + $0x30] sm:$0xff] %vm4976_vm10, %v4973_v49  ;;  %v5642_v49 = vld [vmem:[%s10624_s13] sm:$0xff] }
 0xafb   : > { %v4971_v50 = vpop.permute.xlu1 %4970 }
 0xafc   : > { %4977 = vst.msk [vmem:[#allocation2] sm:$0xff] %vm4976_vm10, %v4971_v50  ;;  %v5643_v50 = vld [vmem:[%s10624_s13 + $0x8] sm:$0xff] }
 0xb01   : > { %v10313_v21 = vld [vmem:[#allocation2 + $0x30] sm:$0xff] }
 0xb02   : > { %v5023_v8 = vmul.f32 %v6149_v40, %v10313_v21  ;;  %v5505_v18 = vmul.f32 %v10262_v62, %v10313_v21  ;;  %v5335_v13 = vmul.f32 %v10266_v60, %v10313_v21  ;;  %v5484_v16 = vmul.f32 %v10264_v15, %v10313_v21 }
 0xb03   : > { %v10318_v59 = vld [vmem:[#allocation2] sm:$0xff]  ;;  %v5313_v20 = vmul.f32 %v10272_v51, %v10313_v21  ;;  %v5164_v25 = vmul.f32 %v10268_v38, %v10313_v21  ;;  %v5292_v14 = vmul.f32 %v10278_v35, %v10313_v21  ;;  %v5463_v36 = vmul.f32 %v10270_v30, %v10313_v21 }
 0xb04   : > { %5025 = vst.msk [vmem:[#allocation3 + $0x20] sm:$0xff] %vm1463_vm2, %v5023_v8  ;;  %v5022_v32 = vmul.f32 %v6149_v40, %v10318_v59  ;;  %5510 = vrot.lane.b32.xlu0 %v5505_v18, %s6704_s26  ;;  %5340 = vrot.lane.b32.xlu1 %v5335_v13, %s6705_s28  ;;  %v5271_v28 = vmul.f32 %v10284_v56, %v10313_v21 }
 0xb05   : > { %v10345_v41 = vmul.f32 %v10306_v47, %v10318_v59  ;;  %v10348_v57 = vmul.f32 %v5182_v46, %v10318_v59  ;;  %v5143_v61 = vmul.f32 %v10274_v6, %v10313_v21  ;;  %v5249_v58 = vmul.f32 %v10290_v23, %v10313_v21 }
 0xb06   : > { %5024 = vst.msk [vmem:[#allocation3] sm:$0xff] %vm1463_vm2, %v5022_v32  ;;  %v5441_v3 = vmul.f32 %v10276_v48, %v10313_v21  ;;  %v5228_v1 = vmul.f32 %v10296_v19, %v10313_v21  ;;  %v5121_v11 = vmul.f32 %v10280_v12, %v10313_v21  ;;  %v5207_v5 = vmul.f32 %v10302_v24, %v10313_v21 }
 0xb07   : > { %v5420_v7 = vmul.f32 %v10282_v55, %v10313_v21  ;;  %v5185_v42 = vmul.f32 %v5182_v46, %v10313_v21  ;;  %v5100_v4 = vmul.f32 %v10286_v52, %v10313_v21  ;;  %v5504_v53 = vmul.f32 %v10262_v62, %v10318_v59 }
 0xb08   : > { %5489 = vrot.lane.b32.xlu0 %v5484_v16, %s6706_s1  ;;  %5318 = vrot.lane.b32.xlu1 %v5313_v20, %s10843_s25  ;;  %v5399_v39 = vmul.f32 %v10288_v9, %v10313_v21  ;;  %v5483_v0 = vmul.f32 %v10264_v15, %v10318_v59  ;;  %s6715_s25 = smov 96   ;;  %v5079_v2 = vmul.f32 %v10292_v44, %v10313_v21 }
 0xb09   : > { %v5163_v26 = vmul.f32 %v10268_v38, %v10318_v59  ;;  %v5377_v34 = vmul.f32 %v10294_v27, %v10313_v21  ;;  %v5462_v17 = vmul.f32 %v10270_v30, %v10318_v59  ;;  %v5057_v63 = vmul.f32 %v10298_v29, %v10313_v21 }
 0xb0a   : > { %v5142_v37 = vmul.f32 %v10274_v6, %v10318_v59  ;;  %v5356_v22 = vmul.f32 %v10300_v45, %v10313_v21  ;;  %v5440_v43 = vmul.f32 %v10276_v48, %v10318_v59  ;;  %v5036_v54 = vmul.f32 %v10304_v31, %v10313_v21 }
 0xb0b   : > { %v5120_v33 = vmul.f32 %v10280_v12, %v10318_v59  ;;  %v5569_v62 = vmul.f32 %v10306_v47, %v10313_v21  ;;  %v5419_v15 = vmul.f32 %v10282_v55, %v10318_v59  ;;  %v5334_v38 = vmul.f32 %v10266_v60, %v10318_v59 }
 0xb0c   : > { %5169 = vrot.lane.b32.xlu0 %v5164_v25, %s11276_s29  ;;  %5297 = vrot.lane.b32.xlu1 %v5292_v14, %s10842_s27  ;;  %s10844_s27 = smov 123   ;;  %v5099_v30 = vmul.f32 %v10286_v52, %v10318_v59  ;;  %v5312_v6 = vmul.f32 %v10272_v51, %v10318_v59  ;;  %v5398_v48 = vmul.f32 %v10288_v9, %v10318_v59 }
 0xb0d   : > { %v5291_v60 = vmul.f32 %v10278_v35, %v10318_v59  ;;  %v5078_v12 = vmul.f32 %v10292_v44, %v10318_v59  ;;  %v5270_v51 = vmul.f32 %v10284_v56, %v10318_v59  ;;  %v5376_v55 = vmul.f32 %v10294_v27, %v10318_v59  ;;  %v5581_v27 = vld [vmem:[%s10623_s12 + $0x8] sm:$0xff] }
 0xb0e   : > { %v5248_v35 = vmul.f32 %v10290_v23, %v10318_v59  ;;  %v5056_v52 = vmul.f32 %v10298_v29, %v10318_v59  ;;  %v5227_v56 = vmul.f32 %v10296_v19, %v10318_v59  ;;  %v5355_v9 = vmul.f32 %v10300_v45, %v10318_v59  ;;  %5724 = vmatprep.mubr.f32.mxu1 %v5581_v27  ;;  %v5545_v19 = vpop.permute.xlu0 %5544 }
 0xb0f   : > { %v5206_v23 = vmul.f32 %v10302_v24, %v10318_v59  ;;  %v5035_v44 = vmul.f32 %v10304_v31, %v10318_v59  ;;  %v5548_v29 = vmul.f32 %v5545_v19, %v10313_v21  ;;  %v5547_v45 = vmul.f32 %v5545_v19, %v10318_v59  ;;  %v5524_v24 = vpop.permute.xlu1 %5523  ;;  %v5583_v31 = vld [vmem:[%s10623_s12 + $0x18] sm:$0xff] }
 0xb10   : > { %5468 = vrot.lane.b32.xlu0 %v5463_v36, %s6709_s19  ;;  %5276 = vrot.lane.b32.xlu1 %v5271_v28, %s10841_s22  ;;  %s6713_s22 = smov 95   ;;  %v5527_v47 = vmul.f32 %v5524_v24, %v10313_v21  ;;  %v5526_v46 = vmul.f32 %v5524_v24, %v10318_v59 }
 0xb11   : > { %6176 = vmatprep.mubr.msk.f32.mxu0 %vm11473_vm13, %v5583_v31 }
 0xb14   : > { %5148 = vrot.lane.b32.xlu0 %v5143_v61, %s11238_s21  ;;  %5254 = vrot.lane.b32.xlu1 %v5249_v58, %s11330_s0 }
 0xb18   : > { %5446 = vrot.lane.b32.xlu0 %v5441_v3, %s6711_s23  ;;  %5233 = vrot.lane.b32.xlu1 %v5228_v1, %s11298_s3 }
 0xb1c   : > { %5126 = vrot.lane.b32.xlu0 %v5121_v11, %s6712_s30  ;;  %5212 = vrot.lane.b32.xlu1 %v5207_v5, %s11299_s4 }
 0xb20   : > { %5425 = vrot.lane.b32.xlu0 %v5420_v7, %s6713_s22  ;;  %5190 = vrot.lane.b32.xlu1 %v5185_v42, %s11300_s9 }
 0xb24   : > { %5105 = vrot.lane.b32.xlu0 %v5100_v4, %s10844_s27  ;;  %5508 = vrot.lane.b32.xlu1 %v5504_v53, %s6704_s26  ;;  %s6716_s27 = smov 124   ;;  %s6717_s26 = smov 102  }
 0xb28   : > { %5404 = vrot.lane.b32.xlu0 %v5399_v39, %s6715_s25  ;;  %5487 = vrot.lane.b32.xlu1 %v5483_v0, %s6706_s1  ;;  %s11469_s1 = smov 123  }
 0xb2c   : > { %5084 = vrot.lane.b32.xlu0 %v5079_v2, %s6716_s27  ;;  %5167 = vrot.lane.b32.xlu1 %v5163_v26, %s11276_s29  ;;  %s6718_s29 = smov 103  }
 0xb30   : > { %5382 = vrot.lane.b32.xlu0 %v5377_v34, %s6717_s26  ;;  %5466 = vrot.lane.b32.xlu1 %v5462_v17, %s6709_s19  ;;  %s11470_s19 = smov 106  }
 0xb34   : > { %5062 = vrot.lane.b32.xlu0 %v5057_v63, %s11233_s24  ;;  %5146 = vrot.lane.b32.xlu1 %v5142_v37, %s11238_s21  ;;  %s6719_s21 = smov 86  }
 0xb38   : > { %5361 = vrot.lane.b32.xlu0 %v5356_v22, %s6718_s29  ;;  %5444 = vrot.lane.b32.xlu1 %v5440_v43, %s6711_s23 }
 0xb3c   : > { %5041 = vrot.lane.b32.xlu0 %v5036_v54, %s11250_s20  ;;  %5124 = vrot.lane.b32.xlu1 %v5120_v33, %s6712_s30 }
 0xb40   : > { %5574 = vrot.lane.b32.xlu0 %v5569_v62, %s6719_s21  ;;  %5423 = vrot.lane.b32.xlu1 %v5419_v15, %s6713_s22  ;;  %s11471_s22 = smov 107  }
 0xb44   : > { %5338 = vrot.lane.b32.xlu0 %v5334_v38, %s6705_s28  ;;  %5103 = vrot.lane.b32.xlu1 %v5099_v30, %s11469_s1  ;;  %s11472_s28 = smov 108  }
 0xb48   : > { %5316 = vrot.lane.b32.xlu0 %v5312_v6, %s11470_s19  ;;  %5402 = vrot.lane.b32.xlu1 %v5398_v48, %s6715_s25  ;;  %s6721_s25 = smov 88  }
 0xb4c   : > { %5295 = vrot.lane.b32.xlu0 %v5291_v60, %s11471_s22  ;;  %5082 = vrot.lane.b32.xlu1 %v5078_v12, %s6716_s27  ;;  %s610_s22 = scalar_lea.vmem %s10628_s17, %s6859_s2 }
 0xb50   : > { %5274 = vrot.lane.b32.xlu0 %v5270_v51, %s11472_s28  ;;  %5380 = vrot.lane.b32.xlu1 %v5376_v55, %s6717_s26 }
 0xb54   : > { %5252 = vrot.lane.b32.xlu0 %v5248_v35, %s11330_s0  ;;  %5060 = vrot.lane.b32.xlu1 %v5056_v52, %s11233_s24  ;;  %s615_s0 = scalar_lea.vmem %s10629_s18, %s6859_s2 }
 0xb58   : > { %5231 = vrot.lane.b32.xlu0 %v5227_v56, %s11298_s3  ;;  %5359 = vrot.lane.b32.xlu1 %v5355_v9, %s6718_s29  ;;  %s6720_s3 = smov 87  }
 0xb5c   : > { %5210 = vrot.lane.b32.xlu0 %v5206_v23, %s11299_s4  ;;  %5039 = vrot.lane.b32.xlu1 %v5035_v44, %s11250_s20 }
 0xb60   : > { %5572 = vrot.lane.b32.xlu0 %v10345_v41, %s6719_s21  ;;  %5188 = vrot.lane.b32.xlu1 %v10348_v57, %s11300_s9 }
 0xb64   : > { %5553 = vrot.lane.b32.xlu0 %v5548_v29, %s6720_s3  ;;  %5551 = vrot.lane.b32.xlu1 %v5547_v45, %s6720_s3 }
 0xb68   : > { %5532 = vrot.lane.b32.xlu0 %v5527_v47, %s6721_s25  ;;  %5530 = vrot.lane.b32.xlu1 %v5526_v46, %s6721_s25 }
 0xb6c   : > { %5646 = vperm.xlu0 %6594, %v5642_v49   ;;  %5651 = vperm.xlu1 %6593, %v5643_v50  }
 0xb76   : > { %v5511_v40 = vpop.permute.xlu0 %5510  ;;  %v5341_v21 = vpop.permute.xlu1 %5340 }
 0xb77   : > { %5515 = vst.msk [vmem:[#allocation3 + $0x5e0] sm:$0xff] %vm1463_vm2, %v5511_v40  ;;  %5345 = vst.msk [vmem:[#allocation3 + $0x3e0] sm:$0xff] %vm1463_vm2, %v5341_v21 }
 0xb7a   : > { %v5490_v8 = vpop.permute.xlu0 %5489  ;;  %v5319_v18 = vpop.permute.xlu1 %5318 }
 0xb7b   : > { %5494 = vst.msk [vmem:[#allocation3 + $0x5a0] sm:$0xff] %vm1463_vm2, %v5490_v8  ;;  %5323 = vst.msk [vmem:[#allocation3 + $0x3a0] sm:$0xff] %vm1463_vm2, %v5319_v18 }
 0xb7e   : > { %v5170_v59 = vpop.permute.xlu0 %5169  ;;  %v5635_v13 = vld [vmem:[#allocation3 + $0x5e0] sm:$0xff]  ;;  %v5298_v32 = vpop.permute.xlu1 %5297 }
 0xb7f   : > { %5174 = vst.msk [vmem:[#allocation3 + $0x1e0] sm:$0xff] %vm1463_vm2, %v5170_v59  ;;  %v5619_v16 = vld [vmem:[#allocation3 + $0x3e0] sm:$0xff]  ;;  %5736 = vmatpush1.msra.mxu0 %v5635_v13  ;;  %5302 = vst.msk [vmem:[#allocation3 + $0x360] sm:$0xff] %vm1463_vm2, %v5298_v32 }
 0xb80   : > { %6194 = vmatprep.subr.mxu1 %v5619_v16  ;;  %5737 = vmatprep.subr.mxu0 %v11429_v10 }
 0xb82   : > { %v5469_v20 = vpop.permute.xlu0 %5468  ;;  %v5277_v25 = vpop.permute.xlu1 %5276  ;;  %v5633_v0 = vld [vmem:[#allocation3 + $0x5a0] sm:$0xff] }
 0xb83   : > { %5473 = vst.msk [vmem:[#allocation3 + $0x560] sm:$0xff] %vm1463_vm2, %v5469_v20  ;;  %5281 = vst.msk [vmem:[#allocation3 + $0x320] sm:$0xff] %vm1463_vm2, %v5277_v25  ;;  %v5617_v27 = vld [vmem:[#allocation3 + $0x3a0] sm:$0xff] }
 0xb86   : > { %v5149_v14 = vpop.permute.xlu0 %5148  ;;  %v5603_v36 = vld [vmem:[#allocation3 + $0x1e0] sm:$0xff]  ;;  %v5255_v28 = vpop.permute.xlu1 %5254 }
 0xb87   : > { %5153 = vst.msk [vmem:[#allocation3 + $0x1a0] sm:$0xff] %vm1463_vm2, %v5149_v14  ;;  %6195 = vmatpush3.msra.mxu1 %v5603_v36  ;;  %5259 = vst.msk [vmem:[#allocation3 + $0x2e0] sm:$0xff] %vm1463_vm2, %v5255_v28  ;;  %v5615_v46 = vld [vmem:[#allocation3 + $0x360] sm:$0xff] }
 0xb8a   : > { %v5447_v41 = vpop.permute.xlu0 %5446  ;;  %v5234_v57 = vpop.permute.xlu1 %5233  ;;  %v5631_v17 = vld [vmem:[#allocation3 + $0x560] sm:$0xff] }
 0xb8b   : > { %5451 = vst.msk [vmem:[#allocation3 + $0x520] sm:$0xff] %vm1463_vm2, %v5447_v41  ;;  %5238 = vst.msk [vmem:[#allocation3 + $0x2a0] sm:$0xff] %vm1463_vm2, %v5234_v57  ;;  %v5613_v59 = vld [vmem:[#allocation3 + $0x320] sm:$0xff] }
 0xb8e   : > { %v5127_v61 = vpop.permute.xlu0 %5126  ;;  %v5213_v58 = vpop.permute.xlu1 %5212  ;;  %v5601_v19 = vld [vmem:[#allocation3 + $0x1a0] sm:$0xff] }
 0xb8f   : > { %5131 = vst.msk [vmem:[#allocation3 + $0x160] sm:$0xff] %vm1463_vm2, %v5127_v61  ;;  %5217 = vst.msk [vmem:[#allocation3 + $0x260] sm:$0xff] %vm1463_vm2, %v5213_v58  ;;  %v5611_v36 = vld [vmem:[#allocation3 + $0x2e0] sm:$0xff] }
 0xb92   : > { %v5426_v3 = vpop.permute.xlu0 %5425  ;;  %v5191_v1 = vpop.permute.xlu1 %5190  ;;  %v5629_v33 = vld [vmem:[#allocation3 + $0x520] sm:$0xff] }
 0xb93   : > { %5430 = vst.msk [vmem:[#allocation3 + $0x4e0] sm:$0xff] %vm1463_vm2, %v5426_v3  ;;  %5195 = vst.msk [vmem:[#allocation3 + $0x220] sm:$0xff] %vm1463_vm2, %v5191_v1  ;;  %v5609_v1 = vld [vmem:[#allocation3 + $0x2a0] sm:$0xff] }
 0xb96   : > { %v5106_v11 = vpop.permute.xlu0 %5105  ;;  %v5509_v5 = vpop.permute.xlu1 %5508  ;;  %v5599_v50 = vld [vmem:[#allocation3 + $0x160] sm:$0xff] }
 0xb97   : > { %5110 = vst.msk [vmem:[#allocation3 + $0x120] sm:$0xff] %vm1463_vm2, %v5106_v11  ;;  %5514 = vst.msk [vmem:[#allocation3 + $0x5c0] sm:$0xff] %vm1463_vm2, %v5509_v5 }
 0xb9a   : > { %v5405_v7 = vpop.permute.xlu0 %5404  ;;  %v5488_v42 = vpop.permute.xlu1 %5487  ;;  %v5627_v48 = vld [vmem:[#allocation3 + $0x4e0] sm:$0xff] }
 0xb9b   : > { %5409 = vst.msk [vmem:[#allocation3 + $0x4a0] sm:$0xff] %vm1463_vm2, %v5405_v7  ;;  %5493 = vst.msk [vmem:[#allocation3 + $0x580] sm:$0xff] %vm1463_vm2, %v5488_v42 }
 0xb9e   : > { %v5085_v4 = vpop.permute.xlu0 %5084  ;;  %v5168_v53 = vpop.permute.xlu1 %5167  ;;  %v5634_v39 = vld [vmem:[#allocation3 + $0x5c0] sm:$0xff] }
 0xb9f   : > { %5089 = vst.msk [vmem:[#allocation3 + $0xe0] sm:$0xff] %vm1463_vm2, %v5085_v4  ;;  %5173 = vst.msk [vmem:[#allocation3 + $0x1c0] sm:$0xff] %vm1463_vm2, %v5168_v53  ;;  %5738 = vmatpush1.msra.mxu0 %v5634_v39  ;;  %v5597_v13 = vld [vmem:[#allocation3 + $0x120] sm:$0xff] }
 0xba0   : > { %5739 = vmatprep.subr.mxu0 %v11429_v10  ;;  %v5607_v39 = vld [vmem:[#allocation3 + $0x260] sm:$0xff] }
 0xba1   : > { %5740 = vmatpush1.msra.mxu0 %v5633_v0 }
 0xba2   : > { %v5383_v2 = vpop.permute.xlu0 %5382  ;;  %5741 = vmatprep.subr.mxu0 %v11429_v10  ;;  %v5467_v26 = vpop.permute.xlu1 %5466  ;;  %v5632_v34 = vld [vmem:[#allocation3 + $0x580] sm:$0xff] }
 0xba3   : > { %5387 = vst.msk [vmem:[#allocation3 + $0x460] sm:$0xff] %vm1463_vm2, %v5383_v2  ;;  %5472 = vst.msk [vmem:[#allocation3 + $0x540] sm:$0xff] %vm1463_vm2, %v5467_v26  ;;  %5742 = vmatpush1.msra.mxu0 %v5632_v34  ;;  %v5625_v52 = vld [vmem:[#allocation3 + $0x4a0] sm:$0xff] }
 0xba4   : > { %5743 = vmatprep.subr.mxu0 %v11429_v10 }
 0xba5   : > { %5744 = vmatpush1.msra.mxu0 %v5631_v17 }
 0xba6   : > { %v5063_v63 = vpop.permute.xlu0 %5062  ;;  %v5147_v37 = vpop.permute.xlu1 %5146  ;;  %5745 = vmatprep.subr.mxu0 %v11429_v10  ;;  %v5602_v44 = vld [vmem:[#allocation3 + $0x1c0] sm:$0xff] }
 0xba7   : > { %5067 = vst.msk [vmem:[#allocation3 + $0xa0] sm:$0xff] %vm1463_vm2, %v5063_v63  ;;  %5152 = vst.msk [vmem:[#allocation3 + $0x180] sm:$0xff] %vm1463_vm2, %v5147_v37  ;;  %v5595_v41 = vld [vmem:[#allocation3 + $0xe0] sm:$0xff] }
 0xba8   : > { %v5605_v37 = vld [vmem:[#allocation3 + $0x220] sm:$0xff] }
 0xbaa   : > { %v5362_v22 = vpop.permute.xlu0 %5361  ;;  %v5445_v43 = vpop.permute.xlu1 %5444  ;;  %v5630_v54 = vld [vmem:[#allocation3 + $0x540] sm:$0xff] }
 0xbab   : > { %5366 = vst.msk [vmem:[#allocation3 + $0x420] sm:$0xff] %vm1463_vm2, %v5362_v22  ;;  %5450 = vst.msk [vmem:[#allocation3 + $0x500] sm:$0xff] %vm1463_vm2, %v5445_v43  ;;  %5746 = vmatpush1.msra.mxu0 %v5630_v54  ;;  %v5623_v49 = vld [vmem:[#allocation3 + $0x460] sm:$0xff] }
 0xbac   : > { %5747 = vmatprep.subr.mxu0 %v11429_v10  ;;  %v5589_v22 = vld [vmem:[#allocation3 + $0x20] sm:$0xff] }
 0xbad   : > { %5748 = vmatpush1.msra.mxu0 %v5629_v33 }
 0xbae   : > { %v5042_v62 = vpop.permute.xlu0 %5041  ;;  %v5125_v15 = vpop.permute.xlu1 %5124  ;;  %5749 = vmatprep.subr.mxu0 %v11429_v10  ;;  %v5600_v47 = vld [vmem:[#allocation3 + $0x180] sm:$0xff] }
 0xbaf   : > { %5046 = vst.msk [vmem:[#allocation3 + $0x60] sm:$0xff] %vm1463_vm2, %v5042_v62  ;;  %5130 = vst.msk [vmem:[#allocation3 + $0x140] sm:$0xff] %vm1463_vm2, %v5125_v15  ;;  %v5593_v11 = vld [vmem:[#allocation3 + $0xa0] sm:$0xff] }
 0xbb0   : > { %v5580_v15 = vld [vmem:[%s10623_s12] sm:$0xff] }
 0xbb2   : > { %v5575_v38 = vpop.permute.xlu0 %5574  ;;  %v5424_v30 = vpop.permute.xlu1 %5423  ;;  %v5628_v6 = vld [vmem:[#allocation3 + $0x500] sm:$0xff] }
 0xbb3   : > { %5579 = vst.msk [vmem:[#allocation3 + $0x6a0] sm:$0xff] %vm1463_vm2, %v5575_v38  ;;  %5429 = vst.msk [vmem:[#allocation3 + $0x4c0] sm:$0xff] %vm1463_vm2, %v5424_v30  ;;  %5750 = vmatpush1.msra.mxu0 %v5628_v6  ;;  %v5621_v28 = vld [vmem:[#allocation3 + $0x420] sm:$0xff]  ;;  %v5585_v30 = vld [vmem:[%s10623_s12 + $0x28] sm:$0xff] }
 0xbb4   : > { %5751 = vmatprep.subr.mxu0 %v11429_v10  ;;  %v5588_v38 = vld [vmem:[#allocation3] sm:$0xff] }
 0xbb5   : > { %5752 = vmatpush1.msra.mxu0 %v5627_v48  ;;  %v5584_v48 = vld [vmem:[%s10623_s12 + $0x20] sm:$0xff] }
 0xbb6   : > { %v5339_v60 = vpop.permute.xlu0 %5338  ;;  %v5104_v12 = vpop.permute.xlu1 %5103  ;;  %5753 = vmatprep.subr.mxu0 %v11429_v10  ;;  %v5598_v18 = vld [vmem:[#allocation3 + $0x140] sm:$0xff] }
 0xbb7   : > { %5344 = vst.msk [vmem:[#allocation3 + $0x3c0] sm:$0xff] %vm1463_vm2, %v5339_v60  ;;  %5109 = vst.msk [vmem:[#allocation3 + $0x100] sm:$0xff] %vm1463_vm2, %v5104_v12  ;;  %v5591_v2 = vld [vmem:[#allocation3 + $0x60] sm:$0xff] }
 0xbba   : > { %v5317_v51 = vpop.permute.xlu0 %5316  ;;  %v5403_v55 = vpop.permute.xlu1 %5402  ;;  %v5626_v35 = vld [vmem:[#allocation3 + $0x4c0] sm:$0xff] }
 0xbbb   : > { %5322 = vst.msk [vmem:[#allocation3 + $0x380] sm:$0xff] %vm1463_vm2, %v5317_v51  ;;  %5408 = vst.msk [vmem:[#allocation3 + $0x480] sm:$0xff] %vm1463_vm2, %v5403_v55  ;;  %5754 = vmatpush1.msra.mxu0 %v5626_v35  ;;  %v5641_v0 = vld [vmem:[#allocation3 + $0x6a0] sm:$0xff]  ;;  %v5582_v51 = vld [vmem:[%s10623_s12 + $0x10] sm:$0xff] }
 0xbbc   : > { %5755 = vmatprep.subr.mxu0 %v11429_v10  ;;  %v5587_v35 = vld [vmem:[%s10623_s12 + $0x38] sm:$0xff] }
 0xbbd   : > { %5756 = vmatpush1.msra.mxu0 %v5625_v52  ;;  %v5586_v52 = vld [vmem:[%s10623_s12 + $0x30] sm:$0xff] }
 0xbbe   : > { %v5296_v56 = vpop.permute.xlu0 %5295  ;;  %v5618_v9 = vld [vmem:[#allocation3 + $0x3c0] sm:$0xff]  ;;  %v5083_v23 = vpop.permute.xlu1 %5082  ;;  %5757 = vmatprep.subr.mxu0 %v11429_v10 }
 0xbbf   : > { %5301 = vst.msk [vmem:[#allocation3 + $0x340] sm:$0xff] %vm1463_vm2, %v5296_v56  ;;  %6196 = vmatprep.subr.mxu1 %v5618_v9  ;;  %5088 = vst.msk [vmem:[#allocation3 + $0xc0] sm:$0xff] %vm1463_vm2, %v5083_v23  ;;  %v5596_v14 = vld [vmem:[#allocation3 + $0x100] sm:$0xff] }
 0xbc0   : > { %6197 = vmatpush3.msra.mxu1 %v5602_v44 }
 0xbc1   : > { %6198 = vmatprep.subr.mxu1 %v5617_v27 }
 0xbc2   : > { %v5275_v29 = vpop.permute.xlu0 %5274  ;;  %6199 = vmatpush3.msra.mxu1 %v5601_v19  ;;  %v5616_v45 = vld [vmem:[#allocation3 + $0x380] sm:$0xff]  ;;  %v5381_v24 = vpop.permute.xlu1 %5380 }
 0xbc3   : > { %5280 = vst.msk [vmem:[#allocation3 + $0x300] sm:$0xff] %vm1463_vm2, %v5275_v29  ;;  %6200 = vmatprep.subr.mxu1 %v5616_v45  ;;  %v5624_v31 = vld [vmem:[#allocation3 + $0x480] sm:$0xff]  ;;  %5386 = vst.msk [vmem:[#allocation3 + $0x440] sm:$0xff] %vm1463_vm2, %v5381_v24 }
 0xbc4   : > { %5758 = vmatpush1.msra.mxu0 %v5624_v31  ;;  %6201 = vmatpush3.msra.mxu1 %v5600_v47 }
 0xbc5   : > { %5759 = vmatprep.subr.mxu0 %v11429_v10  ;;  %6202 = vmatprep.subr.mxu1 %v5615_v46 }
 0xbc6   : > { %5760 = vmatpush1.msra.mxu0 %v5623_v49  ;;  %v5253_v40 = vpop.permute.xlu0 %5252  ;;  %6203 = vmatpush3.msra.mxu1 %v5599_v50  ;;  %v5614_v21 = vld [vmem:[#allocation3 + $0x340] sm:$0xff]  ;;  %v5061_v8 = vpop.permute.xlu1 %5060 }
 0xbc7   : > { %5258 = vst.msk [vmem:[#allocation3 + $0x2c0] sm:$0xff] %vm1463_vm2, %v5253_v40  ;;  %6204 = vmatprep.subr.mxu1 %v5614_v21  ;;  %5761 = vmatprep.subr.mxu0 %v11429_v10  ;;  %5066 = vst.msk [vmem:[#allocation3 + $0x80] sm:$0xff] %vm1463_vm2, %v5061_v8  ;;  %v5594_v3 = vld [vmem:[#allocation3 + $0xc0] sm:$0xff] }
 0xbc8   : > { %6205 = vmatpush3.msra.mxu1 %v5598_v18  ;;  %v5837_v18 = vld [vmem:[%s10625_s14] sm:$0xff] }
 0xbc9   : > { %6206 = vmatprep.subr.mxu1 %v5613_v59  ;;  %v5851_v59 = vld [vmem:[%s10626_s15] sm:$0xff] }
 0xbca   : > { %v5232_v32 = vpop.permute.xlu0 %5231  ;;  %6207 = vmatpush3.msra.mxu1 %v5597_v13  ;;  %v5612_v16 = vld [vmem:[#allocation3 + $0x300] sm:$0xff]  ;;  %v5360_v20 = vpop.permute.xlu1 %5359  ;;  %v5852_v13 = vld [vmem:[%s10626_s15 + $0x8] sm:$0xff] }
 0xbcb   : > { %5237 = vst.msk [vmem:[#allocation3 + $0x280] sm:$0xff] %vm1463_vm2, %v5232_v32  ;;  %6208 = vmatprep.subr.mxu1 %v5612_v16  ;;  %v5622_v25 = vld [vmem:[#allocation3 + $0x440] sm:$0xff]  ;;  %5365 = vst.msk [vmem:[#allocation3 + $0x400] sm:$0xff] %vm1463_vm2, %v5360_v20 }
 0xbcc   : > { %5762 = vmatpush1.msra.mxu0 %v5622_v25  ;;  %6209 = vmatpush3.msra.mxu1 %v5596_v14 }
 0xbcd   : > { %5763 = vmatprep.subr.mxu0 %v11429_v10  ;;  %6210 = vmatprep.subr.mxu1 %v5611_v36 }
 0xbce   : > { %5764 = vmatpush1.msra.mxu0 %v5621_v28  ;;  %v5211_v57 = vpop.permute.xlu0 %5210  ;;  %6211 = vmatpush3.msra.mxu1 %v5595_v41  ;;  %v5610_v61 = vld [vmem:[#allocation3 + $0x2c0] sm:$0xff]  ;;  %v5040_v58 = vpop.permute.xlu1 %5039 }
 0xbcf   : > { %5216 = vst.msk [vmem:[#allocation3 + $0x240] sm:$0xff] %vm1463_vm2, %v5211_v57  ;;  %6212 = vmatprep.subr.mxu1 %v5610_v61  ;;  %5765 = vmatprep.subr.mxu0 %v11429_v10  ;;  %5045 = vst.msk [vmem:[#allocation3 + $0x40] sm:$0xff] %vm1463_vm2, %v5040_v58  ;;  %v5592_v53 = vld [vmem:[#allocation3 + $0x80] sm:$0xff]  ;;  %v5838_v58 = vld [vmem:[%s10625_s14 + $0x8] sm:$0xff] }
 0xbd0   : > { %6213 = vmatpush3.msra.mxu1 %v5594_v3 }
 0xbd1   : > { %6214 = vmatprep.subr.mxu1 %v5609_v1 }
 0xbd2   : > { %v5573_v5 = vpop.permute.xlu0 %5572  ;;  %6215 = vmatpush3.msra.mxu1 %v5593_v11  ;;  %v5608_v7 = vld [vmem:[#allocation3 + $0x280] sm:$0xff]  ;;  %v5189_v42 = vpop.permute.xlu1 %5188 }
 0xbd3   : > { %5578 = vst.msk [vmem:[#allocation3 + $0x680] sm:$0xff] %vm1463_vm2, %v5573_v5  ;;  %6216 = vmatprep.subr.mxu1 %v5608_v7  ;;  %v5620_v4 = vld [vmem:[#allocation3 + $0x400] sm:$0xff]  ;;  %5194 = vst.msk [vmem:[#allocation3 + $0x200] sm:$0xff] %vm1463_vm2, %v5189_v42 }
 0xbd4   : > { %5766 = vmatpush1.msra.mxu0 %v5620_v4  ;;  %6217 = vmatpush3.msra.mxu1 %v5592_v53 }
 0xbd5   : > { %5787 = vmatprep.subr.mxu0 %v11429_v10  ;;  %6218 = vmatprep.subr.mxu1 %v5607_v39 }
 0xbd6   : > { %5788 = vmatpush2.msra.mxu0 %v5641_v0  ;;  %v5554_v26 = vpop.permute.xlu0 %5553  ;;  %6219 = vmatpush3.msra.mxu1 %v5591_v2  ;;  %v5606_v34 = vld [vmem:[#allocation3 + $0x240] sm:$0xff]  ;;  %v5552_v17 = vpop.permute.xlu1 %5551 }
 0xbd7   : > { %5558 = vst.msk [vmem:[#allocation3 + $0x660] sm:$0xff] %vm1463_vm2, %v5554_v26  ;;  %6220 = vmatprep.subr.mxu1 %v5606_v34  ;;  %v5590_v63 = vld [vmem:[#allocation3 + $0x40] sm:$0xff]  ;;  %5789 = vmatprep.subr.mxu0 %v11429_v10  ;;  %5557 = vst.msk [vmem:[#allocation3 + $0x640] sm:$0xff] %vm1463_vm2, %v5552_v17 }
 0xbd8   : > { %6221 = vmatpush3.msra.mxu1 %v5590_v63 }
 0xbd9   : > { %6222 = vmatprep.subr.mxu1 %v5605_v37 }
 0xbda   : > { %v5533_v43 = vpop.permute.xlu0 %5532  ;;  %6223 = vmatpush3.msra.mxu1 %v5589_v22  ;;  %v5640_v54 = vld [vmem:[#allocation3 + $0x680] sm:$0xff]  ;;  %v5531_v33 = vpop.permute.xlu1 %5530 }
 0xbdb   : > { %5537 = vst.msk [vmem:[#allocation3 + $0x620] sm:$0xff] %vm1463_vm2, %v5533_v43  ;;  %v5604_v62 = vld [vmem:[#allocation3 + $0x200] sm:$0xff]  ;;  %5790 = vmatpush2.msra.mxu0 %v5640_v54  ;;  %5536 = vst.msk [vmem:[#allocation3 + $0x600] sm:$0xff] %vm1463_vm2, %v5531_v33 }
 0xbdc   : > { %6224 = vmatprep.subr.mxu1 %v5604_v62  ;;  %5791 = vmatprep.subr.mxu0 %v11429_v10 }
 0xbdd   : > { %6225 = vmatpush3.msra.mxu1 %v5588_v38 }
 0xbde   : > { %5725 = vmatmul.mubr.f32.vlgmr.msra.gmra.mxu1 %v5580_v15  ;;  %v5639_v6 = vld [vmem:[#allocation3 + $0x660] sm:$0xff] }
 0xbdf   : > { %5792 = vmatpush2.msra.mxu0 %v5639_v6  ;;  %5729 = vmatprep.mubr.f32.mxu1 %v5585_v30  ;;  %v5638_v60 = vld [vmem:[#allocation3 + $0x640] sm:$0xff] }
 0xbe0   : > { %5793 = vmatprep.subr.mxu0 %v11429_v10 }
 0xbe1   : > { %5794 = vmatpush2.msra.mxu0 %v5638_v60 }
 0xbe2   : > { %5730 = vmatmul.mubr.f32.gmra.mxu1 %v5584_v48  ;;  %5795 = vmatprep.subr.mxu0 %v11429_v10  ;;  %v5637_v12 = vld [vmem:[#allocation3 + $0x620] sm:$0xff] }
 0xbe3   : > { %5796 = vmatpush2.msra.mxu0 %v5637_v12  ;;  %v5636_v55 = vld [vmem:[#allocation3 + $0x600] sm:$0xff] }
 0xbe4   : > { %5797 = vmatprep.subr.mxu0 %v11429_v10 }
 0xbe5   : > { %5798 = vmatpush2.msra.mxu0 %v5636_v55 }
 0xbe6   : > { %5800 = vmatmul.mubr.f32.vlgmr.msra.gmra.mxu0 %v5582_v51 }
 0xbe7   : > { %6177 = vmatprep.mubr.msk.f32.mxu0 %vm11474_vm5, %v5587_v35  ;;  %v5647_v27 = vpop.permute.xlu0 %5646  ;;  %v5652_v31 = vpop.permute.xlu1 %5651 }
 0xbea   : > { %5805 = vmatmul.mubr.f32.gmra.mxu0 %v5586_v52 }
 0xc9e   : > { %v6226_v56 = vpop.f32.mrf.mxu1 }
 0xca0   : > { %v6227_v9 = vpop.f32.mrf.mxu1 }
 0xca1   : > { %v6228_v23 = vadd.f32 %v6227_v9, %v6226_v56 }
 0xca2   : > { %v6229_v44 = vpop.f32.mrf.mxu1 }
 0xca3   : > { %v5727_v29 = vadd.f32 %v6228_v23, %v5647_v27 }
 0xca4   : > { %v6230_v10 = vpop.f32.mrf.mxu1 }
 0xca5   : > { %v6231_v19 = vadd.f32 %v6230_v10, %v6229_v44 }
 0xca6   : > { %v5801_v45 = vpop.f32.mrf.mxu0 }
 0xca7   : > { %v5802_v24 = vadd.f32 %v5801_v45, %v5727_v29  ;;  %v5732_v46 = vadd.f32 %v6231_v19, %v5652_v31 }
 0xca8   : > { %v5803_v47 = vpop.f32.mrf.mxu0 }
 0xca9   : > { %v5810_v49 = vsel %vm1463_vm2, %v5802_v24, 0.0 }
 0xcaa   : > { %v5806_v50 = vpop.f32.mrf.mxu0  ;;  %5811 = vadd.xlane.f32.xlu0 %v5810_v49 }
 0xcab   : > { %v5807_v40 = vadd.f32 %v5806_v50, %v5732_v46 }
 0xcac   : > { %v5808_v21 = vpop.f32.mrf.mxu0 }
 0xcad   : > { %v5813_v8 = vsel %vm1463_vm2, %v5807_v40, 0.0 }
 0xcae   : > { %5814 = vadd.xlane.f32.xlu1 %v5813_v8 }
 0xcbf   : > { %5841 = vperm.xlu1 %6593, %v5837_v18  }
 0xcc3   : > { %5855 = vperm.xlu1 %6593, %v5851_v59  }
 0xcc7   : > { %5860 = vperm.xlu1 %6593, %v5852_v13  }
 0xd33   : > { %v5812_v32 = vpop.xlane.xlu0 %5811 }
 0xd34   : > { %v5817_v16 = vmul.f32 0.015625, %v5812_v32 }
 0xd36   : > { %v5819_v20 = vsub.f32 %v5802_v24, %v5817_v16 }
 0xd37   : > { %v5815_v25 = vpop.xlane.xlu1 %5814 }
 0xd38   : > { %v5818_v14 = vmul.f32 0.015625, %v5815_v25  ;;  %v5821_v36 = vmul.f32 %v5819_v20, %v5819_v20 }
 0xd3a   : > { %v5820_v28 = vsub.f32 %v5807_v40, %v5818_v14  ;;  %v5823_v41 = vsel %vm1463_vm2, %v5821_v36, 0.0 }
 0xd3b   : > { %5824 = vadd.xlane.f32.xlu0 %v5823_v41  ;;  %v5842_v4 = vpop.permute.xlu1 %5841 }
 0xd3c   : > { %v5822_v57 = vmul.f32 %v5820_v28, %v5820_v28 }
 0xd3e   : > { %v5826_v61 = vsel %vm1463_vm2, %v5822_v57, 0.0 }
 0xd3f   : > { %5827 = vadd.xlane.f32.xlu0 %v5826_v61  ;;  %v5856_v0 = vpop.permute.xlu1 %5855 }
 0xd43   : > { %v5861_v43 = vpop.permute.xlu1 %5860 }
 0xd55   : > { %5846 = vperm.xlu0 %6594, %v5838_v58  }
 0xdc4   : > { %v5825_v3 = vpop.xlane.xlu0 %5824 }
 0xdc5   : > { %v5829_v1 = vmul.f32 0.015625, %v5825_v3 }
 0xdc7   : > { %v5831_v11 = vadd.f32 1e-05, %v5829_v1 }
 0xdc8   : > { %v5828_v5 = vpop.xlane.xlu0 %5827 }
 0xdc9   : > { %6601 = vrsqrt.f32 %v5831_v11  ;;  %v5830_v7 = vmul.f32 0.015625, %v5828_v5 }
 0xdcb   : > { %v5832_v42 = vadd.f32 1e-05, %v5830_v7 }
 0xdcd   : > { %6603 = vrsqrt.f32 %v5832_v42 }
 0xdd0   : > { %v5847_v63 = vpop.permute.xlu0 %5846 }
 0xdd6   : > { %v6602_v53 = vpop.eup %6601 }
 0xdd7   : > { %v5835_v39 = vmul.f32 %v6602_v53, %v5819_v20 }
 0xdd9   : > { %v5849_v2 = vmul.f32 %v5842_v4, %v5835_v39 }
 0xdda   : > { %v6604_v26 = vpop.eup %6603 }
 0xddb   : > { %v5836_v34 = vmul.f32 %v6604_v26, %v5820_v28  ;;  %v5863_v17 = vadd.f32 %v5856_v0, %v5849_v2 }
 0xddd   : > { %v5850_v37 = vmul.f32 %v5847_v63, %v5836_v34  ;;  %vm5865_vm7 = vcmp.ge.f32.partialorder %v5863_v17, 0.0  ;;  %v5867_v22 = vmul.f32 0.01, %v5863_v17 }
 0xddf   : > { %v5864_v54 = vadd.f32 %v5861_v43, %v5850_v37  ;;  %v5869_v33 = vsel %vm5865_vm7, %v5863_v17, %v5867_v22 }
 0xde0   : > { %v5873_v62 = vsel %vm1463_vm2, %v5869_v33, 0.0  ;;  %5871 = vst.msk [vmem:[%s610_s22] sm:$0xff] %vm1463_vm2, %v5869_v33 }
 0xde1   : > { %v5868_v15 = vmul.f32 0.01, %v5864_v54  ;;  %5874 = vadd.xlane.f32.xlu0 %v5873_v62  ;;  %vm5866_vm0 = vcmp.ge.f32.partialorder %v5864_v54, 0.0 }
 0xde3   : > { %v5870_v38 = vsel %vm5866_vm0, %v5864_v54, %v5868_v15 }
 0xde4   : > { %v5876_v30 = vsel %vm1463_vm2, %v5870_v38, 0.0  ;;  %5872 = vst.msk [vmem:[%s610_s22 + $0x8] sm:$0xff] %vm1463_vm2, %v5870_v38 }
 0xde5   : > { %5877 = vadd.xlane.f32.xlu1 %v5876_v30 }
 0xe6a   : > { %v5875_v6 = vpop.xlane.xlu0 %5874 }
 0xe6b   : > { %v5879_v48 = vmul.f32 0.015625, %v5875_v6 }
 0xe6d   : > { %5881 = vst.msk [vmem:[%s615_s0] sm:$0xff] %vm11475_vm1, %v5879_v48 }
 0xe6e   : > { %v5878_v60 = vpop.xlane.xlu1 %5877 }
 0xe6f   : > { %v5880_v12 = vmul.f32 0.015625, %v5878_v60 }
 0xe71   : > { %5882 = vst.msk [vmem:[%s615_s0 + $0x8] sm:$0xff] %vm11476_vm4, %v5880_v12 }
 0xe72 PF: > { %s11477_s3 = sld [smem:[#allocation7_spill]] }
 0xe78   : > { %s30_s27 = sadd.s32 1, %s11477_s3  }
 0xe79   : > { %p27_p1 = scmp.ge.s32.totalorder %s30_s27, 4  }
 0xe7b   :  { %29 = sbr.rel (!%p27_p1) target bundleno = 8 (0x8), region = 143 }
 0xe80   :  { %5936 = vsyncpa [#allocation5], 1 }
 0xe81   :  { %5938 = vsyncpa [#allocation5 + $0x1], 1 }

</bundles_post_ra>
